<compile_context>
chip_gen: v5e
topology: v5e:2x2
jax: 0.10.0
libtpu: 0.0.40
codegen_flags: <defaults>
</compile_context>

<pallas_src>
import functools

import jax
import jax.numpy as jnp
from jax.experimental import pallas as pl
from jax.experimental.pallas import tpu as pltpu

_VMEM_LIMIT = 32 * 1024 * 1024     # safe on v5e/v6e/v7x; workload is far smaller
_HEAD_PAD = 128                    # lane-dense padding for head outputs


# ------------------------- in-kernel value helpers ------------------------- #

def _pad_hw(x):
    """Zero-pad the H and W dims of an (B, H, W, C) value by 1 on each side."""
    B, H, W, C = x.shape
    zw = jnp.zeros((B, H, 1, C), x.dtype)
    x = jnp.concatenate([zw, x, zw], axis=2)           # (B, H, W+2, C)
    zh = jnp.zeros((B, 1, W + 2, C), x.dtype)
    return jnp.concatenate([zh, x, zh], axis=1)        # (B, H+2, W+2, C)


def _im2col_3x3(xpad, H, W):
    """(B, H+2, W+2, C) -> (B*H*W, 9*C) tap matrix (tap-major, channel-minor)."""
    B = xpad.shape[0]
    C = xpad.shape[-1]
    taps = []
    for dy in range(3):
        for dx in range(3):
            t = xpad[:, dy:dy + H, dx:dx + W, :]        # (B, H, W, C)
            taps.append(t.reshape(B * H * W, C))
    return jnp.concatenate(taps, axis=-1)               # (B*H*W, 9*C)


# ------------------------------ Pallas kernels ------------------------------ #

def _conv_bn_kernel(x_ref, w_ref, scale_ref, bias_ref, out_ref, *, relu):
    """Fused 3x3 conv (one K=9*Cin matmul) + folded BN affine (+ ReLU).

    x_ref   : (bn, H, W, Cin)  f32
    w_ref   : (9*Cin, Cout)    bf16
    scale/bias : (1, Cout)     f32 (folded BN + conv bias)
    out_ref : (bn, H, W, Cout) f32
    """
    bn, H, W, _ = x_ref.shape
    cout = out_ref.shape[-1]
    xcol = _im2col_3x3(_pad_hw(x_ref[...]), H, W).astype(jnp.bfloat16)
    acc = jnp.dot(xcol, w_ref[...], preferred_element_type=jnp.float32)
    y = acc * scale_ref[...] + bias_ref[...]
    if relu:
        y = jnp.maximum(y, 0.0)
    out_ref[...] = y.reshape(bn, H, W, cout).astype(out_ref.dtype)


def _resblock_kernel(x_ref, w1_ref, s1_ref, b1_ref, w2_ref, s2_ref, b2_ref,
                     out_ref):
    """Whole ResBlock fused: conv+BN+ReLU -> conv+BN -> +residual -> ReLU.

    The intermediate activation stays in VMEM/vregs (never written to HBM).
    """
    bn, H, W, c = x_ref.shape
    x = x_ref[...]                                                 # f32
    xcol = _im2col_3x3(_pad_hw(x), H, W).astype(jnp.bfloat16)
    h = jnp.dot(xcol, w1_ref[...], preferred_element_type=jnp.float32)
    h = jnp.maximum(h * s1_ref[...] + b1_ref[...], 0.0)            # f32 (M, C)
    hcol = _im2col_3x3(_pad_hw(h.reshape(bn, H, W, c)), H, W).astype(jnp.bfloat16)
    y = jnp.dot(hcol, w2_ref[...], preferred_element_type=jnp.float32)
    y = y * s2_ref[...] + b2_ref[...] + x.reshape(bn * H * W, c)   # residual (f32)
    out_ref[...] = jnp.maximum(y, 0.0).reshape(bn, H, W, c).astype(out_ref.dtype)


def _linear_kernel(x_ref, w_ref, b_ref, out_ref, *, act):
    """Dense layer: x @ w + b (lane-padded fout), optional tanh on the EUP."""
    y = jnp.dot(x_ref[...].astype(jnp.bfloat16), w_ref[...],
                preferred_element_type=jnp.float32) + b_ref[...]
    if act == "tanh":
        y = jnp.tanh(y)
    out_ref[...] = y.astype(out_ref.dtype)


# ------------------------------ glue wrappers ------------------------------ #

def _batch_tile(n):
    # For the 2-D linear input the second-to-last block dim must be a multiple
    # of 8 or equal to the full dim; tile by 8 when possible, else whole batch.
    return 8 if n % 8 == 0 else n


def _compiler_params():
    return pltpu.CompilerParams(dimension_semantics=("parallel",),
                                vmem_limit_bytes=_VMEM_LIMIT)


def conv3x3_bn(x, w, scale, bias, *, relu=True):
    """x: (N,H,W,Cin) f32; w: (9*Cin,Cout) bf16; scale/bias: (Cout,) f32."""
    N, H, W, Cin = x.shape
    Cout = w.shape[-1]
    bn = _batch_tile(N)
    flops = 2 * N * H * W * 9 * Cin * Cout
    bytes_acc = int(x.size * 4 + w.size * 2 + N * H * W * Cout * 4)
    return pl.pallas_call(
        functools.partial(_conv_bn_kernel, relu=relu),
        out_shape=jax.ShapeDtypeStruct((N, H, W, Cout), jnp.float32),
        grid=(N // bn,),
        in_specs=[
            pl.BlockSpec((bn, H, W, Cin), lambda i: (i, 0, 0, 0)),
            pl.BlockSpec((9 * Cin, Cout), lambda i: (0, 0)),
            pl.BlockSpec((1, Cout), lambda i: (0, 0)),
            pl.BlockSpec((1, Cout), lambda i: (0, 0)),
        ],
        out_specs=pl.BlockSpec((bn, H, W, Cout), lambda i: (i, 0, 0, 0)),
        compiler_params=_compiler_params(),
        cost_estimate=pl.CostEstimate(flops=flops, transcendentals=0,
                                      bytes_accessed=bytes_acc),
    )(x, w, scale.reshape(1, Cout), bias.reshape(1, Cout))


def resblock(x, pb):
    """Fused ResBlock: one pallas_call per block."""
    N, H, W, C = x.shape
    bn = _batch_tile(N)
    flops = 2 * 2 * N * H * W * 9 * C * C
    bytes_acc = int(2 * x.size * 4 + 2 * 9 * C * C * 2)
    wspec = pl.BlockSpec((9 * C, C), lambda i: (0, 0))
    sspec = pl.BlockSpec((1, C), lambda i: (0, 0))
    return pl.pallas_call(
        _resblock_kernel,
        out_shape=jax.ShapeDtypeStruct((N, H, W, C), jnp.float32),
        grid=(N // bn,),
        in_specs=[pl.BlockSpec((bn, H, W, C), lambda i: (i, 0, 0, 0)),
                  wspec, sspec, sspec, wspec, sspec, sspec],
        out_specs=pl.BlockSpec((bn, H, W, C), lambda i: (i, 0, 0, 0)),
        compiler_params=_compiler_params(),
        cost_estimate=pl.CostEstimate(flops=flops, transcendentals=0,
                                      bytes_accessed=bytes_acc),
    )(x,
      pb["c1"]["w"], pb["c1"]["scale"].reshape(1, C), pb["c1"]["bias"].reshape(1, C),
      pb["c2"]["w"], pb["c2"]["scale"].reshape(1, C), pb["c2"]["bias"].reshape(1, C))


def linear(x, w, b, *, act="none"):
    """x: (N, fin) f32; w: (fin, fout_pad) bf16; b: (fout_pad,) f32."""
    N, fin = x.shape
    fout_p = w.shape[1]
    bn = _batch_tile(N)
    flops = 2 * N * fin * fout_p
    trans = N * fout_p if act == "tanh" else 0
    bytes_acc = int(N * fin * 4 + fin * fout_p * 2 + N * fout_p * 4)
    return pl.pallas_call(
        functools.partial(_linear_kernel, act=act),
        out_shape=jax.ShapeDtypeStruct((N, fout_p), jnp.float32),
        grid=(N // bn,),
        in_specs=[pl.BlockSpec((bn, fin), lambda i: (i, 0)),
                  pl.BlockSpec((fin, fout_p), lambda i: (0, 0)),
                  pl.BlockSpec((1, fout_p), lambda i: (0, 0))],
        out_specs=pl.BlockSpec((bn, fout_p), lambda i: (i, 0)),
        compiler_params=_compiler_params(),
        cost_estimate=pl.CostEstimate(flops=flops, transcendentals=trans,
                                      bytes_accessed=bytes_acc),
    )(x, w, b.reshape(1, fout_p))


# --------------------------- parameter construction ------------------------ #

def _fold_bn(gamma, beta, mean, var, conv_bias, eps=1e-5):
    scale = gamma / jnp.sqrt(var + eps)
    bias = beta + scale * (conv_bias - mean)
    return scale, bias


def _pad_last(a, total):
    pad = total - a.shape[-1]
    if pad <= 0:
        return a
    return jnp.pad(a, [(0, 0)] * (a.ndim - 1) + [(0, pad)])


def init_conv_bn(key, cin, cout):
    k1, k2, k3, k4, k5, k6 = jax.random.split(key, 6)
    w = jax.random.normal(k1, (3, 3, cin, cout), jnp.float32) / jnp.sqrt(9.0 * cin)
    b = 0.05 * jax.random.normal(k2, (cout,), jnp.float32)
    gamma = 1.0 + 0.1 * jax.random.normal(k3, (cout,), jnp.float32)
    beta = 0.1 * jax.random.normal(k4, (cout,), jnp.float32)
    mean = 0.1 * jax.random.normal(k5, (cout,), jnp.float32)
    var = jnp.abs(1.0 + 0.1 * jax.random.normal(k6, (cout,), jnp.float32))
    scale, bias = _fold_bn(gamma, beta, mean, var, b)
    # (3,3,cin,cout) -> (9*cin, cout): row index = (dy*3+dx)*cin + ci, matching
    # the in-kernel im2col tap order. Weights stored bf16 for the MXU.
    return {"w": w.reshape(9 * cin, cout).astype(jnp.bfloat16),
            "scale": scale.astype(jnp.float32),
            "bias": bias.astype(jnp.float32)}


def init_linear_nhwc(key, rows, cols, cin, fout, fout_pad=_HEAD_PAD):
    """FC weight stored pre-permuted to NHWC flatten order, fout lane-padded.

    Equivalent to permuting the columns of a PyTorch (fout, cin*H*W) weight
    once at init (folds the NCHW flatten transpose into the weight).
    """
    k1, k2 = jax.random.split(key)
    fin = cin * rows * cols
    w = jax.random.normal(k1, (rows, cols, cin, fout), jnp.float32) / jnp.sqrt(float(fin))
    b = 0.05 * jax.random.normal(k2, (fout,), jnp.float32)
    fout_p = ((fout + fout_pad - 1) // fout_pad) * fout_pad
    return {"w": _pad_last(w.reshape(fin, fout), fout_p).astype(jnp.bfloat16),
            "b": _pad_last(b, fout_p).astype(jnp.float32)}


def init_resnet_params(key, num_resblocks, num_hidden, rows, cols, action_size):
    keys = jax.random.split(key, 5 + 2 * num_resblocks)
    ki = iter(keys)
    start = init_conv_bn(next(ki), 3, num_hidden)
    blocks = []
    for _ in range(num_resblocks):
        blocks.append({"c1": init_conv_bn(next(ki), num_hidden, num_hidden),
                       "c2": init_conv_bn(next(ki), num_hidden, num_hidden)})
    pconv = init_conv_bn(next(ki), num_hidden, 32)   # policy head conv
    vconv = init_conv_bn(next(ki), num_hidden, 3)    # value head conv
    # Both head convs share the trunk input: fuse into one lane-dense (128-ch)
    # conv. Padded channels have zero weight/scale/bias -> output exactly 0.
    head = {
        "w": _pad_last(jnp.concatenate([pconv["w"], vconv["w"]], axis=-1), _HEAD_PAD),
        "scale": _pad_last(jnp.concatenate([pconv["scale"], vconv["scale"]]), _HEAD_PAD),
        "bias": _pad_last(jnp.concatenate([pconv["bias"], vconv["bias"]]), _HEAD_PAD),
    }
    policy_fc = init_linear_nhwc(next(ki), rows, cols, 32, action_size)
    value_fc = init_linear_nhwc(next(ki), rows, cols, 3, 1)
    return {"start": start, "blocks": blocks, "head_conv": head,
            "policy_fc": policy_fc, "value_fc": value_fc}


# --------------------------------- forward --------------------------------- #

def resnet_forward(params, x_nchw, *, action_size):
    # PyTorch NCHW input -> internal NHWC
    x = jnp.transpose(x_nchw, (0, 2, 3, 1)).astype(jnp.float32)

    p = params["start"]
    x = conv3x3_bn(x, p["w"], p["scale"], p["bias"], relu=True)

    for pb in params["blocks"]:
        x = resblock(x, pb)

    N, H, W, _ = x.shape

    # Fused policy+value head conv (lane-dense 128-channel output).
    hd = params["head_conv"]
    heads = conv3x3_bn(x, hd["w"], hd["scale"], hd["bias"], relu=True)  # (N,H,W,128)

    # NHWC flatten is contiguous; the NCHW-order permutation was folded into
    # the FC weights at init, so these reshapes are free bitcasts.
    ph_flat = heads[..., :32].reshape(N, H * W * 32)
    vh_flat = heads[..., 32:35].reshape(N, H * W * 3)

    policy = linear(ph_flat, params["policy_fc"]["w"], params["policy_fc"]["b"],
                    act="none")[:, :action_size]
    value = linear(vh_flat, params["value_fc"]["w"], params["value_fc"]["b"],
                   act="tanh")[:, :1]
    return policy, value


# ----------------------------------- main ----------------------------------- #

if __name__ == "__main__":
    num_hidden = 32
    num_resblocks = 2
    rows = cols = 8
    action_size = rows * cols + 1  # 65
    batch = 2

    key = jax.random.PRNGKey(0)
    k_params, k_x = jax.random.split(key)
    params = init_resnet_params(k_params, num_resblocks, num_hidden,
                                rows, cols, action_size)
    x = jax.random.normal(k_x, (batch, 3, rows, cols), jnp.float32)

    fwd = jax.jit(functools.partial(resnet_forward, action_size=action_size))
    policy, value = fwd(params, x)
    jax.block_until_ready((policy, value))

    assert policy.shape == (batch, action_size), policy.shape
    assert value.shape == (batch, 1), value.shape
    assert bool(jnp.all(jnp.abs(value) <= 1.0))
    assert bool(jnp.all(jnp.isfinite(policy)))

    print("KERNEL_OK")
</pallas_src>

<mosaic_0001>
module attributes {stable_mosaic.version = 11 : i64} {
  func.func @_resblock_kernel(%arg0: i32, %arg1: memref<2x8x8x32xf32, #tpu.memory_space<vmem>>, %arg2: memref<288x32xbf16, #tpu.memory_space<vmem>>, %arg3: memref<1x32xf32, #tpu.memory_space<vmem>>, %arg4: memref<1x32xf32, #tpu.memory_space<vmem>>, %arg5: memref<288x32xbf16, #tpu.memory_space<vmem>>, %arg6: memref<1x32xf32, #tpu.memory_space<vmem>>, %arg7: memref<1x32xf32, #tpu.memory_space<vmem>>, %arg8: memref<2x8x8x32xf32, #tpu.memory_space<vmem>>) attributes {dimension_semantics = [#tpu.dimension_semantics<parallel>], iteration_bounds = array<i64: 1>, scalar_prefetch = 0 : i64, scratch_operands = 0 : i64, tpu.core_type = #tpu.core_type<tc>, window_params = [{transform_indices = @transform_0, window_bounds = array<i64: 2, 8, 8, 32>}, {pipeline_mode = #tpu.pipeline_mode<synchronous>, transform_indices = @transform_1, window_bounds = array<i64: 288, 32>}, {pipeline_mode = #tpu.pipeline_mode<synchronous>, transform_indices = @transform_2, window_bounds = array<i64: 1, 32>}, {pipeline_mode = #tpu.pipeline_mode<synchronous>, transform_indices = @transform_3, window_bounds = array<i64: 1, 32>}, {pipeline_mode = #tpu.pipeline_mode<synchronous>, transform_indices = @transform_4, window_bounds = array<i64: 288, 32>}, {pipeline_mode = #tpu.pipeline_mode<synchronous>, transform_indices = @transform_5, window_bounds = array<i64: 1, 32>}, {pipeline_mode = #tpu.pipeline_mode<synchronous>, transform_indices = @transform_6, window_bounds = array<i64: 1, 32>}, {transform_indices = @transform_7, window_bounds = array<i64: 2, 8, 8, 32>}]} {
    %c0 = arith.constant 0 : index
    %c0_0 = arith.constant 0 : index
    %c0_1 = arith.constant 0 : index
    %c0_2 = arith.constant 0 : index
    %0 = vector.load %arg1[%c0, %c0_0, %c0_1, %c0_2] : memref<2x8x8x32xf32, #tpu.memory_space<vmem>>, vector<2x8x8x32xf32>
    %cst = arith.constant 0.000000e+00 : f32
    %1 = vector.broadcast %cst : f32 to vector<2x8x1x32xf32>
    %2 = tpu.concatenate %1, %0, %1 in 2 : vector<2x8x1x32xf32>, vector<2x8x8x32xf32>, vector<2x8x1x32xf32> -> vector<2x8x10x32xf32>
    %cst_3 = arith.constant 0.000000e+00 : f32
    %3 = vector.broadcast %cst_3 : f32 to vector<2x1x10x32xf32>
    %4 = tpu.concatenate %3, %2, %3 in 1 : vector<2x1x10x32xf32>, vector<2x8x10x32xf32>, vector<2x1x10x32xf32> -> vector<2x10x10x32xf32>
    %5 = vector.extract_strided_slice %4 {offsets = [0, 0, 0, 0], sizes = [2, 8, 8, 32], strides = [1, 1, 1, 1]} : vector<2x10x10x32xf32> to vector<2x8x8x32xf32>
    %6 = vector.shape_cast %5 : vector<2x8x8x32xf32> to vector<128x32xf32>
    %7 = vector.extract_strided_slice %4 {offsets = [0, 0, 1, 0], sizes = [2, 8, 8, 32], strides = [1, 1, 1, 1]} : vector<2x10x10x32xf32> to vector<2x8x8x32xf32>
    %8 = vector.shape_cast %7 : vector<2x8x8x32xf32> to vector<128x32xf32>
    %9 = vector.extract_strided_slice %4 {offsets = [0, 0, 2, 0], sizes = [2, 8, 8, 32], strides = [1, 1, 1, 1]} : vector<2x10x10x32xf32> to vector<2x8x8x32xf32>
    %10 = vector.shape_cast %9 : vector<2x8x8x32xf32> to vector<128x32xf32>
    %11 = vector.extract_strided_slice %4 {offsets = [0, 1, 0, 0], sizes = [2, 8, 8, 32], strides = [1, 1, 1, 1]} : vector<2x10x10x32xf32> to vector<2x8x8x32xf32>
    %12 = vector.shape_cast %11 : vector<2x8x8x32xf32> to vector<128x32xf32>
    %13 = vector.extract_strided_slice %4 {offsets = [0, 1, 1, 0], sizes = [2, 8, 8, 32], strides = [1, 1, 1, 1]} : vector<2x10x10x32xf32> to vector<2x8x8x32xf32>
    %14 = vector.shape_cast %13 : vector<2x8x8x32xf32> to vector<128x32xf32>
    %15 = vector.extract_strided_slice %4 {offsets = [0, 1, 2, 0], sizes = [2, 8, 8, 32], strides = [1, 1, 1, 1]} : vector<2x10x10x32xf32> to vector<2x8x8x32xf32>
    %16 = vector.shape_cast %15 : vector<2x8x8x32xf32> to vector<128x32xf32>
    %17 = vector.extract_strided_slice %4 {offsets = [0, 2, 0, 0], sizes = [2, 8, 8, 32], strides = [1, 1, 1, 1]} : vector<2x10x10x32xf32> to vector<2x8x8x32xf32>
    %18 = vector.shape_cast %17 : vector<2x8x8x32xf32> to vector<128x32xf32>
    %19 = vector.extract_strided_slice %4 {offsets = [0, 2, 1, 0], sizes = [2, 8, 8, 32], strides = [1, 1, 1, 1]} : vector<2x10x10x32xf32> to vector<2x8x8x32xf32>
    %20 = vector.shape_cast %19 : vector<2x8x8x32xf32> to vector<128x32xf32>
    %21 = vector.extract_strided_slice %4 {offsets = [0, 2, 2, 0], sizes = [2, 8, 8, 32], strides = [1, 1, 1, 1]} : vector<2x10x10x32xf32> to vector<2x8x8x32xf32>
    %22 = vector.shape_cast %21 : vector<2x8x8x32xf32> to vector<128x32xf32>
    %23 = tpu.concatenate %6, %8, %10, %12, %14, %16, %18, %20, %22 in 1 : vector<128x32xf32>, vector<128x32xf32>, vector<128x32xf32>, vector<128x32xf32>, vector<128x32xf32>, vector<128x32xf32>, vector<128x32xf32>, vector<128x32xf32>, vector<128x32xf32> -> vector<128x288xf32>
    %24 = arith.truncf %23 : vector<128x288xf32> to vector<128x288xbf16>
    %c0_4 = arith.constant 0 : index
    %c0_5 = arith.constant 0 : index
    %25 = vector.load %arg2[%c0_4, %c0_5] : memref<288x32xbf16, #tpu.memory_space<vmem>>, vector<288x32xbf16>
    %cst_6 = arith.constant dense<0.000000e+00> : vector<128x32xf32>
    %26 = tpu.matmul %24, %25, %cst_6 {dimension_numbers = #tpu.dot_dimension_numbers<[1], [0], [0], [1], [0, 0, 1, 1], [], []>} : vector<128x288xbf16>, vector<288x32xbf16>, vector<128x32xf32> -> vector<128x32xf32>
    %c0_7 = arith.constant 0 : index
    %c0_8 = arith.constant 0 : index
    %27 = vector.load %arg3[%c0_7, %c0_8] : memref<1x32xf32, #tpu.memory_space<vmem>>, vector<1x32xf32>
    %28 = vector.broadcast %27 : vector<1x32xf32> to vector<128x32xf32>
    %29 = arith.mulf %26, %28 : vector<128x32xf32>
    %c0_9 = arith.constant 0 : index
    %c0_10 = arith.constant 0 : index
    %30 = vector.load %arg4[%c0_9, %c0_10] : memref<1x32xf32, #tpu.memory_space<vmem>>, vector<1x32xf32>
    %31 = vector.broadcast %30 : vector<1x32xf32> to vector<128x32xf32>
    %32 = arith.addf %29, %31 : vector<128x32xf32>
    %cst_11 = arith.constant 0.000000e+00 : f32
    %33 = vector.broadcast %cst_11 : f32 to vector<128x32xf32>
    %34 = arith.maximumf %32, %33 : vector<128x32xf32>
    %35 = vector.shape_cast %34 : vector<128x32xf32> to vector<2x8x8x32xf32>
    %cst_12 = arith.constant 0.000000e+00 : f32
    %36 = vector.broadcast %cst_12 : f32 to vector<2x8x1x32xf32>
    %37 = tpu.concatenate %36, %35, %36 in 2 : vector<2x8x1x32xf32>, vector<2x8x8x32xf32>, vector<2x8x1x32xf32> -> vector<2x8x10x32xf32>
    %cst_13 = arith.constant 0.000000e+00 : f32
    %38 = vector.broadcast %cst_13 : f32 to vector<2x1x10x32xf32>
    %39 = tpu.concatenate %38, %37, %38 in 1 : vector<2x1x10x32xf32>, vector<2x8x10x32xf32>, vector<2x1x10x32xf32> -> vector<2x10x10x32xf32>
    %40 = vector.extract_strided_slice %39 {offsets = [0, 0, 0, 0], sizes = [2, 8, 8, 32], strides = [1, 1, 1, 1]} : vector<2x10x10x32xf32> to vector<2x8x8x32xf32>
    %41 = vector.shape_cast %40 : vector<2x8x8x32xf32> to vector<128x32xf32>
    %42 = vector.extract_strided_slice %39 {offsets = [0, 0, 1, 0], sizes = [2, 8, 8, 32], strides = [1, 1, 1, 1]} : vector<2x10x10x32xf32> to vector<2x8x8x32xf32>
    %43 = vector.shape_cast %42 : vector<2x8x8x32xf32> to vector<128x32xf32>
    %44 = vector.extract_strided_slice %39 {offsets = [0, 0, 2, 0], sizes = [2, 8, 8, 32], strides = [1, 1, 1, 1]} : vector<2x10x10x32xf32> to vector<2x8x8x32xf32>
    %45 = vector.shape_cast %44 : vector<2x8x8x32xf32> to vector<128x32xf32>
    %46 = vector.extract_strided_slice %39 {offsets = [0, 1, 0, 0], sizes = [2, 8, 8, 32], strides = [1, 1, 1, 1]} : vector<2x10x10x32xf32> to vector<2x8x8x32xf32>
    %47 = vector.shape_cast %46 : vector<2x8x8x32xf32> to vector<128x32xf32>
    %48 = vector.extract_strided_slice %39 {offsets = [0, 1, 1, 0], sizes = [2, 8, 8, 32], strides = [1, 1, 1, 1]} : vector<2x10x10x32xf32> to vector<2x8x8x32xf32>
    %49 = vector.shape_cast %48 : vector<2x8x8x32xf32> to vector<128x32xf32>
    %50 = vector.extract_strided_slice %39 {offsets = [0, 1, 2, 0], sizes = [2, 8, 8, 32], strides = [1, 1, 1, 1]} : vector<2x10x10x32xf32> to vector<2x8x8x32xf32>
    %51 = vector.shape_cast %50 : vector<2x8x8x32xf32> to vector<128x32xf32>
    %52 = vector.extract_strided_slice %39 {offsets = [0, 2, 0, 0], sizes = [2, 8, 8, 32], strides = [1, 1, 1, 1]} : vector<2x10x10x32xf32> to vector<2x8x8x32xf32>
    %53 = vector.shape_cast %52 : vector<2x8x8x32xf32> to vector<128x32xf32>
    %54 = vector.extract_strided_slice %39 {offsets = [0, 2, 1, 0], sizes = [2, 8, 8, 32], strides = [1, 1, 1, 1]} : vector<2x10x10x32xf32> to vector<2x8x8x32xf32>
    %55 = vector.shape_cast %54 : vector<2x8x8x32xf32> to vector<128x32xf32>
    %56 = vector.extract_strided_slice %39 {offsets = [0, 2, 2, 0], sizes = [2, 8, 8, 32], strides = [1, 1, 1, 1]} : vector<2x10x10x32xf32> to vector<2x8x8x32xf32>
    %57 = vector.shape_cast %56 : vector<2x8x8x32xf32> to vector<128x32xf32>
    %58 = tpu.concatenate %41, %43, %45, %47, %49, %51, %53, %55, %57 in 1 : vector<128x32xf32>, vector<128x32xf32>, vector<128x32xf32>, vector<128x32xf32>, vector<128x32xf32>, vector<128x32xf32>, vector<128x32xf32>, vector<128x32xf32>, vector<128x32xf32> -> vector<128x288xf32>
    %59 = arith.truncf %58 : vector<128x288xf32> to vector<128x288xbf16>
    %c0_14 = arith.constant 0 : index
    %c0_15 = arith.constant 0 : index
    %60 = vector.load %arg5[%c0_14, %c0_15] : memref<288x32xbf16, #tpu.memory_space<vmem>>, vector<288x32xbf16>
    %cst_16 = arith.constant dense<0.000000e+00> : vector<128x32xf32>
    %61 = tpu.matmul %59, %60, %cst_16 {dimension_numbers = #tpu.dot_dimension_numbers<[1], [0], [0], [1], [0, 0, 1, 1], [], []>} : vector<128x288xbf16>, vector<288x32xbf16>, vector<128x32xf32> -> vector<128x32xf32>
    %c0_17 = arith.constant 0 : index
    %c0_18 = arith.constant 0 : index
    %62 = vector.load %arg6[%c0_17, %c0_18] : memref<1x32xf32, #tpu.memory_space<vmem>>, vector<1x32xf32>
    %63 = vector.broadcast %62 : vector<1x32xf32> to vector<128x32xf32>
    %64 = arith.mulf %61, %63 : vector<128x32xf32>
    %c0_19 = arith.constant 0 : index
    %c0_20 = arith.constant 0 : index
    %65 = vector.load %arg7[%c0_19, %c0_20] : memref<1x32xf32, #tpu.memory_space<vmem>>, vector<1x32xf32>
    %66 = vector.broadcast %65 : vector<1x32xf32> to vector<128x32xf32>
    %67 = arith.addf %64, %66 : vector<128x32xf32>
    %68 = vector.shape_cast %0 : vector<2x8x8x32xf32> to vector<128x32xf32>
    %69 = arith.addf %67, %68 : vector<128x32xf32>
    %cst_21 = arith.constant 0.000000e+00 : f32
    %70 = vector.broadcast %cst_21 : f32 to vector<128x32xf32>
    %71 = arith.maximumf %69, %70 : vector<128x32xf32>
    %72 = vector.shape_cast %71 : vector<128x32xf32> to vector<2x8x8x32xf32>
    %c0_22 = arith.constant 0 : index
    %c0_23 = arith.constant 0 : index
    %c0_24 = arith.constant 0 : index
    %c0_25 = arith.constant 0 : index
    %73 = vector.load %arg8[%c0_22, %c0_23, %c0_24, %c0_25] : memref<2x8x8x32xf32, #tpu.memory_space<vmem>>, vector<2x8x8x32xf32>
    tpu.vector_store %arg8[%c0_22, %c0_23, %c0_24, %c0_25], %72 {strides = array<i32>} : memref<2x8x8x32xf32, #tpu.memory_space<vmem>>, vector<2x8x8x32xf32>,
    return
  }
  func.func @transform_0(%arg0: i32) -> (i32, i32, i32, i32) {
    %c0_i32 = arith.constant 0 : i32
    %c0_i32_0 = arith.constant 0 : i32
    %c0_i32_1 = arith.constant 0 : i32
    %c0_i32_2 = arith.constant 0 : i32
    return %arg0, %c0_i32, %c0_i32_0, %c0_i32_1 : i32, i32, i32, i32
  }
  func.func @transform_1(%arg0: i32) -> (i32, i32) {
    %c0_i32 = arith.constant 0 : i32
    %c0_i32_0 = arith.constant 0 : i32
    %c0_i32_1 = arith.constant 0 : i32
    return %c0_i32, %c0_i32_0 : i32, i32
  }
  func.func @transform_2(%arg0: i32) -> (i32, i32) {
    %c0_i32 = arith.constant 0 : i32
    %c0_i32_0 = arith.constant 0 : i32
    %c0_i32_1 = arith.constant 0 : i32
    return %c0_i32, %c0_i32_0 : i32, i32
  }
  func.func @transform_3(%arg0: i32) -> (i32, i32) {
    %c0_i32 = arith.constant 0 : i32
    %c0_i32_0 = arith.constant 0 : i32
    %c0_i32_1 = arith.constant 0 : i32
    return %c0_i32, %c0_i32_0 : i32, i32
  }
  func.func @transform_4(%arg0: i32) -> (i32, i32) {
    %c0_i32 = arith.constant 0 : i32
    %c0_i32_0 = arith.constant 0 : i32
    %c0_i32_1 = arith.constant 0 : i32
    return %c0_i32, %c0_i32_0 : i32, i32
  }
  func.func @transform_5(%arg0: i32) -> (i32, i32) {
    %c0_i32 = arith.constant 0 : i32
    %c0_i32_0 = arith.constant 0 : i32
    %c0_i32_1 = arith.constant 0 : i32
    return %c0_i32, %c0_i32_0 : i32, i32
  }
  func.func @transform_6(%arg0: i32) -> (i32, i32) {
    %c0_i32 = arith.constant 0 : i32
    %c0_i32_0 = arith.constant 0 : i32
    %c0_i32_1 = arith.constant 0 : i32
    return %c0_i32, %c0_i32_0 : i32, i32
  }
  func.func @transform_7(%arg0: i32) -> (i32, i32, i32, i32) {
    %c0_i32 = arith.constant 0 : i32
    %c0_i32_0 = arith.constant 0 : i32
    %c0_i32_1 = arith.constant 0 : i32
    %c0_i32_2 = arith.constant 0 : i32
    return %arg0, %c0_i32, %c0_i32_0, %c0_i32_1 : i32, i32, i32, i32
  }
}

module attributes {stable_mosaic.version = 11 : i64} {
  func.func @_conv_bn_kernel(%arg0: i32, %arg1: memref<2x8x8x3xf32, #tpu.memory_space<vmem>>, %arg2: memref<27x32xbf16, #tpu.memory_space<vmem>>, %arg3: memref<1x32xf32, #tpu.memory_space<vmem>>, %arg4: memref<1x32xf32, #tpu.memory_space<vmem>>, %arg5: memref<2x8x8x32xf32, #tpu.memory_space<vmem>>) attributes {dimension_semantics = [#tpu.dimension_semantics<parallel>], iteration_bounds = array<i64: 1>, scalar_prefetch = 0 : i64, scratch_operands = 0 : i64, tpu.core_type = #tpu.core_type<tc>, window_params = [{transform_indices = @transform_0, window_bounds = array<i64: 2, 8, 8, 3>}, {pipeline_mode = #tpu.pipeline_mode<synchronous>, transform_indices = @transform_1, window_bounds = array<i64: 27, 32>}, {pipeline_mode = #tpu.pipeline_mode<synchronous>, transform_indices = @transform_2, window_bounds = array<i64: 1, 32>}, {pipeline_mode = #tpu.pipeline_mode<synchronous>, transform_indices = @transform_3, window_bounds = array<i64: 1, 32>}, {transform_indices = @transform_4, window_bounds = array<i64: 2, 8, 8, 32>}]} {
    %c0 = arith.constant 0 : index
    %c0_0 = arith.constant 0 : index
    %c0_1 = arith.constant 0 : index
    %c0_2 = arith.constant 0 : index
    %0 = vector.load %arg1[%c0, %c0_0, %c0_1, %c0_2] : memref<2x8x8x3xf32, #tpu.memory_space<vmem>>, vector<2x8x8x3xf32>
    %cst = arith.constant 0.000000e+00 : f32
    %1 = vector.broadcast %cst : f32 to vector<2x8x1x3xf32>
    %2 = tpu.concatenate %1, %0, %1 in 2 : vector<2x8x1x3xf32>, vector<2x8x8x3xf32>, vector<2x8x1x3xf32> -> vector<2x8x10x3xf32>
    %cst_3 = arith.constant 0.000000e+00 : f32
    %3 = vector.broadcast %cst_3 : f32 to vector<2x1x10x3xf32>
    %4 = tpu.concatenate %3, %2, %3 in 1 : vector<2x1x10x3xf32>, vector<2x8x10x3xf32>, vector<2x1x10x3xf32> -> vector<2x10x10x3xf32>
    %5 = vector.extract_strided_slice %4 {offsets = [0, 0, 0, 0], sizes = [2, 8, 8, 3], strides = [1, 1, 1, 1]} : vector<2x10x10x3xf32> to vector<2x8x8x3xf32>
    %6 = vector.shape_cast %5 : vector<2x8x8x3xf32> to vector<128x3xf32>
    %7 = vector.extract_strided_slice %4 {offsets = [0, 0, 1, 0], sizes = [2, 8, 8, 3], strides = [1, 1, 1, 1]} : vector<2x10x10x3xf32> to vector<2x8x8x3xf32>
    %8 = vector.shape_cast %7 : vector<2x8x8x3xf32> to vector<128x3xf32>
    %9 = vector.extract_strided_slice %4 {offsets = [0, 0, 2, 0], sizes = [2, 8, 8, 3], strides = [1, 1, 1, 1]} : vector<2x10x10x3xf32> to vector<2x8x8x3xf32>
    %10 = vector.shape_cast %9 : vector<2x8x8x3xf32> to vector<128x3xf32>
    %11 = vector.extract_strided_slice %4 {offsets = [0, 1, 0, 0], sizes = [2, 8, 8, 3], strides = [1, 1, 1, 1]} : vector<2x10x10x3xf32> to vector<2x8x8x3xf32>
    %12 = vector.shape_cast %11 : vector<2x8x8x3xf32> to vector<128x3xf32>
    %13 = vector.extract_strided_slice %4 {offsets = [0, 1, 1, 0], sizes = [2, 8, 8, 3], strides = [1, 1, 1, 1]} : vector<2x10x10x3xf32> to vector<2x8x8x3xf32>
    %14 = vector.shape_cast %13 : vector<2x8x8x3xf32> to vector<128x3xf32>
    %15 = vector.extract_strided_slice %4 {offsets = [0, 1, 2, 0], sizes = [2, 8, 8, 3], strides = [1, 1, 1, 1]} : vector<2x10x10x3xf32> to vector<2x8x8x3xf32>
    %16 = vector.shape_cast %15 : vector<2x8x8x3xf32> to vector<128x3xf32>
    %17 = vector.extract_strided_slice %4 {offsets = [0, 2, 0, 0], sizes = [2, 8, 8, 3], strides = [1, 1, 1, 1]} : vector<2x10x10x3xf32> to vector<2x8x8x3xf32>
    %18 = vector.shape_cast %17 : vector<2x8x8x3xf32> to vector<128x3xf32>
    %19 = vector.extract_strided_slice %4 {offsets = [0, 2, 1, 0], sizes = [2, 8, 8, 3], strides = [1, 1, 1, 1]} : vector<2x10x10x3xf32> to vector<2x8x8x3xf32>
    %20 = vector.shape_cast %19 : vector<2x8x8x3xf32> to vector<128x3xf32>
    %21 = vector.extract_strided_slice %4 {offsets = [0, 2, 2, 0], sizes = [2, 8, 8, 3], strides = [1, 1, 1, 1]} : vector<2x10x10x3xf32> to vector<2x8x8x3xf32>
    %22 = vector.shape_cast %21 : vector<2x8x8x3xf32> to vector<128x3xf32>
    %23 = tpu.concatenate %6, %8, %10, %12, %14, %16, %18, %20, %22 in 1 : vector<128x3xf32>, vector<128x3xf32>, vector<128x3xf32>, vector<128x3xf32>, vector<128x3xf32>, vector<128x3xf32>, vector<128x3xf32>, vector<128x3xf32>, vector<128x3xf32> -> vector<128x27xf32>
    %24 = arith.truncf %23 : vector<128x27xf32> to vector<128x27xbf16>
    %c0_4 = arith.constant 0 : index
    %c0_5 = arith.constant 0 : index
    %25 = vector.load %arg2[%c0_4, %c0_5] : memref<27x32xbf16, #tpu.memory_space<vmem>>, vector<27x32xbf16>
    %cst_6 = arith.constant dense<0.000000e+00> : vector<128x32xf32>
    %26 = tpu.matmul %24, %25, %cst_6 {dimension_numbers = #tpu.dot_dimension_numbers<[1], [0], [0], [1], [0, 0, 1, 1], [], []>} : vector<128x27xbf16>, vector<27x32xbf16>, vector<128x32xf32> -> vector<128x32xf32>
    %c0_7 = arith.constant 0 : index
    %c0_8 = arith.constant 0 : index
    %27 = vector.load %arg3[%c0_7, %c0_8] : memref<1x32xf32, #tpu.memory_space<vmem>>, vector<1x32xf32>
    %28 = vector.broadcast %27 : vector<1x32xf32> to vector<128x32xf32>
    %29 = arith.mulf %26, %28 : vector<128x32xf32>
    %c0_9 = arith.constant 0 : index
    %c0_10 = arith.constant 0 : index
    %30 = vector.load %arg4[%c0_9, %c0_10] : memref<1x32xf32, #tpu.memory_space<vmem>>, vector<1x32xf32>
    %31 = vector.broadcast %30 : vector<1x32xf32> to vector<128x32xf32>
    %32 = arith.addf %29, %31 : vector<128x32xf32>
    %cst_11 = arith.constant 0.000000e+00 : f32
    %33 = vector.broadcast %cst_11 : f32 to vector<128x32xf32>
    %34 = arith.maximumf %32, %33 : vector<128x32xf32>
    %35 = vector.shape_cast %34 : vector<128x32xf32> to vector<2x8x8x32xf32>
    %c0_12 = arith.constant 0 : index
    %c0_13 = arith.constant 0 : index
    %c0_14 = arith.constant 0 : index
    %c0_15 = arith.constant 0 : index
    %36 = vector.load %arg5[%c0_12, %c0_13, %c0_14, %c0_15] : memref<2x8x8x32xf32, #tpu.memory_space<vmem>>, vector<2x8x8x32xf32>
    tpu.vector_store %arg5[%c0_12, %c0_13, %c0_14, %c0_15], %35 {strides = array<i32>} : memref<2x8x8x32xf32, #tpu.memory_space<vmem>>, vector<2x8x8x32xf32>,
    return
  }
  func.func @transform_0(%arg0: i32) -> (i32, i32, i32, i32) {
    %c0_i32 = arith.constant 0 : i32
    %c0_i32_0 = arith.constant 0 : i32
    %c0_i32_1 = arith.constant 0 : i32
    %c0_i32_2 = arith.constant 0 : i32
    return %arg0, %c0_i32, %c0_i32_0, %c0_i32_1 : i32, i32, i32, i32
  }
  func.func @transform_1(%arg0: i32) -> (i32, i32) {
    %c0_i32 = arith.constant 0 : i32
    %c0_i32_0 = arith.constant 0 : i32
    %c0_i32_1 = arith.constant 0 : i32
    return %c0_i32, %c0_i32_0 : i32, i32
  }
  func.func @transform_2(%arg0: i32) -> (i32, i32) {
    %c0_i32 = arith.constant 0 : i32
    %c0_i32_0 = arith.constant 0 : i32
    %c0_i32_1 = arith.constant 0 : i32
    return %c0_i32, %c0_i32_0 : i32, i32
  }
  func.func @transform_3(%arg0: i32) -> (i32, i32) {
    %c0_i32 = arith.constant 0 : i32
    %c0_i32_0 = arith.constant 0 : i32
    %c0_i32_1 = arith.constant 0 : i32
    return %c0_i32, %c0_i32_0 : i32, i32
  }
  func.func @transform_4(%arg0: i32) -> (i32, i32, i32, i32) {
    %c0_i32 = arith.constant 0 : i32
    %c0_i32_0 = arith.constant 0 : i32
    %c0_i32_1 = arith.constant 0 : i32
    %c0_i32_2 = arith.constant 0 : i32
    return %arg0, %c0_i32, %c0_i32_0, %c0_i32_1 : i32, i32, i32, i32
  }
}

module attributes {stable_mosaic.version = 11 : i64} {
  func.func @_resblock_kernel(%arg0: i32, %arg1: memref<2x8x8x32xf32, #tpu.memory_space<vmem>>, %arg2: memref<288x32xbf16, #tpu.memory_space<vmem>>, %arg3: memref<1x32xf32, #tpu.memory_space<vmem>>, %arg4: memref<1x32xf32, #tpu.memory_space<vmem>>, %arg5: memref<288x32xbf16, #tpu.memory_space<vmem>>, %arg6: memref<1x32xf32, #tpu.memory_space<vmem>>, %arg7: memref<1x32xf32, #tpu.memory_space<vmem>>, %arg8: memref<2x8x8x32xf32, #tpu.memory_space<vmem>>) attributes {dimension_semantics = [#tpu.dimension_semantics<parallel>], iteration_bounds = array<i64: 1>, scalar_prefetch = 0 : i64, scratch_operands = 0 : i64, tpu.core_type = #tpu.core_type<tc>, window_params = [{transform_indices = @transform_0, window_bounds = array<i64: 2, 8, 8, 32>}, {pipeline_mode = #tpu.pipeline_mode<synchronous>, transform_indices = @transform_1, window_bounds = array<i64: 288, 32>}, {pipeline_mode = #tpu.pipeline_mode<synchronous>, transform_indices = @transform_2, window_bounds = array<i64: 1, 32>}, {pipeline_mode = #tpu.pipeline_mode<synchronous>, transform_indices = @transform_3, window_bounds = array<i64: 1, 32>}, {pipeline_mode = #tpu.pipeline_mode<synchronous>, transform_indices = @transform_4, window_bounds = array<i64: 288, 32>}, {pipeline_mode = #tpu.pipeline_mode<synchronous>, transform_indices = @transform_5, window_bounds = array<i64: 1, 32>}, {pipeline_mode = #tpu.pipeline_mode<synchronous>, transform_indices = @transform_6, window_bounds = array<i64: 1, 32>}, {transform_indices = @transform_7, window_bounds = array<i64: 2, 8, 8, 32>}]} {
    %c0 = arith.constant 0 : index
    %c0_0 = arith.constant 0 : index
    %c0_1 = arith.constant 0 : index
    %c0_2 = arith.constant 0 : index
    %0 = vector.load %arg1[%c0, %c0_0, %c0_1, %c0_2] : memref<2x8x8x32xf32, #tpu.memory_space<vmem>>, vector<2x8x8x32xf32>
    %cst = arith.constant 0.000000e+00 : f32
    %1 = vector.broadcast %cst : f32 to vector<2x8x1x32xf32>
    %2 = tpu.concatenate %1, %0, %1 in 2 : vector<2x8x1x32xf32>, vector<2x8x8x32xf32>, vector<2x8x1x32xf32> -> vector<2x8x10x32xf32>
    %cst_3 = arith.constant 0.000000e+00 : f32
    %3 = vector.broadcast %cst_3 : f32 to vector<2x1x10x32xf32>
    %4 = tpu.concatenate %3, %2, %3 in 1 : vector<2x1x10x32xf32>, vector<2x8x10x32xf32>, vector<2x1x10x32xf32> -> vector<2x10x10x32xf32>
    %5 = vector.extract_strided_slice %4 {offsets = [0, 0, 0, 0], sizes = [2, 8, 8, 32], strides = [1, 1, 1, 1]} : vector<2x10x10x32xf32> to vector<2x8x8x32xf32>
    %6 = vector.shape_cast %5 : vector<2x8x8x32xf32> to vector<128x32xf32>
    %7 = vector.extract_strided_slice %4 {offsets = [0, 0, 1, 0], sizes = [2, 8, 8, 32], strides = [1, 1, 1, 1]} : vector<2x10x10x32xf32> to vector<2x8x8x32xf32>
    %8 = vector.shape_cast %7 : vector<2x8x8x32xf32> to vector<128x32xf32>
    %9 = vector.extract_strided_slice %4 {offsets = [0, 0, 2, 0], sizes = [2, 8, 8, 32], strides = [1, 1, 1, 1]} : vector<2x10x10x32xf32> to vector<2x8x8x32xf32>
    %10 = vector.shape_cast %9 : vector<2x8x8x32xf32> to vector<128x32xf32>
    %11 = vector.extract_strided_slice %4 {offsets = [0, 1, 0, 0], sizes = [2, 8, 8, 32], strides = [1, 1, 1, 1]} : vector<2x10x10x32xf32> to vector<2x8x8x32xf32>
    %12 = vector.shape_cast %11 : vector<2x8x8x32xf32> to vector<128x32xf32>
    %13 = vector.extract_strided_slice %4 {offsets = [0, 1, 1, 0], sizes = [2, 8, 8, 32], strides = [1, 1, 1, 1]} : vector<2x10x10x32xf32> to vector<2x8x8x32xf32>
    %14 = vector.shape_cast %13 : vector<2x8x8x32xf32> to vector<128x32xf32>
    %15 = vector.extract_strided_slice %4 {offsets = [0, 1, 2, 0], sizes = [2, 8, 8, 32], strides = [1, 1, 1, 1]} : vector<2x10x10x32xf32> to vector<2x8x8x32xf32>
    %16 = vector.shape_cast %15 : vector<2x8x8x32xf32> to vector<128x32xf32>
    %17 = vector.extract_strided_slice %4 {offsets = [0, 2, 0, 0], sizes = [2, 8, 8, 32], strides = [1, 1, 1, 1]} : vector<2x10x10x32xf32> to vector<2x8x8x32xf32>
    %18 = vector.shape_cast %17 : vector<2x8x8x32xf32> to vector<128x32xf32>
    %19 = vector.extract_strided_slice %4 {offsets = [0, 2, 1, 0], sizes = [2, 8, 8, 32], strides = [1, 1, 1, 1]} : vector<2x10x10x32xf32> to vector<2x8x8x32xf32>
    %20 = vector.shape_cast %19 : vector<2x8x8x32xf32> to vector<128x32xf32>
    %21 = vector.extract_strided_slice %4 {offsets = [0, 2, 2, 0], sizes = [2, 8, 8, 32], strides = [1, 1, 1, 1]} : vector<2x10x10x32xf32> to vector<2x8x8x32xf32>
    %22 = vector.shape_cast %21 : vector<2x8x8x32xf32> to vector<128x32xf32>
    %23 = tpu.concatenate %6, %8, %10, %12, %14, %16, %18, %20, %22 in 1 : vector<128x32xf32>, vector<128x32xf32>, vector<128x32xf32>, vector<128x32xf32>, vector<128x32xf32>, vector<128x32xf32>, vector<128x32xf32>, vector<128x32xf32>, vector<128x32xf32> -> vector<128x288xf32>
    %24 = arith.truncf %23 : vector<128x288xf32> to vector<128x288xbf16>
    %c0_4 = arith.constant 0 : index
    %c0_5 = arith.constant 0 : index
    %25 = vector.load %arg2[%c0_4, %c0_5] : memref<288x32xbf16, #tpu.memory_space<vmem>>, vector<288x32xbf16>
    %cst_6 = arith.constant dense<0.000000e+00> : vector<128x32xf32>
    %26 = tpu.matmul %24, %25, %cst_6 {dimension_numbers = #tpu.dot_dimension_numbers<[1], [0], [0], [1], [0, 0, 1, 1], [], []>} : vector<128x288xbf16>, vector<288x32xbf16>, vector<128x32xf32> -> vector<128x32xf32>
    %c0_7 = arith.constant 0 : index
    %c0_8 = arith.constant 0 : index
    %27 = vector.load %arg3[%c0_7, %c0_8] : memref<1x32xf32, #tpu.memory_space<vmem>>, vector<1x32xf32>
    %28 = vector.broadcast %27 : vector<1x32xf32> to vector<128x32xf32>
    %29 = arith.mulf %26, %28 : vector<128x32xf32>
    %c0_9 = arith.constant 0 : index
    %c0_10 = arith.constant 0 : index
    %30 = vector.load %arg4[%c0_9, %c0_10] : memref<1x32xf32, #tpu.memory_space<vmem>>, vector<1x32xf32>
    %31 = vector.broadcast %30 : vector<1x32xf32> to vector<128x32xf32>
    %32 = arith.addf %29, %31 : vector<128x32xf32>
    %cst_11 = arith.constant 0.000000e+00 : f32
    %33 = vector.broadcast %cst_11 : f32 to vector<128x32xf32>
    %34 = arith.maximumf %32, %33 : vector<128x32xf32>
    %35 = vector.shape_cast %34 : vector<128x32xf32> to vector<2x8x8x32xf32>
    %cst_12 = arith.constant 0.000000e+00 : f32
    %36 = vector.broadcast %cst_12 : f32 to vector<2x8x1x32xf32>
    %37 = tpu.concatenate %36, %35, %36 in 2 : vector<2x8x1x32xf32>, vector<2x8x8x32xf32>, vector<2x8x1x32xf32> -> vector<2x8x10x32xf32>
    %cst_13 = arith.constant 0.000000e+00 : f32
    %38 = vector.broadcast %cst_13 : f32 to vector<2x1x10x32xf32>
    %39 = tpu.concatenate %38, %37, %38 in 1 : vector<2x1x10x32xf32>, vector<2x8x10x32xf32>, vector<2x1x10x32xf32> -> vector<2x10x10x32xf32>
    %40 = vector.extract_strided_slice %39 {offsets = [0, 0, 0, 0], sizes = [2, 8, 8, 32], strides = [1, 1, 1, 1]} : vector<2x10x10x32xf32> to vector<2x8x8x32xf32>
    %41 = vector.shape_cast %40 : vector<2x8x8x32xf32> to vector<128x32xf32>
    %42 = vector.extract_strided_slice %39 {offsets = [0, 0, 1, 0], sizes = [2, 8, 8, 32], strides = [1, 1, 1, 1]} : vector<2x10x10x32xf32> to vector<2x8x8x32xf32>
    %43 = vector.shape_cast %42 : vector<2x8x8x32xf32> to vector<128x32xf32>
    %44 = vector.extract_strided_slice %39 {offsets = [0, 0, 2, 0], sizes = [2, 8, 8, 32], strides = [1, 1, 1, 1]} : vector<2x10x10x32xf32> to vector<2x8x8x32xf32>
    %45 = vector.shape_cast %44 : vector<2x8x8x32xf32> to vector<128x32xf32>
    %46 = vector.extract_strided_slice %39 {offsets = [0, 1, 0, 0], sizes = [2, 8, 8, 32], strides = [1, 1, 1, 1]} : vector<2x10x10x32xf32> to vector<2x8x8x32xf32>
    %47 = vector.shape_cast %46 : vector<2x8x8x32xf32> to vector<128x32xf32>
    %48 = vector.extract_strided_slice %39 {offsets = [0, 1, 1, 0], sizes = [2, 8, 8, 32], strides = [1, 1, 1, 1]} : vector<2x10x10x32xf32> to vector<2x8x8x32xf32>
    %49 = vector.shape_cast %48 : vector<2x8x8x32xf32> to vector<128x32xf32>
    %50 = vector.extract_strided_slice %39 {offsets = [0, 1, 2, 0], sizes = [2, 8, 8, 32], strides = [1, 1, 1, 1]} : vector<2x10x10x32xf32> to vector<2x8x8x32xf32>
    %51 = vector.shape_cast %50 : vector<2x8x8x32xf32> to vector<128x32xf32>
    %52 = vector.extract_strided_slice %39 {offsets = [0, 2, 0, 0], sizes = [2, 8, 8, 32], strides = [1, 1, 1, 1]} : vector<2x10x10x32xf32> to vector<2x8x8x32xf32>
    %53 = vector.shape_cast %52 : vector<2x8x8x32xf32> to vector<128x32xf32>
    %54 = vector.extract_strided_slice %39 {offsets = [0, 2, 1, 0], sizes = [2, 8, 8, 32], strides = [1, 1, 1, 1]} : vector<2x10x10x32xf32> to vector<2x8x8x32xf32>
    %55 = vector.shape_cast %54 : vector<2x8x8x32xf32> to vector<128x32xf32>
    %56 = vector.extract_strided_slice %39 {offsets = [0, 2, 2, 0], sizes = [2, 8, 8, 32], strides = [1, 1, 1, 1]} : vector<2x10x10x32xf32> to vector<2x8x8x32xf32>
    %57 = vector.shape_cast %56 : vector<2x8x8x32xf32> to vector<128x32xf32>
    %58 = tpu.concatenate %41, %43, %45, %47, %49, %51, %53, %55, %57 in 1 : vector<128x32xf32>, vector<128x32xf32>, vector<128x32xf32>, vector<128x32xf32>, vector<128x32xf32>, vector<128x32xf32>, vector<128x32xf32>, vector<128x32xf32>, vector<128x32xf32> -> vector<128x288xf32>
    %59 = arith.truncf %58 : vector<128x288xf32> to vector<128x288xbf16>
    %c0_14 = arith.constant 0 : index
    %c0_15 = arith.constant 0 : index
    %60 = vector.load %arg5[%c0_14, %c0_15] : memref<288x32xbf16, #tpu.memory_space<vmem>>, vector<288x32xbf16>
    %cst_16 = arith.constant dense<0.000000e+00> : vector<128x32xf32>
    %61 = tpu.matmul %59, %60, %cst_16 {dimension_numbers = #tpu.dot_dimension_numbers<[1], [0], [0], [1], [0, 0, 1, 1], [], []>} : vector<128x288xbf16>, vector<288x32xbf16>, vector<128x32xf32> -> vector<128x32xf32>
    %c0_17 = arith.constant 0 : index
    %c0_18 = arith.constant 0 : index
    %62 = vector.load %arg6[%c0_17, %c0_18] : memref<1x32xf32, #tpu.memory_space<vmem>>, vector<1x32xf32>
    %63 = vector.broadcast %62 : vector<1x32xf32> to vector<128x32xf32>
    %64 = arith.mulf %61, %63 : vector<128x32xf32>
    %c0_19 = arith.constant 0 : index
    %c0_20 = arith.constant 0 : index
    %65 = vector.load %arg7[%c0_19, %c0_20] : memref<1x32xf32, #tpu.memory_space<vmem>>, vector<1x32xf32>
    %66 = vector.broadcast %65 : vector<1x32xf32> to vector<128x32xf32>
    %67 = arith.addf %64, %66 : vector<128x32xf32>
    %68 = vector.shape_cast %0 : vector<2x8x8x32xf32> to vector<128x32xf32>
    %69 = arith.addf %67, %68 : vector<128x32xf32>
    %cst_21 = arith.constant 0.000000e+00 : f32
    %70 = vector.broadcast %cst_21 : f32 to vector<128x32xf32>
    %71 = arith.maximumf %69, %70 : vector<128x32xf32>
    %72 = vector.shape_cast %71 : vector<128x32xf32> to vector<2x8x8x32xf32>
    %c0_22 = arith.constant 0 : index
    %c0_23 = arith.constant 0 : index
    %c0_24 = arith.constant 0 : index
    %c0_25 = arith.constant 0 : index
    %73 = vector.load %arg8[%c0_22, %c0_23, %c0_24, %c0_25] : memref<2x8x8x32xf32, #tpu.memory_space<vmem>>, vector<2x8x8x32xf32>
    tpu.vector_store %arg8[%c0_22, %c0_23, %c0_24, %c0_25], %72 {strides = array<i32>} : memref<2x8x8x32xf32, #tpu.memory_space<vmem>>, vector<2x8x8x32xf32>,
    return
  }
  func.func @transform_0(%arg0: i32) -> (i32, i32, i32, i32) {
    %c0_i32 = arith.constant 0 : i32
    %c0_i32_0 = arith.constant 0 : i32
    %c0_i32_1 = arith.constant 0 : i32
    %c0_i32_2 = arith.constant 0 : i32
    return %arg0, %c0_i32, %c0_i32_0, %c0_i32_1 : i32, i32, i32, i32
  }
  func.func @transform_1(%arg0: i32) -> (i32, i32) {
    %c0_i32 = arith.constant 0 : i32
    %c0_i32_0 = arith.constant 0 : i32
    %c0_i32_1 = arith.constant 0 : i32
    return %c0_i32, %c0_i32_0 : i32, i32
  }
  func.func @transform_2(%arg0: i32) -> (i32, i32) {
    %c0_i32 = arith.constant 0 : i32
    %c0_i32_0 = arith.constant 0 : i32
    %c0_i32_1 = arith.constant 0 : i32
    return %c0_i32, %c0_i32_0 : i32, i32
  }
  func.func @transform_3(%arg0: i32) -> (i32, i32) {
    %c0_i32 = arith.constant 0 : i32
    %c0_i32_0 = arith.constant 0 : i32
    %c0_i32_1 = arith.constant 0 : i32
    return %c0_i32, %c0_i32_0 : i32, i32
  }
  func.func @transform_4(%arg0: i32) -> (i32, i32) {
    %c0_i32 = arith.constant 0 : i32
    %c0_i32_0 = arith.constant 0 : i32
    %c0_i32_1 = arith.constant 0 : i32
    return %c0_i32, %c0_i32_0 : i32, i32
  }
  func.func @transform_5(%arg0: i32) -> (i32, i32) {
    %c0_i32 = arith.constant 0 : i32
    %c0_i32_0 = arith.constant 0 : i32
    %c0_i32_1 = arith.constant 0 : i32
    return %c0_i32, %c0_i32_0 : i32, i32
  }
  func.func @transform_6(%arg0: i32) -> (i32, i32) {
    %c0_i32 = arith.constant 0 : i32
    %c0_i32_0 = arith.constant 0 : i32
    %c0_i32_1 = arith.constant 0 : i32
    return %c0_i32, %c0_i32_0 : i32, i32
  }
  func.func @transform_7(%arg0: i32) -> (i32, i32, i32, i32) {
    %c0_i32 = arith.constant 0 : i32
    %c0_i32_0 = arith.constant 0 : i32
    %c0_i32_1 = arith.constant 0 : i32
    %c0_i32_2 = arith.constant 0 : i32
    return %arg0, %c0_i32, %c0_i32_0, %c0_i32_1 : i32, i32, i32, i32
  }
}

module attributes {stable_mosaic.version = 11 : i64} {
  func.func @_conv_bn_kernel(%arg0: i32, %arg1: memref<2x8x8x32xf32, #tpu.memory_space<vmem>>, %arg2: memref<288x128xbf16, #tpu.memory_space<vmem>>, %arg3: memref<1x128xf32, #tpu.memory_space<vmem>>, %arg4: memref<1x128xf32, #tpu.memory_space<vmem>>, %arg5: memref<2x8x8x128xf32, #tpu.memory_space<vmem>>) attributes {dimension_semantics = [#tpu.dimension_semantics<parallel>], iteration_bounds = array<i64: 1>, scalar_prefetch = 0 : i64, scratch_operands = 0 : i64, tpu.core_type = #tpu.core_type<tc>, window_params = [{transform_indices = @transform_0, window_bounds = array<i64: 2, 8, 8, 32>}, {pipeline_mode = #tpu.pipeline_mode<synchronous>, transform_indices = @transform_1, window_bounds = array<i64: 288, 128>}, {pipeline_mode = #tpu.pipeline_mode<synchronous>, transform_indices = @transform_2, window_bounds = array<i64: 1, 128>}, {pipeline_mode = #tpu.pipeline_mode<synchronous>, transform_indices = @transform_3, window_bounds = array<i64: 1, 128>}, {transform_indices = @transform_4, window_bounds = array<i64: 2, 8, 8, 128>}]} {
    %c0 = arith.constant 0 : index
    %c0_0 = arith.constant 0 : index
    %c0_1 = arith.constant 0 : index
    %c0_2 = arith.constant 0 : index
    %0 = vector.load %arg1[%c0, %c0_0, %c0_1, %c0_2] : memref<2x8x8x32xf32, #tpu.memory_space<vmem>>, vector<2x8x8x32xf32>
    %cst = arith.constant 0.000000e+00 : f32
    %1 = vector.broadcast %cst : f32 to vector<2x8x1x32xf32>
    %2 = tpu.concatenate %1, %0, %1 in 2 : vector<2x8x1x32xf32>, vector<2x8x8x32xf32>, vector<2x8x1x32xf32> -> vector<2x8x10x32xf32>
    %cst_3 = arith.constant 0.000000e+00 : f32
    %3 = vector.broadcast %cst_3 : f32 to vector<2x1x10x32xf32>
    %4 = tpu.concatenate %3, %2, %3 in 1 : vector<2x1x10x32xf32>, vector<2x8x10x32xf32>, vector<2x1x10x32xf32> -> vector<2x10x10x32xf32>
    %5 = vector.extract_strided_slice %4 {offsets = [0, 0, 0, 0], sizes = [2, 8, 8, 32], strides = [1, 1, 1, 1]} : vector<2x10x10x32xf32> to vector<2x8x8x32xf32>
    %6 = vector.shape_cast %5 : vector<2x8x8x32xf32> to vector<128x32xf32>
    %7 = vector.extract_strided_slice %4 {offsets = [0, 0, 1, 0], sizes = [2, 8, 8, 32], strides = [1, 1, 1, 1]} : vector<2x10x10x32xf32> to vector<2x8x8x32xf32>
    %8 = vector.shape_cast %7 : vector<2x8x8x32xf32> to vector<128x32xf32>
    %9 = vector.extract_strided_slice %4 {offsets = [0, 0, 2, 0], sizes = [2, 8, 8, 32], strides = [1, 1, 1, 1]} : vector<2x10x10x32xf32> to vector<2x8x8x32xf32>
    %10 = vector.shape_cast %9 : vector<2x8x8x32xf32> to vector<128x32xf32>
    %11 = vector.extract_strided_slice %4 {offsets = [0, 1, 0, 0], sizes = [2, 8, 8, 32], strides = [1, 1, 1, 1]} : vector<2x10x10x32xf32> to vector<2x8x8x32xf32>
    %12 = vector.shape_cast %11 : vector<2x8x8x32xf32> to vector<128x32xf32>
    %13 = vector.extract_strided_slice %4 {offsets = [0, 1, 1, 0], sizes = [2, 8, 8, 32], strides = [1, 1, 1, 1]} : vector<2x10x10x32xf32> to vector<2x8x8x32xf32>
    %14 = vector.shape_cast %13 : vector<2x8x8x32xf32> to vector<128x32xf32>
    %15 = vector.extract_strided_slice %4 {offsets = [0, 1, 2, 0], sizes = [2, 8, 8, 32], strides = [1, 1, 1, 1]} : vector<2x10x10x32xf32> to vector<2x8x8x32xf32>
    %16 = vector.shape_cast %15 : vector<2x8x8x32xf32> to vector<128x32xf32>
    %17 = vector.extract_strided_slice %4 {offsets = [0, 2, 0, 0], sizes = [2, 8, 8, 32], strides = [1, 1, 1, 1]} : vector<2x10x10x32xf32> to vector<2x8x8x32xf32>
    %18 = vector.shape_cast %17 : vector<2x8x8x32xf32> to vector<128x32xf32>
    %19 = vector.extract_strided_slice %4 {offsets = [0, 2, 1, 0], sizes = [2, 8, 8, 32], strides = [1, 1, 1, 1]} : vector<2x10x10x32xf32> to vector<2x8x8x32xf32>
    %20 = vector.shape_cast %19 : vector<2x8x8x32xf32> to vector<128x32xf32>
    %21 = vector.extract_strided_slice %4 {offsets = [0, 2, 2, 0], sizes = [2, 8, 8, 32], strides = [1, 1, 1, 1]} : vector<2x10x10x32xf32> to vector<2x8x8x32xf32>
    %22 = vector.shape_cast %21 : vector<2x8x8x32xf32> to vector<128x32xf32>
    %23 = tpu.concatenate %6, %8, %10, %12, %14, %16, %18, %20, %22 in 1 : vector<128x32xf32>, vector<128x32xf32>, vector<128x32xf32>, vector<128x32xf32>, vector<128x32xf32>, vector<128x32xf32>, vector<128x32xf32>, vector<128x32xf32>, vector<128x32xf32> -> vector<128x288xf32>
    %24 = arith.truncf %23 : vector<128x288xf32> to vector<128x288xbf16>
    %c0_4 = arith.constant 0 : index
    %c0_5 = arith.constant 0 : index
    %25 = vector.load %arg2[%c0_4, %c0_5] : memref<288x128xbf16, #tpu.memory_space<vmem>>, vector<288x128xbf16>
    %cst_6 = arith.constant dense<0.000000e+00> : vector<128x128xf32>
    %26 = tpu.matmul %24, %25, %cst_6 {dimension_numbers = #tpu.dot_dimension_numbers<[1], [0], [0], [1], [0, 0, 1, 1], [], []>} : vector<128x288xbf16>, vector<288x128xbf16>, vector<128x128xf32> -> vector<128x128xf32>
    %c0_7 = arith.constant 0 : index
    %c0_8 = arith.constant 0 : index
    %27 = vector.load %arg3[%c0_7, %c0_8] : memref<1x128xf32, #tpu.memory_space<vmem>>, vector<1x128xf32>
    %28 = vector.broadcast %27 : vector<1x128xf32> to vector<128x128xf32>
    %29 = arith.mulf %26, %28 : vector<128x128xf32>
    %c0_9 = arith.constant 0 : index
    %c0_10 = arith.constant 0 : index
    %30 = vector.load %arg4[%c0_9, %c0_10] : memref<1x128xf32, #tpu.memory_space<vmem>>, vector<1x128xf32>
    %31 = vector.broadcast %30 : vector<1x128xf32> to vector<128x128xf32>
    %32 = arith.addf %29, %31 : vector<128x128xf32>
    %cst_11 = arith.constant 0.000000e+00 : f32
    %33 = vector.broadcast %cst_11 : f32 to vector<128x128xf32>
    %34 = arith.maximumf %32, %33 : vector<128x128xf32>
    %35 = vector.shape_cast %34 : vector<128x128xf32> to vector<2x8x8x128xf32>
    %c0_12 = arith.constant 0 : index
    %c0_13 = arith.constant 0 : index
    %c0_14 = arith.constant 0 : index
    %c0_15 = arith.constant 0 : index
    %36 = vector.load %arg5[%c0_12, %c0_13, %c0_14, %c0_15] : memref<2x8x8x128xf32, #tpu.memory_space<vmem>>, vector<2x8x8x128xf32>
    tpu.vector_store %arg5[%c0_12, %c0_13, %c0_14, %c0_15], %35 {strides = array<i32>} : memref<2x8x8x128xf32, #tpu.memory_space<vmem>>, vector<2x8x8x128xf32>,
    return
  }
  func.func @transform_0(%arg0: i32) -> (i32, i32, i32, i32) {
    %c0_i32 = arith.constant 0 : i32
    %c0_i32_0 = arith.constant 0 : i32
    %c0_i32_1 = arith.constant 0 : i32
    %c0_i32_2 = arith.constant 0 : i32
    return %arg0, %c0_i32, %c0_i32_0, %c0_i32_1 : i32, i32, i32, i32
  }
  func.func @transform_1(%arg0: i32) -> (i32, i32) {
    %c0_i32 = arith.constant 0 : i32
    %c0_i32_0 = arith.constant 0 : i32
    %c0_i32_1 = arith.constant 0 : i32
    return %c0_i32, %c0_i32_0 : i32, i32
  }
  func.func @transform_2(%arg0: i32) -> (i32, i32) {
    %c0_i32 = arith.constant 0 : i32
    %c0_i32_0 = arith.constant 0 : i32
    %c0_i32_1 = arith.constant 0 : i32
    return %c0_i32, %c0_i32_0 : i32, i32
  }
  func.func @transform_3(%arg0: i32) -> (i32, i32) {
    %c0_i32 = arith.constant 0 : i32
    %c0_i32_0 = arith.constant 0 : i32
    %c0_i32_1 = arith.constant 0 : i32
    return %c0_i32, %c0_i32_0 : i32, i32
  }
  func.func @transform_4(%arg0: i32) -> (i32, i32, i32, i32) {
    %c0_i32 = arith.constant 0 : i32
    %c0_i32_0 = arith.constant 0 : i32
    %c0_i32_1 = arith.constant 0 : i32
    %c0_i32_2 = arith.constant 0 : i32
    return %arg0, %c0_i32, %c0_i32_0, %c0_i32_1 : i32, i32, i32, i32
  }
}

module attributes {stable_mosaic.version = 11 : i64} {
  func.func @_linear_kernel(%arg0: i32, %arg1: memref<2x2048xf32, #tpu.memory_space<vmem>>, %arg2: memref<2048x128xbf16, #tpu.memory_space<vmem>>, %arg3: memref<1x128xf32, #tpu.memory_space<vmem>>, %arg4: memref<2x128xf32, #tpu.memory_space<vmem>>) attributes {dimension_semantics = [#tpu.dimension_semantics<parallel>], iteration_bounds = array<i64: 1>, scalar_prefetch = 0 : i64, scratch_operands = 0 : i64, tpu.core_type = #tpu.core_type<tc>, window_params = [{transform_indices = @transform_0, window_bounds = array<i64: 2, 2048>}, {pipeline_mode = #tpu.pipeline_mode<synchronous>, transform_indices = @transform_1, window_bounds = array<i64: 2048, 128>}, {pipeline_mode = #tpu.pipeline_mode<synchronous>, transform_indices = @transform_2, window_bounds = array<i64: 1, 128>}, {transform_indices = @transform_3, window_bounds = array<i64: 2, 128>}]} {
    %c0 = arith.constant 0 : index
    %c0_0 = arith.constant 0 : index
    %0 = vector.load %arg1[%c0, %c0_0] : memref<2x2048xf32, #tpu.memory_space<vmem>>, vector<2x2048xf32>
    %1 = arith.truncf %0 : vector<2x2048xf32> to vector<2x2048xbf16>
    %c0_1 = arith.constant 0 : index
    %c0_2 = arith.constant 0 : index
    %2 = vector.load %arg2[%c0_1, %c0_2] : memref<2048x128xbf16, #tpu.memory_space<vmem>>, vector<2048x128xbf16>
    %cst = arith.constant dense<0.000000e+00> : vector<2x128xf32>
    %3 = tpu.matmul %1, %2, %cst {dimension_numbers = #tpu.dot_dimension_numbers<[1], [0], [0], [1], [0, 0, 1, 1], [], []>} : vector<2x2048xbf16>, vector<2048x128xbf16>, vector<2x128xf32> -> vector<2x128xf32>
    %c0_3 = arith.constant 0 : index
    %c0_4 = arith.constant 0 : index
    %4 = vector.load %arg3[%c0_3, %c0_4] : memref<1x128xf32, #tpu.memory_space<vmem>>, vector<1x128xf32>
    %5 = vector.broadcast %4 : vector<1x128xf32> to vector<2x128xf32>
    %6 = arith.addf %3, %5 : vector<2x128xf32>
    %c0_5 = arith.constant 0 : index
    %c0_6 = arith.constant 0 : index
    %7 = vector.load %arg4[%c0_5, %c0_6] : memref<2x128xf32, #tpu.memory_space<vmem>>, vector<2x128xf32>
    tpu.vector_store %arg4[%c0_5, %c0_6], %6 {strides = array<i32>} : memref<2x128xf32, #tpu.memory_space<vmem>>, vector<2x128xf32>,
    return
  }
  func.func @transform_0(%arg0: i32) -> (i32, i32) {
    %c0_i32 = arith.constant 0 : i32
    %c0_i32_0 = arith.constant 0 : i32
    return %arg0, %c0_i32 : i32, i32
  }
  func.func @transform_1(%arg0: i32) -> (i32, i32) {
    %c0_i32 = arith.constant 0 : i32
    %c0_i32_0 = arith.constant 0 : i32
    %c0_i32_1 = arith.constant 0 : i32
    return %c0_i32, %c0_i32_0 : i32, i32
  }
  func.func @transform_2(%arg0: i32) -> (i32, i32) {
    %c0_i32 = arith.constant 0 : i32
    %c0_i32_0 = arith.constant 0 : i32
    %c0_i32_1 = arith.constant 0 : i32
    return %c0_i32, %c0_i32_0 : i32, i32
  }
  func.func @transform_3(%arg0: i32) -> (i32, i32) {
    %c0_i32 = arith.constant 0 : i32
    %c0_i32_0 = arith.constant 0 : i32
    return %arg0, %c0_i32 : i32, i32
  }
}

module attributes {stable_mosaic.version = 11 : i64} {
  func.func @_linear_kernel(%arg0: i32, %arg1: memref<2x192xf32, #tpu.memory_space<vmem>>, %arg2: memref<192x128xbf16, #tpu.memory_space<vmem>>, %arg3: memref<1x128xf32, #tpu.memory_space<vmem>>, %arg4: memref<2x128xf32, #tpu.memory_space<vmem>>) attributes {dimension_semantics = [#tpu.dimension_semantics<parallel>], iteration_bounds = array<i64: 1>, scalar_prefetch = 0 : i64, scratch_operands = 0 : i64, tpu.core_type = #tpu.core_type<tc>, window_params = [{transform_indices = @transform_0, window_bounds = array<i64: 2, 192>}, {pipeline_mode = #tpu.pipeline_mode<synchronous>, transform_indices = @transform_1, window_bounds = array<i64: 192, 128>}, {pipeline_mode = #tpu.pipeline_mode<synchronous>, transform_indices = @transform_2, window_bounds = array<i64: 1, 128>}, {transform_indices = @transform_3, window_bounds = array<i64: 2, 128>}]} {
    %c0 = arith.constant 0 : index
    %c0_0 = arith.constant 0 : index
    %0 = vector.load %arg1[%c0, %c0_0] : memref<2x192xf32, #tpu.memory_space<vmem>>, vector<2x192xf32>
    %1 = arith.truncf %0 : vector<2x192xf32> to vector<2x192xbf16>
    %c0_1 = arith.constant 0 : index
    %c0_2 = arith.constant 0 : index
    %2 = vector.load %arg2[%c0_1, %c0_2] : memref<192x128xbf16, #tpu.memory_space<vmem>>, vector<192x128xbf16>
    %cst = arith.constant dense<0.000000e+00> : vector<2x128xf32>
    %3 = tpu.matmul %1, %2, %cst {dimension_numbers = #tpu.dot_dimension_numbers<[1], [0], [0], [1], [0, 0, 1, 1], [], []>} : vector<2x192xbf16>, vector<192x128xbf16>, vector<2x128xf32> -> vector<2x128xf32>
    %c0_3 = arith.constant 0 : index
    %c0_4 = arith.constant 0 : index
    %4 = vector.load %arg3[%c0_3, %c0_4] : memref<1x128xf32, #tpu.memory_space<vmem>>, vector<1x128xf32>
    %5 = vector.broadcast %4 : vector<1x128xf32> to vector<2x128xf32>
    %6 = arith.addf %3, %5 : vector<2x128xf32>
    %7 = math.tanh %6 : vector<2x128xf32>
    %c0_5 = arith.constant 0 : index
    %c0_6 = arith.constant 0 : index
    %8 = vector.load %arg4[%c0_5, %c0_6] : memref<2x128xf32, #tpu.memory_space<vmem>>, vector<2x128xf32>
    tpu.vector_store %arg4[%c0_5, %c0_6], %7 {strides = array<i32>} : memref<2x128xf32, #tpu.memory_space<vmem>>, vector<2x128xf32>,
    return
  }
  func.func @transform_0(%arg0: i32) -> (i32, i32) {
    %c0_i32 = arith.constant 0 : i32
    %c0_i32_0 = arith.constant 0 : i32
    return %arg0, %c0_i32 : i32, i32
  }
  func.func @transform_1(%arg0: i32) -> (i32, i32) {
    %c0_i32 = arith.constant 0 : i32
    %c0_i32_0 = arith.constant 0 : i32
    %c0_i32_1 = arith.constant 0 : i32
    return %c0_i32, %c0_i32_0 : i32, i32
  }
  func.func @transform_2(%arg0: i32) -> (i32, i32) {
    %c0_i32 = arith.constant 0 : i32
    %c0_i32_0 = arith.constant 0 : i32
    %c0_i32_1 = arith.constant 0 : i32
    return %c0_i32, %c0_i32_0 : i32, i32
  }
  func.func @transform_3(%arg0: i32) -> (i32, i32) {
    %c0_i32 = arith.constant 0 : i32
    %c0_i32_0 = arith.constant 0 : i32
    return %arg0, %c0_i32 : i32, i32
  }
}

</mosaic_0001>

<bundles_post_ra>
// kernel: resnet_forward.6
= control target key start
LH: loop header
LB: loop body
LE: loop exit
PB: predicated region body
PF: predicated region fallthrough
CT: control target
= control target key end

     0   :  { %9 = vsyncpa [#allocation3], 0  ;;  %s2246_s0 = inlined_call_operand.vmem [shape: f32[2,8,8,3], index: 0, kind: input, shape index: {}]   ;;  %s2247_s1 = inlined_call_operand.vmem [shape: bf16[27,32], index: 1, kind: input, shape index: {}]   ;;  %s2248_s2 = inlined_call_operand.hbm [shape: f32[1,32], index: 2, kind: input, shape index: {}]   ;;  %s2249_s3 = inlined_call_operand.hbm [shape: f32[1,32], index: 3, kind: input, shape index: {}]   ;;  %s2250_s4 = inlined_call_operand.vmem [shape: f32[2,8,8,32], index: 4, kind: output, shape index: {}]  }
   0x1   :  { %s20_s17 = sshll.u32 %s2248_s2, 4  ;;  %s21_s17 = int_to_ptr.hbm [resolvable:$true] %s20_s17 }
   0x2   :  { %10 = vsyncpa [#allocation5], 0  ;;  %s1348_s18 = smov [#allocation2]   ;;  %s31_s22 = sshll.u32 %s2249_s3, 4  ;;  %s32_s22 = int_to_ptr.hbm [resolvable:$true] %s31_s22 }
   0x3   :  { %s22_s19 = sshll.u32 %s1348_s18, 4  ;;  %s1349_s23 = smov [#allocation4]   ;;  %s23_s19 = int_to_ptr.vmem [resolvable:$true] %s22_s19 }
   0x4   :  { %25 = dma.hbm_to_vmem [thread:$0]  %s21_s17, 16, %s23_s19, [#allocation3]  }
   0x5   :  { %s33_s24 = sshll.u32 %s1349_s23, 4  ;;  %s34_s24 = int_to_ptr.vmem [resolvable:$true] %s33_s24 }
   0x6   :  { %36 = dma.hbm_to_vmem [thread:$0]  %s32_s22, 16, %s34_s24, [#allocation5]  }
   0x7   :  { %1344 = dma.done.wait [#allocation3], 16  }
   0x8   :  { %1345 = vsyncadd [#allocation3], 4294967280 }
   0x9   :  { %1346 = dma.done.wait [#allocation5], 16  }
   0xa   :  { %1347 = vsyncadd [#allocation5], 4294967280  ;;  %v54_v0 = vld [vmem:[%s2246_s0 + $0x40] sm:$0xff]  ;;  %v55_v1 = vld [vmem:[%s2246_s0 + $0x48] sm:$0xff]  ;;  %vm110_vm0 = vcmask 1040384   ;;  %vm172_vm1 = vcmask 1046528  }
   0xb   :  { %v49_v2 = vld [vmem:[%s2246_s0 + $0x18] sm:$0xff]  ;;  %v86_v3 = vrot.slane %v54_v0, 7  ;;  %v87_v4 = vrot.slane %v55_v1, 7  ;;  %v50_v5 = vld [vmem:[%s2246_s0 + $0x20] sm:$0xff]  ;;  %v47_v9 = vld [vmem:[%s2246_s0 + $0x8] sm:$0xff]  ;;  %v2251_v31 = vmov 0.0  }
   0xc   :  { %v81_v6 = vrot.slane %v49_v2, 7  ;;  %v82_v7 = vrot.slane %v50_v5, 7  ;;  %v46_v8 = vld [vmem:[%s2246_s0] sm:$0xff]  ;;  %v79_v21 = vrot.slane %v47_v9, 7  ;;  %v1449_v32 = vrot.slane %v2251_v31, 1  ;;  %s1351_s9 = smov 3  }
   0xd   :  { %v1410_v10 = vsel %vm110_vm0, 0.0, %v86_v3  ;;  %v1413_v11 = vsel %vm110_vm0, 0.0, %v87_v4  ;;  %v1416_v12 = vsel %vm110_vm0, %v86_v3, 0.0  ;;  %v1419_v13 = vsel %vm110_vm0, %v87_v4, 0.0  ;;  %v56_v37 = vld [vmem:[%s2246_s0 + $0x50] sm:$0xff]  ;;  %v57_v38 = vld [vmem:[%s2246_s0 + $0x58] sm:$0xff] }
   0xe   :  { %2253 = vst [vmem:[#allocation8_spill] sm:$0xff] %v1410_v10  ;;  %v196_v14 = vrot.slane %v1410_v10, 1  ;;  %v197_v15 = vrot.slane %v1416_v12, 1  ;;  %v199_v16 = vrot.slane %v1413_v11, 1  ;;  %v200_v17 = vrot.slane %v1419_v13, 1  ;;  %v51_v39 = vld [vmem:[%s2246_s0 + $0x28] sm:$0xff] }
   0xf   :  { %v1426_v18 = vsel %vm110_vm0, 0.0, %v81_v6  ;;  %v1429_v19 = vsel %vm110_vm0, 0.0, %v82_v7  ;;  %v78_v20 = vrot.slane %v46_v8, 7  ;;  %v1436_v24 = vsel %vm110_vm0, %v81_v6, 0.0  ;;  %v52_v44 = vld [vmem:[%s2246_s0 + $0x30] sm:$0xff]  ;;  %s1352_s25 = smov 6  }
  0x10   :  { %v198_v22 = vsel %vm172_vm1, %v196_v14, %v197_v15  ;;  %v1433_v23 = vsel %vm172_vm1, %v199_v16, %v200_v17  ;;  %v1439_v25 = vsel %vm110_vm0, %v82_v7, 0.0  ;;  %v184_v27 = vrot.slane %v1426_v18, 1  ;;  %v48_v48 = vld [vmem:[%s2246_s0 + $0x10] sm:$0xff]  ;;  %s1353_s3 = smov 9   ;;  %s1355_s30 = smov 18  }
  0x11   :  { %v1442_v26 = vpack.i.bf16 %v1433_v23, %v198_v22  ;;  %v185_v28 = vrot.slane %v1436_v24, 1  ;;  %v187_v29 = vrot.slane %v1429_v19, 1  ;;  %v188_v30 = vrot.slane %v1439_v25, 1  ;;  %v60_v9 = vld [vmem:[%s2246_s0 + $0x70] sm:$0xff]  ;;  %s1356_s5 = smov 15   ;;  %s1357_s6 = smov 21  }
  0x12   :  { %v1457_v34 = vsel %vm110_vm0, 0.0, %v78_v20  ;;  %v1460_v35 = vsel %vm110_vm0, 0.0, %v79_v21  ;;  %v1463_v36 = vsel %vm110_vm0, %v78_v20, 0.0  ;;  %v1478_v41 = vsel %vm110_vm0, %v79_v21, 0.0  ;;  %v58_v20 = vld [vmem:[%s2246_s0 + $0x60] sm:$0xff]  ;;  %v59_v21 = vld [vmem:[%s2246_s0 + $0x68] sm:$0xff] }
  0x13   :  { %1020 = vrot.lane.b32.xlu2 %v1442_v26, %s1351_s9  ;;  %v1454_v33 = vsel %vm172_vm1, %v184_v27, %v185_v28  ;;  %v1475_v40 = vsel %vm172_vm1, %v187_v29, %v188_v30  ;;  %v175_v42 = vrot.slane %v1457_v34, 1  ;;  %v176_v43 = vrot.slane %v1463_v36, 1  ;;  %s1358_s7 = smov 24  }
  0x14   :  { %v1487_v45 = vpack.i.bf16 %v1475_v40, %v1454_v33  ;;  %v178_v46 = vrot.slane %v1460_v35, 1  ;;  %v179_v47 = vrot.slane %v1478_v41, 1  ;;  %vm217_vm2 = vcmask 1045504  }
  0x15   :  { %v1495_v49 = vsel %vm172_vm1, %v175_v42, %v176_v43  ;;  %v88_v50 = vrot.slane %v56_v37, 7  ;;  %v89_v51 = vrot.slane %v57_v38, 7  ;;  %v83_v52 = vrot.slane %v51_v39, 7 }
  0x16   :  { %1010 = vrot.lane.b32.xlu1 %v1487_v45, %s1351_s9  ;;  %v1500_v53 = vsel %vm172_vm1, %v178_v46, %v179_v47  ;;  %v221_v54 = vrot.slane %v1463_v36, 2  ;;  %v999_v55 = vpack.i.bf16 %v1495_v49, %v1449_v32  ;;  %v84_v56 = vrot.slane %v52_v44, 7 }
  0x17   :  { %v1506_v57 = vsel %vm110_vm0, 0.0, %v88_v50  ;;  %v1509_v58 = vsel %vm110_vm0, 0.0, %v89_v51  ;;  %v1512_v59 = vsel %vm110_vm0, %v88_v50, 0.0  ;;  %v80_v60 = vrot.slane %v48_v48, 7 }
  0x18   :  { %1000 = vrot.lane.b32.xlu0 %v999_v55, %s1351_s9  ;;  %v1516_v61 = vsel %vm110_vm0, %v89_v51, 0.0  ;;  %v202_v62 = vrot.slane %v1506_v57, 1  ;;  %v203_v63 = vrot.slane %v1512_v59, 1  ;;  %v205_v0 = vrot.slane %v1509_v58, 1 }
  0x19   :  { %v206_v1 = vrot.slane %v1516_v61, 1  ;;  %v1523_v2 = vsel %vm110_vm0, 0.0, %v83_v52  ;;  %v1526_v3 = vsel %vm110_vm0, 0.0, %v84_v56  ;;  %v132_v4 = vsel %vm110_vm0, %v83_v52, 0.0 }
  0x1a   :  { %v1530_v5 = vsel %vm172_vm1, %v202_v62, %v203_v63  ;;  %v133_v6 = vsel %vm110_vm0, %v84_v56, 0.0  ;;  %v190_v7 = vrot.slane %v1523_v2, 1  ;;  %v191_v8 = vrot.slane %v132_v4, 1 }
  0x1b   :  { %v1538_v14 = vsel %vm172_vm1, %v205_v0, %v206_v1  ;;  %v193_v15 = vrot.slane %v1526_v3, 1  ;;  %v194_v16 = vrot.slane %v133_v6, 1  ;;  %v1542_v17 = vsel %vm110_vm0, 0.0, %v80_v60 }
  0x1c   :  { %v1552_v22 = vpack.i.bf16 %v1538_v14, %v1530_v5  ;;  %v1555_v27 = vsel %vm172_vm1, %v190_v7, %v191_v8  ;;  %v129_v28 = vsel %vm110_vm0, %v80_v60, 0.0  ;;  %v181_v29 = vrot.slane %v1542_v17, 1 }
  0x1d   :  { %v1560_v30 = vsel %vm172_vm1, %v193_v15, %v194_v16  ;;  %v182_v36 = vrot.slane %v129_v28, 1  ;;  %v92_v37 = vrot.slane %v60_v9, 7  ;;  %v220_v38 = vrot.slane %v1457_v34, 2 }
  0x1e   :  { %1025 = vrot.lane.b32.xlu2 %v1552_v22, %s1351_s9  ;;  %v1567_v39 = vpack.i.bf16 %v1560_v30, %v1555_v27  ;;  %v1570_v42 = vrot.slane %v2251_v31, 2  ;;  %v90_v43 = vrot.slane %v58_v20, 7  ;;  %v91_v44 = vrot.slane %v59_v21, 7 }
  0x1f   :  { %v1573_v46 = vsel %vm172_vm1, %v181_v29, %v182_v36  ;;  %v1576_v47 = vsel %vm110_vm0, 0.0, %v92_v37  ;;  %v1579_v48 = vsel %vm110_vm0, %v92_v37, 0.0  ;;  %v1582_v50 = vsel %vm217_vm2, %v220_v38, %v221_v54 }
  0x20   :  { %1015 = vrot.lane.b32.xlu1 %v1567_v39, %s1351_s9  ;;  %v1588_v51 = vpack.i.bf16 %v1573_v46, %v1500_v53  ;;  %v214_v52 = vrot.slane %v1576_v47, 1  ;;  %v215_v55 = vrot.slane %v1579_v48, 1  ;;  %v1593_v56 = vsel %vm110_vm0, 0.0, %v90_v43 }
  0x21   :  { %v1596_v60 = vsel %vm110_vm0, 0.0, %v91_v44  ;;  %v139_v54 = vsel %vm110_vm0, %v90_v43, 0.0  ;;  %v140_v62 = vsel %vm110_vm0, %v91_v44, 0.0  ;;  %v1034_v63 = vpack.i.bf16 %v1582_v50, %v1570_v42 }
  0x22   :  { %1005 = vrot.lane.b32.xlu0 %v1588_v51, %s1351_s9  ;;  %v208_v0 = vrot.slane %v1593_v56, 1  ;;  %v209_v1 = vrot.slane %v139_v54, 1  ;;  %v211_v7 = vrot.slane %v1596_v60, 1  ;;  %v230_v8 = vrot.slane %v1436_v24, 2 }
  0x23   :  { %v233_v9 = vrot.slane %v1439_v25, 2  ;;  %v212_v15 = vrot.slane %v140_v62, 1  ;;  %v235_v16 = vrot.slane %v1523_v2, 2  ;;  %v236_v21 = vrot.slane %v132_v4, 2 }
  0x24   :  { %v1610_v20 = vsel %vm172_vm1, %v208_v0, %v209_v1  ;;  %v238_v29 = vrot.slane %v1526_v3, 2  ;;  %v239_v36 = vrot.slane %v133_v6, 2  ;;  %v1614_v37 = vsel %vm172_vm1, %v214_v52, %v215_v55 }
  0x25   :  { %v1617_v38 = vsel %vm172_vm1, %v211_v7, %v212_v15  ;;  %v229_v24 = vrot.slane %v1426_v18, 2  ;;  %v232_v25 = vrot.slane %v1429_v19, 2  ;;  %v223_v4 = vrot.slane %v1460_v35, 2 }
  0x26   :  { %1035 = vrot.lane.b32.xlu2 %v1034_v63, %s1352_s25  ;;  %v1624_v43 = vpack.i.bf16 %v1617_v38, %v1610_v20  ;;  %v224_v6 = vrot.slane %v1478_v41, 2  ;;  %v1629_v44 = vsel %vm217_vm2, %v235_v16, %v236_v21  ;;  %v1632_v52 = vsel %vm217_vm2, %v238_v29, %v239_v36 }
  0x27   :  { %v226_v55 = vrot.slane %v1542_v17, 2  ;;  %v227_v0 = vrot.slane %v129_v28, 2  ;;  %v1638_v63 = vsel %vm217_vm2, %v229_v24, %v230_v8  ;;  %v1641_v1 = vsel %vm217_vm2, %v232_v25, %v233_v9 }
  0x28   :  { %306 = vrot.lane.b32.xlu1 %v1614_v37, %s1351_s9  ;;  %v1647_v41 = vpack.i.bf16 %v1632_v52, %v1629_v44  ;;  %v1650_v7 = vsel %vm217_vm2, %v223_v4, %v224_v6  ;;  %v253_v15 = vrot.slane %v1593_v56, 2  ;;  %v254_v8 = vrot.slane %v139_v54, 2 }
  0x29   :  { %v1653_v28 = vsel %vm217_vm2, %v226_v55, %v227_v0  ;;  %v256_v16 = vrot.slane %v1596_v60, 2  ;;  %v257_v9 = vrot.slane %v140_v62, 2  ;;  %v1659_v21 = vpack.i.bf16 %v1641_v1, %v1638_v63 }
  0x2a   :  { %1030 = vrot.lane.b32.xlu0 %v1624_v43, %s1351_s9  ;;  %v247_v29 = vrot.slane %v1506_v57, 2  ;;  %v248_v36 = vrot.slane %v1512_v59, 2  ;;  %v250_v24 = vrot.slane %v1509_v58, 2  ;;  %v251_v25 = vrot.slane %v1516_v61, 2 }
  0x2b   :  { %v242_v4 = vrot.slane %v1416_v12, 2  ;;  %v245_v6 = vrot.slane %v1419_v13, 2  ;;  %v1671_v54 = vpack.i.bf16 %v1653_v28, %v1650_v7  ;;  %v1674_v62 = vsel %vm217_vm2, %v253_v15, %v254_v8 }
  0x2c   :  { %v1677_v59 = vsel %vm217_vm2, %v256_v16, %v257_v9  ;;  %v241_v55 = vrot.slane %v1410_v10, 2  ;;  %v244_v61 = vrot.slane %v1413_v11, 2  ;;  %v1684_v12 = vsel %vm217_vm2, %v247_v29, %v248_v36  ;;  %v53_v36 = vld [vmem:[%s2246_s0 + $0x38] sm:$0xff] }
  0x2d   :  { %v1687_v13 = vsel %vm217_vm2, %v250_v24, %v251_v25  ;;  %v1064_v0 = vpack.i.bf16 %v1677_v59, %v1674_v62  ;;  %v1074_v29 = vpack.i.bf16 %v1426_v18, %v1542_v17  ;;  %v259_v24 = vrot.slane %v1576_v47, 2 }
  0x2e   :  { %1050 = vrot.lane.b32.xlu2 %v1647_v41, %s1352_s25  ;;  %v243_v15 = vsel %vm217_vm2, %v241_v55, %v242_v4  ;;  %v1695_v8 = vsel %vm217_vm2, %v244_v61, %v245_v6  ;;  %v1699_v16 = vpack.i.bf16 %v1687_v13, %v1684_v12  ;;  %v260_v25 = vrot.slane %v1579_v48, 2  ;;  %v61_v61 = vld [vmem:[%s2246_s0 + $0x78] sm:$0xff]  ;;  %s1354_s0 = smov 12  }
  0x2f   :  { %v1054_v9 = vpack.i.bf16 %v1695_v8, %v243_v15  ;;  %v1069_v4 = vpack.i.bf16 %v1460_v35, %v1457_v34  ;;  %v85_v6 = vrot.slane %v53_v36, 7  ;;  %v1089_v48 = vpack.i.bf16 %v1413_v11, %v1410_v10 }
  0x30   :  { %1045 = vrot.lane.b32.xlu1 %v1659_v21, %s1352_s25  ;;  %v1716_v55 = vsel %vm217_vm2, %v259_v24, %v260_v25  ;;  %v93_v36 = vrot.slane %v61_v61, 7  ;;  %v1079_v24 = vpack.i.bf16 %v1523_v2, %v1429_v19  ;;  %v1099_v31 = vpack.i.bf16 %v1596_v60, %v1593_v56 }
  0x31   :  { %v1722_v15 = vsel %vm110_vm0, 0.0, %v85_v6  ;;  %v1094_v61 = vpack.i.bf16 %v1509_v58, %v1506_v57  ;;  %v1114_v10 = vpack.i.bf16 %v1454_v33, %v1573_v46  ;;  %v1174_v46 = vpack.i.bf16 %v1716_v55, %v1677_v59 }
  0x32   :  { %1040 = vrot.lane.b32.xlu0 %v1671_v54, %s1352_s25  ;;  %v1733_v25 = vsel %vm110_vm0, 0.0, %v93_v36  ;;  %v142_v59 = vsel %vm110_vm0, %v93_v36, 0.0  ;;  %vm647_vm3 = vcmask 23552   ;;  %vm663_vm4 = vcmask 48128  }
  0x33   :  { %vm679_vm5 = vcmask 72704   ;;  %vm829_vm6 = vcmask 1044480   ;;  %vm696_vm7 = vcmask 97280   ;;  %vm713_vm8 = vcmask 121856  }
  0x34   :  { %vm730_vm9 = vcmask 146432   ;;  %vm747_vm10 = vcmask 171008   ;;  %vm764_vm11 = vcmask 195584   ;;  %vm804_vm12 = vcmask 220160  }
  0x35   :  { %vm940_vm13 = vcmask 261120  }
  0x36   :  { %1065 = vrot.lane.b32.xlu2 %v1064_v0, %s1352_s25 }
  0x38   :  { %1060 = vrot.lane.b32.xlu1 %v1699_v16, %s1352_s25 }
  0x3a   :  { %1055 = vrot.lane.b32.xlu0 %v1054_v9, %s1352_s25 }
  0x3e   :  { %1075 = vrot.lane.b32.xlu2 %v1074_v29, %s1353_s3  ;;  %v1084_v29 = vpack.i.bf16 %v1722_v15, %v1526_v3 }
  0x40   :  { %1070 = vrot.lane.b32.xlu1 %v1069_v4, %s1353_s3  ;;  %v1104_v4 = vpack.i.bf16 %v1733_v25, %v1576_v47 }
  0x42   :  { %351 = vrot.lane.b32.xlu0 %v1716_v55, %s1352_s25 }
  0x46   :  { %1090 = vrot.lane.b32.xlu2 %v1089_v48, %s1353_s3  ;;  %v1119_v48 = vpack.i.bf16 %v1555_v27, %v1475_v40  ;;  %v1179_v40 = vpack.i.bf16 %v1650_v7, %v1582_v50  ;;  %v1159_v27 = vpack.i.bf16 %v1530_v5, %v1433_v23  ;;  %v1169_v23 = vpack.i.bf16 %v1684_v12, %v1695_v8 }
  0x47   :  { %v1194_v50 = vpack.i.bf16 %v1526_v3, %v1523_v2  ;;  %v269_v12 = vrot.slane %v1733_v25, 1 }
  0x48   :  { %1085 = vrot.lane.b32.xlu1 %v1084_v29, %s1353_s3  ;;  %v1746_v29 = vsel %vm110_vm0, %v85_v6, 0.0 }
  0x4a   :  { %1080 = vrot.lane.b32.xlu0 %v1079_v24, %s1353_s3  ;;  %v1109_v24 = vpack.i.bf16 %v1500_v53, %v1495_v49  ;;  %v1164_v53 = vpack.i.bf16 %v1614_v37, %v1617_v38  ;;  %v1189_v38 = vpack.i.bf16 %v1542_v17, %v1460_v35 }
  0x4e   :  { %1105 = vrot.lane.b32.xlu2 %v1104_v4, %s1353_s3  ;;  %v266_v4 = vrot.slane %v1722_v15, 1 }
  0x50   :  { %1100 = vrot.lane.b32.xlu1 %v1099_v31, %s1353_s3  ;;  %v267_v31 = vrot.slane %v1746_v29, 1 }
  0x52   :  { %1095 = vrot.lane.b32.xlu0 %v1094_v61, %s1353_s3  ;;  %v1758_v33 = vsel %vm172_vm1, %v266_v4, %v267_v31  ;;  %v275_v4 = vrot.slane %v1733_v25, 2  ;;  %v276_v31 = vrot.slane %v142_v59, 2 }
  0x53   :  { %v1124_v49 = vpack.i.bf16 %v1758_v33, %v1560_v30 }
  0x56   :  { %1120 = vrot.lane.b32.xlu2 %v1119_v48, %s1354_s0 }
  0x58   :  { %1115 = vrot.lane.b32.xlu1 %v1114_v10, %s1354_s0  ;;  %v1149_v10 = vpack.i.bf16 %v1506_v57, %v1413_v11 }
  0x5a   :  { %1110 = vrot.lane.b32.xlu0 %v1109_v24, %s1354_s0 }
  0x5e   :  { %1135 = vrot.lane.b32.xlu2 %v1624_v43, %s1354_s0  ;;  %v1184_v43 = vpack.i.bf16 %v1629_v44, %v1641_v1 }
  0x60   :  { %1130 = vrot.lane.b32.xlu1 %v1442_v26, %s1354_s0  ;;  %v1154_v26 = vpack.i.bf16 %v1576_v47, %v1596_v60 }
  0x62   :  { %1125 = vrot.lane.b32.xlu0 %v1124_v49, %s1354_s0 }
  0x66   :  { %1150 = vrot.lane.b32.xlu2 %v1149_v10, %s1355_s30 }
  0x68   :  { %1145 = vrot.lane.b32.xlu1 %v1064_v0, %s1356_s5  ;;  %v270_v0 = vrot.slane %v142_v59, 1 }
  0x6a   :  { %1140 = vrot.lane.b32.xlu0 %v1054_v9, %s1356_s5  ;;  %v271_v8 = vsel %vm172_vm1, %v269_v12, %v270_v0 }
  0x6b   :  { %v1224_v61 = vpack.i.bf16 %v271_v8, %v1614_v37 }
  0x6d   :  { %v1779_v30 = vpop.permute.xlu2 %1020 }
  0x6e   :  { %1165 = vrot.lane.b32.xlu2 %v1164_v53, %s1357_s6 }
  0x70   :  { %1160 = vrot.lane.b32.xlu1 %v1159_v27, %s1357_s6  ;;  %v2254_v27 = vmov 0.0  }
  0x72   :  { %1155 = vrot.lane.b32.xlu0 %v1154_v26, %s1355_s30  ;;  %v1239_v26 = vpack.i.bf16 %v1509_v58, %v2254_v27  ;;  %v272_v27 = vrot.slane %v1722_v15, 2 }
  0x76   :  { %1180 = vrot.lane.b32.xlu2 %v1179_v40, %s1356_s5 }
  0x78   :  { %1175 = vrot.lane.b32.xlu1 %v1174_v46, %s1358_s7  ;;  %v1789_v5 = vpop.permute.xlu2 %1025 }
  0x7a   :  { %1170 = vrot.lane.b32.xlu0 %v1169_v23, %s1358_s7 }
  0x7e   :  { %1195 = vrot.lane.b32.xlu2 %v1194_v50, %s1355_s30 }
  0x80   :  { %1190 = vrot.lane.b32.xlu1 %v1189_v38, %s1355_s30  ;;  %v1036_v7 = vpop.permute.xlu2 %1035 }
  0x81   :  { %v1038_v1 = vunpack.i.h.bf16 %v1036_v7  ;;  %v1037_v6 = vunpack.i.l.bf16 %v1036_v7 }
  0x82   :  { %1185 = vrot.lane.b32.xlu0 %v1184_v43, %s1356_s5 }
  0x86   :  { %1210 = vrot.lane.b32.xlu2 %v1671_v54, %s1358_s7 }
  0x88   :  { %1205 = vrot.lane.b32.xlu1 %v1567_v39, %s1357_s6  ;;  %v1808_v9 = vpop.permute.xlu1 %1010  ;;  %v1051_v44 = vpop.permute.xlu2 %1050 }
  0x89   :  { %v1053_v49 = vunpack.i.h.bf16 %v1051_v44  ;;  %v1052_v10 = vunpack.i.l.bf16 %v1051_v44  ;;  %v1254_v44 = vpack.i.bf16 %v271_v8, %v1610_v20  ;;  %v1012_v20 = vunpack.i.l.bf16 %v1808_v9 }
  0x8a   :  { %1200 = vrot.lane.b32.xlu0 %v1588_v51, %s1357_s6  ;;  %v1001_v36 = vpop.permute.xlu0 %1000 }
  0x8b   :  { %v1003_v48 = vunpack.i.h.bf16 %v1001_v36  ;;  %v1002_v54 = vunpack.i.l.bf16 %v1001_v36 }
  0x8d   :  { %v649_v24 = vsel %vm647_vm3, %v1457_v34, %v1003_v48  ;;  %v648_v39 = vsel %vm647_vm3, 0.0, %v1002_v54  ;;  %v277_v34 = vsel %vm217_vm2, %v275_v4, %v276_v31  ;;  %v1269_v48 = vpack.i.bf16 %v1638_v63, %v1653_v28 }
  0x8e   :  { %v1818_v40 = vsel %vm663_vm4, %v648_v39, %v1037_v6  ;;  %1225 = vrot.lane.b32.xlu2 %v1224_v61, %s1354_s0  ;;  %v1822_v51 = vsel %vm663_vm4, %v649_v24, %v1038_v1  ;;  %v1234_v38 = vpack.i.bf16 %v277_v34, %v1716_v55  ;;  %v1013_v61 = vunpack.i.h.bf16 %v1808_v9 }
  0x8f   :  { %v652_v24 = vsel %vm647_vm3, %v1426_v18, %v1012_v20  ;;  %v1259_v28 = vpack.i.bf16 %v1687_v13, %v1570_v42  ;;  %v1023_v13 = vunpack.i.h.bf16 %v1779_v30 }
  0x90   :  { %1220 = vrot.lane.b32.xlu1 %v1552_v22, %s1354_s0  ;;  %v1826_v37 = vpop.permute.xlu2 %1065  ;;  %v653_v9 = vsel %vm647_vm3, %v1429_v19, %v1013_v61 }
  0x91   :  { %v1068_v1 = vunpack.i.h.bf16 %v1826_v37 }
  0x92   :  { %1215 = vrot.lane.b32.xlu0 %v1647_v41, %s1358_s7  ;;  %v1016_v53 = vpop.permute.xlu1 %1015 }
  0x93   :  { %v1018_v46 = vunpack.i.h.bf16 %v1016_v53  ;;  %v1017_v23 = vunpack.i.l.bf16 %v1016_v53 }
  0x94   :  { %v1006_v50 = vpop.permute.xlu0 %1005 }
  0x95   :  { %v655_v22 = vsel %vm647_vm3, %v1526_v3, %v1018_v46  ;;  %v654_v43 = vsel %vm647_vm3, %v1523_v2, %v1017_v23  ;;  %v1008_v7 = vunpack.i.h.bf16 %v1006_v50  ;;  %v1007_v59 = vunpack.i.l.bf16 %v1006_v50 }
  0x96   :  { %1240 = vrot.lane.b32.xlu2 %v1239_v26, %s1355_s30  ;;  %v1840_v41 = vsel %vm663_vm4, %v654_v43, %v1052_v10  ;;  %v1843_v12 = vsel %vm663_vm4, %v655_v22, %v1053_v49  ;;  %v273_v26 = vrot.slane %v1746_v29, 2  ;;  %v1027_v46 = vunpack.i.l.bf16 %v1789_v5 }
  0x97   :  { %v651_v0 = vsel %vm647_vm3, %v1542_v17, %v1008_v7  ;;  %v650_v55 = vsel %vm647_vm3, %v1460_v35, %v1007_v59  ;;  %v1249_v17 = vpack.i.bf16 %v1538_v14, %v1449_v32  ;;  %v1244_v35 = vpack.i.bf16 %v1733_v25, %v1593_v56 }
  0x98   :  { %1235 = vrot.lane.b32.xlu1 %v1234_v38, %s1356_s5  ;;  %v1076_v3 = vpop.permute.xlu2 %1075  ;;  %v274_v7 = vsel %vm217_vm2, %v272_v27, %v273_v26  ;;  %v658_v59 = vsel %vm647_vm3, %v1506_v57, %v1027_v46 }
  0x99   :  { %v1078_v39 = vunpack.i.h.bf16 %v1076_v3  ;;  %v1077_v4 = vunpack.i.l.bf16 %v1076_v3 }
  0x9a   :  { %1230 = vrot.lane.b32.xlu0 %v1699_v16, %s1356_s5  ;;  %v1852_v2 = vpop.permute.xlu1 %306 }
  0x9c   :  { %v1856_v6 = vpop.permute.xlu0 %1030 }
  0x9d   :  { %v1033_v36 = vunpack.i.h.bf16 %v1856_v6 }
  0x9e   :  { %1255 = vrot.lane.b32.xlu2 %v1254_v44, %s1357_s6 }
  0x9f   :  { %v661_v16 = vsel %vm647_vm3, %v1596_v60, %v1033_v36  ;;  %v1264_v60 = vpack.i.bf16 %v277_v34, %v1674_v62 }
  0xa0   :  { %1250 = vrot.lane.b32.xlu1 %v1249_v17, %s1357_s6  ;;  %v1869_v8 = vpop.permute.xlu2 %1090  ;;  %v677_v32 = vsel %vm663_vm4, %v661_v16, %v1068_v1  ;;  %v657_v1 = vsel %vm647_vm3, %v1413_v11, %v1023_v13  ;;  %v1274_v17 = vpack.i.bf16 %v274_v7, %v1632_v52  ;;  %v662_v11 = vsel %vm647_vm3, %v1576_v47, %v1852_v2 }
  0xa2   :  { %1245 = vrot.lane.b32.xlu0 %v1244_v35, %s1355_s30  ;;  %v1046_v14 = vpop.permute.xlu1 %1045 }
  0xa3   :  { %v1048_v25 = vunpack.i.h.bf16 %v1046_v14  ;;  %v1047_v54 = vunpack.i.l.bf16 %v1046_v14 }
  0xa4   :  { %v1041_v31 = vpop.permute.xlu0 %1040 }
  0xa5   :  { %v668_v49 = vsel %vm663_vm4, %v652_v24, %v1047_v54  ;;  %v669_v10 = vsel %vm663_vm4, %v653_v9, %v1048_v25  ;;  %v1043_v53 = vunpack.i.h.bf16 %v1041_v31  ;;  %v1042_v63 = vunpack.i.l.bf16 %v1041_v31 }
  0xa6   :  { %1270 = vrot.lane.b32.xlu2 %v1269_v48, %s1356_s5 }
  0xa7   :  { %v666_v62 = vsel %vm663_vm4, %v650_v55, %v1042_v63  ;;  %v667_v34 = vsel %vm663_vm4, %v651_v0, %v1043_v53  ;;  %v1279_v55 = vpack.i.bf16 %v1429_v19, %v1426_v18  ;;  %v1359_v63 = vmov 65535  }
  0xa8   :  { %1265 = vrot.lane.b32.xlu1 %v1264_v60, %s1358_s7  ;;  %v1106_v23 = vpop.permute.xlu2 %1105  ;;  %v1892_v50 = vsel %vm679_vm5, %v666_v62, %v1077_v4  ;;  %v1895_v38 = vsel %vm679_vm5, %v667_v34, %v1078_v39  ;;  %v980_v4 = vld [vmem:[%s2247_s1 + $0x8] sm:$0x30] }
  0xa9   :  { %v1107_v42 = vunpack.i.l.bf16 %v1106_v23  ;;  %v1108_v57 = vunpack.i.h.bf16 %v1106_v23 }
  0xaa   :  { %1260 = vrot.lane.b32.xlu0 %v1259_v28, %s1358_s7  ;;  %v1899_v22 = vpop.permute.xlu1 %1060  ;;  %v830_v28 = vsel %vm829_vm6, 4294967295, %v1359_v63 }
  0xab   :  { %v1062_v29 = vunpack.i.l.bf16 %v1899_v22  ;;  %v1903_v43 = vsel %vm679_vm5, %v677_v32, %v1107_v42  ;;  %v831_v62 = vsel %vm217_vm2, %v830_v28, 0 }
  0xac   :  { %v1908_v0 = vpop.permute.xlu0 %1055 }
  0xad   :  { %v674_v3 = vsel %vm663_vm4, %v658_v59, %v1062_v29  ;;  %v1058_v44 = vunpack.i.h.bf16 %v1908_v0  ;;  %v979_v29 = vld [vmem:[%s2247_s1] sm:$0xff] }
  0xae   :  { %524 = vrot.lane.b32.xlu2 %v1722_v15, %s1355_s30 }
  0xaf   :  { %v673_v36 = vsel %vm663_vm4, %v657_v1, %v1058_v44  ;;  %v1022_v1 = vunpack.i.l.bf16 %v1779_v30  ;;  %v1093_v30 = vunpack.i.h.bf16 %v1869_v8 }
  0xb0   :  { %1280 = vrot.lane.b32.xlu1 %v1279_v55, %s1355_s30  ;;  %v1922_v16 = vpop.permute.xlu2 %1120 }
  0xb2   :  { %1275 = vrot.lane.b32.xlu0 %v1274_v17, %s1356_s5  ;;  %v1071_v18 = vpop.permute.xlu1 %1070  ;;  %v1032_v17 = vunpack.i.l.bf16 %v1856_v6  ;;  %v1092_v6 = vunpack.i.l.bf16 %v1869_v8 }
  0xb3   :  { %v1073_v19 = vunpack.i.h.bf16 %v1071_v18  ;;  %v1072_v35 = vunpack.i.l.bf16 %v1071_v18 }
  0xb4   :  { %v352_v52 = vpop.permute.xlu0 %351 }
  0xb5   :  { %v1929_v15 = vsel %vm679_vm5, %v1818_v40, %v1072_v35  ;;  %v1933_v61 = vsel %vm679_vm5, %v1822_v51, %v1073_v19  ;;  %v678_v20 = vsel %vm663_vm4, %v662_v11, %v352_v52  ;;  %v2255_v35 = vld [vmem:[#allocation8_spill] sm:$0xff]  ;;  %v1028_v52 = vunpack.i.h.bf16 %v1789_v5 }
  0xb6   :  { %v1937_v32 = vsel %vm679_vm5, %v678_v20, %v1108_v57  ;;  %1290 = vrot.lane.b32.xlu2 %v1659_v21, %s1358_s7  ;;  %v1057_v57 = vunpack.i.l.bf16 %v1908_v0  ;;  %v656_v11 = vsel %vm647_vm3, %v2255_v35, %v1022_v1  ;;  %v1067_v20 = vunpack.i.l.bf16 %v1826_v37 }
  0xb7   :  { %v659_v5 = vsel %vm647_vm3, %v1509_v58, %v1028_v52 }
  0xb8   :  { %569 = vrot.lane.b32.xlu1 %v1758_v33, %s1357_s6  ;;  %v1949_v54 = vpop.permute.xlu2 %1135  ;;  %v672_v0 = vsel %vm663_vm4, %v656_v11, %v1057_v57 }
  0xb9   :  { %v689_v8 = vsel %vm679_vm5, %v672_v0, %v1093_v30 }
  0xba   :  { %1285 = vrot.lane.b32.xlu0 %v1487_v45, %s1357_s6  ;;  %v1086_v47 = vpop.permute.xlu1 %1085 }
  0xbb   :  { %v1088_v2 = vunpack.i.h.bf16 %v1086_v47  ;;  %v1087_v14 = vunpack.i.l.bf16 %v1086_v47  ;;  %v660_v47 = vsel %vm647_vm3, %v1593_v56, %v1032_v17  ;;  %v688_v56 = vsel %vm679_vm5, %v1818_v40, %v1092_v6 }
  0xbc   :  { %v1081_v48 = vpop.permute.xlu0 %1080  ;;  %v676_v37 = vsel %vm663_vm4, %v660_v47, %v1067_v20 }
  0xbd   :  { %v686_v51 = vsel %vm679_vm5, %v1840_v41, %v1087_v14  ;;  %v687_v25 = vsel %vm679_vm5, %v1843_v12, %v1088_v2  ;;  %v1083_v60 = vunpack.i.h.bf16 %v1081_v48  ;;  %v1082_v21 = vunpack.i.l.bf16 %v1081_v48  ;;  %v969_v12 = vld [vmem:[%s2247_s1 + $0x8] sm:$0xf] }
  0xbe   :  { %v970_v53 = vor.u32 %v980_v4, %v969_v12  ;;  %v1063_v2 = vunpack.i.h.bf16 %v1899_v22 }
  0xbf   :  { %v1952_v9 = vsel %vm679_vm5, %v669_v10, %v1083_v60  ;;  %v1955_v33 = vsel %vm679_vm5, %v668_v49, %v1082_v21  ;;  %v1137_v60 = vunpack.i.l.bf16 %v1949_v54 }
  0xc0   :  { %v1966_v31 = vpop.permute.xlu2 %1150  ;;  %v833_v34 = vand.u32 %v970_v53, %v831_v62 }
  0xc1   :  { %v1153_v62 = vunpack.i.h.bf16 %v1966_v31 }
  0xc2   :  { %614 = vrot.lane.b32.xlu0 %v274_v7, %s1358_s7  ;;  %v1958_v45 = vpop.permute.xlu1 %1100  ;;  %982 = vmatpush.bf16.msra.mxu2 %v833_v34 }
  0xc3   :  { %983 = vmatpush.bf16.msra.mxu3 %v833_v34  ;;  %841 = vmatpush.bf16.msra.mxu0 %v833_v34  ;;  %v1103_v14 = vunpack.i.h.bf16 %v1958_v45  ;;  %v1102_v48 = vunpack.i.l.bf16 %v1958_v45 }
  0xc4   :  { %v1096_v24 = vpop.permute.xlu0 %1095  ;;  %981 = vmatpush.bf16.msra.mxu1 %v833_v34  ;;  %v1152_v34 = vunpack.i.l.bf16 %v1966_v31 }
  0xc5   :  { %v1098_v39 = vunpack.i.h.bf16 %v1096_v24  ;;  %v1097_v41 = vunpack.i.l.bf16 %v1096_v24  ;;  %v693_v45 = vsel %vm679_vm5, %v676_v37, %v1103_v14 }
  0xc6   :  { %985 = vmatpush.bf16.msra.mxu2 %v979_v29 }
  0xc7   :  { %v1969_v49 = vsel %vm679_vm5, %v674_v3, %v1098_v39  ;;  %v1972_v10 = vsel %vm679_vm5, %v673_v36, %v1097_v41  ;;  %986 = vmatpush.bf16.msra.mxu3 %v979_v29  ;;  %842 = vmatpush.bf16.msra.mxu0 %v979_v29 }
  0xc8   :  { %984 = vmatpush.bf16.msra.mxu1 %v979_v29  ;;  %v1988_v7 = vpop.permute.xlu2 %1165 }
  0xca   :  { %v1116_v27 = vpop.permute.xlu1 %1115 }
  0xcb   :  { %v1118_v26 = vunpack.i.h.bf16 %v1116_v27  ;;  %v1117_v46 = vunpack.i.l.bf16 %v1116_v27  ;;  %v1167_v27 = vunpack.i.l.bf16 %v1988_v7 }
  0xcc   :  { %v1975_v23 = vpop.permute.xlu0 %1110 }
  0xcd   :  { %v1979_v42 = vsel %vm696_vm7, %v1892_v50, %v1117_v46  ;;  %v1983_v13 = vsel %vm696_vm7, %v1895_v38, %v1118_v26 }
  0xd0   :  { %v1999_v18 = vpop.permute.xlu2 %1180 }
  0xd2   :  { %v1131_v59 = vpop.permute.xlu1 %1130 }
  0xd3   :  { %v1133_v58 = vunpack.i.h.bf16 %v1131_v59  ;;  %v1132_v24 = vunpack.i.l.bf16 %v1131_v59 }
  0xd4   :  { %v1126_v55 = vpop.permute.xlu0 %1125 }
  0xd5   :  { %v1128_v3 = vunpack.i.h.bf16 %v1126_v55  ;;  %v1127_v44 = vunpack.i.l.bf16 %v1126_v55  ;;  %v705_v29 = vsel %vm696_vm7, %v688_v56, %v1132_v24  ;;  %v706_v59 = vsel %vm696_vm7, %v689_v8, %v1133_v58 }
  0xd6   :  { %v1183_v58 = vunpack.i.h.bf16 %v1999_v18  ;;  %v1182_v24 = vunpack.i.l.bf16 %v1999_v18 }
  0xd7   :  { %v1991_v50 = vsel %vm696_vm7, %v687_v25, %v1128_v3  ;;  %v1994_v38 = vsel %vm696_vm7, %v686_v51, %v1127_v44  ;;  %v675_v51 = vsel %vm663_vm4, %v659_v5, %v1063_v2  ;;  %v1138_v25 = vunpack.i.h.bf16 %v1949_v54 }
  0xd8   :  { %v692_v21 = vsel %vm679_vm5, %v675_v51, %v1102_v48  ;;  %v2024_v40 = vpop.permute.xlu2 %1195  ;;  %v1168_v54 = vunpack.i.h.bf16 %v1988_v7 }
  0xd9   :  { %v709_v26 = vsel %vm696_vm7, %v692_v21, %v1137_v60  ;;  %v710_v46 = vsel %vm696_vm7, %v693_v45, %v1138_v25  ;;  %v1113_v21 = vunpack.i.h.bf16 %v1975_v23  ;;  %v1112_v45 = vunpack.i.l.bf16 %v1975_v23 }
  0xda   :  { %v1146_v36 = vpop.permute.xlu1 %1145 }
  0xdb   :  { %v1148_v39 = vunpack.i.h.bf16 %v1146_v36  ;;  %v1147_v41 = vunpack.i.l.bf16 %v1146_v36 }
  0xdc   :  { %v1141_v19 = vpop.permute.xlu0 %1140 }
  0xdd   :  { %v1143_v4 = vunpack.i.h.bf16 %v1141_v19  ;;  %v1142_v53 = vunpack.i.l.bf16 %v1141_v19  ;;  %v726_v55 = vsel %vm713_vm8, %v709_v26, %v1147_v41  ;;  %v727_v3 = vsel %vm713_vm8, %v710_v46, %v1148_v39 }
  0xdf   :  { %v722_v31 = vsel %vm713_vm8, %v705_v29, %v1142_v53  ;;  %v723_v44 = vsel %vm713_vm8, %v706_v59, %v1143_v4  ;;  %v1123_v53 = vunpack.i.h.bf16 %v1922_v16 }
  0xe0   :  { %v739_v11 = vsel %vm730_vm9, %v722_v31, %v1152_v34  ;;  %v740_v52 = vsel %vm730_vm9, %v723_v44, %v1153_v62  ;;  %v1211_v56 = vpop.permute.xlu2 %1210  ;;  %v698_v62 = vsel %vm696_vm7, %v1933_v61, %v1113_v21 }
  0xe1   :  { %v1213_v23 = vunpack.i.h.bf16 %v1211_v56  ;;  %v1212_v34 = vunpack.i.l.bf16 %v1211_v56 }
  0xe2   :  { %v1161_v22 = vpop.permute.xlu1 %1160 }
  0xe3   :  { %v1163_v17 = vunpack.i.h.bf16 %v1161_v22  ;;  %v1162_v36 = vunpack.i.l.bf16 %v1161_v22 }
  0xe4   :  { %v1156_v12 = vpop.permute.xlu0 %1155 }
  0xe5   :  { %v1158_v63 = vunpack.i.h.bf16 %v1156_v12  ;;  %v1157_v28 = vunpack.i.l.bf16 %v1156_v12  ;;  %v756_v48 = vsel %vm747_vm10, %v739_v11, %v1162_v36  ;;  %v757_v5 = vsel %vm747_vm10, %v740_v52, %v1163_v17 }
  0xe6   :  { %v702_v17 = vsel %vm696_vm7, %v1952_v9, %v1123_v53 }
  0xe7   :  { %v743_v1 = vsel %vm730_vm9, %v726_v55, %v1157_v28  ;;  %v744_v7 = vsel %vm730_vm9, %v727_v3, %v1158_v63  ;;  %v1122_v63 = vunpack.i.l.bf16 %v1922_v16  ;;  %v697_v28 = vsel %vm696_vm7, %v1929_v15, %v1112_v45 }
  0xe8   :  { %v760_v47 = vsel %vm747_vm10, %v743_v1, %v1167_v27  ;;  %v761_v30 = vsel %vm747_vm10, %v744_v7, %v1168_v54  ;;  %v2056_v39 = vpop.permute.xlu2 %1225  ;;  %v714_v18 = vsel %vm713_vm8, %v697_v28, %v1182_v24  ;;  %v715_v27 = vsel %vm713_vm8, %v698_v62, %v1183_v58 }
  0xe9   :  { %v701_v61 = vsel %vm696_vm7, %v1955_v33, %v1122_v63  ;;  %v1198_v1 = vunpack.i.h.bf16 %v2024_v40  ;;  %v1197_v7 = vunpack.i.l.bf16 %v2024_v40 }
  0xea   :  { %v1176_v57 = vpop.permute.xlu1 %1175 }
  0xeb   :  { %v1178_v19 = vunpack.i.h.bf16 %v1176_v57  ;;  %v1177_v35 = vunpack.i.l.bf16 %v1176_v57 }
  0xec   :  { %v1171_v20 = vpop.permute.xlu0 %1170 }
  0xed   :  { %v1173_v6 = vunpack.i.h.bf16 %v1171_v20  ;;  %v1172_v2 = vunpack.i.l.bf16 %v1171_v20  ;;  %v777_v0 = vsel %vm764_vm11, %v760_v47, %v1177_v35  ;;  %v778_v14 = vsel %vm764_vm11, %v761_v30, %v1178_v19 }
  0xee   :  { %v787_v37 = vpack.c.bf16 %v778_v14, %v777_v0 }
  0xef   :  { %v773_v51 = vsel %vm764_vm11, %v756_v48, %v1172_v2  ;;  %v774_v8 = vsel %vm764_vm11, %v757_v5, %v1173_v6 }
  0xf0   :  { %v785_v22 = vpack.c.bf16 %v774_v8, %v773_v51  ;;  %977 = vmatmul.msk.bf16.vlgmr.msra.gmra.mxu3 %vm804_vm12, %v787_v37  ;;  %v2080_v33 = vpop.permute.xlu2 %1240  ;;  %v1228_v51 = vunpack.i.h.bf16 %v2056_v39  ;;  %v1227_v8 = vunpack.i.l.bf16 %v2056_v39 }
  0xf1   :  { %v1243_v28 = vunpack.i.h.bf16 %v2080_v33  ;;  %v1242_v39 = vunpack.i.l.bf16 %v2080_v33 }
  0xf2   :  { %975 = vmatmul.msk.bf16.vlgmr.msra.gmra.mxu2 %vm804_vm12, %v785_v22  ;;  %v1191_v25 = vpop.permute.xlu1 %1190  ;;  %v711_v53 = vsel %vm696_vm7, %v1903_v43, %v1227_v8  ;;  %v712_v63 = vsel %vm696_vm7, %v1937_v32, %v1228_v51 }
  0xf3   :  { %v1193_v41 = vunpack.i.h.bf16 %v1191_v25  ;;  %v1192_v12 = vunpack.i.l.bf16 %v1191_v25 }
  0xf4   :  { %v1186_v60 = vpop.permute.xlu0 %1185 }
  0xf5   :  { %v731_v29 = vsel %vm730_vm9, %v714_v18, %v1192_v12  ;;  %v732_v59 = vsel %vm730_vm9, %v715_v27, %v1193_v41  ;;  %v1188_v16 = vunpack.i.h.bf16 %v1186_v60  ;;  %v1187_v55 = vunpack.i.l.bf16 %v1186_v60 }
  0xf7   :  { %v718_v57 = vsel %vm713_vm8, %v701_v61, %v1187_v55  ;;  %v719_v19 = vsel %vm713_vm8, %v702_v17, %v1188_v16 }
  0xf8   :  { %v735_v47 = vsel %vm730_vm9, %v718_v57, %v1197_v7  ;;  %v736_v40 = vsel %vm730_vm9, %v719_v19, %v1198_v1  ;;  %v1256_v56 = vpop.permute.xlu2 %1255 }
  0xf9   :  { %v1258_v62 = vunpack.i.h.bf16 %v1256_v56 }
  0xfa   :  { %v1206_v4 = vpop.permute.xlu1 %1205 }
  0xfb   :  { %v1208_v35 = vunpack.i.h.bf16 %v1206_v4  ;;  %v1207_v11 = vunpack.i.l.bf16 %v1206_v4 }
  0xfc   :  { %v1201_v54 = vpop.permute.xlu0 %1200 }
  0xfd   :  { %v1203_v26 = vunpack.i.h.bf16 %v1201_v54  ;;  %v1202_v46 = vunpack.i.l.bf16 %v1201_v54  ;;  %v752_v9 = vsel %vm747_vm10, %v735_v47, %v1207_v11  ;;  %v753_v2 = vsel %vm747_vm10, %v736_v40, %v1208_v35 }
  0xfe   :  { %v1257_v54 = vunpack.i.l.bf16 %v1256_v56 }
  0xff   :  { %v748_v15 = vsel %vm747_vm10, %v731_v29, %v1202_v46  ;;  %v749_v3 = vsel %vm747_vm10, %v732_v59, %v1203_v26 }
 0x100   :  { %v765_v31 = vsel %vm764_vm11, %v748_v15, %v1212_v34  ;;  %v766_v44 = vsel %vm764_vm11, %v749_v3, %v1213_v23  ;;  %v1271_v34 = vpop.permute.xlu2 %1270 }
 0x101   :  { %v781_v36 = vpack.c.bf16 %v766_v44, %v765_v31 }
 0x102   :  { %v1221_v52 = vpop.permute.xlu1 %1220 }
 0x103   :  { %971 = vmatmul.msk.bf16.vlgmr.msra.gmra.mxu0 %vm804_vm12, %v781_v36  ;;  %v1223_v25 = vunpack.i.h.bf16 %v1221_v52  ;;  %v1222_v60 = vunpack.i.l.bf16 %v1221_v52 }
 0x104   :  { %v1216_v20 = vpop.permute.xlu0 %1215 }
 0x105   :  { %v1218_v30 = vunpack.i.h.bf16 %v1216_v20  ;;  %v1217_v6 = vunpack.i.l.bf16 %v1216_v20  ;;  %v708_v23 = vsel %vm696_vm7, %v1969_v49, %v1223_v25  ;;  %v707_v18 = vsel %vm696_vm7, %v1972_v10, %v1222_v60 }
 0x107   :  { %v769_v0 = vsel %vm764_vm11, %v752_v9, %v1217_v6  ;;  %v770_v14 = vsel %vm764_vm11, %v753_v2, %v1218_v30  ;;  %v1273_v6 = vunpack.i.h.bf16 %v1271_v34  ;;  %v1272_v9 = vunpack.i.l.bf16 %v1271_v34  ;;  %v2146_v34 = vld [vmem:[#allocation2] ss:$0 sm:$0xff] }
 0x108   :  { %v783_v48 = vpack.c.bf16 %v770_v14, %v769_v0  ;;  %v525_v52 = vpop.permute.xlu2 %524 }
 0x109   :  { %v716_v8 = vsel %vm713_vm8, %v1979_v42, %v1272_v9 }
 0x10a   :  { %973 = vmatmul.msk.bf16.vlgmr.msra.gmra.mxu1 %vm804_vm12, %v783_v48  ;;  %v1236_v5 = vpop.permute.xlu1 %1235 }
 0x10b   :  { %v1237_v21 = vunpack.i.l.bf16 %v1236_v5  ;;  %v1238_v24 = vunpack.i.h.bf16 %v1236_v5 }
 0x10c   :  { %v1231_v37 = vpop.permute.xlu0 %1230 }
 0x10d   :  { %v1233_v45 = vunpack.i.h.bf16 %v1231_v37  ;;  %v1232_v41 = vunpack.i.l.bf16 %v1231_v37  ;;  %v728_v27 = vsel %vm713_vm8, %v711_v53, %v1237_v21  ;;  %v729_v26 = vsel %vm713_vm8, %v712_v63, %v1238_v24 }
 0x10e   :  { %v746_v3 = vsel %vm730_vm9, %v729_v26, %v1242_v39 }
 0x10f   :  { %v725_v43 = vsel %vm713_vm8, %v708_v23, %v1233_v45  ;;  %v724_v32 = vsel %vm713_vm8, %v707_v18, %v1232_v41 }
 0x110   :  { %v741_v10 = vsel %vm730_vm9, %v724_v32, %v1243_v28  ;;  %v1291_v2 = vpop.permute.xlu2 %1290 }
 0x111   :  { %v1293_v56 = vunpack.i.h.bf16 %v1291_v2  ;;  %v1292_v51 = vunpack.i.l.bf16 %v1291_v2 }
 0x112   :  { %v2092_v22 = vpop.permute.xlu1 %1250 }
 0x113   :  { %v1253_v59 = vunpack.i.h.bf16 %v2092_v22  ;;  %v1252_v49 = vunpack.i.l.bf16 %v2092_v22  ;;  %v717_v22 = vsel %vm713_vm8, %v1983_v13, %v1273_v6 }
 0x114   :  { %v1246_v58 = vpop.permute.xlu0 %1245 }
 0x115   :  { %v1248_v12 = vunpack.i.h.bf16 %v1246_v58  ;;  %v1247_v4 = vunpack.i.l.bf16 %v1246_v58  ;;  %v758_v57 = vsel %vm747_vm10, %v741_v10, %v1253_v59  ;;  %v763_v19 = vsel %vm747_vm10, %v746_v3, %v1252_v49 }
 0x117   :  { %v742_v46 = vsel %vm730_vm9, %v725_v43, %v1247_v4  ;;  %v745_v29 = vsel %vm730_vm9, %v728_v27, %v1248_v12 }
 0x118   :  { %v759_v31 = vsel %vm747_vm10, %v742_v46, %v1257_v54  ;;  %v762_v44 = vsel %vm747_vm10, %v745_v29, %v1258_v62  ;;  %v2148_v54 = vld [vmem:[#allocation4] ss:$0 sm:$0xff] }
 0x11a   :  { %v1266_v16 = vpop.permute.xlu1 %1265 }
 0x11b   :  { %v1268_v55 = vunpack.i.h.bf16 %v1266_v16  ;;  %v1267_v15 = vunpack.i.l.bf16 %v1266_v16 }
 0x11c   :  { %v1261_v61 = vpop.permute.xlu0 %1260 }
 0x11d   :  { %v1263_v1 = vunpack.i.h.bf16 %v1261_v61  ;;  %v1262_v7 = vunpack.i.l.bf16 %v1261_v61  ;;  %v776_v17 = vsel %vm764_vm11, %v759_v31, %v1267_v15  ;;  %v779_v36 = vsel %vm764_vm11, %v762_v44, %v1268_v55 }
 0x11f   :  { %v775_v35 = vsel %vm764_vm11, %v758_v57, %v1263_v1  ;;  %v780_v11 = vsel %vm764_vm11, %v763_v19, %v1262_v7 }
 0x120   :  { %v786_v33 = vpack.c.bf16 %v776_v17, %v775_v35  ;;  %v788_v20 = vpack.c.bf16 %v780_v11, %v779_v36 }
 0x122   :  { %976 = vmatmul.msk.bf16.gmra.mxu2 %vm804_vm12, %v786_v33  ;;  %978 = vmatmul.msk.bf16.gmra.mxu3 %vm804_vm12, %v788_v20  ;;  %v1281_v40 = vpop.permute.xlu1 %1280 }
 0x123   :  { %v1283_v0 = vunpack.i.h.bf16 %v1281_v40  ;;  %v1282_v14 = vunpack.i.l.bf16 %v1281_v40 }
 0x124   :  { %v1276_v47 = vpop.permute.xlu0 %1275 }
 0x125   :  { %v1278_v30 = vunpack.i.h.bf16 %v1276_v47  ;;  %v1277_v48 = vunpack.i.l.bf16 %v1276_v47  ;;  %v733_v21 = vsel %vm730_vm9, %v716_v8, %v1282_v14  ;;  %v734_v45 = vsel %vm730_vm9, %v717_v22, %v1283_v0 }
 0x127   :  { %v721_v5 = vsel %vm713_vm8, %v1991_v50, %v1278_v30  ;;  %v720_v41 = vsel %vm713_vm8, %v1994_v38, %v1277_v48 }
 0x128   :  { %v738_v50 = vsel %vm730_vm9, %v721_v5, %v1242_v39  ;;  %v737_v63 = vsel %vm730_vm9, %v720_v41, %v525_v52 }
 0x129   :  { %v755_v53 = vsel %vm747_vm10, %v738_v50, %v1252_v49 }
 0x12a   :  { %v570_v13 = vpop.permute.xlu1 %569  ;;  %v772_v23 = vsel %vm764_vm11, %v755_v53, %v1262_v7 }
 0x12b   :  { %v754_v28 = vsel %vm747_vm10, %v737_v63, %v570_v13 }
 0x12c   :  { %v1286_v37 = vpop.permute.xlu0 %1285 }
 0x12d   :  { %v1288_v25 = vunpack.i.h.bf16 %v1286_v37  ;;  %v1287_v60 = vunpack.i.l.bf16 %v1286_v37 }
 0x12f   :  { %v750_v58 = vsel %vm747_vm10, %v733_v21, %v1287_v60  ;;  %v751_v24 = vsel %vm747_vm10, %v734_v45, %v1288_v25 }
 0x130   :  { %v767_v42 = vsel %vm764_vm11, %v750_v58, %v1292_v51  ;;  %v768_v12 = vsel %vm764_vm11, %v751_v24, %v1293_v56 }
 0x131   :  { %v782_v4 = vpack.c.bf16 %v768_v12, %v767_v42 }
 0x133   :  { %972 = vmatmul.msk.bf16.gmra.mxu0 %vm804_vm12, %v782_v4 }
 0x134   :  { %v615_v62 = vpop.permute.xlu0 %614 }
 0x135   :  { %v771_v39 = vsel %vm764_vm11, %v754_v28, %v615_v62 }
 0x136   :  { %v784_v38 = vpack.c.bf16 %v772_v23, %v771_v39 }
 0x138   :  { %974 = vmatmul.msk.bf16.gmra.mxu1 %vm804_vm12, %v784_v38 }
 0x173   :  { %v874_v18 = vpop.f32.mrf.mxu3 }
 0x174   :  { %v900_v27 = vmul.f32 %v2146_v34, %v874_v18 }
 0x175   :  { %v864_v43 = vpop.f32.mrf.mxu2 }
 0x176   :  { %v896_v26 = vmul.f32 %v2146_v34, %v864_v43  ;;  %v920_v32 = vadd.f32 %v2148_v54, %v900_v27 }
 0x178   :  { %v916_v46 = vadd.f32 %v2148_v54, %v896_v26  ;;  %v936_v29 = vmax.f32 %v920_v32, 0.0 }
 0x17a   :  { %v932_v59 = vmax.f32 %v916_v46, 0.0  ;;  %953 = vst.msk [vmem:[%s2250_s4 + $0x60] sm:$0xff] %vm940_vm13, %v936_v29 }
 0x17b   :  { %v876_v49 = vpop.f32.mrf.mxu3 }
 0x17c   :  { %949 = vst.msk [vmem:[%s2250_s4 + $0x40] sm:$0xff] %vm940_vm13, %v932_v59  ;;  %v901_v16 = vmul.f32 %v2146_v34, %v876_v49 }
 0x17d   :  { %v866_v55 = vpop.f32.mrf.mxu2 }
 0x17e   :  { %v897_v15 = vmul.f32 %v2146_v34, %v866_v55  ;;  %v921_v10 = vadd.f32 %v2148_v54, %v901_v16 }
 0x180   :  { %v917_v3 = vadd.f32 %v2148_v54, %v897_v15  ;;  %v937_v61 = vmax.f32 %v921_v10, 0.0  ;;  %v844_v31 = vpop.f32.mrf.mxu0 }
 0x181   :  { %v888_v44 = vmul.f32 %v2146_v34, %v844_v31 }
 0x182   :  { %v933_v1 = vmax.f32 %v917_v3, 0.0  ;;  %954 = vst.msk [vmem:[%s2250_s4 + $0x68] sm:$0xff] %vm940_vm13, %v937_v61 }
 0x183   :  { %v908_v7 = vadd.f32 %v2148_v54, %v888_v44 }
 0x184   :  { %950 = vst.msk [vmem:[%s2250_s4 + $0x48] sm:$0xff] %vm940_vm13, %v933_v1 }
 0x185   :  { %v924_v17 = vmax.f32 %v908_v7, 0.0 }
 0x187   :  { %941 = vst.msk [vmem:[%s2250_s4] sm:$0xff] %vm940_vm13, %v924_v17  ;;  %v854_v36 = vpop.f32.mrf.mxu1 }
 0x188   :  { %v892_v57 = vmul.f32 %v2146_v34, %v854_v36  ;;  %v846_v19 = vpop.f32.mrf.mxu0 }
 0x189   :  { %v889_v35 = vmul.f32 %v2146_v34, %v846_v19 }
 0x18a   :  { %v912_v11 = vadd.f32 %v2148_v54, %v892_v57 }
 0x18b   :  { %v909_v52 = vadd.f32 %v2148_v54, %v889_v35 }
 0x18c   :  { %v928_v33 = vmax.f32 %v912_v11, 0.0 }
 0x18d   :  { %v925_v20 = vmax.f32 %v909_v52, 0.0 }
 0x18e   :  { %945 = vst.msk [vmem:[%s2250_s4 + $0x20] sm:$0xff] %vm940_vm13, %v928_v33 }
 0x18f   :  { %942 = vst.msk [vmem:[%s2250_s4 + $0x8] sm:$0xff] %vm940_vm13, %v925_v20  ;;  %v856_v47 = vpop.f32.mrf.mxu1 }
 0x190   :  { %v893_v40 = vmul.f32 %v2146_v34, %v856_v47 }
 0x192   :  { %v913_v30 = vadd.f32 %v2148_v54, %v893_v40 }
 0x194   :  { %v929_v6 = vmax.f32 %v913_v30, 0.0 }
 0x196   :  { %946 = vst.msk [vmem:[%s2250_s4 + $0x28] sm:$0xff] %vm940_vm13, %v929_v6 }
 0x1a5   :  { %v869_v9 = vpop.f32.mrf.mxu2  ;;  %v879_v2 = vpop.f32.mrf.mxu3 }
 0x1a6   :  { %v898_v0 = vmul.f32 %v2146_v34, %v869_v9  ;;  %v902_v14 = vmul.f32 %v2146_v34, %v879_v2 }
 0x1a8   :  { %v918_v48 = vadd.f32 %v2148_v54, %v898_v0  ;;  %v922_v5 = vadd.f32 %v2148_v54, %v902_v14 }
 0x1aa   :  { %v934_v37 = vmax.f32 %v918_v48, 0.0  ;;  %v938_v56 = vmax.f32 %v922_v5, 0.0 }
 0x1ac   :  { %951 = vst.msk [vmem:[%s2250_s4 + $0x50] sm:$0xff] %vm940_vm13, %v934_v37 }
 0x1ad   :  { %955 = vst.msk [vmem:[%s2250_s4 + $0x70] sm:$0xff] %vm940_vm13, %v938_v56  ;;  %v871_v51 = vpop.f32.mrf.mxu2  ;;  %v881_v8 = vpop.f32.mrf.mxu3 }
 0x1ae   :  { %v899_v22 = vmul.f32 %v2146_v34, %v871_v51  ;;  %v903_v25 = vmul.f32 %v2146_v34, %v881_v8 }
 0x1b0   :  { %v919_v60 = vadd.f32 %v2148_v54, %v899_v22  ;;  %v923_v21 = vadd.f32 %v2148_v54, %v903_v25  ;;  %v849_v45 = vpop.f32.mrf.mxu0 }
 0x1b1   :  { %v890_v58 = vmul.f32 %v2146_v34, %v849_v45 }
 0x1b2   :  { %v935_v24 = vmax.f32 %v919_v60, 0.0  ;;  %v939_v50 = vmax.f32 %v923_v21, 0.0 }
 0x1b3   :  { %v910_v41 = vadd.f32 %v2148_v54, %v890_v58 }
 0x1b4   :  { %952 = vst.msk [vmem:[%s2250_s4 + $0x58] sm:$0xff] %vm940_vm13, %v935_v24 }
 0x1b5   :  { %956 = vst.msk [vmem:[%s2250_s4 + $0x78] sm:$0xff] %vm940_vm13, %v939_v50  ;;  %v926_v42 = vmax.f32 %v910_v41, 0.0  ;;  %v859_v12 = vpop.f32.mrf.mxu1 }
 0x1b6   :  { %v894_v13 = vmul.f32 %v2146_v34, %v859_v12 }
 0x1b7   :  { %943 = vst.msk [vmem:[%s2250_s4 + $0x10] sm:$0xff] %vm940_vm13, %v926_v42 }
 0x1b8   :  { %v914_v4 = vadd.f32 %v2148_v54, %v894_v13  ;;  %v851_v53 = vpop.f32.mrf.mxu0 }
 0x1b9   :  { %v891_v63 = vmul.f32 %v2146_v34, %v851_v53 }
 0x1ba   :  { %v930_v28 = vmax.f32 %v914_v4, 0.0 }
 0x1bb   :  { %v911_v62 = vadd.f32 %v2148_v54, %v891_v63 }
 0x1bc   :  { %947 = vst.msk [vmem:[%s2250_s4 + $0x30] sm:$0xff] %vm940_vm13, %v930_v28 }
 0x1bd   :  { %v927_v39 = vmax.f32 %v911_v62, 0.0  ;;  %v861_v23 = vpop.f32.mrf.mxu1 }
 0x1be   :  { %v895_v38 = vmul.f32 %v2146_v34, %v861_v23 }
 0x1bf   :  { %944 = vst.msk [vmem:[%s2250_s4 + $0x18] sm:$0xff] %vm940_vm13, %v927_v39 }
 0x1c0   :  { %v915_v18 = vadd.f32 %v2148_v54, %v895_v38 }
 0x1c2   :  { %v931_v27 = vmax.f32 %v915_v18, 0.0 }
 0x1c4   :  { %948 = vst.msk [vmem:[%s2250_s4 + $0x38] sm:$0xff] %vm940_vm13, %v931_v27 }
 0x1c5   :  { %961 = vsyncpa [#allocation3], 1 }
 0x1c6   :  { %962 = vsyncpa [#allocation5], 1 }

// kernel: resnet_forward.7
= control target key start
LH: loop header
LB: loop body
LE: loop exit
PB: predicated region body
PF: predicated region fallthrough
CT: control target
= control target key end

     0   :  { %12 = vsyncpa [#allocation3], 0  ;;  %s4341_s0 = inlined_call_operand.vmem [shape: f32[2,8,8,32], index: 0, kind: input, shape index: {}]   ;;  %s4342_s1 = inlined_call_operand.vmem [shape: bf16[288,32], index: 1, kind: input, shape index: {}]   ;;  %s4343_s2 = inlined_call_operand.hbm [shape: f32[1,32], index: 2, kind: input, shape index: {}]   ;;  %s4344_s3 = inlined_call_operand.hbm [shape: f32[1,32], index: 3, kind: input, shape index: {}]   ;;  %s4345_s4 = inlined_call_operand.vmem [shape: bf16[288,32], index: 4, kind: input, shape index: {}]   ;;  %s4346_s5 = inlined_call_operand.hbm [shape: f32[1,32], index: 5, kind: input, shape index: {}]   ;;  %s4347_s6 = inlined_call_operand.hbm [shape: f32[1,32], index: 6, kind: input, shape index: {}]   ;;  %s4348_s7 = inlined_call_operand.vmem [shape: f32[2,8,8,32], index: 7, kind: output, shape index: {}]  }
   0x1   :  { %13 = vsyncpa [#allocation5], 0  ;;  %s35_s26 = sshll.u32 %s4344_s3, 4  ;;  %s36_s26 = int_to_ptr.hbm [resolvable:$true] %s35_s26 }
   0x2   :  { %14 = vsyncpa [#allocation8], 0  ;;  %s2924_s27 = smov [#allocation4]   ;;  %s24_s8 = sshll.u32 %s4343_s2, 4  ;;  %s25_s8 = int_to_ptr.hbm [resolvable:$true] %s24_s8 }
   0x3   :  { %s37_s28 = sshll.u32 %s2924_s27, 4  ;;  %s2925_s9 = smov [#allocation2]   ;;  %s38_s28 = int_to_ptr.vmem [resolvable:$true] %s37_s28 }
   0x4   :  { %40 = dma.hbm_to_vmem [thread:$0]  %s36_s26, 16, %s38_s28, [#allocation5]  }
   0x5   :  { %s26_s10 = sshll.u32 %s2925_s9, 4  ;;  %s48_s13 = sshll.u32 %s4346_s5, 4  ;;  %s27_s10 = int_to_ptr.vmem [resolvable:$true] %s26_s10  ;;  %s49_s13 = int_to_ptr.hbm [resolvable:$true] %s48_s13 }
   0x6   :  { %29 = dma.hbm_to_vmem [thread:$0]  %s25_s8, 16, %s27_s10, [#allocation3]  }
   0x7   :  { %s59_s15 = sshll.u32 %s4347_s6, 4  ;;  %s2926_s16 = smov [#allocation6]   ;;  %s60_s15 = int_to_ptr.hbm [resolvable:$true] %s59_s15 }
   0x8   :  { %s50_s17 = sshll.u32 %s2926_s16, 4  ;;  %s2927_s2 = smov [#allocation7]   ;;  %s51_s17 = int_to_ptr.vmem [resolvable:$true] %s50_s17 }
   0x9   :  { %53 = dma.hbm_to_vmem [thread:$0]  %s49_s13, 16, %s51_s17, [#allocation5]  }
   0xa   :  { %s61_s18 = sshll.u32 %s2927_s2, 4  ;;  %s62_s18 = int_to_ptr.vmem [resolvable:$true] %s61_s18 }
   0xb   :  { %64 = dma.hbm_to_vmem [thread:$0]  %s60_s15, 16, %s62_s18, [#allocation8]  }
   0xc   :  { %2918 = dma.done.wait [#allocation3], 16  }
   0xd   :  { %2919 = vsyncadd [#allocation3], 4294967280 }
   0xe   :  { %2920 = dma.done.wait [#allocation5], 32  }
   0xf   :  { %2921 = vsyncadd [#allocation5], 4294967264 }
  0x10   :  { %2922 = dma.done.wait [#allocation8], 16  }
  0x11   :  { %2923 = vsyncadd [#allocation8], 4294967280  ;;  %v90_v0 = vld [vmem:[%s4341_s0 + $0x40] sm:$0xff]  ;;  %v91_v1 = vld [vmem:[%s4341_s0 + $0x48] sm:$0xff]  ;;  %vm146_vm0 = vcmask 1040384   ;;  %vm208_vm1 = vcmask 1046528  }
  0x12   :  { %v92_v2 = vld [vmem:[%s4341_s0 + $0x50] sm:$0xff]  ;;  %v122_v3 = vrot.slane %v90_v0, 7  ;;  %v123_v4 = vrot.slane %v91_v1, 7  ;;  %v93_v6 = vld [vmem:[%s4341_s0 + $0x58] sm:$0xff]  ;;  %v94_v7 = vld [vmem:[%s4341_s0 + $0x60] sm:$0xff]  ;;  %v4350_v8 = vmov 0.0  }
  0x13   :  { %v124_v5 = vrot.slane %v92_v2, 7  ;;  %v3000_v9 = vrot.slane %v4350_v8, 1  ;;  %vm253_vm2 = vcmask 1045504   ;;  %v125_v10 = vrot.slane %v93_v6, 7  ;;  %s2929_s27 = smov 96   ;;  %v95_v32 = vld [vmem:[%s4341_s0 + $0x68] sm:$0xff] }
  0x14   :  { %v126_v11 = vrot.slane %v94_v7, 7  ;;  %v3003_v12 = vsel %vm146_vm0, 0.0, %v122_v3  ;;  %v3006_v13 = vsel %vm146_vm0, 0.0, %v123_v4  ;;  %v171_v14 = vsel %vm146_vm0, %v122_v3, 0.0  ;;  %v96_v37 = vld [vmem:[%s4341_s0 + $0x70] sm:$0xff]  ;;  %s2930_s9 = smov 32  }
  0x15   :  { %v3010_v15 = vsel %vm146_vm0, 0.0, %v124_v5  ;;  %v2365_v16 = vpack.i.bf16 %v3006_v13, %v3003_v12  ;;  %v232_v17 = vrot.slane %v3003_v12, 1  ;;  %v233_v18 = vrot.slane %v171_v14, 1  ;;  %v83_v61 = vld [vmem:[%s4341_s0 + $0x8] sm:$0xff]  ;;  %s2931_s12 = smov 64  }
  0x16   :  { %v278_v19 = vrot.slane %v171_v14, 2  ;;  %v172_v20 = vsel %vm146_vm0, %v123_v4, 0.0  ;;  %v173_v21 = vsel %vm146_vm0, %v124_v5, 0.0  ;;  %v235_v22 = vrot.slane %v3006_v13, 1 }
  0x17   :  { %v238_v23 = vrot.slane %v3010_v15, 1  ;;  %2366 = vrot.lane.b32.xlu1 %v2365_v16, %s2929_s27  ;;  %v3021_v24 = vsel %vm208_vm1, %v232_v17, %v233_v18  ;;  %v236_v25 = vrot.slane %v172_v20, 1  ;;  %v239_v26 = vrot.slane %v173_v21, 1 }
  0x18   :  { %v277_v27 = vrot.slane %v3003_v12, 2  ;;  %v2355_v28 = vpack.i.bf16 %v3021_v24, %v3000_v9  ;;  %v3027_v29 = vsel %vm146_vm0, 0.0, %v125_v10  ;;  %v3030_v30 = vsel %vm146_vm0, 0.0, %v126_v11 }
  0x19   :  { %v174_v31 = vsel %vm146_vm0, %v125_v10, 0.0  ;;  %v3037_v33 = vrot.slane %v4350_v8, 2  ;;  %v3040_v34 = vsel %vm208_vm1, %v235_v22, %v236_v25  ;;  %v3043_v35 = vsel %vm208_vm1, %v238_v23, %v239_v26 }
  0x1a   :  { %v175_v36 = vsel %vm146_vm0, %v126_v11, 0.0  ;;  %2356 = vrot.lane.b32.xlu0 %v2355_v28, %s2930_s9  ;;  %v3051_v38 = vsel %vm253_vm2, %v277_v27, %v278_v19  ;;  %v286_v39 = vrot.slane %v3027_v29, 2  ;;  %v287_v40 = vrot.slane %v174_v31, 2  ;;  %v82_v11 = vld [vmem:[%s4341_s0] sm:$0xff] }
  0x1b   :  { %v3056_v41 = vpack.i.bf16 %v3043_v35, %v3040_v34  ;;  %v289_v42 = vrot.slane %v3030_v30, 2  ;;  %v290_v43 = vrot.slane %v175_v36, 2  ;;  %v127_v44 = vrot.slane %v95_v32, 7 }
  0x1c   :  { %v128_v45 = vrot.slane %v96_v37, 7  ;;  %v2360_v46 = vpack.i.bf16 %v3051_v38, %v3037_v33  ;;  %v241_v47 = vrot.slane %v3027_v29, 1  ;;  %v242_v48 = vrot.slane %v174_v31, 1 }
  0x1d   :  { %v3063_v49 = vsel %vm253_vm2, %v286_v39, %v287_v40  ;;  %v3066_v50 = vsel %vm253_vm2, %v289_v42, %v290_v43  ;;  %v244_v51 = vrot.slane %v3030_v30, 1  ;;  %v245_v52 = vrot.slane %v175_v36, 1 }
  0x1e   :  { %v3072_v53 = vsel %vm146_vm0, 0.0, %v127_v44  ;;  %v3075_v54 = vsel %vm146_vm0, 0.0, %v128_v45  ;;  %v176_v55 = vsel %vm146_vm0, %v127_v44, 0.0  ;;  %v177_v56 = vsel %vm146_vm0, %v128_v45, 0.0 }
  0x1f   :  { %2371 = vrot.lane.b32.xlu1 %v3056_v41, %s2930_s9  ;;  %v3081_v57 = vpack.i.bf16 %v3066_v50, %v3063_v49  ;;  %v3084_v58 = vsel %vm208_vm1, %v241_v47, %v242_v48  ;;  %v280_v59 = vrot.slane %v3006_v13, 2  ;;  %v281_v60 = vrot.slane %v172_v20, 2 }
  0x20   :  { %v3092_v62 = vsel %vm208_vm1, %v244_v51, %v245_v52  ;;  %v292_v63 = vrot.slane %v3072_v53, 2  ;;  %v283_v0 = vrot.slane %v3010_v15, 2  ;;  %v284_v1 = vrot.slane %v173_v21, 2  ;;  %v85_v52 = vld [vmem:[%s4341_s0 + $0x18] sm:$0xff] }
  0x21   :  { %4357 = vst [vmem:[#allocation12_spill] sm:$0xff] %v3092_v62  ;;  %v293_v2 = vrot.slane %v176_v55, 2  ;;  %v295_v3 = vrot.slane %v3075_v54, 2  ;;  %v296_v4 = vrot.slane %v177_v56, 2  ;;  %v3098_v5 = vsel %vm253_vm2, %v280_v59, %v281_v60 }
  0x22   :  { %2361 = vrot.lane.b32.xlu0 %v2360_v46, %s2931_s12  ;;  %v3101_v6 = vsel %vm253_vm2, %v283_v0, %v284_v1  ;;  %v115_v7 = vrot.slane %v83_v61, 7  ;;  %v3112_v14 = vpack.i.bf16 %v3092_v62, %v3084_v58  ;;  %v247_v16 = vrot.slane %v3072_v53, 1 }
  0x23   :  { %v3105_v10 = vpack.i.bf16 %v3101_v6, %v3098_v5  ;;  %v248_v17 = vrot.slane %v176_v55, 1  ;;  %v3118_v18 = vsel %vm253_vm2, %v292_v63, %v293_v2  ;;  %v3121_v19 = vsel %vm253_vm2, %v295_v3, %v296_v4  ;;  %v3174_v55 = vld [vmem:[%s4341_s0 + $0x78] sm:$0xff]  ;;  %v84_v63 = vld [vmem:[%s4341_s0 + $0x10] sm:$0xff] }
  0x24   :  { %v250_v20 = vrot.slane %v3075_v54, 1  ;;  %v251_v21 = vrot.slane %v177_v56, 1  ;;  %v3127_v22 = vsel %vm146_vm0, 0.0, %v115_v7  ;;  %v164_v23 = vsel %vm146_vm0, %v115_v7, 0.0  ;;  %4360 = vst [vmem:[#allocation15_spill] sm:$0xff] %v3174_v55 }
  0x25   :  { %2376 = vrot.lane.b32.xlu2 %v3105_v10, %s2931_s12  ;;  %v114_v25 = vrot.slane %v82_v11, 7  ;;  %v3134_v26 = vpack.i.bf16 %v3121_v19, %v3118_v18  ;;  %v3137_v27 = vsel %vm208_vm1, %v247_v16, %v248_v17  ;;  %v214_v31 = vrot.slane %v3127_v22, 1  ;;  %v2308_v16 = vld [vmem:[%s4342_s1 + $0x38] sm:$0xff] }
  0x26   :  { %4358 = vst [vmem:[#allocation13_spill] sm:$0xff] %v3137_v27  ;;  %v3140_v28 = vsel %vm208_vm1, %v250_v20, %v251_v21  ;;  %v215_v32 = vrot.slane %v164_v23, 1  ;;  %v3145_v36 = vpack.i.bf16 %v3027_v29, %v3010_v15  ;;  %v259_v37 = vrot.slane %v3127_v22, 2  ;;  %2337 = vmatpush.bf16.msra.mxu1 %v2308_v16  ;;  %910 = vmatpush.bf16.msra.mxu0 %v2308_v16 }
  0x27   :  { %2391 = vrot.lane.b32.xlu1 %v3081_v57, %s2931_s12  ;;  %4359 = vst [vmem:[#allocation14_spill] sm:$0xff] %v3140_v28  ;;  %v260_v39 = vrot.slane %v164_v23, 2  ;;  %v3149_v40 = vsel %vm146_vm0, 0.0, %v114_v25  ;;  %v163_v42 = vsel %vm146_vm0, %v114_v25, 0.0  ;;  %v3154_v43 = vpack.i.bf16 %v3140_v28, %v3137_v27 }
  0x28   :  { %v211_v44 = vrot.slane %v3149_v40, 1  ;;  %v212_v45 = vrot.slane %v163_v42, 1  ;;  %v256_v46 = vrot.slane %v3149_v40, 2  ;;  %v257_v47 = vrot.slane %v163_v42, 2 }
  0x29   :  { %v3163_v48 = vsel %vm208_vm1, %v214_v31, %v215_v32  ;;  %v3166_v51 = vsel %vm253_vm2, %v259_v37, %v260_v39  ;;  %v3186_v61 = vpack.i.bf16 %v3072_v53, %v3030_v30  ;;  %v117_v0 = vrot.slane %v85_v52, 7  ;;  %v2307_v39 = vld [vmem:[%s4342_s1 + $0x30] sm:$0xff] }
  0x2a   :  { %2386 = vrot.lane.b32.xlu0 %v3112_v14, %s2930_s9  ;;  %v2420_v56 = vpack.i.bf16 %v3163_v48, %v3166_v51  ;;  %v3181_v59 = vsel %vm208_vm1, %v211_v44, %v212_v45  ;;  %v258_v60 = vsel %vm253_vm2, %v256_v46, %v257_v47  ;;  %v4349_v1 = vrot.slane %v3174_v55, 7  ;;  %2338 = vmatpush.bf16.msra.mxu1 %v2307_v39 }
  0x2b   :  { %v2415_v2 = vpack.i.bf16 %v258_v60, %v3181_v59  ;;  %v116_v3 = vrot.slane %v84_v63, 7  ;;  %v3197_v4 = vsel %vm146_vm0, 0.0, %v117_v0  ;;  %v166_v11 = vsel %vm146_vm0, %v117_v0, 0.0  ;;  %911 = vmatpush.bf16.msra.mxu0 %v2307_v39  ;;  %v87_v63 = vld [vmem:[%s4341_s0 + $0x28] sm:$0xff] }
  0x2c   :  { %v3202_v7 = vsel %vm146_vm0, 0.0, %v4349_v1  ;;  %v2435_v17 = vpack.i.bf16 %v3127_v22, %v3149_v40  ;;  %v220_v21 = vrot.slane %v3197_v4, 1  ;;  %v221_v25 = vrot.slane %v166_v11, 1  ;;  %v2306_v0 = vld [vmem:[%s4342_s1 + $0x28] sm:$0xff] }
  0x2d   :  { %2381 = vrot.lane.b32.xlu2 %v3145_v36, %s2929_s27  ;;  %4361 = vst [vmem:[#allocation16_spill] sm:$0xff] %v3202_v7  ;;  %v3212_v20 = vsel %vm146_vm0, 0.0, %v116_v3  ;;  %v3217_v23 = vpack.i.bf16 %v3202_v7, %v3075_v54  ;;  %v265_v31 = vrot.slane %v3197_v4, 2  ;;  %v266_v32 = vrot.slane %v166_v11, 2 }
  0x2e   :  { %v165_v37 = vsel %vm146_vm0, %v116_v3, 0.0  ;;  %v2430_v42 = vpack.i.bf16 %v3166_v51, %v3212_v20  ;;  %v217_v44 = vrot.slane %v3212_v20, 1  ;;  %v262_v46 = vrot.slane %v3212_v20, 2  ;;  %2339 = vmatpush.bf16.msra.mxu1 %v2306_v0 }
  0x2f   :  { %2406 = vrot.lane.b32.xlu1 %v3134_v26, %s2931_s12  ;;  %v218_v45 = vrot.slane %v165_v37, 1  ;;  %v263_v47 = vrot.slane %v165_v37, 2  ;;  %v3232_v52 = vsel %vm208_vm1, %v220_v21, %v221_v25  ;;  %v2425_v16 = vpack.i.bf16 %v3127_v22, %v258_v60  ;;  %v2305_v21 = vld [vmem:[%s4342_s1 + $0x20] sm:$0xff]  ;;  %912 = vmatpush.bf16.msra.mxu0 %v2306_v0 }
  0x30   :  { %v119_v25 = vrot.slane %v87_v63, 7  ;;  %v2465_v39 = vpack.i.bf16 %v3197_v4, %v3212_v20  ;;  %vm621_vm3 = vcmask 261120   ;;  %vm637_vm4 = vcmask 523264  }
  0x31   :  { %v3247_v3 = vsel %vm208_vm1, %v217_v44, %v218_v45  ;;  %v3250_v11 = vsel %vm253_vm2, %v262_v46, %v263_v47  ;;  %vm653_vm5 = vcmask 785408  }
  0x32   :  { %2401 = vrot.lane.b32.xlu0 %v3154_v43, %s2930_s9  ;;  %2340 = vmatpush.bf16.msra.mxu1 %v2305_v21  ;;  %v3264_v60 = vsel %vm146_vm0, 0.0, %v119_v25  ;;  %v168_v37 = vsel %vm146_vm0, %v119_v25, 0.0 }
  0x33   :  { %913 = vmatpush.bf16.msra.mxu0 %v2305_v21  ;;  %v226_v46 = vrot.slane %v3264_v60, 1  ;;  %v227_v47 = vrot.slane %v168_v37, 1  ;;  %v271_v63 = vrot.slane %v3264_v60, 2  ;;  %v272_v0 = vrot.slane %v168_v37, 2 }
  0x34   :  { %v2455_v37 = vpack.i.bf16 %v3197_v4, %v3250_v11 }
  0x35   :  { %2396 = vrot.lane.b32.xlu2 %v3186_v61, %s2929_s27 }
  0x37   :  { %2421 = vrot.lane.b32.xlu1 %v2420_v56, %s2930_s9  ;;  %v3235_v56 = vsel %vm253_vm2, %v265_v31, %v266_v32  ;;  %v2445_v31 = vpack.i.bf16 %v3250_v11, %v3247_v3 }
  0x3a   :  { %2416 = vrot.lane.b32.xlu0 %v2415_v2, %s2930_s9  ;;  %v2450_v2 = vpack.i.bf16 %v3232_v52, %v3235_v56 }
  0x3d   :  { %2411 = vrot.lane.b32.xlu2 %v3217_v23, %s2929_s27 }
  0x3f   :  { %2436 = vrot.lane.b32.xlu1 %v2435_v17, %s2929_s27  ;;  %v86_v17 = vld [vmem:[%s4341_s0 + $0x20] sm:$0xff] }
  0x40   :  { %v118_v32 = vrot.slane %v86_v17, 7 }
  0x42   :  { %2431 = vrot.lane.b32.xlu0 %v2430_v42, %s2931_s12  ;;  %v2440_v42 = vpack.i.bf16 %v3247_v3, %v3163_v48  ;;  %v3273_v44 = vsel %vm146_vm0, 0.0, %v118_v32  ;;  %v167_v45 = vsel %vm146_vm0, %v118_v32, 0.0  ;;  %v3288_v32 = vsel %vm253_vm2, %v271_v63, %v272_v0 }
  0x43   :  { %v224_v17 = vrot.slane %v167_v45, 1  ;;  %v268_v21 = vrot.slane %v3273_v44, 2  ;;  %v269_v25 = vrot.slane %v167_v45, 2 }
  0x45   :  { %2426 = vrot.lane.b32.xlu2 %v2425_v16, %s2931_s12  ;;  %v223_v16 = vrot.slane %v3273_v44, 1 }
  0x47   :  { %2451 = vrot.lane.b32.xlu1 %v2450_v2, %s2930_s9  ;;  %v2460_v2 = vpack.i.bf16 %v3235_v56, %v3273_v44 }
  0x4a   :  { %2446 = vrot.lane.b32.xlu0 %v2445_v31, %s2930_s9  ;;  %v3285_v31 = vsel %vm208_vm1, %v226_v46, %v227_v47  ;;  %v88_v46 = vld [vmem:[%s4341_s0 + $0x30] sm:$0xff] }
  0x4b   :  { %v2480_v45 = vpack.i.bf16 %v3285_v31, %v3288_v32  ;;  %v120_v63 = vrot.slane %v88_v46, 7 }
  0x4d   :  { %2441 = vrot.lane.b32.xlu2 %v2440_v42, %s2929_s27  ;;  %v3297_v42 = vsel %vm253_vm2, %v268_v21, %v269_v25  ;;  %v3310_v0 = vsel %vm146_vm0, 0.0, %v120_v63  ;;  %v169_v25 = vsel %vm146_vm0, %v120_v63, 0.0 }
  0x4e   :  { %v274_v46 = vrot.slane %v3310_v0, 2 }
  0x4f   :  { %2466 = vrot.lane.b32.xlu1 %v2465_v39, %s2929_s27  ;;  %v3294_v39 = vsel %vm208_vm1, %v223_v16, %v224_v17  ;;  %v2490_v16 = vpack.i.bf16 %v3288_v32, %v3310_v0  ;;  %v89_v17 = vld [vmem:[%s4341_s0 + $0x38] sm:$0xff] }
  0x50   :  { %v2475_v47 = vpack.i.bf16 %v3297_v42, %v3294_v39  ;;  %v121_v21 = vrot.slane %v89_v17, 7 }
  0x52   :  { %2461 = vrot.lane.b32.xlu0 %v2460_v2, %s2931_s12  ;;  %v2495_v2 = vpack.i.bf16 %v3264_v60, %v3273_v44  ;;  %v154_v1 = vsel %vm146_vm0, 0.0, %v121_v21  ;;  %v170_v8 = vsel %vm146_vm0, %v121_v21, 0.0 }
  0x53   :  { %v324_v28 = vrot.slane %v154_v1, 2  ;;  %v325_v17 = vrot.slane %v170_v8, 2 }
  0x55   :  { %2456 = vrot.lane.b32.xlu2 %v2455_v37, %s2931_s12  ;;  %v229_v37 = vrot.slane %v3310_v0, 1  ;;  %v3335_v7 = vsel %vm253_vm2, %v324_v28, %v325_v17  ;;  %v2303_v28 = vld [vmem:[%s4342_s1 + $0x10] sm:$0xff]  ;;  %v2302_v17 = vld [vmem:[%s4342_s1 + $0x8] sm:$0xff] }
  0x56   :  { %v2510_v21 = vpack.i.bf16 %v3051_v38, %v3335_v7  ;;  %v2525_v38 = vpack.i.bf16 %v154_v1, %v3310_v0 }
  0x57   :  { %2481 = vrot.lane.b32.xlu1 %v2480_v45, %s2930_s9  ;;  %v230_v45 = vrot.slane %v169_v25, 1 }
  0x5a   :  { %2476 = vrot.lane.b32.xlu0 %v2475_v47, %s2930_s9  ;;  %v275_v47 = vrot.slane %v169_v25, 2  ;;  %v2470_v25 = vpack.i.bf16 %v3294_v39, %v3232_v52 }
  0x5d   :  { %2471 = vrot.lane.b32.xlu2 %v2470_v25, %s2929_s27 }
  0x5f   :  { %2496 = vrot.lane.b32.xlu1 %v2495_v2, %s2929_s27  ;;  %v3327_v2 = vsel %vm208_vm1, %v229_v37, %v230_v45  ;;  %v2304_v37 = vld [vmem:[%s4342_s1 + $0x18] sm:$0xff]  ;;  %v4362_v45 = vmov 0.0  }
  0x60   :  { %2341 = vmatpush.bf16.msra.mxu1 %v2304_v37  ;;  %914 = vmatpush.bf16.msra.mxu0 %v2304_v37  ;;  %v2500_v25 = vpack.i.bf16 %v3327_v2, %v3285_v31 }
  0x62   :  { %2491 = vrot.lane.b32.xlu0 %v2490_v16, %s2931_s12  ;;  %v3330_v16 = vsel %vm253_vm2, %v274_v46, %v275_v47  ;;  %v2520_v46 = vpack.i.bf16 %v3006_v13, %v4362_v45  ;;  %v2485_v47 = vpack.i.bf16 %v3264_v60, %v3297_v42  ;;  %v2315_v45 = vld [vmem:[%s4342_s1 + $0x70] sm:$0xff] }
  0x63   :  { %v2505_v63 = vpack.i.bf16 %v3330_v16, %v3327_v2 }
  0x64   :  { %2342 = vmatpush.bf16.msra.mxu1 %v2303_v28  ;;  %915 = vmatpush.bf16.msra.mxu0 %v2303_v28  ;;  %v2515_v28 = vpack.i.bf16 %v154_v1, %v3330_v16 }
  0x65   :  { %2486 = vrot.lane.b32.xlu2 %v2485_v47, %s2931_s12 }
  0x67   :  { %2511 = vrot.lane.b32.xlu1 %v2510_v21, %s2930_s9  ;;  %v2316_v21 = vld [vmem:[%s4342_s1 + $0x78] sm:$0xff] }
  0x68   :  { %2343 = vmatpush.bf16.msra.mxu1 %v2302_v17  ;;  %916 = vmatpush.bf16.msra.mxu0 %v2302_v17 }
  0x6a   :  { %2506 = vrot.lane.b32.xlu0 %v2505_v63, %s2930_s9  ;;  %v2301_v63 = vld [vmem:[%s4342_s1] sm:$0xff] }
  0x6c   :  { %2344 = vmatpush.bf16.msra.mxu1 %v2301_v63  ;;  %917 = vmatpush.bf16.msra.mxu0 %v2301_v63 }
  0x6d   :  { %2501 = vrot.lane.b32.xlu2 %v2500_v25, %s2929_s27  ;;  %v2314_v25 = vld [vmem:[%s4342_s1 + $0x68] sm:$0xff] }
  0x6f   :  { %2526 = vrot.lane.b32.xlu1 %v2525_v38, %s2929_s27  ;;  %v303_v38 = vrot.slane %v170_v8, 1 }
  0x70   :  { %959 = vmatpush.bf16.msrb.mxu1 %v2316_v21 }
  0x72   :  { %2521 = vrot.lane.b32.xlu0 %v2520_v46, %s2931_s12  ;;  %v302_v46 = vrot.slane %v154_v1, 1 }
  0x74   :  { %960 = vmatpush.bf16.msrb.mxu1 %v2315_v45  ;;  %v3382_v47 = vsel %vm208_vm1, %v302_v46, %v303_v38 }
  0x75   :  { %2516 = vrot.lane.b32.xlu2 %v2515_v28, %s2931_s12 }
  0x77   :  { %2541 = vrot.lane.b32.xlu1 %v3145_v36, %s2931_s12 }
  0x78   :  { %961 = vmatpush.bf16.msrb.mxu1 %v2314_v25 }
  0x7a   :  { %2536 = vrot.lane.b32.xlu0 %v3105_v10, %s2930_s9  ;;  %v2530_v10 = vpack.i.bf16 %v3000_v9, %v3382_v47  ;;  %v2313_v9 = vld [vmem:[%s4342_s1 + $0x60] sm:$0xff] }
  0x7c   :  { %962 = vmatpush.bf16.msrb.mxu1 %v2313_v9 }
  0x7d   :  { %2531 = vrot.lane.b32.xlu2 %v2530_v10, %s2929_s27 }
  0x7f   :  { %v3370_v37 = vpop.permute.xlu2 %2376  ;;  %2556 = vrot.lane.b32.xlu1 %v3186_v61, %s2931_s12 }
  0x82   :  { %2551 = vrot.lane.b32.xlu0 %v3081_v57, %s2930_s9 }
  0x85   :  { %2546 = vrot.lane.b32.xlu2 %v3056_v41, %s2929_s27  ;;  %v2378_v41 = vunpack.i.l.bf16 %v3370_v37 }
  0x87   :  { %v2382_v63 = vpop.permute.xlu2 %2381  ;;  %2571 = vrot.lane.b32.xlu1 %v3217_v23, %s2931_s12 }
  0x89   :  { %v2367_v17 = vpop.permute.xlu1 %2366 }
  0x8a   :  { %v2369_v28 = vunpack.i.h.bf16 %v2367_v17  ;;  %v2368_v45 = vunpack.i.l.bf16 %v2367_v17  ;;  %2566 = vrot.lane.b32.xlu0 %v3134_v26, %s2930_s9  ;;  %v2318_v26 = vld [vmem:[%s4342_s1 + $0x88] sm:$0xff] }
  0x8b   :  { %1014 = vmatpush.bf16.msra.mxu2 %v2318_v26  ;;  %2345 = vmatpush.bf16.msra.mxu3 %v2318_v26 }
  0x8c   :  { %v2357_v36 = vpop.permute.xlu0 %2356 }
  0x8d   :  { %v2359_v8 = vunpack.i.h.bf16 %v2357_v36  ;;  %v2358_v1 = vunpack.i.l.bf16 %v2357_v36  ;;  %2561 = vrot.lane.b32.xlu2 %v3112_v14, %s2929_s27 }
  0x8f   :  { %v3397_v38 = vpop.permute.xlu2 %2396  ;;  %v630_v57 = vsel %vm621_vm3, %v3003_v12, %v2359_v8  ;;  %v622_v61 = vsel %vm621_vm3, 0.0, %v2358_v1 }
  0x90   :  { %v2398_v26 = vunpack.i.l.bf16 %v3397_v38 }
  0x91   :  { %v2372_v21 = vpop.permute.xlu1 %2371 }
  0x92   :  { %v2374_v12 = vunpack.i.h.bf16 %v2372_v21  ;;  %v2373_v8 = vunpack.i.l.bf16 %v2372_v21 }
  0x94   :  { %v2362_v46 = vpop.permute.xlu0 %2361  ;;  %v631_v21 = vsel %vm621_vm3, %v3006_v13, %v2373_v8  ;;  %v2317_v8 = vld [vmem:[%s4342_s1 + $0x80] sm:$0xff] }
  0x95   :  { %v2364_v10 = vunpack.i.h.bf16 %v2362_v46  ;;  %v2363_v25 = vunpack.i.l.bf16 %v2362_v46  ;;  %v2312_v46 = vld [vmem:[%s4342_s1 + $0x58] sm:$0xff]  ;;  %v647_v23 = vsel %vm637_vm4, %v631_v21, %v2378_v41  ;;  %1015 = vmatpush.bf16.msra.mxu2 %v2317_v8  ;;  %2346 = vmatpush.bf16.msra.mxu3 %v2317_v8 }
  0x96   :  { %963 = vmatpush.bf16.msrb.mxu1 %v2312_v46  ;;  %2576 = vrot.lane.b32.xlu2 %v3154_v43, %s2929_s27 }
  0x97   :  { %v3403_v36 = vsel %vm637_vm4, %v622_v61, %v2363_v25  ;;  %v646_v55 = vsel %vm637_vm4, %v630_v57, %v2364_v10  ;;  %v3417_v10 = vpop.permute.xlu2 %2411  ;;  %v2384_v25 = vunpack.i.h.bf16 %v2382_v63  ;;  %v2383_v57 = vunpack.i.l.bf16 %v2382_v63 }
  0x98   :  { %v662_v17 = vsel %vm653_vm5, %v3403_v36, %v2368_v45  ;;  %v663_v27 = vsel %vm653_vm5, %v646_v55, %v2369_v28  ;;  %v2311_v45 = vld [vmem:[%s4342_s1 + $0x50] sm:$0xff]  ;;  %v632_v55 = vsel %vm621_vm3, %v3010_v15, %v2374_v12 }
  0x99   :  { %v2392_v62 = vpop.permute.xlu1 %2391  ;;  %v730_v9 = vpack.c.bf16 %v663_v27, %v662_v17  ;;  %v2379_v27 = vunpack.i.h.bf16 %v3370_v37  ;;  %v664_v15 = vsel %vm653_vm5, %v647_v23, %v2383_v57  ;;  %v2309_v57 = vld [vmem:[%s4342_s1 + $0x40] sm:$0xff] }
  0x9a   :  { %964 = vmatpush.bf16.msrb.mxu1 %v2311_v45  ;;  %v2310_v45 = vld [vmem:[%s4342_s1 + $0x48] sm:$0xff] }
  0x9b   :  { %938 = vmatmul.bf16.vlgmr.msra.gmra.mxu1 %v730_v9  ;;  %v648_v61 = vsel %vm637_vm4, %v632_v55, %v2379_v27  ;;  %v720_v27 = vpack.c.bf16 %v3250_v11, %v3166_v51  ;;  %v2393_v55 = vunpack.i.l.bf16 %v2392_v62 }
  0x9c   :  { %v2387_v1 = vpop.permute.xlu0 %2386  ;;  %v665_v13 = vsel %vm653_vm5, %v648_v61, %v2384_v25 }
  0x9d   :  { %v733_v63 = vpack.c.bf16 %v665_v13, %v664_v15  ;;  %v2389_v46 = vunpack.i.h.bf16 %v2387_v1  ;;  %v2388_v12 = vunpack.i.l.bf16 %v2387_v1  ;;  %v2394_v1 = vunpack.i.h.bf16 %v2392_v62  ;;  %2213 = vmatmul.msk.bf16.vlgmr.msra.gmra.mxu2 %vm621_vm3, %v720_v27 }
  0x9e   :  { %965 = vmatpush.bf16.msrb.mxu1 %v2310_v45  ;;  %v2399_v62 = vunpack.i.h.bf16 %v3397_v38 }
  0x9f   :  { %v3440_v17 = vpop.permute.xlu2 %2426  ;;  %v634_v14 = vsel %vm621_vm3, %v3030_v30, %v2389_v46  ;;  %v633_v51 = vsel %vm621_vm3, %v3027_v29, %v2388_v12 }
  0xa0   :  { %v2428_v25 = vunpack.i.l.bf16 %v3440_v17  ;;  %v649_v13 = vsel %vm637_vm4, %v633_v51, %v2393_v55  ;;  %v650_v30 = vsel %vm637_vm4, %v634_v14, %v2394_v1 }
  0xa1   :  { %v3429_v28 = vpop.permute.xlu1 %2406  ;;  %v666_v46 = vsel %vm653_vm5, %v649_v13, %v2398_v26  ;;  %v667_v12 = vsel %vm653_vm5, %v650_v30, %v2399_v62  ;;  %v2413_v13 = vunpack.i.l.bf16 %v3417_v10 }
  0xa2   :  { %966 = vmatpush.bf16.msrb.mxu1 %v2309_v57  ;;  %v736_v27 = vpack.c.bf16 %v667_v12, %v666_v46  ;;  %v723_v57 = vpack.c.bf16 %v3297_v42, %v3235_v56  ;;  %v2409_v14 = vunpack.i.h.bf16 %v3429_v28 }
  0xa4   :  { %v3436_v37 = vpop.permute.xlu0 %2401 }
  0xa5   :  { %v2404_v55 = vunpack.i.h.bf16 %v3436_v37  ;;  %v2403_v43 = vunpack.i.l.bf16 %v3436_v37 }
  0xa7   :  { %v3470_v23 = vpop.permute.xlu2 %2441 }
  0xa9   :  { %v3442_v9 = vpop.permute.xlu1 %2421 }
  0xab   :  { %943 = vmatmul.bf16.gmra.mxu1 %v733_v63 }
  0xac   :  { %v3454_v41 = vpop.permute.xlu0 %2416 }
  0xad   :  { %v2418_v21 = vunpack.i.l.bf16 %v3454_v41  ;;  %2214 = vmatmul.msk.bf16.gmra.mxu2 %vm621_vm3, %v723_v57  ;;  %v2423_v57 = vunpack.i.l.bf16 %v3442_v9 }
  0xaf   :  { %v623_v11 = vsel %vm621_vm3, %v3149_v40, %v2418_v21  ;;  %v2424_v21 = vunpack.i.h.bf16 %v3442_v9 }
  0xb0   :  { %v639_v15 = vsel %vm637_vm4, %v623_v11, %v2428_v25  ;;  %v3489_v25 = vpop.permute.xlu2 %2456  ;;  %v2408_v11 = vunpack.i.l.bf16 %v3429_v28  ;;  %v2414_v28 = vunpack.i.h.bf16 %v3417_v10 }
  0xb1   :  { %v2437_v61 = vpop.permute.xlu1 %2436  ;;  %v2458_v37 = vunpack.i.l.bf16 %v3489_v25  ;;  %v624_v56 = vsel %vm621_vm3, %v3127_v22, %v2424_v21  ;;  %v726_v21 = vpack.c.bf16 %v3330_v16, %v3288_v32  ;;  %v671_v32 = vsel %vm621_vm3, %v3163_v48, %v2423_v57 }
  0xb2   :  { %v2439_v29 = vunpack.i.h.bf16 %v2437_v61  ;;  %v2438_v63 = vunpack.i.l.bf16 %v2437_v61  ;;  %v636_v61 = vsel %vm621_vm3, %v3075_v54, %v2404_v55 }
  0xb3   :  { %v652_v54 = vsel %vm637_vm4, %v636_v61, %v2409_v14  ;;  %v2419_v14 = vunpack.i.h.bf16 %v3454_v41  ;;  %v2429_v61 = vunpack.i.h.bf16 %v3440_v17  ;;  %v2444_v17 = vunpack.i.h.bf16 %v3470_v23 }
  0xb4   :  { %v654_v40 = vsel %vm653_vm5, %v3403_v36, %v2438_v63  ;;  %v655_v38 = vsel %vm653_vm5, %v639_v15, %v2439_v29  ;;  %v3482_v8 = vpop.permute.xlu0 %2431  ;;  %v635_v15 = vsel %vm621_vm3, %v3072_v53, %v2403_v43 }
  0xb5   :  { %v718_v45 = vpack.c.bf16 %v655_v38, %v654_v40  ;;  %v2434_v62 = vunpack.i.h.bf16 %v3482_v8  ;;  %v651_v29 = vsel %vm637_vm4, %v635_v15, %v2408_v11  ;;  %v2433_v15 = vunpack.i.l.bf16 %v3482_v8 }
  0xb6   :  { %v668_v38 = vsel %vm653_vm5, %v651_v29, %v2413_v13  ;;  %v670_v16 = vsel %vm621_vm3, %v3181_v59, %v2419_v14  ;;  %v2443_v8 = vunpack.i.l.bf16 %v3470_v23 }
  0xb7   :  { %918 = vmatmul.bf16.vlgmr.msra.gmra.mxu0 %v718_v45  ;;  %v640_v63 = vsel %vm637_vm4, %v624_v56, %v2434_v62  ;;  %v687_v13 = vsel %vm637_vm4, %v671_v32, %v2433_v15 }
  0xb9   :  { %v3484_v1 = vpop.permute.xlu1 %2451 }
  0xba   :  { %v2454_v11 = vunpack.i.h.bf16 %v3484_v1 }
  0xbb   :  { %948 = vmatmul.bf16.gmra.mxu1 %v736_v27  ;;  %v3519_v27 = vpop.permute.xlu2 %2471 }
  0xbc   :  { %v3494_v51 = vpop.permute.xlu0 %2446  ;;  %v626_v9 = vsel %vm621_vm3, %v3197_v4, %v2454_v11 }
  0xbd   :  { %v2448_v26 = vunpack.i.l.bf16 %v3494_v51  ;;  %2215 = vmatmul.msk.bf16.gmra.mxu2 %vm621_vm3, %v726_v21 }
  0xbf   :  { %v625_v42 = vsel %vm621_vm3, %v3212_v20, %v2448_v26  ;;  %v669_v20 = vsel %vm653_vm5, %v652_v54, %v2414_v28  ;;  %v686_v28 = vsel %vm637_vm4, %v670_v16, %v2429_v61 }
  0xc0   :  { %v641_v53 = vsel %vm637_vm4, %v625_v42, %v2458_v37  ;;  %v739_v55 = vpack.c.bf16 %v669_v20, %v668_v38  ;;  %v702_v4 = vsel %vm653_vm5, %v686_v28, %v2443_v8  ;;  %v2453_v20 = vunpack.i.l.bf16 %v3484_v1 }
  0xc1   :  { %v2467_v30 = vpop.permute.xlu1 %2466 }
  0xc2   :  { %v2469_v40 = vunpack.i.h.bf16 %v2467_v30  ;;  %v2468_v22 = vunpack.i.l.bf16 %v2467_v30  ;;  %v673_v21 = vsel %vm621_vm3, %v3232_v52, %v2453_v20 }
  0xc3   :  { %v3531_v37 = vpop.permute.xlu2 %2486 }
  0xc4   :  { %v656_v46 = vsel %vm653_vm5, %v640_v63, %v2468_v22  ;;  %v657_v12 = vsel %vm653_vm5, %v641_v53, %v2469_v40  ;;  %v2462_v10 = vpop.permute.xlu0 %2461  ;;  %v2488_v42 = vunpack.i.l.bf16 %v3531_v37 }
  0xc5   :  { %v721_v45 = vpack.c.bf16 %v657_v12, %v656_v46  ;;  %v2464_v56 = vunpack.i.h.bf16 %v2462_v10  ;;  %v2449_v46 = vunpack.i.h.bf16 %v3494_v51  ;;  %v729_v12 = vpack.c.bf16 %v3037_v33, %v3335_v7 }
  0xc6   :  { %v2474_v51 = vunpack.i.h.bf16 %v3519_v27  ;;  %v2473_v7 = vunpack.i.l.bf16 %v3519_v27 }
  0xc7   :  { %923 = vmatmul.bf16.gmra.mxu0 %v721_v45  ;;  %v642_v48 = vsel %vm637_vm4, %v626_v9, %v2464_v56  ;;  %v2459_v45 = vunpack.i.h.bf16 %v3489_v25  ;;  %v672_v57 = vsel %vm621_vm3, %v3247_v3, %v2449_v46 }
  0xc9   :  { %v3521_v43 = vpop.permute.xlu1 %2481  ;;  %v688_v25 = vsel %vm637_vm4, %v672_v57, %v2459_v45  ;;  %v735_v45 = vpack.c.bf16 %v3066_v50, %v3063_v49 }
  0xca   :  { %v2484_v1 = vunpack.i.h.bf16 %v3521_v43 }
  0xcb   :  { %953 = vmatmul.bf16.gmra.mxu1 %v739_v55  ;;  %v2502_v40 = vpop.permute.xlu2 %2501  ;;  %v2463_v55 = vunpack.i.l.bf16 %v2462_v10  ;;  %2218 = vmatmul.msk.bf16.vlgmr.msra.gmra.mxu3 %vm621_vm3, %v735_v45 }
  0xcc   :  { %v3528_v62 = vpop.permute.xlu0 %2476  ;;  %v628_v3 = vsel %vm621_vm3, %v3264_v60, %v2484_v1 }
  0xcd   :  { %v2478_v26 = vunpack.i.l.bf16 %v3528_v62  ;;  %2216 = vmatmul.msk.bf16.gmra.mxu2 %vm621_vm3, %v729_v12  ;;  %v689_v10 = vsel %vm637_vm4, %v673_v21, %v2463_v55  ;;  %v2479_v60 = vunpack.i.h.bf16 %v3528_v62  ;;  %v2504_v62 = vunpack.i.h.bf16 %v2502_v40 }
  0xce   :  { %v705_v32 = vsel %vm653_vm5, %v689_v10, %v2474_v51 }
  0xcf   :  { %v627_v41 = vsel %vm621_vm3, %v3273_v44, %v2478_v26  ;;  %v703_v44 = vsel %vm653_vm5, %v687_v13, %v2444_v17 }
  0xd0   :  { %v643_v29 = vsel %vm637_vm4, %v627_v41, %v2488_v42  ;;  %v719_v38 = vpack.c.bf16 %v703_v44, %v702_v4  ;;  %v704_v42 = vsel %vm653_vm5, %v688_v25, %v2473_v7  ;;  %v2503_v44 = vunpack.i.l.bf16 %v2502_v40 }
  0xd1   :  { %v2497_v30 = vpop.permute.xlu1 %2496  ;;  %v722_v41 = vpack.c.bf16 %v705_v32, %v704_v42  ;;  %v738_v42 = vpack.c.bf16 %v3121_v19, %v3118_v18 }
  0xd2   :  { %v2499_v54 = vunpack.i.h.bf16 %v2497_v30  ;;  %v2498_v63 = vunpack.i.l.bf16 %v2497_v30 }
  0xd3   :  { %v2517_v52 = vpop.permute.xlu2 %2516 }
  0xd4   :  { %v2492_v59 = vpop.permute.xlu0 %2491  ;;  %v658_v53 = vsel %vm653_vm5, %v642_v48, %v2498_v63  ;;  %v659_v23 = vsel %vm653_vm5, %v643_v29, %v2499_v54  ;;  %v2518_v15 = vunpack.i.l.bf16 %v2517_v52  ;;  %v732_v48 = vpack.c.bf16 %v3101_v6, %v3098_v5 }
  0xd5   :  { %v724_v22 = vpack.c.bf16 %v659_v23, %v658_v53  ;;  %v2494_v61 = vunpack.i.h.bf16 %v2492_v59  ;;  %v2489_v29 = vunpack.i.h.bf16 %v3531_v37  ;;  %v2493_v54 = vunpack.i.l.bf16 %v2492_v59 }
  0xd6   :  { %v674_v63 = vsel %vm621_vm3, %v3294_v39, %v2479_v60 }
  0xd7   :  { %928 = vmatmul.bf16.gmra.mxu0 %v724_v22  ;;  %v644_v27 = vsel %vm637_vm4, %v628_v3, %v2494_v61  ;;  %v2519_v22 = vunpack.i.h.bf16 %v2517_v52 }
  0xd9   :  { %v3564_v11 = vpop.permute.xlu1 %2511 }
  0xda   :  { %v2513_v23 = vunpack.i.l.bf16 %v3564_v11  ;;  %v2514_v1 = vunpack.i.h.bf16 %v3564_v11 }
  0xdb   :  { %967 = vmatmul.bf16.vlgmr.msrb.gmra.mxu1 %v719_v38  ;;  %v2532_v38 = vpop.permute.xlu2 %2531  ;;  %2219 = vmatmul.msk.bf16.gmra.mxu3 %vm621_vm3, %v738_v42 }
  0xdc   :  { %v2507_v14 = vpop.permute.xlu0 %2506  ;;  %v677_v20 = vsel %vm621_vm3, %v3382_v47, %v2513_v23  ;;  %v3603_v46 = vunpack.i.h.bf16 %v2532_v38  ;;  %v2533_v12 = vunpack.i.l.bf16 %v2532_v38  ;;  %v678_v25 = vsel %vm621_vm3, %v3021_v24, %v2514_v1 }
  0xdd   :  { %v2508_v26 = vunpack.i.l.bf16 %v2507_v14  ;;  %2217 = vmatmul.msk.bf16.gmra.mxu2 %vm621_vm3, %v732_v48  ;;  %v2509_v59 = vunpack.i.h.bf16 %v2507_v14 }
  0xdf   :  { %v629_v56 = vsel %vm621_vm3, %v3310_v0, %v2508_v26  ;;  %v2483_v0 = vunpack.i.l.bf16 %v3521_v43  ;;  %v690_v43 = vsel %vm637_vm4, %v674_v63, %v2489_v29  ;;  %v676_v40 = vsel %vm621_vm3, %v3327_v2, %v2509_v59 }
  0xe0   :  { %v645_v9 = vsel %vm637_vm4, %v629_v56, %v2518_v15  ;;  %v706_v5 = vsel %vm653_vm5, %v690_v43, %v2503_v44  ;;  %v692_v55 = vsel %vm637_vm4, %v676_v40, %v2519_v22 }
  0xe1   :  { %v2527_v16 = vpop.permute.xlu1 %2526  ;;  %v675_v4 = vsel %vm621_vm3, %v3285_v31, %v2483_v0  ;;  %v708_v57 = vsel %vm653_vm5, %v692_v55, %v2533_v12 }
  0xe2   :  { %v2529_v17 = vunpack.i.h.bf16 %v2527_v16  ;;  %v2528_v8 = vunpack.i.l.bf16 %v2527_v16  ;;  %v691_v53 = vsel %vm637_vm4, %v675_v4, %v2493_v54 }
  0xe3   :  { %v707_v6 = vsel %vm653_vm5, %v691_v53, %v2504_v62  ;;  %v2547_v7 = vpop.permute.xlu2 %2546 }
  0xe4   :  { %v660_v28 = vsel %vm653_vm5, %v644_v27, %v2528_v8  ;;  %v661_v13 = vsel %vm653_vm5, %v645_v9, %v2529_v17  ;;  %v725_v37 = vpack.c.bf16 %v707_v6, %v706_v5  ;;  %v2522_v39 = vpop.permute.xlu0 %2521  ;;  %v2549_v52 = vunpack.i.h.bf16 %v2547_v7  ;;  %v4363_v5 = vld [vmem:[#allocation12_spill] sm:$0xff] }
  0xe5   :  { %v727_v30 = vpack.c.bf16 %v661_v13, %v660_v28  ;;  %v3597_v31 = vunpack.i.l.bf16 %v2522_v39  ;;  %v2524_v49 = vunpack.i.h.bf16 %v2522_v39  ;;  %v2548_v61 = vunpack.i.l.bf16 %v2547_v7 }
  0xe7   :  { %933 = vmatmul.bf16.gmra.mxu0 %v727_v30  ;;  %v693_v21 = vsel %vm637_vm4, %v677_v20, %v3597_v31  ;;  %v694_v15 = vsel %vm637_vm4, %v678_v25, %v2524_v49  ;;  %v2335_v49 = vld [vmem:[%s4345_s4 + $0x80] sm:$0xff] }
  0xe8   :  { %v709_v2 = vsel %vm653_vm5, %v693_v21, %v3603_v46  ;;  %v710_v11 = vsel %vm653_vm5, %v694_v15, %v2548_v61  ;;  %v3670_v25 = vld [vmem:[#allocation2] ss:$0 sm:$0xff]  ;;  %v3672_v61 = vld [vmem:[#allocation4] ss:$0 sm:$0xff] }
  0xe9   :  { %v728_v14 = vpack.c.bf16 %v709_v2, %v708_v57  ;;  %v2542_v51 = vpop.permute.xlu1 %2541  ;;  %v4365_v15 = vld [vmem:[#allocation15_spill] sm:$0xff] }
  0xea   :  { %v2543_v50 = vunpack.i.l.bf16 %v2542_v51 }
  0xeb   :  { %972 = vmatmul.bf16.gmra.mxu1 %v722_v41  ;;  %v2544_v41 = vunpack.i.h.bf16 %v2542_v51  ;;  %v2562_v8 = vpop.permute.xlu2 %2561 }
  0xec   :  { %v2537_v47 = vpop.permute.xlu0 %2536  ;;  %v2564_v19 = vunpack.i.h.bf16 %v2562_v8  ;;  %v2563_v60 = vunpack.i.l.bf16 %v2562_v8 }
  0xed   :  { %v2538_v26 = vunpack.i.l.bf16 %v2537_v47 }
  0xef   :  { %v679_v10 = vsel %vm621_vm3, %v3040_v34, %v2538_v26  ;;  %v2539_v34 = vunpack.i.h.bf16 %v2537_v47  ;;  %v2336_v26 = vld [vmem:[%s4345_s4 + $0x88] sm:$0xff] }
  0xf0   :  { %v695_v3 = vsel %vm637_vm4, %v679_v10, %v2543_v50  ;;  %2003 = vmatpush.bf16.msrb.mxu0 %v2336_v26 }
  0xf1   :  { %v711_v56 = vsel %vm653_vm5, %v695_v3, %v2549_v52  ;;  %v2557_v9 = vpop.permute.xlu1 %2556  ;;  %v680_v28 = vsel %vm621_vm3, %v3043_v35, %v2539_v34  ;;  %v4366_v3 = vrot.slane %v4365_v15, 7 }
  0xf2   :  { %v731_v32 = vpack.c.bf16 %v711_v56, %v710_v11  ;;  %v2558_v17 = vunpack.i.l.bf16 %v2557_v9  ;;  %v696_v0 = vsel %vm637_vm4, %v680_v28, %v2544_v41  ;;  %v2559_v44 = vunpack.i.h.bf16 %v2557_v9 }
  0xf3   :  { %v712_v48 = vsel %vm653_vm5, %v696_v0, %v2563_v60  ;;  %v2577_v53 = vpop.permute.xlu2 %2576  ;;  %v178_v11 = vsel %vm146_vm0, %v4366_v3, 0.0 }
  0xf4   :  { %v2552_v24 = vpop.permute.xlu0 %2551  ;;  %v2579_v39 = vunpack.i.h.bf16 %v2577_v53  ;;  %v2578_v22 = vunpack.i.l.bf16 %v2577_v53  ;;  %2004 = vmatpush.bf16.msrb.mxu0 %v2335_v49  ;;  %v328_v28 = vrot.slane %v178_v11, 2 }
  0xf5   :  { %v2553_v27 = vunpack.i.l.bf16 %v2552_v24  ;;  %v2554_v35 = vunpack.i.h.bf16 %v2552_v24  ;;  %v4367_v24 = vld [vmem:[#allocation16_spill] sm:$0xff] }
  0xf6   :  { %v305_v34 = vrot.slane %v4367_v24, 1  ;;  %v327_v8 = vrot.slane %v4367_v24, 2 }
  0xf7   :  { %v681_v13 = vsel %vm621_vm3, %v3084_v58, %v2553_v27  ;;  %v682_v6 = vsel %vm621_vm3, %v4363_v5, %v2554_v35  ;;  %v306_v27 = vrot.slane %v178_v11, 1 }
  0xf8   :  { %v697_v30 = vsel %vm637_vm4, %v681_v13, %v2558_v17  ;;  %v698_v38 = vsel %vm637_vm4, %v682_v6, %v2559_v44  ;;  %v3692_v35 = vsel %vm253_vm2, %v327_v8, %v328_v28 }
  0xf9   :  { %v713_v29 = vsel %vm653_vm5, %v697_v30, %v2564_v19  ;;  %v3643_v62 = vpop.permute.xlu1 %2571  ;;  %v714_v20 = vsel %vm653_vm5, %v698_v38, %v2578_v22  ;;  %v3682_v60 = vsel %vm208_vm1, %v305_v34, %v306_v27 }
  0xfa   :  { %v734_v54 = vpack.c.bf16 %v713_v29, %v712_v48  ;;  %v2573_v43 = vunpack.i.l.bf16 %v3643_v62 }
  0xfb   :  { %977 = vmatmul.bf16.gmra.mxu1 %v725_v37  ;;  %v4364_v37 = vld [vmem:[#allocation13_spill] sm:$0xff] }
  0xfc   :  { %v3638_v63 = vpop.permute.xlu0 %2566 }
  0xfd   :  { %v2568_v58 = vunpack.i.l.bf16 %v3638_v63 }
  0xff   :  { %v683_v59 = vsel %vm621_vm3, %v4364_v37, %v2568_v58 }
 0x100   :  { %v699_v40 = vsel %vm637_vm4, %v683_v59, %v2573_v43 }
 0x101   :  { %v715_v12 = vsel %vm653_vm5, %v699_v40, %v2579_v39 }
 0x102   :  { %v737_v45 = vpack.c.bf16 %v715_v12, %v714_v20 }
 0x10b   :  { %982 = vmatmul.bf16.gmra.mxu1 %v728_v14 }
 0x118   :  { %v3626_v16 = vpop.f32.mrf.mxu1 }
 0x11b   :  { %987 = vmatmul.bf16.gmra.mxu1 %v731_v32 }
 0x120   :  { %v3632_v18 = vpop.f32.mrf.mxu1  ;;  %v1017_v2 = vpop.f32.mrf.mxu2 }
 0x128   :  { %v3640_v4 = vpop.f32.mrf.mxu1  ;;  %v1019_v1 = vpop.f32.mrf.mxu2 }
 0x12b   :  { %992 = vmatmul.bf16.gmra.mxu1 %v734_v54 }
 0x130   :  { %v3650_v23 = vpop.f32.mrf.mxu1  ;;  %v1022_v10 = vpop.f32.mrf.mxu2 }
 0x134   :  { %v919_v14 = vpop.f32.mrf.mxu0 }
 0x138   :  { %v3656_v55 = vpop.f32.mrf.mxu1  ;;  %v1024_v0 = vpop.f32.mrf.mxu2 }
 0x13b   :  { %997 = vmatmul.bf16.gmra.mxu1 %v737_v45 }
 0x13c   :  { %v921_v51 = vpop.f32.mrf.mxu0 }
 0x140   :  { %v3658_v21 = vpop.f32.mrf.mxu1  ;;  %v1027_v26 = vpop.f32.mrf.mxu2 }
 0x144   :  { %v924_v42 = vpop.f32.mrf.mxu0 }
 0x148   :  { %v3660_v57 = vpop.f32.mrf.mxu1 }
 0x14c   :  { %v926_v53 = vpop.f32.mrf.mxu0 }
 0x150   :  { %v3662_v47 = vpop.f32.mrf.mxu1 }
 0x154   :  { %v929_v15 = vpop.f32.mrf.mxu0 }
 0x158   :  { %v968_v50 = vpop.f32.mrf.mxu1 }
 0x159   :  { %v969_v7 = vadd.f32 %v968_v50, %v919_v14 }
 0x15b   :  { %v1018_v52 = vadd.f32 %v1017_v2, %v969_v7 }
 0x15d   :  { %v1061_v56 = vmul.f32 %v3670_v25, %v1018_v52 }
 0x15f   :  { %v1081_v32 = vadd.f32 %v3672_v61, %v1061_v56 }
 0x160   :  { %v970_v9 = vpop.f32.mrf.mxu1 }
 0x161   :  { %v1097_v41 = vmax.f32 %v1081_v32, 0.0  ;;  %v971_v17 = vadd.f32 %v970_v9, %v921_v51 }
 0x163   :  { %v1129_v13 = vrot.slane %v1097_v41, 7  ;;  %v1020_v19 = vadd.f32 %v1019_v1, %v971_v17 }
 0x165   :  { %v1177_v30 = vsel %vm146_vm0, %v1129_v13, 0.0  ;;  %v1062_v48 = vmul.f32 %v3670_v25, %v1020_v19  ;;  %v3687_v29 = vsel %vm146_vm0, 0.0, %v1129_v13 }
 0x166   :  { %v2585_v54 = vpack.i.bf16 %v3687_v29, %v3682_v60  ;;  %v1221_v58 = vrot.slane %v3687_v29, 1  ;;  %v1222_v44 = vrot.slane %v1177_v30, 1  ;;  %v1263_v40 = vrot.slane %v3687_v29, 2 }
 0x167   :  { %v1082_v43 = vadd.f32 %v3672_v61, %v1062_v48  ;;  %v1264_v20 = vrot.slane %v1177_v30, 2 }
 0x168   :  { %v973_v5 = vpop.f32.mrf.mxu1  ;;  %2586 = vrot.lane.b32.xlu1 %v2585_v54, %s2929_s27  ;;  %v3698_v6 = vsel %vm208_vm1, %v1221_v58, %v1222_v44  ;;  %v1029_v58 = vpop.f32.mrf.mxu2 }
 0x169   :  { %v1098_v37 = vmax.f32 %v1082_v43, 0.0  ;;  %v974_v59 = vadd.f32 %v973_v5, %v924_v42  ;;  %v2580_v39 = vpack.i.bf16 %v3698_v6, %v3692_v35  ;;  %v1265_v49 = vsel %vm253_vm2, %v1263_v40, %v1264_v20 }
 0x16b   :  { %v1130_v22 = vrot.slane %v1098_v37, 7  ;;  %v1023_v38 = vadd.f32 %v1022_v10, %v974_v59  ;;  %2581 = vrot.lane.b32.xlu0 %v2580_v39, %s2930_s9  ;;  %v931_v59 = vpop.f32.mrf.mxu0 }
 0x16d   :  { %v3705_v12 = vsel %vm146_vm0, 0.0, %v1130_v22  ;;  %v1178_v45 = vsel %vm146_vm0, %v1130_v22, 0.0  ;;  %v1063_v2 = vmul.f32 %v3670_v25, %v1023_v38 }
 0x16e   :  { %v1267_v14 = vrot.slane %v1178_v45, 2  ;;  %v1266_v1 = vrot.slane %v3705_v12, 2  ;;  %v1225_v50 = vrot.slane %v1178_v45, 1  ;;  %v2590_v10 = vpack.i.bf16 %v3705_v12, %v1265_v49 }
 0x16f   :  { %v1083_v51 = vadd.f32 %v3672_v61, %v1063_v2  ;;  %v1224_v42 = vrot.slane %v3705_v12, 1 }
 0x170   :  { %v975_v7 = vpop.f32.mrf.mxu1  ;;  %v1268_v52 = vsel %vm253_vm2, %v1266_v1, %v1267_v14 }
 0x171   :  { %v1099_v3 = vmax.f32 %v1083_v51, 0.0  ;;  %v976_v11 = vadd.f32 %v975_v7, %v926_v53  ;;  %v2595_v56 = vpack.i.bf16 %v1268_v52, %v1265_v49  ;;  %v3723_v41 = vsel %vm208_vm1, %v1224_v42, %v1225_v50 }
 0x172   :  { %v2600_v48 = vpack.i.bf16 %v3723_v41, %v3705_v12 }
 0x173   :  { %v1131_v32 = vrot.slane %v1099_v3, 7  ;;  %v1025_v24 = vadd.f32 %v1024_v0, %v976_v11  ;;  %2591 = vrot.lane.b32.xlu0 %v2590_v10, %s2931_s12  ;;  %2596 = vrot.lane.b32.xlu2 %v2595_v56, %s2930_s9  ;;  %v1032_v3 = vpop.f32.mrf.mxu2  ;;  %v934_v42 = vpop.f32.mrf.mxu0 }
 0x175   :  { %v3718_v34 = vsel %vm146_vm0, 0.0, %v1131_v32  ;;  %v1179_v27 = vsel %vm146_vm0, %v1131_v32, 0.0  ;;  %v1064_v9 = vmul.f32 %v3670_v25, %v1025_v24 }
 0x176   :  { %v1228_v17 = vrot.slane %v1179_v27, 1  ;;  %v1269_v8 = vrot.slane %v3718_v34, 2  ;;  %v1270_v28 = vrot.slane %v1179_v27, 2  ;;  %v2605_v13 = vpack.i.bf16 %v1268_v52, %v3718_v34 }
 0x177   :  { %v1084_v19 = vadd.f32 %v3672_v61, %v1064_v9  ;;  %v1227_v0 = vrot.slane %v3718_v34, 1 }
 0x178   :  { %v978_v30 = vpop.f32.mrf.mxu1  ;;  %2606 = vrot.lane.b32.xlu1 %v2605_v13, %s2931_s12  ;;  %v1271_v54 = vsel %vm253_vm2, %v1269_v8, %v1270_v28 }
 0x179   :  { %v1100_v44 = vmax.f32 %v1084_v19, 0.0  ;;  %v979_v43 = vadd.f32 %v978_v30, %v929_v15  ;;  %v1709_v53 = vpack.c.bf16 %v1271_v54, %v1268_v52  ;;  %v3734_v5 = vsel %vm208_vm1, %v1227_v0, %v1228_v17 }
 0x17a   :  { %v2610_v37 = vpack.i.bf16 %v3718_v34, %v3734_v5  ;;  %v2615_v2 = vpack.i.bf16 %v3734_v5, %v3723_v41 }
 0x17b   :  { %v1132_v39 = vrot.slane %v1100_v44, 7  ;;  %v1028_v22 = vadd.f32 %v1027_v26, %v979_v43  ;;  %2601 = vrot.lane.b32.xlu2 %v2600_v48, %s2929_s27  ;;  %2293 = vmatmul.msk.bf16.vlgmr.msrb.gmra.mxu0 %vm621_vm3, %v1709_v53 }
 0x17c   :  { %2611 = vrot.lane.b32.xlu0 %v2610_v37, %s2929_s27 }
 0x17d   :  { %v3742_v38 = vsel %vm146_vm0, 0.0, %v1132_v39  ;;  %v1180_v40 = vsel %vm146_vm0, %v1132_v39, 0.0  ;;  %v1065_v20 = vmul.f32 %v3670_v25, %v1028_v22  ;;  %v1034_v22 = vpop.f32.mrf.mxu2 }
 0x17e   :  { %v1273_v45 = vrot.slane %v1180_v40, 2  ;;  %v1272_v14 = vrot.slane %v3742_v38, 2  ;;  %v1231_v26 = vrot.slane %v1180_v40, 1  ;;  %v1230_v52 = vrot.slane %v3742_v38, 1 }
 0x17f   :  { %v1085_v1 = vadd.f32 %v3672_v61, %v1065_v20  ;;  %v2620_v15 = vpack.i.bf16 %v3742_v38, %v1271_v54 }
 0x180   :  { %v980_v51 = vpop.f32.mrf.mxu1  ;;  %2616 = vrot.lane.b32.xlu1 %v2615_v2, %s2930_s9  ;;  %v1274_v49 = vsel %vm253_vm2, %v1272_v14, %v1273_v45  ;;  %v3762_v9 = vsel %vm208_vm1, %v1230_v52, %v1231_v26 }
 0x181   :  { %v1101_v50 = vmax.f32 %v1085_v1, 0.0  ;;  %v981_v7 = vadd.f32 %v980_v51, %v931_v59  ;;  %v2625_v10 = vpack.i.bf16 %v1274_v49, %v1271_v54  ;;  %v2630_v48 = vpack.i.bf16 %v3762_v9, %v3742_v38  ;;  %v936_v1 = vpop.f32.mrf.mxu0 }
 0x183   :  { %v1133_v11 = vrot.slane %v1101_v50, 7  ;;  %v1030_v56 = vadd.f32 %v1029_v58, %v981_v7  ;;  %2626 = vrot.lane.b32.xlu2 %v2625_v10, %s2930_s9 }
 0x184   :  { %2621 = vrot.lane.b32.xlu0 %v2620_v15, %s2931_s12 }
 0x185   :  { %v3757_v32 = vsel %vm146_vm0, 0.0, %v1133_v11  ;;  %v1181_v24 = vsel %vm146_vm0, %v1133_v11, 0.0  ;;  %v1066_v27 = vmul.f32 %v3670_v25, %v1030_v56 }
 0x186   :  { %v1234_v17 = vrot.slane %v1181_v24, 1  ;;  %v1276_v8 = vrot.slane %v1181_v24, 2  ;;  %v2635_v28 = vpack.i.bf16 %v1274_v49, %v3757_v32  ;;  %v1275_v13 = vrot.slane %v3757_v32, 2 }
 0x187   :  { %v1086_v19 = vadd.f32 %v3672_v61, %v1066_v27  ;;  %v1233_v0 = vrot.slane %v3757_v32, 1 }
 0x188   :  { %v983_v30 = vpop.f32.mrf.mxu1  ;;  %2636 = vrot.lane.b32.xlu1 %v2635_v28, %s2931_s12  ;;  %v1277_v54 = vsel %vm253_vm2, %v1275_v13, %v1276_v8 }
 0x189   :  { %v1102_v58 = vmax.f32 %v1086_v19, 0.0  ;;  %v984_v44 = vadd.f32 %v983_v30, %v934_v42  ;;  %v1712_v43 = vpack.c.bf16 %v1277_v54, %v1274_v49  ;;  %v3773_v53 = vsel %vm208_vm1, %v1233_v0, %v1234_v17  ;;  %v1037_v0 = vpop.f32.mrf.mxu2 }
 0x18a   :  { %v2640_v37 = vpack.i.bf16 %v3757_v32, %v3773_v53  ;;  %v2645_v14 = vpack.i.bf16 %v3773_v53, %v3762_v9 }
 0x18b   :  { %v1134_v59 = vrot.slane %v1102_v58, 7  ;;  %v1033_v39 = vadd.f32 %v1032_v3, %v984_v44  ;;  %2631 = vrot.lane.b32.xlu2 %v2630_v48, %s2929_s27  ;;  %2294 = vmatmul.msk.bf16.gmra.mxu0 %vm621_vm3, %v1712_v43 }
 0x18c   :  { %2641 = vrot.lane.b32.xlu0 %v2640_v37, %s2929_s27 }
 0x18d   :  { %v3781_v40 = vsel %vm146_vm0, 0.0, %v1134_v59  ;;  %v1182_v20 = vsel %vm146_vm0, %v1134_v59, 0.0  ;;  %v1067_v45 = vmul.f32 %v3670_v25, %v1033_v39 }
 0x18e   :  { %v1279_v2 = vrot.slane %v1182_v20, 2  ;;  %v1278_v26 = vrot.slane %v3781_v40, 2  ;;  %v1237_v49 = vrot.slane %v1182_v20, 1  ;;  %v2650_v7 = vpack.i.bf16 %v3781_v40, %v1277_v54 }
 0x18f   :  { %v1087_v51 = vadd.f32 %v3672_v61, %v1067_v45  ;;  %v1236_v52 = vrot.slane %v3781_v40, 1 }
 0x190   :  { %v985_v50 = vpop.f32.mrf.mxu1  ;;  %2646 = vrot.lane.b32.xlu1 %v2645_v14, %s2930_s9  ;;  %v1280_v10 = vsel %vm253_vm2, %v1278_v26, %v1279_v2 }
 0x191   :  { %v1103_v15 = vmax.f32 %v1087_v51, 0.0  ;;  %v986_v3 = vadd.f32 %v985_v50, %v936_v1  ;;  %v2655_v11 = vpack.i.bf16 %v1280_v10, %v1277_v54  ;;  %v3796_v24 = vsel %vm208_vm1, %v1236_v52, %v1237_v49 }
 0x192   :  { %v2665_v54 = vpack.i.bf16 %v3796_v24, %v3781_v40 }
 0x193   :  { %v1135_v56 = vrot.slane %v1103_v15, 7  ;;  %v1035_v42 = vadd.f32 %v1034_v22, %v986_v3  ;;  %2656 = vrot.lane.b32.xlu2 %v2655_v11, %s2930_s9  ;;  %v1039_v15 = vpop.f32.mrf.mxu2 }
 0x194   :  { %2651 = vrot.lane.b32.xlu0 %v2650_v7, %s2931_s12 }
 0x195   :  { %v3799_v27 = vsel %vm146_vm0, 0.0, %v1135_v56  ;;  %v1183_v17 = vsel %vm146_vm0, %v1135_v56, 0.0  ;;  %v1068_v8 = vmul.f32 %v3670_v25, %v1035_v42 }
 0x196   :  { %v1240_v28 = vrot.slane %v1183_v17, 1  ;;  %v1282_v13 = vrot.slane %v1183_v17, 2  ;;  %v2660_v19 = vpack.i.bf16 %v1280_v10, %v3799_v27  ;;  %v1281_v30 = vrot.slane %v3799_v27, 2 }
 0x197   :  { %v1088_v48 = vadd.f32 %v3672_v61, %v1068_v8  ;;  %v1239_v58 = vrot.slane %v3799_v27, 1 }
 0x198   :  { %v988_v44 = vpop.f32.mrf.mxu1  ;;  %2661 = vrot.lane.b32.xlu1 %v2660_v19, %s2931_s12  ;;  %v1283_v43 = vsel %vm253_vm2, %v1281_v30, %v1282_v13 }
 0x199   :  { %v1104_v37 = vmax.f32 %v1088_v48, 0.0  ;;  %v989_v59 = vadd.f32 %v988_v44, %v3626_v16  ;;  %v1715_v39 = vpack.c.bf16 %v1283_v43, %v1280_v10  ;;  %v3813_v22 = vsel %vm208_vm1, %v1239_v58, %v1240_v28  ;;  %v1042_v28 = vpop.f32.mrf.mxu3 }
 0x19a   :  { %v2670_v20 = vpack.i.bf16 %v3799_v27, %v3813_v22  ;;  %v2675_v14 = vpack.i.bf16 %v3813_v22, %v3796_v24 }
 0x19b   :  { %v1136_v45 = vrot.slane %v1104_v37, 7  ;;  %v1038_v2 = vadd.f32 %v1037_v0, %v989_v59  ;;  %2666 = vrot.lane.b32.xlu2 %v2665_v54, %s2929_s27  ;;  %2295 = vmatmul.msk.bf16.gmra.mxu0 %vm621_vm3, %v1715_v39 }
 0x19c   :  { %2671 = vrot.lane.b32.xlu0 %v2670_v20, %s2929_s27 }
 0x19d   :  { %v1168_v16 = vsel %vm146_vm0, 0.0, %v1136_v45  ;;  %v1184_v1 = vsel %vm146_vm0, %v1136_v45, 0.0  ;;  %v1069_v26 = vmul.f32 %v3670_v25, %v1038_v2 }
 0x19e   :  { %v1310_v51 = vrot.slane %v1184_v1, 1  ;;  %v1332_v49 = vrot.slane %v1184_v1, 2  ;;  %v1331_v50 = vrot.slane %v1168_v16, 2  ;;  %v1309_v10 = vrot.slane %v1168_v16, 1 }
 0x19f   :  { %v1089_v7 = vadd.f32 %v3672_v61, %v1069_v26  ;;  %v2685_v11 = vpack.i.bf16 %v1168_v16, %v1283_v43 }
 0x1a0   :  { %v990_v52 = vpop.f32.mrf.mxu1  ;;  %2676 = vrot.lane.b32.xlu1 %v2675_v14, %s2930_s9  ;;  %v1333_v3 = vsel %vm253_vm2, %v1331_v50, %v1332_v49  ;;  %v3830_v8 = vsel %vm208_vm1, %v1309_v10, %v1310_v51  ;;  %v2326_v49 = vld [vmem:[%s4345_s4 + $0x38] sm:$0xff] }
 0x1a1   :  { %v1105_v56 = vmax.f32 %v1089_v7, 0.0  ;;  %v991_v42 = vadd.f32 %v990_v52, %v3632_v18  ;;  %v2680_v17 = vpack.i.bf16 %v1333_v3, %v1283_v43  ;;  %v2690_v0 = vpack.i.bf16 %v3830_v8, %v1168_v16  ;;  %v1044_v51 = vpop.f32.mrf.mxu3  ;;  %1899 = vmatpush.bf16.msrb.mxu3 %v2326_v49 }
 0x1a2   :  { %v1718_v59 = vpack.c.bf16 %v3037_v33, %v1333_v3  ;;  %v741_v49 = vpack.c.bf16 %v3037_v33, %v3692_v35 }
 0x1a3   :  { %v1137_v13 = vrot.slane %v1105_v56, 7  ;;  %v1040_v19 = vadd.f32 %v1039_v15, %v991_v42  ;;  %2681 = vrot.lane.b32.xlu2 %v2680_v17, %s2930_s9 }
 0x1a4   :  { %2686 = vrot.lane.b32.xlu0 %v2685_v11, %s2931_s12  ;;  %2220 = vmatmul.msk.bf16.gmra.mxu3 %vm621_vm3, %v741_v49 }
 0x1a5   :  { %v3836_v30 = vsel %vm146_vm0, 0.0, %v1137_v13  ;;  %v1185_v48 = vsel %vm146_vm0, %v1137_v13, 0.0  ;;  %v1070_v18 = vmul.f32 %v3670_v25, %v1040_v19 }
 0x1a6   :  { %v1243_v54 = vrot.slane %v1185_v48, 1  ;;  %v1285_v58 = vrot.slane %v1185_v48, 2  ;;  %v1242_v44 = vrot.slane %v3836_v30, 1  ;;  %v1284_v43 = vrot.slane %v3836_v30, 2 }
 0x1a7   :  { %v1090_v37 = vadd.f32 %v3672_v61, %v1070_v18 }
 0x1a8   :  { %v993_v39 = vpop.f32.mrf.mxu1  ;;  %2691 = vrot.lane.b32.xlu1 %v2690_v0, %s2929_s27  ;;  %v3846_v20 = vsel %vm208_vm1, %v1242_v44, %v1243_v54  ;;  %v1286_v45 = vsel %vm253_vm2, %v1284_v43, %v1285_v58  ;;  %v2334_v58 = vld [vmem:[%s4345_s4 + $0x78] sm:$0xff]  ;;  %v2324_v44 = vld [vmem:[%s4345_s4 + $0x28] sm:$0xff] }
 0x1a9   :  { %v1106_v2 = vmax.f32 %v1090_v37, 0.0  ;;  %v994_v14 = vadd.f32 %v993_v39, %v3640_v4  ;;  %v2695_v16 = vpack.i.bf16 %v1286_v45, %v3846_v20  ;;  %1948 = vmatpush.bf16.msrb.mxu2 %v2334_v58 }
 0x1ab   :  { %v1138_v1 = vrot.slane %v1106_v2, 7  ;;  %v1043_v26 = vadd.f32 %v1042_v28, %v994_v14  ;;  %2696 = vrot.lane.b32.xlu2 %v2695_v16, %s2930_s9  ;;  %2296 = vmatmul.msk.bf16.gmra.mxu0 %vm621_vm3, %v1718_v59  ;;  %v2325_v28 = vld [vmem:[%s4345_s4 + $0x30] sm:$0xff]  ;;  %v1047_v2 = vpop.f32.mrf.mxu3 }
 0x1ac   :  { %1900 = vmatpush.bf16.msrb.mxu3 %v2325_v28  ;;  %v2333_v16 = vld [vmem:[%s4345_s4 + $0x70] sm:$0xff]  ;;  %v2322_v28 = vld [vmem:[%s4345_s4 + $0x18] sm:$0xff] }
 0x1ad   :  { %v3857_v50 = vsel %vm146_vm0, 0.0, %v1138_v1  ;;  %v1186_v7 = vsel %vm146_vm0, %v1138_v1, 0.0  ;;  %v1071_v4 = vmul.f32 %v3670_v25, %v1043_v26  ;;  %v2323_v1 = vld [vmem:[%s4345_s4 + $0x20] sm:$0xff]  ;;  %1949 = vmatpush.bf16.msrb.mxu2 %v2333_v16 }
 0x1ae   :  { %v1246_v10 = vrot.slane %v1186_v7, 1  ;;  %v1288_v52 = vrot.slane %v1186_v7, 2  ;;  %v2700_v15 = vpack.i.bf16 %v3857_v50, %v1286_v45  ;;  %v1245_v3 = vrot.slane %v3857_v50, 1 }
 0x1af   :  { %v1091_v11 = vadd.f32 %v3672_v61, %v1071_v4  ;;  %v1287_v56 = vrot.slane %v3857_v50, 2 }
 0x1b0   :  { %v995_v42 = vpop.f32.mrf.mxu1  ;;  %2701 = vrot.lane.b32.xlu1 %v2700_v15, %s2931_s12  ;;  %v3867_v17 = vsel %vm208_vm1, %v1245_v3, %v1246_v10  ;;  %1901 = vmatpush.bf16.msrb.mxu3 %v2324_v44 }
 0x1b1   :  { %v1107_v13 = vmax.f32 %v1091_v11, 0.0  ;;  %v996_v19 = vadd.f32 %v995_v42, %v3650_v23  ;;  %v1289_v0 = vsel %vm253_vm2, %v1287_v56, %v1288_v52  ;;  %v2710_v11 = vpack.i.bf16 %v3857_v50, %v3836_v30 }
 0x1b2   :  { %v2705_v48 = vpack.i.bf16 %v3867_v17, %v1289_v0 }
 0x1b3   :  { %v1139_v18 = vrot.slane %v1107_v13, 7  ;;  %v1045_v54 = vadd.f32 %v1044_v51, %v996_v19 }
 0x1b4   :  { %2706 = vrot.lane.b32.xlu0 %v2705_v48, %s2930_s9  ;;  %1902 = vmatpush.bf16.msrb.mxu3 %v2323_v1 }
 0x1b5   :  { %v3883_v43 = vsel %vm146_vm0, 0.0, %v1139_v18  ;;  %v1187_v23 = vsel %vm146_vm0, %v1139_v18, 0.0  ;;  %v1072_v37 = vmul.f32 %v3670_v25, %v1045_v54 }
 0x1b6   :  { %v1249_v59 = vrot.slane %v1187_v23, 1  ;;  %v1291_v39 = vrot.slane %v1187_v23, 2  ;;  %v2715_v45 = vpack.i.bf16 %v1289_v0, %v3883_v43  ;;  %v1290_v14 = vrot.slane %v3883_v43, 2 }
 0x1b7   :  { %v1092_v26 = vadd.f32 %v3672_v61, %v1072_v37  ;;  %v1248_v51 = vrot.slane %v3883_v43, 1  ;;  %v2331_v37 = vld [vmem:[%s4345_s4 + $0x60] sm:$0xff] }
 0x1b8   :  { %v998_v7 = vpop.f32.mrf.mxu1  ;;  %2716 = vrot.lane.b32.xlu2 %v2715_v45, %s2931_s12  ;;  %v1292_v4 = vsel %vm253_vm2, %v1290_v14, %v1291_v39  ;;  %1903 = vmatpush.bf16.msrb.mxu3 %v2322_v28  ;;  %v1049_v39 = vpop.f32.mrf.mxu3  ;;  %v2321_v14 = vld [vmem:[%s4345_s4 + $0x10] sm:$0xff] }
 0x1b9   :  { %v1108_v10 = vmax.f32 %v1092_v26, 0.0  ;;  %v999_v52 = vadd.f32 %v998_v7, %v3656_v55  ;;  %v1721_v15 = vpack.c.bf16 %v1292_v4, %v1289_v0  ;;  %v3903_v3 = vsel %vm208_vm1, %v1248_v51, %v1249_v59  ;;  %v2332_v55 = vld [vmem:[%s4345_s4 + $0x68] sm:$0xff]  ;;  %v2330_v51 = vld [vmem:[%s4345_s4 + $0x58] sm:$0xff] }
 0x1ba   :  { %v2720_v35 = vpack.i.bf16 %v3903_v3, %v3867_v17  ;;  %v2725_v48 = vpack.i.bf16 %v1292_v4, %v3903_v3  ;;  %1950 = vmatpush.bf16.msrb.mxu2 %v2332_v55 }
 0x1bb   :  { %v1140_v56 = vrot.slane %v1108_v10, 7  ;;  %v1048_v42 = vadd.f32 %v1047_v2, %v999_v52  ;;  %2297 = vmatmul.msk.bf16.gmra.mxu0 %vm621_vm3, %v1721_v15 }
 0x1bc   :  { %2711 = vrot.lane.b32.xlu0 %v2710_v11, %s2929_s27  ;;  %2721 = vrot.lane.b32.xlu1 %v2720_v35, %s2929_s27 }
 0x1bd   :  { %v3920_v13 = vsel %vm146_vm0, 0.0, %v1140_v56  ;;  %v1188_v19 = vsel %vm146_vm0, %v1140_v56, 0.0  ;;  %v1073_v0 = vmul.f32 %v3670_v25, %v1048_v42  ;;  %1904 = vmatpush.bf16.msrb.mxu3 %v2321_v14 }
 0x1be   :  { %v1252_v18 = vrot.slane %v1188_v19, 1  ;;  %v1294_v54 = vrot.slane %v1188_v19, 2  ;;  %v1251_v58 = vrot.slane %v3920_v13, 1  ;;  %v1293_v44 = vrot.slane %v3920_v13, 2  ;;  %1951 = vmatpush.bf16.msrb.mxu2 %v2331_v37  ;;  %v2329_v19 = vld [vmem:[%s4345_s4 + $0x50] sm:$0xff] }
 0x1bf   :  { %v1093_v23 = vadd.f32 %v3672_v61, %v1073_v0  ;;  %v2730_v49 = vpack.i.bf16 %v3920_v13, %v1292_v4  ;;  %v2319_v0 = vld [vmem:[%s4345_s4] sm:$0xff] }
 0x1c0   :  { %v1000_v59 = vpop.f32.mrf.mxu1  ;;  %2726 = vrot.lane.b32.xlu2 %v2725_v48, %s2930_s9  ;;  %v3933_v45 = vsel %vm208_vm1, %v1251_v58, %v1252_v18  ;;  %v1295_v2 = vsel %vm253_vm2, %v1293_v44, %v1294_v54 }
 0x1c1   :  { %v1109_v16 = vmax.f32 %v1093_v23, 0.0  ;;  %v1001_v1 = vadd.f32 %v1000_v59, %v3658_v21  ;;  %v2735_v26 = vpack.i.bf16 %v3933_v45, %v1295_v2  ;;  %v2320_v21 = vld [vmem:[%s4345_s4 + $0x8] sm:$0xff] }
 0x1c2   :  { %1952 = vmatpush.bf16.msrb.mxu2 %v2330_v51  ;;  %1905 = vmatpush.bf16.msrb.mxu3 %v2320_v21  ;;  %v2328_v23 = vld [vmem:[%s4345_s4 + $0x48] sm:$0xff] }
 0x1c3   :  { %v1141_v7 = vrot.slane %v1109_v16, 7  ;;  %v1050_v10 = vadd.f32 %v1049_v39, %v1001_v1 }
 0x1c4   :  { %2736 = vrot.lane.b32.xlu0 %v2735_v26, %s2930_s9  ;;  %2731 = vrot.lane.b32.xlu1 %v2730_v49, %s2931_s12  ;;  %v2327_v26 = vld [vmem:[%s4345_s4 + $0x40] sm:$0xff] }
 0x1c5   :  { %v3951_v52 = vsel %vm146_vm0, 0.0, %v1141_v7  ;;  %v1189_v15 = vsel %vm146_vm0, %v1141_v7, 0.0  ;;  %v1074_v11 = vmul.f32 %v3670_v25, %v1050_v10 }
 0x1c6   :  { %v1255_v4 = vrot.slane %v1189_v15, 1  ;;  %v1297_v35 = vrot.slane %v1189_v15, 2  ;;  %v2745_v56 = vpack.i.bf16 %v1295_v2, %v3951_v52  ;;  %v1296_v42 = vrot.slane %v3951_v52, 2  ;;  %1953 = vmatpush.bf16.msrb.mxu2 %v2329_v19  ;;  %1906 = vmatpush.bf16.msrb.mxu3 %v2319_v0 }
 0x1c7   :  { %v1094_v55 = vadd.f32 %v3672_v61, %v1074_v11  ;;  %v1254_v28 = vrot.slane %v3951_v52, 1  ;;  %v2740_v61 = vpack.i.bf16 %v3920_v13, %v3883_v43  ;;  %v2569_v15 = vunpack.i.h.bf16 %v3638_v63 }
 0x1c8   :  { %2746 = vrot.lane.b32.xlu2 %v2745_v56, %s2931_s12  ;;  %v1298_v25 = vsel %vm253_vm2, %v1296_v42, %v1297_v35  ;;  %v2574_v35 = vunpack.i.h.bf16 %v3643_v62 }
 0x1c9   :  { %v1110_v48 = vmax.f32 %v1094_v55, 0.0  ;;  %v1724_v18 = vpack.c.bf16 %v1298_v25, %v1295_v2  ;;  %v3968_v54 = vsel %vm208_vm1, %v1254_v28, %v1255_v4  ;;  %v4368_v55 = vld [vmem:[#allocation14_spill] sm:$0xff] }
 0x1ca   :  { %v2750_v58 = vpack.i.bf16 %v3968_v54, %v3933_v45  ;;  %1954 = vmatpush.bf16.msrb.mxu2 %v2328_v23  ;;  %v2755_v14 = vpack.i.bf16 %v1298_v25, %v3968_v54  ;;  %v684_v28 = vsel %vm621_vm3, %v4368_v55, %v2569_v15 }
 0x1cb   :  { %v1142_v44 = vrot.slane %v1110_v48, 7  ;;  %2298 = vmatmul.msk.bf16.gmra.mxu0 %vm621_vm3, %v1724_v18  ;;  %v700_v63 = vsel %vm637_vm4, %v684_v28, %v2574_v35 }
 0x1cc   :  { %2741 = vrot.lane.b32.xlu0 %v2740_v61, %s2929_s27  ;;  %2751 = vrot.lane.b32.xlu1 %v2750_v58, %s2929_s27 }
 0x1cd   :  { %v3981_v37 = vsel %vm146_vm0, 0.0, %v1142_v44  ;;  %v1190_v59 = vsel %vm146_vm0, %v1142_v44, 0.0  ;;  %v2597_v21 = vpop.permute.xlu2 %2596 }
 0x1ce   :  { %v1258_v39 = vrot.slane %v1190_v59, 1  ;;  %v1300_v2 = vrot.slane %v1190_v59, 2  ;;  %v1257_v16 = vrot.slane %v3981_v37, 1  ;;  %v1299_v1 = vrot.slane %v3981_v37, 2  ;;  %1955 = vmatpush.bf16.msrb.mxu2 %v2327_v26 }
 0x1cf   :  { %v2760_v10 = vpack.i.bf16 %v3981_v37, %v1298_v25  ;;  %v2775_v11 = vpack.i.bf16 %v3981_v37, %v3951_v52 }
 0x1d0   :  { %2756 = vrot.lane.b32.xlu2 %v2755_v14, %s2930_s9  ;;  %v3992_v51 = vsel %vm208_vm1, %v1257_v16, %v1258_v39  ;;  %v3995_v49 = vsel %vm253_vm2, %v1299_v1, %v1300_v2  ;;  %v2598_v16 = vunpack.i.l.bf16 %v2597_v21 }
 0x1d1   :  { %v2765_v7 = vpack.i.bf16 %v3992_v51, %v3995_v49 }
 0x1d2   :  { %v1659_v35 = vsel %vm621_vm3, %v3698_v6, %v2598_v16 }
 0x1d4   :  { %2766 = vrot.lane.b32.xlu0 %v2765_v7, %s2930_s9  ;;  %2761 = vrot.lane.b32.xlu1 %v2760_v10, %s2931_s12 }
 0x1d5   :  { %v2602_v56 = vpop.permute.xlu2 %2601 }
 0x1d6   :  { %v2603_v39 = vunpack.i.l.bf16 %v2602_v56  ;;  %v2604_v28 = vunpack.i.h.bf16 %v2602_v56 }
 0x1da   :  { %v2587_v4 = vpop.permute.xlu1 %2586 }
 0x1db   :  { %v2588_v19 = vunpack.i.l.bf16 %v2587_v4  ;;  %v2589_v44 = vunpack.i.h.bf16 %v2587_v4 }
 0x1dc   :  { %2776 = vrot.lane.b32.xlu0 %v2775_v11, %s2929_s27  ;;  %v2599_v11 = vunpack.i.h.bf16 %v2597_v21 }
 0x1dd   :  { %v2582_v42 = vpop.permute.xlu0 %2581  ;;  %v716_v18 = vsel %vm653_vm5, %v700_v63, %v2588_v19  ;;  %v2627_v2 = vpop.permute.xlu2 %2626  ;;  %v1643_v1 = vsel %vm653_vm5, %v3403_v36, %v2589_v44 }
 0x1de   :  { %v2583_v25 = vunpack.i.l.bf16 %v2582_v42  ;;  %v2584_v61 = vunpack.i.h.bf16 %v2582_v42  ;;  %v1660_v55 = vsel %vm621_vm3, %v3723_v41, %v2599_v11 }
 0x1e0   :  { %v685_v0 = vsel %vm621_vm3, %v3682_v60, %v2583_v25  ;;  %v1615_v60 = vsel %vm621_vm3, %v3687_v29, %v2584_v61 }
 0x1e1   :  { %v701_v48 = vsel %vm637_vm4, %v685_v0, %v3597_v31 }
 0x1e2   :  { %v717_v62 = vsel %vm653_vm5, %v701_v48, %v3603_v46 }
 0x1e3   :  { %v740_v58 = vpack.c.bf16 %v717_v62, %v716_v18 }
 0x1e5   :  { %1002 = vmatmul.bf16.gmra.mxu1 %v740_v58  ;;  %v2592_v23 = vpop.permute.xlu0 %2591  ;;  %v2632_v0 = vpop.permute.xlu2 %2631 }
 0x1e6   :  { %v2593_v59 = vunpack.i.l.bf16 %v2592_v23  ;;  %v2594_v7 = vunpack.i.h.bf16 %v2592_v23  ;;  %v2633_v23 = vunpack.i.l.bf16 %v2632_v0 }
 0x1e8   :  { %v1629_v14 = vsel %vm637_vm4, %v1615_v60, %v2593_v59  ;;  %v1675_v29 = vsel %vm637_vm4, %v1659_v35, %v2594_v7  ;;  %v2628_v60 = vunpack.i.l.bf16 %v2627_v2 }
 0x1e9   :  { %v1644_v26 = vsel %vm653_vm5, %v1629_v14, %v2603_v39  ;;  %v1691_v63 = vsel %vm653_vm5, %v1675_v29, %v2604_v28 }
 0x1ea   :  { %v2607_v10 = vpop.permute.xlu1 %2606  ;;  %v1707_v15 = vpack.c.bf16 %v1644_v26, %v1643_v1 }
 0x1eb   :  { %v2608_v4 = vunpack.i.l.bf16 %v2607_v10  ;;  %v2609_v6 = vunpack.i.h.bf16 %v2607_v10  ;;  %v2629_v10 = vunpack.i.h.bf16 %v2627_v2 }
 0x1ec   :  { %1907 = vmatmul.bf16.vlgmr.msrb.gmra.mxu3 %v1707_v15 }
 0x1ed   :  { %v1676_v25 = vsel %vm637_vm4, %v1660_v55, %v2608_v4  ;;  %v1661_v4 = vsel %vm621_vm3, %v3734_v5, %v2628_v60  ;;  %v1662_v29 = vsel %vm621_vm3, %v3762_v9, %v2629_v10 }
 0x1ee   :  { %v2612_v42 = vpop.permute.xlu0 %2611 }
 0x1ef   :  { %v2613_v19 = vunpack.i.l.bf16 %v2612_v42  ;;  %v2614_v59 = vunpack.i.h.bf16 %v2612_v42  ;;  %v2634_v42 = vunpack.i.h.bf16 %v2632_v0 }
 0x1f1   :  { %v1692_v21 = vsel %vm653_vm5, %v1676_v25, %v2613_v19 }
 0x1f2   :  { %v2617_v48 = vpop.permute.xlu1 %2616  ;;  %v1708_v18 = vpack.c.bf16 %v1692_v21, %v1691_v63 }
 0x1f3   :  { %v2618_v62 = vunpack.i.l.bf16 %v2617_v48  ;;  %v2619_v61 = vunpack.i.h.bf16 %v2617_v48 }
 0x1f4   :  { %1956 = vmatmul.bf16.vlgmr.msrb.gmra.mxu2 %v1708_v18 }
 0x1f5   :  { %v1616_v58 = vsel %vm621_vm3, %v3705_v12, %v2618_v62  ;;  %v1617_v39 = vsel %vm621_vm3, %v3718_v34, %v2619_v61  ;;  %v2657_v12 = vpop.permute.xlu2 %2656 }
 0x1f6   :  { %v2622_v44 = vpop.permute.xlu0 %2621  ;;  %v1630_v56 = vsel %vm637_vm4, %v1616_v58, %v2609_v6  ;;  %v2658_v5 = vunpack.i.l.bf16 %v2657_v12  ;;  %v2659_v58 = vunpack.i.h.bf16 %v2657_v12 }
 0x1f7   :  { %v2623_v41 = vunpack.i.l.bf16 %v2622_v44  ;;  %v2624_v16 = vunpack.i.h.bf16 %v2622_v44  ;;  %v1645_v26 = vsel %vm653_vm5, %v1630_v56, %v2614_v59 }
 0x1f8   :  { %v1663_v59 = vsel %vm621_vm3, %v3773_v53, %v2658_v5 }
 0x1f9   :  { %v1631_v14 = vsel %vm637_vm4, %v1617_v39, %v2623_v41  ;;  %v1677_v34 = vsel %vm637_vm4, %v1661_v4, %v2624_v16  ;;  %v1664_v16 = vsel %vm621_vm3, %v3796_v24, %v2659_v58 }
 0x1fa   :  { %v2637_v1 = vpop.permute.xlu1 %2636  ;;  %v1646_v7 = vsel %vm653_vm5, %v1631_v14, %v2633_v23  ;;  %v1693_v19 = vsel %vm653_vm5, %v1677_v34, %v2634_v42 }
 0x1fb   :  { %v1710_v15 = vpack.c.bf16 %v1646_v7, %v1645_v26  ;;  %v2638_v11 = vunpack.i.l.bf16 %v2637_v1  ;;  %v2639_v62 = vunpack.i.h.bf16 %v2637_v1 }
 0x1fd   :  { %1912 = vmatmul.bf16.gmra.mxu3 %v1710_v15  ;;  %v1678_v28 = vsel %vm637_vm4, %v1662_v29, %v2638_v11  ;;  %v2667_v18 = vpop.permute.xlu2 %2666 }
 0x1fe   :  { %v2642_v35 = vpop.permute.xlu0 %2641  ;;  %v2668_v9 = vunpack.i.l.bf16 %v2667_v18  ;;  %v2669_v1 = vunpack.i.h.bf16 %v2667_v18 }
 0x1ff   :  { %v2643_v55 = vunpack.i.l.bf16 %v2642_v35  ;;  %v2644_v0 = vunpack.i.h.bf16 %v2642_v35 }
 0x201   :  { %v1694_v2 = vsel %vm653_vm5, %v1678_v28, %v2643_v55 }
 0x202   :  { %v2647_v25 = vpop.permute.xlu1 %2646  ;;  %v1711_v63 = vpack.c.bf16 %v1694_v2, %v1693_v19 }
 0x203   :  { %v2648_v21 = vunpack.i.l.bf16 %v2647_v25  ;;  %v2649_v48 = vunpack.i.h.bf16 %v2647_v25 }
 0x204   :  { %1961 = vmatmul.bf16.gmra.mxu2 %v1711_v63 }
 0x205   :  { %v1618_v61 = vsel %vm621_vm3, %v3742_v38, %v2648_v21  ;;  %v1619_v56 = vsel %vm621_vm3, %v3757_v32, %v2649_v48  ;;  %v2682_v42 = vpop.permute.xlu2 %2681 }
 0x206   :  { %v2652_v6 = vpop.permute.xlu0 %2651  ;;  %v1632_v41 = vsel %vm637_vm4, %v1618_v61, %v2639_v62  ;;  %v2683_v24 = vunpack.i.l.bf16 %v2682_v42  ;;  %v2684_v19 = vunpack.i.h.bf16 %v2682_v42 }
 0x207   :  { %v2653_v44 = vunpack.i.l.bf16 %v2652_v6  ;;  %v2654_v23 = vunpack.i.h.bf16 %v2652_v6  ;;  %v1647_v14 = vsel %vm653_vm5, %v1632_v41, %v2644_v0 }
 0x208   :  { %v1665_v48 = vsel %vm621_vm3, %v3813_v22, %v2683_v24 }
 0x209   :  { %v1633_v39 = vsel %vm637_vm4, %v1619_v56, %v2653_v44  ;;  %v1679_v10 = vsel %vm637_vm4, %v1663_v59, %v2654_v23 }
 0x20a   :  { %v2662_v60 = vpop.permute.xlu1 %2661  ;;  %v1648_v38 = vsel %vm653_vm5, %v1633_v39, %v2668_v9  ;;  %v1695_v15 = vsel %vm653_vm5, %v1679_v10, %v2669_v1  ;;  %v1666_v9 = vsel %vm621_vm3, %v3830_v8, %v2684_v19 }
 0x20b   :  { %v2663_v26 = vunpack.i.l.bf16 %v2662_v60  ;;  %v1713_v7 = vpack.c.bf16 %v1648_v38, %v1647_v14  ;;  %v2664_v55 = vunpack.i.h.bf16 %v2662_v60  ;;  %v1682_v22 = vsel %vm637_vm4, %v1666_v9, %v3597_v31 }
 0x20c   :  { %v1698_v23 = vsel %vm653_vm5, %v1682_v22, %v3603_v46 }
 0x20d   :  { %1917 = vmatmul.bf16.gmra.mxu3 %v1713_v7  ;;  %v1680_v12 = vsel %vm637_vm4, %v1664_v16, %v2663_v26  ;;  %v2697_v41 = vpop.permute.xlu2 %2696 }
 0x20e   :  { %v2672_v32 = vpop.permute.xlu0 %2671  ;;  %v2699_v38 = vunpack.i.h.bf16 %v2697_v41  ;;  %v2698_v16 = vunpack.i.l.bf16 %v2697_v41 }
 0x20f   :  { %v2673_v53 = vunpack.i.l.bf16 %v2672_v32  ;;  %v2674_v5 = vunpack.i.h.bf16 %v2672_v32 }
 0x210   :  { %v1667_v10 = vsel %vm621_vm3, %v3846_v20, %v2699_v38  ;;  %v1622_v32 = vsel %vm621_vm3, %v3836_v30, %v2698_v16 }
 0x211   :  { %v1696_v11 = vsel %vm653_vm5, %v1680_v12, %v2673_v53 }
 0x212   :  { %v2677_v4 = vpop.permute.xlu1 %2676  ;;  %v1714_v35 = vpack.c.bf16 %v1696_v11, %v1695_v15 }
 0x213   :  { %v2679_v34 = vunpack.i.h.bf16 %v2677_v4  ;;  %v2678_v29 = vunpack.i.l.bf16 %v2677_v4 }
 0x214   :  { %1966 = vmatmul.bf16.gmra.mxu2 %v1714_v35 }
 0x215   :  { %v1621_v2 = vsel %vm621_vm3, %v3799_v27, %v2679_v34  ;;  %v1620_v25 = vsel %vm621_vm3, %v3781_v40, %v2678_v29  ;;  %v2717_v60 = vpop.permute.xlu2 %2716 }
 0x216   :  { %v2687_v28 = vpop.permute.xlu0 %2686  ;;  %v1634_v62 = vsel %vm637_vm4, %v1620_v25, %v2664_v55  ;;  %v2718_v12 = vunpack.i.l.bf16 %v2717_v60 }
 0x217   :  { %v2688_v63 = vunpack.i.l.bf16 %v2687_v28  ;;  %v2689_v21 = vunpack.i.h.bf16 %v2687_v28  ;;  %v1649_v40 = vsel %vm653_vm5, %v1634_v62, %v2674_v5 }
 0x219   :  { %v1635_v61 = vsel %vm637_vm4, %v1621_v2, %v2688_v63  ;;  %v1681_v27 = vsel %vm637_vm4, %v1665_v48, %v2689_v21 }
 0x21a   :  { %v2692_v18 = vpop.permute.xlu1 %2691 }
 0x21b   :  { %v2694_v0 = vunpack.i.h.bf16 %v2692_v18  ;;  %v2693_v6 = vunpack.i.l.bf16 %v2692_v18 }
 0x21d   :  { %v1650_v58 = vsel %vm653_vm5, %v1635_v61, %v2693_v6  ;;  %v1697_v56 = vsel %vm653_vm5, %v1681_v27, %v2694_v0  ;;  %v2719_v6 = vunpack.i.h.bf16 %v2717_v60 }
 0x21e   :  { %v1716_v44 = vpack.c.bf16 %v1650_v58, %v1649_v40  ;;  %v1717_v8 = vpack.c.bf16 %v1698_v23, %v1697_v56 }
 0x220   :  { %1922 = vmatmul.bf16.gmra.mxu3 %v1716_v44 }
 0x222   :  { %v2702_v59 = vpop.permute.xlu1 %2701 }
 0x223   :  { %v2704_v1 = vunpack.i.h.bf16 %v2702_v59  ;;  %v2703_v26 = vunpack.i.l.bf16 %v2702_v59 }
 0x224   :  { %1971 = vmatmul.bf16.gmra.mxu2 %v1717_v8 }
 0x225   :  { %v1636_v29 = vsel %vm637_vm4, %v1622_v32, %v2703_v26  ;;  %v1683_v42 = vsel %vm637_vm4, %v1667_v10, %v2704_v1 }
 0x226   :  { %v2707_v39 = vpop.permute.xlu0 %2706 }
 0x227   :  { %v2708_v14 = vunpack.i.l.bf16 %v2707_v39  ;;  %v2709_v21 = vunpack.i.h.bf16 %v2707_v39 }
 0x229   :  { %v1668_v7 = vsel %vm621_vm3, %v3867_v17, %v2708_v14  ;;  %v2727_v17 = vpop.permute.xlu2 %2726 }
 0x22a   :  { %v1684_v24 = vsel %vm637_vm4, %v1668_v7, %v2718_v12  ;;  %v2729_v5 = vunpack.i.h.bf16 %v2727_v17  ;;  %v2728_v18 = vunpack.i.l.bf16 %v2727_v17 }
 0x22c   :  { %v1669_v27 = vsel %vm621_vm3, %v3903_v3, %v2729_v5  ;;  %v1624_v40 = vsel %vm621_vm3, %v3883_v43, %v2728_v18 }
 0x22e   :  { %v2712_v53 = vpop.permute.xlu0 %2711  ;;  %v2722_v15 = vpop.permute.xlu1 %2721 }
 0x22f   :  { %v2714_v11 = vunpack.i.h.bf16 %v2712_v53  ;;  %v2713_v4 = vunpack.i.l.bf16 %v2712_v53  ;;  %v2724_v35 = vunpack.i.h.bf16 %v2722_v15  ;;  %v2723_v34 = vunpack.i.l.bf16 %v2722_v15 }
 0x231   :  { %v1651_v20 = vsel %vm653_vm5, %v3403_v36, %v2713_v4  ;;  %v1652_v55 = vsel %vm653_vm5, %v1636_v29, %v2714_v11  ;;  %v1699_v30 = vsel %vm653_vm5, %v1683_v42, %v2723_v34  ;;  %v1700_v28 = vsel %vm653_vm5, %v1684_v24, %v2724_v35  ;;  %v2747_v62 = vpop.permute.xlu2 %2746 }
 0x232   :  { %v1719_v19 = vpack.c.bf16 %v1652_v55, %v1651_v20  ;;  %v1720_v2 = vpack.c.bf16 %v1700_v28, %v1699_v30  ;;  %v1623_v36 = vsel %vm621_vm3, %v3857_v50, %v2709_v21  ;;  %v2748_v58 = vunpack.i.l.bf16 %v2747_v62  ;;  %v1052_v55 = vpop.f32.mrf.mxu3  ;;  %v2006_v30 = vpop.f32.mrf.mxu0 }
 0x233   :  { %v1637_v59 = vsel %vm637_vm4, %v1623_v36, %v2719_v6  ;;  %v2749_v15 = vunpack.i.h.bf16 %v2747_v62 }
 0x234   :  { %1927 = vmatmul.bf16.gmra.mxu3 %v1719_v19  ;;  %1976 = vmatmul.bf16.gmra.mxu2 %v1720_v2  ;;  %v2804_v2 = vld [vmem:[#allocation2] ss:$0 sm:$0xff] }
 0x236   :  { %v2737_v25 = vpop.permute.xlu0 %2736  ;;  %v2732_v63 = vpop.permute.xlu1 %2731 }
 0x237   :  { %v2738_v48 = vunpack.i.l.bf16 %v2737_v25  ;;  %v2734_v61 = vunpack.i.h.bf16 %v2732_v63  ;;  %v2733_v9 = vunpack.i.l.bf16 %v2732_v63  ;;  %v2739_v7 = vunpack.i.h.bf16 %v2737_v25  ;;  %v2805_v63 = vld [vmem:[#allocation4] ss:$0 sm:$0xff] }
 0x239   :  { %v1670_v0 = vsel %vm621_vm3, %v3933_v45, %v2738_v48  ;;  %v1638_v50 = vsel %vm637_vm4, %v1624_v40, %v2733_v9  ;;  %v1685_v45 = vsel %vm637_vm4, %v1669_v27, %v2734_v61  ;;  %v4113_v26 = vpop.permute.xlu2 %2756  ;;  %v1625_v53 = vsel %vm621_vm3, %v3920_v13, %v2739_v7 }
 0x23a   :  { %v1686_v39 = vsel %vm637_vm4, %v1670_v0, %v2748_v58  ;;  %v2758_v32 = vunpack.i.l.bf16 %v4113_v26  ;;  %v1639_v29 = vsel %vm637_vm4, %v1625_v53, %v2749_v15  ;;  %v1054_v25 = vpop.f32.mrf.mxu3  ;;  %v2008_v62 = vpop.f32.mrf.mxu0 }
 0x23c   :  { %v1626_v4 = vsel %vm621_vm3, %v3951_v52, %v2758_v32 }
 0x23e   :  { %v2742_v44 = vpop.permute.xlu0 %2741  ;;  %v2752_v22 = vpop.permute.xlu1 %2751 }
 0x23f   :  { %v2744_v41 = vunpack.i.h.bf16 %v2742_v44  ;;  %v2743_v56 = vunpack.i.l.bf16 %v2742_v44  ;;  %v2754_v23 = vunpack.i.h.bf16 %v2752_v22  ;;  %v2753_v8 = vunpack.i.l.bf16 %v2752_v22 }
 0x241   :  { %v1653_v3 = vsel %vm653_vm5, %v1637_v59, %v2743_v56  ;;  %v1654_v60 = vsel %vm653_vm5, %v1638_v50, %v2744_v41  ;;  %v1701_v43 = vsel %vm653_vm5, %v1685_v45, %v2753_v8  ;;  %v1702_v14 = vsel %vm653_vm5, %v1686_v39, %v2754_v23 }
 0x242   :  { %v1722_v38 = vpack.c.bf16 %v1654_v60, %v1653_v3  ;;  %v1723_v16 = vpack.c.bf16 %v1702_v14, %v1701_v43  ;;  %v2011_v45 = vpop.f32.mrf.mxu0 }
 0x244   :  { %1932 = vmatmul.bf16.gmra.mxu3 %v1722_v38  ;;  %1981 = vmatmul.bf16.gmra.mxu2 %v1723_v16 }
 0x246   :  { %v4111_v1 = vpop.permute.xlu0 %2766  ;;  %v4115_v10 = vpop.permute.xlu1 %2761 }
 0x247   :  { %v2763_v12 = vunpack.i.l.bf16 %v4115_v10 }
 0x249   :  { %v1640_v42 = vsel %vm637_vm4, %v1626_v4, %v2763_v12  ;;  %v4152_v12 = vld [vmem:[#allocation7] ss:$0 sm:$0xff] }
 0x24e   :  { %v2777_v11 = vpop.permute.xlu0 %2776 }
 0x24f   :  { %v2779_v35 = vunpack.i.h.bf16 %v2777_v11  ;;  %v2778_v34 = vunpack.i.l.bf16 %v2777_v11 }
 0x251   :  { %v1655_v24 = vsel %vm653_vm5, %v1639_v29, %v2778_v34  ;;  %v1656_v17 = vsel %vm653_vm5, %v1640_v42, %v2779_v35  ;;  %v2013_v42 = vpop.f32.mrf.mxu0 }
 0x252   :  { %v1725_v20 = vpack.c.bf16 %v1656_v17, %v1655_v24  ;;  %v2806_v24 = vld [vmem:[%s4341_s0] sm:$0xff] }
 0x254   :  { %1937 = vmatmul.bf16.gmra.mxu3 %v1725_v20 }
 0x262   :  { %v1003_v13 = vpop.f32.mrf.mxu1 }
 0x263   :  { %v1004_v28 = vadd.f32 %v1003_v13, %v3660_v57 }
 0x265   :  { %v1053_v19 = vadd.f32 %v1052_v55, %v1004_v28 }
 0x267   :  { %v1075_v52 = vmul.f32 %v2804_v2, %v1053_v19 }
 0x269   :  { %v1095_v21 = vadd.f32 %v2805_v63, %v1075_v52 }
 0x26a   :  { %v1005_v48 = vpop.f32.mrf.mxu1 }
 0x26b   :  { %v1111_v5 = vmax.f32 %v1095_v21, 0.0  ;;  %v1006_v18 = vadd.f32 %v1005_v48, %v3662_v47  ;;  %v2807_v21 = vld [vmem:[%s4341_s0 + $0x8] sm:$0xff] }
 0x26d   :  { %v1143_v61 = vrot.slane %v1111_v5, 7  ;;  %v1055_v9 = vadd.f32 %v1054_v25, %v1006_v18  ;;  %v2016_v18 = vpop.f32.mrf.mxu0 }
 0x26f   :  { %v4130_v36 = vsel %vm146_vm0, 0.0, %v1143_v61  ;;  %v1191_v0 = vsel %vm146_vm0, %v1143_v61, 0.0  ;;  %v1076_v6 = vmul.f32 %v2804_v2, %v1055_v9  ;;  %v1908_v57 = vpop.f32.mrf.mxu3 }
 0x270   :  { %v1261_v27 = vrot.slane %v1191_v0, 1  ;;  %v1303_v40 = vrot.slane %v1191_v0, 2  ;;  %v2770_v58 = vpack.i.bf16 %v3995_v49, %v4130_v36  ;;  %v1302_v44 = vrot.slane %v4130_v36, 2 }
 0x271   :  { %v1096_v22 = vadd.f32 %v2805_v63, %v1076_v6  ;;  %v1260_v47 = vrot.slane %v4130_v36, 1 }
 0x272   :  { %2771 = vrot.lane.b32.xlu2 %v2770_v58, %s2931_s12  ;;  %v1304_v41 = vsel %vm253_vm2, %v1302_v44, %v1303_v40 }
 0x273   :  { %v1112_v56 = vmax.f32 %v1096_v22, 0.0  ;;  %v1727_v23 = vpack.c.bf16 %v1304_v41, %v3995_v49  ;;  %v4141_v8 = vsel %vm208_vm1, %v1260_v47, %v1261_v27  ;;  %v4149_v49 = vld [vmem:[#allocation6] ss:$0 sm:$0xff] }
 0x274   :  { %v2780_v59 = vpack.i.bf16 %v4141_v8, %v3992_v51  ;;  %v2785_v38 = vpack.i.bf16 %v1304_v41, %v4141_v8 }
 0x275   :  { %v1144_v50 = vrot.slane %v1112_v56, 7  ;;  %2299 = vmatmul.msk.bf16.gmra.mxu0 %vm621_vm3, %v1727_v23  ;;  %v2018_v47 = vpop.f32.mrf.mxu0 }
 0x276   :  { %2781 = vrot.lane.b32.xlu1 %v2780_v59, %s2929_s27  ;;  %v2809_v59 = vld [vmem:[%s4341_s0 + $0x18] sm:$0xff] }
 0x277   :  { %v1176_v39 = vsel %vm146_vm0, 0.0, %v1144_v50  ;;  %v1957_v3 = vpop.f32.mrf.mxu2  ;;  %v1910_v60 = vpop.f32.mrf.mxu3  ;;  %v1192_v43 = vsel %vm146_vm0, %v1144_v50, 0.0 }
 0x278   :  { %v1958_v14 = vadd.f32 %v1957_v3, %v1908_v57  ;;  %v1334_v16 = vrot.slane %v1176_v39, 2  ;;  %v1335_v7 = vrot.slane %v1192_v43, 2  ;;  %v2790_v11 = vpack.i.bf16 %v1176_v39, %v1304_v41  ;;  %v2808_v57 = vld [vmem:[%s4341_s0 + $0x10] sm:$0xff] }
 0x279   :  { %v1312_v35 = vrot.slane %v1176_v39, 1  ;;  %v1313_v34 = vrot.slane %v1192_v43, 1 }
 0x27a   :  { %v2007_v32 = vadd.f32 %v2006_v30, %v1958_v14  ;;  %2786 = vrot.lane.b32.xlu2 %v2785_v38, %s2930_s9  ;;  %v1336_v53 = vsel %vm253_vm2, %v1334_v16, %v1335_v7  ;;  %v2795_v30 = vpack.i.bf16 %v1176_v39, %v4130_v36  ;;  %v2810_v7 = vld [vmem:[%s4341_s0 + $0x20] sm:$0xff] }
 0x27b   :  { %1513 = vrot.lane.b32.xlu0 %v1336_v53, %s2930_s9  ;;  %v4166_v19 = vsel %vm208_vm1, %v1312_v35, %v1313_v34  ;;  %v1730_v2 = vpack.c.bf16 %v3037_v33, %v1336_v53 }
 0x27c   :  { %v2050_v15 = vmul.f32 %v4149_v49, %v2007_v32 }
 0x27d   :  { %v2021_v14 = vpop.f32.mrf.mxu0 }
 0x27e   :  { %v2070_v4 = vadd.f32 %v4152_v12, %v2050_v15  ;;  %2791 = vrot.lane.b32.xlu1 %v2790_v11, %s2931_s12 }
 0x27f   :  { %v1959_v29 = vpop.f32.mrf.mxu2 }
 0x280   :  { %v2086_v17 = vadd.f32 %v2806_v24, %v2070_v4  ;;  %v1960_v20 = vadd.f32 %v1959_v29, %v1910_v60  ;;  %v1913_v55 = vpop.f32.mrf.mxu3  ;;  %v2811_v24 = vld [vmem:[%s4341_s0 + $0x28] sm:$0xff] }
 0x282   :  { %v2102_v13 = vmax.f32 %v2086_v17, 0.0  ;;  %v2009_v28 = vadd.f32 %v2008_v62, %v1960_v20  ;;  %2796 = vrot.lane.b32.xlu2 %v2795_v30, %s2929_s27 }
 0x283   :  { %1599 = vrot.lane.b32.xlu0 %v4166_v19, %s2929_s27 }
 0x284   :  { %2118 = vst.msk [vmem:[%s4348_s7] sm:$0xff] %vm621_vm3, %v2102_v13  ;;  %v2051_v52 = vmul.f32 %v4149_v49, %v2009_v28 }
 0x285   :  { %2300 = vmatmul.msk.bf16.gmra.mxu0 %vm621_vm3, %v1730_v2 }
 0x286   :  { %v2071_v25 = vadd.f32 %v4152_v12, %v2051_v52 }
 0x287   :  { %v1962_v63 = vpop.f32.mrf.mxu2 }
 0x288   :  { %v2087_v33 = vadd.f32 %v2807_v21, %v2071_v25  ;;  %v1963_v48 = vadd.f32 %v1962_v63, %v1913_v55  ;;  %v1915_v5 = vpop.f32.mrf.mxu3  ;;  %v2812_v25 = vld [vmem:[%s4341_s0 + $0x30] sm:$0xff] }
 0x28a   :  { %v2103_v62 = vmax.f32 %v2087_v33, 0.0  ;;  %v2012_v61 = vadd.f32 %v2011_v45, %v1963_v48 }
 0x28c   :  { %2119 = vst.msk [vmem:[%s4348_s7 + $0x8] sm:$0xff] %vm621_vm3, %v2103_v62  ;;  %v2052_v9 = vmul.f32 %v4149_v49, %v2012_v61 }
 0x28e   :  { %v2072_v0 = vadd.f32 %v4152_v12, %v2052_v9 }
 0x28f   :  { %v1964_v6 = vpop.f32.mrf.mxu2 }
 0x290   :  { %v2088_v27 = vadd.f32 %v2808_v57, %v2072_v0  ;;  %v1965_v40 = vadd.f32 %v1964_v6, %v1915_v5  ;;  %v1918_v22 = vpop.f32.mrf.mxu3  ;;  %v2813_v0 = vld [vmem:[%s4341_s0 + $0x38] sm:$0xff] }
 0x292   :  { %v2104_v58 = vmax.f32 %v2088_v27, 0.0  ;;  %v2014_v44 = vadd.f32 %v2013_v42, %v1965_v40  ;;  %v2023_v42 = vpop.f32.mrf.mxu0 }
 0x294   :  { %2120 = vst.msk [vmem:[%s4348_s7 + $0x10] sm:$0xff] %vm621_vm3, %v2104_v58  ;;  %v2053_v41 = vmul.f32 %v4149_v49, %v2014_v44 }
 0x296   :  { %v2073_v56 = vadd.f32 %v4152_v12, %v2053_v41 }
 0x297   :  { %v1967_v23 = vpop.f32.mrf.mxu2 }
 0x298   :  { %v2089_v50 = vadd.f32 %v2809_v59, %v2073_v56  ;;  %v1968_v45 = vadd.f32 %v1967_v23, %v1918_v22  ;;  %v1920_v43 = vpop.f32.mrf.mxu3  ;;  %v2814_v56 = vld [vmem:[%s4341_s0 + $0x40] sm:$0xff] }
 0x29a   :  { %v2105_v39 = vmax.f32 %v2089_v50, 0.0  ;;  %v2017_v3 = vadd.f32 %v2016_v18, %v1968_v45  ;;  %v2026_v33 = vpop.f32.mrf.mxu0 }
 0x29c   :  { %2121 = vst.msk [vmem:[%s4348_s7 + $0x18] sm:$0xff] %vm621_vm3, %v2105_v39  ;;  %v2054_v60 = vmul.f32 %v4149_v49, %v2017_v3 }
 0x29e   :  { %v2074_v38 = vadd.f32 %v4152_v12, %v2054_v60 }
 0x29f   :  { %v1969_v16 = vpop.f32.mrf.mxu2 }
 0x2a0   :  { %v2090_v32 = vadd.f32 %v2810_v7, %v2074_v38  ;;  %v1970_v53 = vadd.f32 %v1969_v16, %v1920_v43  ;;  %v2815_v38 = vld [vmem:[%s4341_s0 + $0x48] sm:$0xff] }
 0x2a2   :  { %v2106_v15 = vmax.f32 %v2090_v32, 0.0  ;;  %v2019_v11 = vadd.f32 %v2018_v47, %v1970_v53  ;;  %v2028_v58 = vpop.f32.mrf.mxu0 }
 0x2a3   :  { %v1923_v35 = vpop.f32.mrf.mxu3 }
 0x2a4   :  { %2122 = vst.msk [vmem:[%s4348_s7 + $0x20] sm:$0xff] %vm621_vm3, %v2106_v15  ;;  %v2055_v4 = vmul.f32 %v4149_v49, %v2019_v11 }
 0x2a6   :  { %v2075_v34 = vadd.f32 %v4152_v12, %v2055_v4 }
 0x2a7   :  { %v1972_v29 = vpop.f32.mrf.mxu2 }
 0x2a8   :  { %v2091_v17 = vadd.f32 %v2811_v24, %v2075_v34  ;;  %v1973_v20 = vadd.f32 %v1972_v29, %v1923_v35  ;;  %v2816_v34 = vld [vmem:[%s4341_s0 + $0x50] sm:$0xff] }
 0x2aa   :  { %v2107_v55 = vmax.f32 %v2091_v17, 0.0  ;;  %v2022_v30 = vadd.f32 %v2021_v14, %v1973_v20  ;;  %v2031_v3 = vpop.f32.mrf.mxu0 }
 0x2ab   :  { %v1925_v2 = vpop.f32.mrf.mxu3 }
 0x2ac   :  { %2123 = vst.msk [vmem:[%s4348_s7 + $0x28] sm:$0xff] %vm621_vm3, %v2107_v55  ;;  %v2056_v13 = vmul.f32 %v4149_v49, %v2022_v30 }
 0x2ae   :  { %v2076_v28 = vadd.f32 %v4152_v12, %v2056_v13  ;;  %v2817_v13 = vld [vmem:[%s4341_s0 + $0x58] sm:$0xff] }
 0x2af   :  { %v1974_v52 = vpop.f32.mrf.mxu2 }
 0x2b0   :  { %v2092_v63 = vadd.f32 %v2812_v25, %v2076_v28  ;;  %v1975_v21 = vadd.f32 %v1974_v52, %v1925_v2 }
 0x2b2   :  { %v2108_v48 = vmax.f32 %v2092_v63, 0.0  ;;  %v2024_v5 = vadd.f32 %v2023_v42, %v1975_v21  ;;  %v2033_v24 = vpop.f32.mrf.mxu0  ;;  %v2759_v63 = vunpack.i.h.bf16 %v4113_v26  ;;  %v2768_v21 = vunpack.i.l.bf16 %v4111_v1 }
 0x2b4   :  { %2124 = vst.msk [vmem:[%s4348_s7 + $0x30] sm:$0xff] %vm621_vm3, %v2108_v48  ;;  %v2057_v18 = vmul.f32 %v4149_v49, %v2024_v5 }
 0x2b6   :  { %v2077_v62 = vadd.f32 %v4152_v12, %v2057_v18  ;;  %v1671_v18 = vsel %vm621_vm3, %v3968_v54, %v2759_v63 }
 0x2b7   :  { %v1928_v61 = vpop.f32.mrf.mxu3  ;;  %v1977_v9 = vpop.f32.mrf.mxu2 }
 0x2b8   :  { %v2093_v6 = vadd.f32 %v2813_v0, %v2077_v62  ;;  %v1978_v57 = vadd.f32 %v1977_v9, %v1928_v61  ;;  %v1672_v62 = vsel %vm621_vm3, %v3992_v51, %v2768_v21 }
 0x2ba   :  { %v2109_v27 = vmax.f32 %v2093_v6, 0.0  ;;  %v2027_v40 = vadd.f32 %v2026_v33, %v1978_v57  ;;  %v2764_v33 = vunpack.i.h.bf16 %v4115_v10 }
 0x2bc   :  { %2125 = vst.msk [vmem:[%s4348_s7 + $0x38] sm:$0xff] %vm621_vm3, %v2109_v27  ;;  %v2058_v44 = vmul.f32 %v4149_v49, %v2027_v40  ;;  %v1687_v0 = vsel %vm637_vm4, %v1671_v18, %v2764_v33 }
 0x2be   :  { %v2078_v22 = vadd.f32 %v4152_v12, %v2058_v44 }
 0x2bf   :  { %v1930_v47 = vpop.f32.mrf.mxu3  ;;  %v1979_v41 = vpop.f32.mrf.mxu2 }
 0x2c0   :  { %v2094_v23 = vadd.f32 %v2814_v56, %v2078_v22  ;;  %v1980_v59 = vadd.f32 %v1979_v41, %v1930_v47 }
 0x2c2   :  { %v2110_v50 = vmax.f32 %v2094_v23, 0.0  ;;  %v2029_v45 = vadd.f32 %v2028_v58, %v1980_v59  ;;  %v2769_v58 = vunpack.i.h.bf16 %v4111_v1 }
 0x2c4   :  { %2126 = vst.msk [vmem:[%s4348_s7 + $0x40] sm:$0xff] %vm621_vm3, %v2110_v50  ;;  %v2059_v39 = vmul.f32 %v4149_v49, %v2029_v45  ;;  %v1627_v41 = vsel %vm621_vm3, %v3981_v37, %v2769_v58 }
 0x2c6   :  { %v2079_v60 = vadd.f32 %v4152_v12, %v2059_v39 }
 0x2c7   :  { %v1933_v43 = vpop.f32.mrf.mxu3  ;;  %v1982_v14 = vpop.f32.mrf.mxu2 }
 0x2c8   :  { %v2095_v16 = vadd.f32 %v2815_v38, %v2079_v60  ;;  %v1983_v7 = vadd.f32 %v1982_v14, %v1933_v43 }
 0x2ca   :  { %v2111_v32 = vmax.f32 %v2095_v16, 0.0  ;;  %v2032_v53 = vadd.f32 %v2031_v3, %v1983_v7 }
 0x2cc   :  { %2127 = vst.msk [vmem:[%s4348_s7 + $0x48] sm:$0xff] %vm621_vm3, %v2111_v32  ;;  %v2060_v15 = vmul.f32 %v4149_v49, %v2032_v53  ;;  %v2772_v2 = vpop.permute.xlu2 %2771 }
 0x2cd   :  { %v2773_v48 = vunpack.i.l.bf16 %v2772_v2  ;;  %v2774_v54 = vunpack.i.h.bf16 %v2772_v2 }
 0x2ce   :  { %v2080_v11 = vadd.f32 %v4152_v12, %v2060_v15 }
 0x2cf   :  { %v1935_v4 = vpop.f32.mrf.mxu3  ;;  %v1984_v35 = vpop.f32.mrf.mxu2  ;;  %v1688_v6 = vsel %vm637_vm4, %v1672_v62, %v2773_v48  ;;  %v1641_v50 = vsel %vm637_vm4, %v1627_v41, %v2774_v54 }
 0x2d0   :  { %v2096_v29 = vadd.f32 %v2816_v34, %v2080_v11  ;;  %v1985_v42 = vadd.f32 %v1984_v35, %v1935_v4 }
 0x2d2   :  { %v2112_v17 = vmax.f32 %v2096_v29, 0.0  ;;  %v2034_v20 = vadd.f32 %v2033_v24, %v1985_v42  ;;  %v2818_v42 = vld [vmem:[%s4341_s0 + $0x60] sm:$0xff] }
 0x2d4   :  { %2128 = vst.msk [vmem:[%s4348_s7 + $0x50] sm:$0xff] %vm621_vm3, %v2112_v17  ;;  %v2061_v55 = vmul.f32 %v4149_v49, %v2034_v20  ;;  %v2787_v25 = vpop.permute.xlu2 %2786 }
 0x2d5   :  { %v2788_v44 = vunpack.i.l.bf16 %v2787_v25  ;;  %v2789_v59 = vunpack.i.h.bf16 %v2787_v25 }
 0x2d6   :  { %v2081_v30 = vadd.f32 %v4152_v12, %v2061_v55 }
 0x2d7   :  { %v1628_v56 = vsel %vm621_vm3, %v4130_v36, %v2788_v44  ;;  %v1673_v37 = vsel %vm621_vm3, %v4141_v8, %v2789_v59  ;;  %v1938_v53 = vpop.f32.mrf.mxu3 }
 0x2d8   :  { %v2097_v28 = vadd.f32 %v2817_v13, %v2081_v30 }
 0x2da   :  { %v2113_v52 = vmax.f32 %v2097_v28, 0.0 }
 0x2dc   :  { %2129 = vst.msk [vmem:[%s4348_s7 + $0x58] sm:$0xff] %vm621_vm3, %v2113_v52  ;;  %v2797_v10 = vpop.permute.xlu2 %2796  ;;  %v2819_v52 = vld [vmem:[%s4341_s0 + $0x68] sm:$0xff] }
 0x2dd   :  { %v2798_v22 = vunpack.i.l.bf16 %v2797_v10  ;;  %v2799_v23 = vunpack.i.h.bf16 %v2797_v10 }
 0x2df   :  { %v1657_v1 = vsel %vm653_vm5, %v1641_v50, %v2798_v22  ;;  %v1940_v35 = vpop.f32.mrf.mxu3 }
 0x2e8   :  { %v2782_v5 = vpop.permute.xlu1 %2781 }
 0x2e9   :  { %v2784_v61 = vunpack.i.h.bf16 %v2782_v5  ;;  %v2783_v9 = vunpack.i.l.bf16 %v2782_v5 }
 0x2eb   :  { %v1703_v26 = vsel %vm653_vm5, %v1687_v0, %v2783_v9  ;;  %v1704_v57 = vsel %vm653_vm5, %v1688_v6, %v2784_v61  ;;  %v2820_v61 = vld [vmem:[%s4341_s0 + $0x70] sm:$0xff] }
 0x2ec   :  { %v1726_v27 = vpack.c.bf16 %v1704_v57, %v1703_v26 }
 0x2ed   :  { %v1514_v40 = vpop.permute.xlu0 %1513 }
 0x2ee   :  { %1986 = vmatmul.bf16.gmra.mxu2 %v1726_v27  ;;  %v1674_v60 = vsel %vm621_vm3, %v4166_v19, %v1514_v40  ;;  %v2821_v40 = vld [vmem:[%s4341_s0 + $0x78] sm:$0xff] }
 0x2ef   :  { %v1690_v36 = vsel %vm637_vm4, %v1674_v60, %v3597_v31 }
 0x2f0   :  { %v2792_v51 = vpop.permute.xlu1 %2791  ;;  %v1706_v7 = vsel %vm653_vm5, %v1690_v36, %v3603_v46 }
 0x2f1   :  { %v2793_v47 = vunpack.i.l.bf16 %v2792_v51  ;;  %v2794_v39 = vunpack.i.h.bf16 %v2792_v51 }
 0x2f2   :  { %v2036_v19 = vpop.f32.mrf.mxu0 }
 0x2f3   :  { %v1642_v45 = vsel %vm637_vm4, %v1628_v56, %v2793_v47  ;;  %v1689_v38 = vsel %vm637_vm4, %v1673_v37, %v2794_v39 }
 0x2f4   :  { %v1658_v3 = vsel %vm653_vm5, %v1642_v45, %v2799_v23 }
 0x2f5   :  { %v1728_v43 = vpack.c.bf16 %v1658_v3, %v1657_v1  ;;  %v1600_v14 = vpop.permute.xlu0 %1599 }
 0x2f6   :  { %v1705_v16 = vsel %vm653_vm5, %v1689_v38, %v1600_v14 }
 0x2f7   :  { %1942 = vmatmul.bf16.gmra.mxu3 %v1728_v43  ;;  %v1729_v32 = vpack.c.bf16 %v1706_v7, %v1705_v16 }
 0x2fa   :  { %v2038_v34 = vpop.f32.mrf.mxu0 }
 0x2fe   :  { %1991 = vmatmul.bf16.gmra.mxu2 %v1729_v32 }
 0x302   :  { %v2041_v28 = vpop.f32.mrf.mxu0 }
 0x30a   :  { %v2043_v6 = vpop.f32.mrf.mxu0 }
 0x371   :  { %v1987_v15 = vpop.f32.mrf.mxu2 }
 0x372   :  { %v1988_v11 = vadd.f32 %v1987_v15, %v1938_v53 }
 0x374   :  { %v2037_v4 = vadd.f32 %v2036_v19, %v1988_v11 }
 0x376   :  { %v2062_v8 = vmul.f32 %v4149_v49, %v2037_v4 }
 0x378   :  { %v2082_v31 = vadd.f32 %v4152_v12, %v2062_v8 }
 0x379   :  { %v1989_v29 = vpop.f32.mrf.mxu2 }
 0x37a   :  { %v2098_v24 = vadd.f32 %v2818_v42, %v2082_v31  ;;  %v1990_v46 = vadd.f32 %v1989_v29, %v1940_v35  ;;  %v1943_v30 = vpop.f32.mrf.mxu3 }
 0x37c   :  { %v2114_v17 = vmax.f32 %v2098_v24, 0.0  ;;  %v2039_v20 = vadd.f32 %v2038_v34, %v1990_v46 }
 0x37e   :  { %2130 = vst.msk [vmem:[%s4348_s7 + $0x60] sm:$0xff] %vm621_vm3, %v2114_v17  ;;  %v2063_v55 = vmul.f32 %v4149_v49, %v2039_v20 }
 0x380   :  { %v2083_v13 = vadd.f32 %v4152_v12, %v2063_v55 }
 0x381   :  { %v1992_v2 = vpop.f32.mrf.mxu2 }
 0x382   :  { %v2099_v25 = vadd.f32 %v2819_v52, %v2083_v13  ;;  %v1993_v63 = vadd.f32 %v1992_v2, %v1943_v30  ;;  %v1945_v18 = vpop.f32.mrf.mxu3 }
 0x384   :  { %v2115_v21 = vmax.f32 %v2099_v25, 0.0  ;;  %v2042_v33 = vadd.f32 %v2041_v28, %v1993_v63 }
 0x386   :  { %2131 = vst.msk [vmem:[%s4348_s7 + $0x68] sm:$0xff] %vm621_vm3, %v2115_v21  ;;  %v2064_v48 = vmul.f32 %v4149_v49, %v2042_v33 }
 0x388   :  { %v2084_v5 = vadd.f32 %v4152_v12, %v2064_v48 }
 0x389   :  { %v1994_v62 = vpop.f32.mrf.mxu2 }
 0x38a   :  { %v2100_v9 = vadd.f32 %v2820_v61, %v2084_v5  ;;  %v1995_v0 = vadd.f32 %v1994_v62, %v1945_v18 }
 0x38c   :  { %v2116_v26 = vmax.f32 %v2100_v9, 0.0  ;;  %v2044_v57 = vadd.f32 %v2043_v6, %v1995_v0 }
 0x38e   :  { %2132 = vst.msk [vmem:[%s4348_s7 + $0x70] sm:$0xff] %vm621_vm3, %v2116_v26  ;;  %v2065_v27 = vmul.f32 %v4149_v49, %v2044_v57 }
 0x390   :  { %v2085_v10 = vadd.f32 %v4152_v12, %v2065_v27 }
 0x392   :  { %v2101_v58 = vadd.f32 %v2821_v40, %v2085_v10 }
 0x394   :  { %v2117_v44 = vmax.f32 %v2101_v58, 0.0 }
 0x396   :  { %2133 = vst.msk [vmem:[%s4348_s7 + $0x78] sm:$0xff] %vm621_vm3, %v2117_v44 }
 0x397   :  { %2138 = vsyncpa [#allocation3], 1 }
 0x398   :  { %2139 = vsyncpa [#allocation5], 1 }
 0x399   :  { %2140 = vsyncpa [#allocation8], 1 }

// kernel: resnet_forward.9
= control target key start
LH: loop header
LB: loop body
LE: loop exit
PB: predicated region body
PF: predicated region fallthrough
CT: control target
= control target key end

     0   :  { %vm82_vm0 = vcmask 1040384   ;;  %vm144_vm1 = vcmask 1046528   ;;  %vm189_vm2 = vcmask 1045504   ;;  %v1414_v17 = vmov 0.0   ;;  %s1415_s23 = smov 64   ;;  %s1416_s24 = smov 32   ;;  %s2169_s0 = inlined_call_operand.vmem [shape: f32[2,8,8,32], index: 0, kind: input, shape index: {}]   ;;  %s2170_s1 = inlined_call_operand.vmem [shape: bf16[288,128], index: 1, kind: input, shape index: {}]   ;;  %s2171_s2 = inlined_call_operand.vmem [shape: f32[1,128], index: 2, kind: input, shape index: {}]   ;;  %s2172_s3 = inlined_call_operand.vmem [shape: f32[1,128], index: 3, kind: input, shape index: {}]   ;;  %s2173_s4 = inlined_call_operand.vmem [shape: f32[2,8,8,128], index: 4, kind: output, shape index: {}]  }
   0x1   :  { %v19_v0 = vld [vmem:[%s2169_s0 + $0x8] sm:$0xff]  ;;  %v20_v1 = vld [vmem:[%s2169_s0 + $0x10] sm:$0xff]  ;;  %v18_v2 = vld [vmem:[%s2169_s0] sm:$0xff]  ;;  %v1469_v18 = vrot.slane %v1414_v17, 1  ;;  %v1491_v32 = vrot.slane %v1414_v17, 2  ;;  %s1417_s27 = smov 96  }
   0x2   :  { %v51_v3 = vrot.slane %v19_v0, 7  ;;  %v52_v4 = vrot.slane %v20_v1, 7  ;;  %v50_v5 = vrot.slane %v18_v2, 7  ;;  %v21_v10 = vld [vmem:[%s2169_s0 + $0x18] sm:$0xff]  ;;  %v22_v44 = vld [vmem:[%s2169_s0 + $0x20] sm:$0xff]  ;;  %v23_v63 = vld [vmem:[%s2169_s0 + $0x28] sm:$0xff] }
   0x3   :  { %v53_v22 = vrot.slane %v21_v10, 7  ;;  %v54_v47 = vrot.slane %v22_v44, 7  ;;  %v29_v48 = vld [vmem:[%s2169_s0 + $0x58] sm:$0xff]  ;;  %v30_v49 = vld [vmem:[%s2169_s0 + $0x60] sm:$0xff]  ;;  %v31_v0 = vld [vmem:[%s2169_s0 + $0x68] sm:$0xff]  ;;  %v55_v10 = vrot.slane %v23_v63, 7 }
   0x4   :  { %v1453_v6 = vsel %vm82_vm0, 0.0, %v51_v3  ;;  %v1456_v7 = vsel %vm82_vm0, 0.0, %v52_v4  ;;  %v100_v8 = vsel %vm82_vm0, %v51_v3, 0.0  ;;  %v101_v9 = vsel %vm82_vm0, %v52_v4, 0.0  ;;  %v1637_v63 = vld [vmem:[%s2169_s0 + $0x78] sm:$0xff] }
   0x5   :  { %v153_v11 = vrot.slane %v1456_v7, 1  ;;  %v154_v12 = vrot.slane %v101_v9, 1  ;;  %v195_v13 = vrot.slane %v1453_v6, 2  ;;  %v196_v14 = vrot.slane %v100_v8, 2 }
   0x6   :  { %v1466_v15 = vsel %vm82_vm0, 0.0, %v50_v5  ;;  %v99_v16 = vsel %vm82_vm0, %v50_v5, 0.0  ;;  %v1187_v26 = vpack.i.bf16 %v1456_v7, %v1453_v6  ;;  %v151_v27 = vrot.slane %v100_v8, 1 }
   0x7   :  { %v1472_v19 = vsel %vm144_vm1, %v153_v11, %v154_v12  ;;  %v147_v20 = vrot.slane %v1466_v15, 1  ;;  %v148_v21 = vrot.slane %v99_v16, 1  ;;  %v1476_v23 = vsel %vm189_vm2, %v195_v13, %v196_v14 }
   0x8   :  { %v193_v24 = vrot.slane %v99_v16, 2  ;;  %v192_v25 = vrot.slane %v1466_v15, 2  ;;  %v1207_v28 = vpack.i.bf16 %v1472_v19, %v1476_v23  ;;  %v150_v30 = vrot.slane %v1453_v6, 1  ;;  %1188 = vrot.lane.b32.xlu2 %v1187_v26, %s1415_s23 }
   0x9   :  { %v1484_v29 = vsel %vm144_vm1, %v147_v20, %v148_v21  ;;  %v1499_v35 = vsel %vm82_vm0, 0.0, %v53_v22  ;;  %v102_v36 = vsel %vm82_vm0, %v53_v22, 0.0  ;;  %v1192_v37 = vpack.i.bf16 %v1453_v6, %v1466_v15 }
   0xa   :  { %v1197_v31 = vpack.i.bf16 %v1484_v29, %v1469_v18  ;;  %1208 = vrot.lane.b32.xlu1 %v1207_v28, %s1416_s24  ;;  %v194_v33 = vsel %vm189_vm2, %v192_v25, %v193_v24  ;;  %v1496_v34 = vsel %vm144_vm1, %v150_v30, %v151_v27  ;;  %v199_v38 = vrot.slane %v101_v9, 2 }
   0xb   :  { %v1212_v39 = vpack.i.bf16 %v194_v33, %v1491_v32  ;;  %v1202_v40 = vpack.i.bf16 %v194_v33, %v1496_v34  ;;  %v198_v41 = vrot.slane %v1456_v7, 2  ;;  %v201_v42 = vrot.slane %v1499_v35, 2 }
   0xc   :  { %1198 = vrot.lane.b32.xlu0 %v1197_v31, %s1416_s24  ;;  %v202_v43 = vrot.slane %v102_v36, 2  ;;  %v103_v51 = vsel %vm82_vm0, %v54_v47, 0.0  ;;  %v1217_v53 = vpack.i.bf16 %v1472_v19, %v1496_v34  ;;  %v1534_v54 = vsel %vm82_vm0, 0.0, %v54_v47 }
   0xd   :  { %v1515_v45 = vsel %vm189_vm2, %v198_v41, %v199_v38  ;;  %v61_v55 = vrot.slane %v29_v48, 7  ;;  %v62_v56 = vrot.slane %v30_v49, 7  ;;  %v156_v57 = vrot.slane %v1499_v35, 1  ;;  %v32_v48 = vld [vmem:[%s2169_s0 + $0x70] sm:$0xff] }
   0xe   :  { %v1518_v46 = vsel %vm189_vm2, %v201_v42, %v202_v43  ;;  %v1227_v50 = vpack.i.bf16 %v1515_v45, %v1476_v23  ;;  %v157_v58 = vrot.slane %v102_v36, 1  ;;  %v159_v59 = vrot.slane %v1534_v54, 1  ;;  %v24_v42 = vld [vmem:[%s2169_s0 + $0x30] sm:$0xff] }
   0xf   :  { %v1222_v52 = vpack.i.bf16 %v1518_v46, %v1515_v45  ;;  %v160_v60 = vrot.slane %v103_v51, 1  ;;  %v1542_v61 = vsel %vm82_vm0, 0.0, %v61_v55  ;;  %v110_v62 = vsel %vm82_vm0, %v61_v55, 0.0 }
  0x10   :  { %1193 = vrot.lane.b32.xlu2 %v1192_v37, %s1417_s27  ;;  %v1552_v1 = vsel %vm82_vm0, 0.0, %v62_v56  ;;  %v111_v2 = vsel %vm82_vm0, %v62_v56, 0.0  ;;  %v1556_v3 = vsel %vm144_vm1, %v156_v57, %v157_v58  ;;  %v1237_v8 = vpack.i.bf16 %v1499_v35, %v1456_v7 }
  0x11   :  { %v1559_v4 = vsel %vm144_vm1, %v159_v59, %v160_v60  ;;  %v1232_v9 = vpack.i.bf16 %v1534_v54, %v1499_v35  ;;  %v63_v11 = vrot.slane %v31_v0, 7  ;;  %v222_v12 = vrot.slane %v1542_v61, 2 }
  0x12   :  { %1213 = vrot.lane.b32.xlu1 %v1212_v39, %s1415_s23  ;;  %v1242_v5 = vpack.i.bf16 %v1559_v4, %v1556_v3  ;;  %v223_v13 = vrot.slane %v110_v62, 2  ;;  %v225_v14 = vrot.slane %v1552_v1, 2  ;;  %v226_v16 = vrot.slane %v111_v2, 2 }
  0x13   :  { %v177_v17 = vrot.slane %v1542_v61, 1  ;;  %v178_v20 = vrot.slane %v110_v62, 1  ;;  %v180_v21 = vrot.slane %v1552_v1, 1  ;;  %v181_v22 = vrot.slane %v111_v2, 1 }
  0x14   :  { %1203 = vrot.lane.b32.xlu0 %v1202_v40, %s1416_s24  ;;  %v1574_v24 = vsel %vm82_vm0, 0.0, %v63_v11  ;;  %v1578_v25 = vsel %vm189_vm2, %v222_v12, %v223_v13  ;;  %v1581_v26 = vsel %vm189_vm2, %v225_v14, %v226_v16  ;;  %v1590_v30 = vsel %vm82_vm0, 0.0, %v55_v10 }
  0x15   :  { %v1584_v27 = vsel %vm144_vm1, %v177_v17, %v178_v20  ;;  %v1587_v28 = vsel %vm144_vm1, %v180_v21, %v181_v22  ;;  %v104_v31 = vsel %vm82_vm0, %v55_v10, 0.0  ;;  %v1257_v33 = vpack.i.bf16 %v1574_v24, %v1552_v1  ;;  %v25_v10 = vld [vmem:[%s2169_s0 + $0x38] sm:$0xff] }
  0x16   :  { %v1252_v36 = vpack.i.bf16 %v1581_v26, %v1578_v25  ;;  %v204_v37 = vrot.slane %v1534_v54, 2  ;;  %v1247_v38 = vpack.i.bf16 %v1587_v28, %v1584_v27  ;;  %v205_v39 = vrot.slane %v103_v51, 2 }
  0x17   :  { %v207_v40 = vrot.slane %v1590_v30, 2  ;;  %v208_v41 = vrot.slane %v104_v31, 2  ;;  %v56_v47 = vrot.slane %v24_v42, 7  ;;  %v162_v55 = vrot.slane %v1590_v30, 1 }
  0x18   :  { %1228 = vrot.lane.b32.xlu2 %v1227_v50, %s1415_s23  ;;  %v1608_v43 = vsel %vm189_vm2, %v204_v37, %v205_v39  ;;  %v163_v56 = vrot.slane %v104_v31, 1  ;;  %v112_v60 = vsel %vm82_vm0, %v63_v11, 0.0  ;;  %v65_v16 = vrot.slane %v1637_v63, 7  ;;  %v1159_v63 = vld [vmem:[%s2170_s1 + $0x50] sm:$0xff] }
  0x19   :  { %v1611_v44 = vsel %vm189_vm2, %v207_v40, %v208_v41  ;;  %v1272_v49 = vpack.i.bf16 %v1608_v43, %v1518_v46  ;;  %v105_v50 = vsel %vm82_vm0, %v56_v47, 0.0  ;;  %v229_v12 = vrot.slane %v112_v60, 2 }
  0x1a   :  { %1223 = vrot.lane.b32.xlu1 %v1222_v52, %s1416_s24  ;;  %v1267_v51 = vpack.i.bf16 %v1611_v44, %v1608_v43  ;;  %v1622_v52 = vsel %vm82_vm0, 0.0, %v56_v47  ;;  %v166_v58 = vrot.slane %v105_v50, 1  ;;  %v1640_v0 = vsel %vm144_vm1, %v162_v55, %v163_v56 }
  0x1b   :  { %v165_v57 = vrot.slane %v1622_v52, 1  ;;  %v183_v17 = vrot.slane %v1574_v24, 1  ;;  %v184_v20 = vrot.slane %v112_v60, 1  ;;  %v57_v31 = vrot.slane %v25_v10, 7  ;;  %v27_v10 = vld [vmem:[%s2169_s0 + $0x48] sm:$0xff] }
  0x1c   :  { %1218 = vrot.lane.b32.xlu0 %v1217_v53, %s1417_s27  ;;  %v64_v53 = vrot.slane %v32_v48, 7  ;;  %vm557_vm3 = vcmask 261120   ;;  %vm589_vm4 = vcmask 785408   ;;  %vm573_vm5 = vcmask 523264  }
  0x1d   :  { %v1643_v2 = vsel %vm144_vm1, %v165_v57, %v166_v58  ;;  %v90_v40 = vsel %vm82_vm0, 0.0, %v57_v31  ;;  %v106_v41 = vsel %vm82_vm0, %v57_v31, 0.0  ;;  %v1154_v31 = vld [vmem:[%s2170_s1 + $0x28] sm:$0xff] }
  0x1e   :  { %v1630_v59 = vsel %vm82_vm0, 0.0, %v64_v53  ;;  %v113_v62 = vsel %vm82_vm0, %v64_v53, 0.0  ;;  %v1287_v11 = vpack.i.bf16 %v1643_v2, %v1640_v0  ;;  %v260_v53 = vrot.slane %v90_v40, 2 }
  0x1f   :  { %v231_v13 = vrot.slane %v1630_v59, 2  ;;  %v232_v14 = vrot.slane %v113_v62, 2  ;;  %v186_v21 = vrot.slane %v1630_v59, 1  ;;  %v187_v22 = vrot.slane %v113_v62, 1 }
  0x20   :  { %1243 = vrot.lane.b32.xlu2 %v1242_v5, %s1417_s27  ;;  %v261_v55 = vrot.slane %v106_v41, 2  ;;  %v238_v60 = vrot.slane %v90_v40, 1  ;;  %v239_v62 = vrot.slane %v106_v41, 1 }
  0x21   :  { %v1671_v37 = vsel %vm189_vm2, %v231_v13, %v232_v14  ;;  %v1677_v39 = vsel %vm144_vm1, %v186_v21, %v187_v22  ;;  %v1327_v13 = vpack.i.bf16 %v90_v40, %v1622_v52  ;;  %v26_v14 = vld [vmem:[%s2169_s0 + $0x40] sm:$0xff] }
  0x22   :  { %1238 = vrot.lane.b32.xlu1 %v1237_v8, %s1417_s27  ;;  %v1277_v8 = vpack.i.bf16 %v1622_v52, %v1590_v30  ;;  %v1698_v57 = vsel %vm189_vm2, %v260_v53, %v261_v55  ;;  %v58_v21 = vrot.slane %v26_v14, 7  ;;  %v1165_v22 = vld [vmem:[%s2170_s1 + $0x80] sm:$0xff]  ;;  %v28_v53 = vld [vmem:[%s2169_s0 + $0x50] sm:$0xff] }
  0x24   :  { %1233 = vrot.lane.b32.xlu0 %v1232_v9, %s1415_s23  ;;  %v228_v9 = vrot.slane %v1574_v24, 2 }
  0x28   :  { %1258 = vrot.lane.b32.xlu2 %v1257_v33, %s1417_s27  ;;  %v1664_v33 = vsel %vm82_vm0, 0.0, %v65_v16 }
  0x29   :  { %v1302_v42 = vpack.i.bf16 %v1664_v33, %v1630_v59 }
  0x2a   :  { %1253 = vrot.lane.b32.xlu1 %v1252_v36, %s1415_s23  ;;  %v1668_v36 = vsel %vm189_vm2, %v228_v9, %v229_v12  ;;  %v1166_v9 = vld [vmem:[%s2170_s1 + $0x88] sm:$0xff] }
  0x2b   :  { %v1297_v47 = vpack.i.bf16 %v1671_v37, %v1668_v36  ;;  %950 = vmatpush.bf16.msra.mxu2 %v1166_v9  ;;  %v1337_v55 = vpack.i.bf16 %v1668_v36, %v1581_v26 }
  0x2c   :  { %1248 = vrot.lane.b32.xlu0 %v1247_v38, %s1416_s24  ;;  %v1674_v38 = vsel %vm144_vm1, %v183_v17, %v184_v20  ;;  %v1322_v17 = vpack.i.bf16 0.0, %v90_v40  ;;  %v59_v20 = vrot.slane %v27_v10, 7  ;;  %v656_v40 = vpack.c.bf16 %v1515_v45, %v1476_v23  ;;  %v1153_v23 = vld [vmem:[%s2170_s1 + $0x20] sm:$0xff] }
  0x2d   :  { %v1687_v48 = vpack.i.bf16 %v1677_v39, %v1674_v38  ;;  %v1342_v45 = vpack.i.bf16 %v1630_v59, %v1574_v24  ;;  %v60_v10 = vrot.slane %v28_v53, 7 }
  0x2e   :  { %v1745_v41 = vsel %vm82_vm0, 0.0, %v59_v20 }
  0x2f   :  { %951 = vmatpush.bf16.msra.mxu2 %v1165_v22  ;;  %v171_v53 = vrot.slane %v1745_v41, 1 }
  0x30   :  { %1273 = vrot.lane.b32.xlu2 %v1272_v49, %s1415_s23  ;;  %v210_v49 = vrot.slane %v1622_v52, 2 }
  0x32   :  { %1268 = vrot.lane.b32.xlu1 %v1267_v51, %s1416_s24  ;;  %v211_v51 = vrot.slane %v105_v50, 2  ;;  %1141 = vmatmul.msk.bf16.vlgmr.msra.gmra.mxu2 %vm557_vm3, %v656_v40 }
  0x34   :  { %1263 = vrot.lane.b32.xlu0 %v1242_v5, %s1416_s24  ;;  %v1282_v5 = vpack.i.bf16 %v1590_v30, %v1534_v54  ;;  %v1695_v56 = vsel %vm189_vm2, %v210_v49, %v211_v51  ;;  %v1755_v49 = vsel %vm82_vm0, 0.0, %v58_v21  ;;  %v107_v51 = vsel %vm82_vm0, %v58_v21, 0.0 }
  0x35   :  { %v1317_v58 = vpack.i.bf16 %v1695_v56, %v1611_v44  ;;  %v1312_v50 = vpack.i.bf16 %v1698_v57, %v1695_v56  ;;  %v214_v9 = vrot.slane %v107_v51, 2  ;;  %v109_v21 = vsel %vm82_vm0, %v60_v10, 0.0 }
  0x36   :  { %v175_v40 = vrot.slane %v109_v21, 1 }
  0x38   :  { %1288 = vrot.lane.b32.xlu2 %v1287_v11, %s1417_s27 }
  0x3a   :  { %1283 = vrot.lane.b32.xlu1 %v1282_v5, %s1417_s27  ;;  %v1707_v5 = vsel %vm144_vm1, %v238_v60, %v239_v62  ;;  %v168_v60 = vrot.slane %v1755_v49, 1  ;;  %v169_v62 = vrot.slane %v107_v51, 1  ;;  %v1161_v51 = vld [vmem:[%s2170_s1 + $0x60] sm:$0xff] }
  0x3b   :  { %v1332_v12 = vpack.i.bf16 %v1469_v18, %v1707_v5  ;;  %v1733_v18 = vld [vmem:[%s2170_s1 + $0x78] sm:$0xff] }
  0x3c   :  { %1278 = vrot.lane.b32.xlu0 %v1277_v8, %s1415_s23  ;;  %v1156_v8 = vld [vmem:[%s2170_s1 + $0x38] sm:$0xff]  ;;  %895 = vmatpush.bf16.msra.mxu1 %v1733_v18 }
  0x3d   :  { %846 = vmatpush.bf16.msra.mxu0 %v1156_v8  ;;  %1167 = vmatpush.bf16.msra.mxu3 %v1156_v8  ;;  %v213_v8 = vrot.slane %v1755_v49, 2 }
  0x3f   :  { %v215_v14 = vsel %vm189_vm2, %v213_v8, %v214_v9 }
  0x40   :  { %1303 = vrot.lane.b32.xlu2 %v1302_v42, %s1417_s27  ;;  %v108_v42 = vsel %vm82_vm0, %v59_v20, 0.0  ;;  %v1362_v20 = vpack.i.bf16 %v1745_v41, %v215_v14 }
  0x42   :  { %1298 = vrot.lane.b32.xlu1 %v1297_v47, %s1415_s23  ;;  %v1752_v47 = vld [vmem:[%s2170_s1 + $0x70] sm:$0xff] }
  0x43   :  { %896 = vmatpush.bf16.msra.mxu1 %v1752_v47 }
  0x44   :  { %1293 = vrot.lane.b32.xlu0 %v1687_v48, %s1416_s24 }
  0x48   :  { %1318 = vrot.lane.b32.xlu2 %v1317_v58, %s1415_s23  ;;  %v216_v58 = vrot.slane %v1745_v41, 2 }
  0x4a   :  { %1313 = vrot.lane.b32.xlu1 %v1312_v50, %s1416_s24  ;;  %v217_v50 = vrot.slane %v108_v42, 2 }
  0x4c   :  { %1308 = vrot.lane.b32.xlu0 %v1287_v11, %s1416_s24  ;;  %v1155_v11 = vld [vmem:[%s2170_s1 + $0x30] sm:$0xff] }
  0x4d   :  { %847 = vmatpush.bf16.msra.mxu0 %v1155_v11  ;;  %1168 = vmatpush.bf16.msra.mxu3 %v1155_v11  ;;  %v1783_v11 = vsel %vm189_vm2, %v216_v58, %v217_v50  ;;  %v1160_v50 = vld [vmem:[%s2170_s1 + $0x58] sm:$0xff] }
  0x4e   :  { %v1357_v22 = vpack.i.bf16 %v1671_v37, %v1783_v11 }
  0x50   :  { %1333 = vrot.lane.b32.xlu2 %v1332_v12, %s1417_s27  ;;  %v1779_v12 = vld [vmem:[%s2170_s1 + $0x68] sm:$0xff] }
  0x51   :  { %848 = vmatpush.bf16.msra.mxu0 %v1154_v31  ;;  %1169 = vmatpush.bf16.msra.mxu3 %v1154_v31 }
  0x52   :  { %1328 = vrot.lane.b32.xlu1 %v1327_v13, %s1417_s27  ;;  %v1152_v13 = vld [vmem:[%s2170_s1 + $0x18] sm:$0xff]  ;;  %897 = vmatpush.bf16.msra.mxu1 %v1779_v12 }
  0x54   :  { %1323 = vrot.lane.b32.xlu0 %v1322_v17, %s1415_s23  ;;  %v1794_v17 = vsel %vm82_vm0, 0.0, %v60_v10  ;;  %v659_v10 = vpack.c.bf16 %v1608_v43, %v1518_v46  ;;  %v1149_v46 = vld [vmem:[%s2170_s1] sm:$0xff]  ;;  %v263_v43 = vrot.slane %v1664_v33, 2 }
  0x55   :  { %849 = vmatpush.bf16.msra.mxu0 %v1153_v23  ;;  %1170 = vmatpush.bf16.msra.mxu3 %v1153_v23  ;;  %v174_v31 = vrot.slane %v1794_v17, 1 }
  0x56   :  { %898 = vmatpush.bf16.msra.mxu1 %v1161_v51  ;;  %1142 = vmatmul.msk.bf16.gmra.mxu2 %vm557_vm3, %v659_v10  ;;  %v662_v10 = vpack.c.bf16 %v1695_v56, %v1611_v44  ;;  %v1407_v44 = vpack.i.bf16 %v1584_v27, %v1542_v61 }
  0x57   :  { %v1812_v58 = vsel %vm144_vm1, %v174_v31, %v175_v40  ;;  %v219_v31 = vrot.slane %v1794_v17, 2  ;;  %v220_v40 = vrot.slane %v109_v21, 2 }
  0x58   :  { %1348 = vrot.lane.b32.xlu2 %v1687_v48, %s1417_s27  ;;  %v1789_v48 = vsel %vm144_vm1, %v168_v60, %v169_v62  ;;  %v114_v62 = vsel %vm82_vm0, %v65_v16, 0.0  ;;  %v1367_v16 = vpack.i.bf16 %v1664_v33, %v1794_v17 }
  0x59   :  { %850 = vmatpush.bf16.msra.mxu0 %v1152_v13  ;;  %1171 = vmatpush.bf16.msra.mxu3 %v1152_v13  ;;  %v1352_v23 = vpack.i.bf16 %v215_v14, %v1789_v48  ;;  %v1372_v13 = vpack.i.bf16 %v1745_v41, %v1755_v49  ;;  %v241_v14 = vrot.slane %v1664_v33, 1  ;;  %v1861_v21 = vsel %vm189_vm2, %v219_v31, %v220_v40 }
  0x5a   :  { %1343 = vrot.lane.b32.xlu1 %v1342_v45, %s1415_s23  ;;  %v1151_v45 = vld [vmem:[%s2170_s1 + $0x10] sm:$0xff]  ;;  %899 = vmatpush.bf16.msra.mxu1 %v1160_v50 }
  0x5c   :  { %1338 = vrot.lane.b32.xlu0 %v1337_v55, %s1416_s24  ;;  %v172_v55 = vrot.slane %v108_v42, 1  ;;  %v1150_v42 = vld [vmem:[%s2170_s1 + $0x8] sm:$0xff] }
  0x5d   :  { %851 = vmatpush.bf16.msra.mxu0 %v1151_v45  ;;  %1172 = vmatpush.bf16.msra.mxu3 %v1151_v45 }
  0x5e   :  { %v1827_v8 = vsel %vm144_vm1, %v171_v53, %v172_v55  ;;  %900 = vmatpush.bf16.msra.mxu1 %v1159_v63  ;;  %v1392_v53 = vpack.i.bf16 %v1861_v21, %v1812_v58 }
  0x5f   :  { %v1377_v9 = vpack.i.bf16 %v1812_v58, %v1827_v8 }
  0x60   :  { %1363 = vrot.lane.b32.xlu2 %v1362_v20, %s1415_s23  ;;  %v242_v20 = vrot.slane %v114_v62, 1 }
  0x61   :  { %852 = vmatpush.bf16.msra.mxu0 %v1150_v42  ;;  %1173 = vmatpush.bf16.msra.mxu3 %v1150_v42 }
  0x62   :  { %1358 = vrot.lane.b32.xlu1 %v1357_v22, %s1416_s24  ;;  %v1821_v60 = vpop.permute.xlu2 %1188  ;;  %v264_v22 = vrot.slane %v114_v62, 2  ;;  %v1854_v45 = vsel %vm144_vm1, %v241_v14, %v242_v20  ;;  %v1157_v62 = vld [vmem:[%s2170_s1 + $0x40] sm:$0xff] }
  0x63   :  { %v1387_v55 = vpack.i.bf16 %v1794_v17, %v1854_v45 }
  0x64   :  { %1353 = vrot.lane.b32.xlu0 %v1352_v23, %s1416_s24  ;;  %v1158_v23 = vld [vmem:[%s2170_s1 + $0x48] sm:$0xff]  ;;  %v1858_v33 = vsel %vm189_vm2, %v263_v43, %v264_v22 }
  0x65   :  { %853 = vmatpush.bf16.msra.mxu0 %v1149_v46  ;;  %1174 = vmatpush.bf16.msra.mxu3 %v1149_v46 }
  0x66   :  { %901 = vmatpush.bf16.msra.mxu1 %v1158_v23  ;;  %1143 = vmatmul.msk.bf16.gmra.mxu2 %vm557_vm3, %v662_v10 }
  0x68   :  { %1378 = vrot.lane.b32.xlu2 %v1377_v9, %s1417_s27  ;;  %v1402_v9 = vpack.i.bf16 %v1552_v1, %v1542_v61 }
  0x69   :  { %1175 = vmatpush.bf16.msrb.mxu3 %v1733_v18  ;;  %v1382_v18 = vpack.i.bf16 %v1827_v8, %v1858_v33 }
  0x6a   :  { %1373 = vrot.lane.b32.xlu1 %v1372_v13, %s1417_s27  ;;  %v1194_v42 = vpop.permute.xlu2 %1193  ;;  %902 = vmatpush.bf16.msra.mxu1 %v1157_v62  ;;  %v1397_v13 = vpack.i.bf16 %v1861_v21, %v1783_v11 }
  0x6b   :  { %v1196_v20 = vunpack.i.h.bf16 %v1194_v42  ;;  %v1195_v46 = vunpack.i.l.bf16 %v1194_v42 }
  0x6c   :  { %1368 = vrot.lane.b32.xlu0 %v1367_v16, %s1415_s23 }
  0x6d   :  { %1176 = vmatpush.bf16.msrb.mxu3 %v1752_v47 }
  0x70   :  { %1393 = vrot.lane.b32.xlu2 %v1392_v53, %s1416_s24 }
  0x71   :  { %1177 = vmatpush.bf16.msrb.mxu3 %v1779_v12 }
  0x72   :  { %1388 = vrot.lane.b32.xlu1 %v1387_v55, %s1417_s27  ;;  %v1884_v47 = vpop.permute.xlu2 %1228 }
  0x74   :  { %1383 = vrot.lane.b32.xlu0 %v1382_v18, %s1416_s24 }
  0x75   :  { %1178 = vmatpush.bf16.msrb.mxu3 %v1161_v51 }
  0x78   :  { %1403 = vrot.lane.b32.xlu2 %v1402_v9, %s1415_s23 }
  0x79   :  { %1179 = vmatpush.bf16.msrb.mxu3 %v1160_v50 }
  0x7a   :  { %1398 = vrot.lane.b32.xlu1 %v1397_v13, %s1415_s23  ;;  %v1892_v56 = vpop.permute.xlu2 %1243  ;;  %v1191_v13 = vunpack.i.h.bf16 %v1821_v60 }
  0x7c   :  { %441 = vrot.lane.b32.xlu0 %v1578_v25, %s1416_s24  ;;  %v1209_v12 = vpop.permute.xlu1 %1208 }
  0x7d   :  { %1180 = vmatpush.bf16.msrb.mxu3 %v1159_v63  ;;  %v665_v63 = vpack.c.bf16 %v1491_v32, %v1698_v57  ;;  %v1210_v42 = vunpack.i.l.bf16 %v1209_v12 }
  0x7e   :  { %v1199_v16 = vpop.permute.xlu0 %1198 }
  0x7f   :  { %v1201_v14 = vunpack.i.h.bf16 %v1199_v16  ;;  %v1200_v51 = vunpack.i.l.bf16 %v1199_v16  ;;  %1144 = vmatmul.msk.bf16.gmra.mxu2 %vm557_vm3, %v665_v63  ;;  %v607_v16 = vsel %vm557_vm3, %v1496_v34, %v1210_v42 }
  0x80   :  { %v623_v63 = vsel %vm573_vm5, %v607_v16, %v1191_v13 }
  0x81   :  { %1181 = vmatpush.bf16.msrb.mxu3 %v1158_v23  ;;  %v559_v40 = vsel %vm557_vm3, %v1466_v15, %v1201_v14  ;;  %v558_v53 = vsel %vm557_vm3, 0.0, %v1200_v51  ;;  %v1190_v14 = vunpack.i.l.bf16 %v1821_v60 }
  0x82   :  { %534 = vrot.lane.b32.xlu1 %v1587_v28, %s1417_s27  ;;  %v1910_v15 = vpop.permute.xlu2 %1258 }
  0x84   :  { %1408 = vrot.lane.b32.xlu0 %v1407_v44, %s1417_s27  ;;  %v1214_v43 = vpop.permute.xlu1 %1213 }
  0x85   :  { %v1216_v50 = vunpack.i.h.bf16 %v1214_v43  ;;  %v1215_v22 = vunpack.i.l.bf16 %v1214_v43  ;;  %1182 = vmatpush.bf16.msrb.mxu3 %v1157_v62 }
  0x86   :  { %v1204_v31 = vpop.permute.xlu0 %1203 }
  0x87   :  { %v1903_v55 = vsel %vm573_vm5, %v558_v53, %v1215_v22  ;;  %v575_v23 = vsel %vm573_vm5, %v559_v40, %v1216_v50  ;;  %v1206_v18 = vunpack.i.h.bf16 %v1204_v31  ;;  %v1211_v50 = vunpack.i.h.bf16 %v1209_v12 }
  0x88   :  { %v590_v9 = vsel %vm589_vm4, %v1903_v55, %v1195_v46  ;;  %v591_v57 = vsel %vm589_vm4, %v575_v23, %v1196_v20  ;;  %v1205_v20 = vunpack.i.l.bf16 %v1204_v31  ;;  %v1231_v23 = vunpack.i.h.bf16 %v1884_v47 }
  0x89   :  { %v654_v10 = vpack.c.bf16 %v591_v57, %v590_v9  ;;  %v606_v44 = vsel %vm557_vm3, %v1484_v29, %v1206_v18  ;;  %v1230_v29 = vunpack.i.l.bf16 %v1884_v47  ;;  %v561_v60 = vsel %vm557_vm3, %v1456_v7, %v1211_v50 }
  0x8a   :  { %v622_v22 = vsel %vm573_vm5, %v606_v44, %v1190_v14  ;;  %v560_v12 = vsel %vm557_vm3, %v1453_v6, %v1205_v20  ;;  %v1928_v42 = vpop.permute.xlu2 %1273  ;;  %v577_v44 = vsel %vm573_vm5, %v561_v60, %v1231_v23 }
  0x8b   :  { %854 = vmatmul.bf16.vlgmr.msra.gmra.mxu0 %v654_v10  ;;  %v668_v10 = vpack.c.bf16 %v1861_v21, %v1783_v11  ;;  %v576_v47 = vsel %vm573_vm5, %v560_v12, %v1230_v29  ;;  %v1246_v21 = vunpack.i.h.bf16 %v1892_v56 }
  0x8c   :  { %v1224_v62 = vpop.permute.xlu1 %1223 }
  0x8d   :  { %v1226_v13 = vunpack.i.h.bf16 %v1224_v62  ;;  %v1225_v16 = vunpack.i.l.bf16 %v1224_v62  ;;  %v1245_v62 = vunpack.i.l.bf16 %v1892_v56 }
  0x8e   :  { %v1219_v51 = vpop.permute.xlu0 %1218 }
  0x8f   :  { %v1221_v43 = vunpack.i.h.bf16 %v1219_v51  ;;  %v1220_v46 = vunpack.i.l.bf16 %v1219_v51  ;;  %1145 = vmatmul.msk.bf16.gmra.mxu2 %vm557_vm3, %v668_v10  ;;  %v608_v11 = vsel %vm557_vm3, %v1472_v19, %v1225_v16 }
  0x91   :  { %v638_v40 = vsel %vm589_vm4, %v622_v22, %v1220_v46  ;;  %v639_v53 = vsel %vm589_vm4, %v623_v63, %v1221_v43  ;;  %v609_v46 = vsel %vm557_vm3, %v1556_v3, %v1226_v13  ;;  %v1261_v63 = vunpack.i.h.bf16 %v1910_v15 }
  0x92   :  { %v655_v34 = vpack.c.bf16 %v639_v53, %v638_v40  ;;  %v1260_v40 = vunpack.i.l.bf16 %v1910_v15  ;;  %v1289_v56 = vpop.permute.xlu2 %1288 }
  0x94   :  { %903 = vmatmul.bf16.vlgmr.msra.gmra.mxu1 %v655_v34  ;;  %v1239_v31 = vpop.permute.xlu1 %1238 }
  0x95   :  { %v1241_v18 = vunpack.i.h.bf16 %v1239_v31  ;;  %v1240_v9 = vunpack.i.l.bf16 %v1239_v31 }
  0x96   :  { %v1234_v57 = vpop.permute.xlu0 %1233 }
  0x97   :  { %v1236_v7 = vunpack.i.h.bf16 %v1234_v57  ;;  %v1235_v14 = vunpack.i.l.bf16 %v1234_v57  ;;  %v592_v6 = vsel %vm589_vm4, %v576_v47, %v1240_v9  ;;  %v593_v51 = vsel %vm589_vm4, %v577_v44, %v1241_v18 }
  0x98   :  { %v657_v43 = vpack.c.bf16 %v593_v51, %v592_v6  ;;  %v1275_v6 = vunpack.i.l.bf16 %v1928_v42 }
  0x99   :  { %v624_v50 = vsel %vm573_vm5, %v608_v11, %v1235_v14  ;;  %v625_v20 = vsel %vm573_vm5, %v609_v46, %v1236_v7  ;;  %v1276_v14 = vunpack.i.h.bf16 %v1928_v42 }
  0x9a   :  { %v640_v19 = vsel %vm589_vm4, %v624_v50, %v1245_v62  ;;  %v641_v60 = vsel %vm589_vm4, %v625_v20, %v1246_v21  ;;  %v1291_v62 = vunpack.i.h.bf16 %v1289_v56 }
  0x9b   :  { %859 = vmatmul.bf16.gmra.mxu0 %v657_v43  ;;  %v658_v18 = vpack.c.bf16 %v641_v60, %v640_v19 }
  0x9c   :  { %v1254_v22 = vpop.permute.xlu1 %1253 }
  0x9d   :  { %v1256_v53 = vunpack.i.h.bf16 %v1254_v22  ;;  %v1255_v34 = vunpack.i.l.bf16 %v1254_v22 }
  0x9e   :  { %v1249_v3 = vpop.permute.xlu0 %1248 }
  0x9f   :  { %v1251_v23 = vunpack.i.h.bf16 %v1249_v3  ;;  %v1250_v29 = vunpack.i.l.bf16 %v1249_v3 }
  0xa1   :  { %v570_v12 = vsel %vm557_vm3, %v1552_v1, %v1251_v23  ;;  %v569_v31 = vsel %vm557_vm3, %v1542_v61, %v1250_v29  ;;  %v671_v1 = vpack.c.bf16 %v1581_v26, %v1578_v25  ;;  %v1304_v61 = vpop.permute.xlu2 %1303  ;;  %v1290_v25 = vunpack.i.l.bf16 %v1289_v56 }
  0xa2   :  { %v585_v9 = vsel %vm573_vm5, %v569_v31, %v1255_v34  ;;  %v586_v15 = vsel %vm573_vm5, %v570_v12, %v1256_v53 }
  0xa3   :  { %v602_v57 = vsel %vm589_vm4, %v585_v9, %v1260_v40  ;;  %v603_v10 = vsel %vm589_vm4, %v586_v15, %v1261_v63  ;;  %1146 = vmatmul.msk.bf16.gmra.mxu2 %vm557_vm3, %v671_v1  ;;  %v674_v9 = vpack.c.bf16 %v1671_v37, %v1668_v36  ;;  %v1306_v15 = vunpack.i.h.bf16 %v1304_v61 }
  0xa4   :  { %908 = vmatmul.bf16.gmra.mxu1 %v658_v18  ;;  %v672_v13 = vpack.c.bf16 %v603_v10, %v602_v57  ;;  %v1269_v16 = vpop.permute.xlu1 %1268  ;;  %v1305_v57 = vunpack.i.l.bf16 %v1304_v61 }
  0xa5   :  { %v1271_v51 = vunpack.i.h.bf16 %v1269_v16  ;;  %v1270_v43 = vunpack.i.l.bf16 %v1269_v16 }
  0xa6   :  { %v1264_v47 = vpop.permute.xlu0 %1263  ;;  %884 = vmatmul.bf16.vlgmr.msra.gmra.mxu3 %v672_v13 }
  0xa7   :  { %v1266_v44 = vunpack.i.h.bf16 %v1264_v47  ;;  %v1265_v7 = vunpack.i.l.bf16 %v1264_v47  ;;  %v611_v53 = vsel %vm557_vm3, %v1640_v0, %v1271_v51 }
  0xa9   :  { %v563_v46 = vsel %vm557_vm3, %v1534_v54, %v1266_v44  ;;  %v562_v11 = vsel %vm557_vm3, %v1499_v35, %v1265_v7  ;;  %v610_v54 = vsel %vm557_vm3, %v1559_v4, %v1270_v43  ;;  %v1319_v12 = vpop.permute.xlu2 %1318 }
  0xaa   :  { %v578_v40 = vsel %vm573_vm5, %v562_v11, %v1275_v6  ;;  %v579_v42 = vsel %vm573_vm5, %v563_v46, %v1276_v14  ;;  %v1320_v46 = vunpack.i.l.bf16 %v1319_v12 }
  0xac   :  { %v1284_v21 = vpop.permute.xlu1 %1283 }
  0xad   :  { %v1286_v26 = vunpack.i.h.bf16 %v1284_v21  ;;  %v1285_v50 = vunpack.i.l.bf16 %v1284_v21 }
  0xae   :  { %v1279_v20 = vpop.permute.xlu0 %1278 }
  0xaf   :  { %v1281_v22 = vunpack.i.h.bf16 %v1279_v20  ;;  %v1280_v63 = vunpack.i.l.bf16 %v1279_v20  ;;  %v594_v35 = vsel %vm589_vm4, %v578_v40, %v1285_v50  ;;  %v595_v34 = vsel %vm589_vm4, %v579_v42, %v1286_v26 }
  0xb0   :  { %v660_v3 = vpack.c.bf16 %v595_v34, %v594_v35 }
  0xb1   :  { %v626_v23 = vsel %vm573_vm5, %v610_v54, %v1280_v63  ;;  %v627_v29 = vsel %vm573_vm5, %v611_v53, %v1281_v22  ;;  %v1989_v14 = vpop.permute.xlu2 %1333 }
  0xb2   :  { %v642_v19 = vsel %vm589_vm4, %v626_v23, %v1290_v25  ;;  %v643_v60 = vsel %vm589_vm4, %v627_v29, %v1291_v62  ;;  %864 = vmatmul.bf16.gmra.mxu0 %v660_v3  ;;  %v1336_v26 = vunpack.i.h.bf16 %v1989_v14  ;;  %v1335_v50 = vunpack.i.l.bf16 %v1989_v14 }
  0xb3   :  { %v661_v56 = vpack.c.bf16 %v643_v60, %v642_v19  ;;  %1147 = vmatmul.msk.bf16.gmra.mxu2 %vm557_vm3, %v674_v9 }
  0xb4   :  { %v1299_v0 = vpop.permute.xlu1 %1298 }
  0xb5   :  { %913 = vmatmul.bf16.gmra.mxu1 %v661_v56  ;;  %v1301_v31 = vunpack.i.h.bf16 %v1299_v0  ;;  %v1300_v4 = vunpack.i.l.bf16 %v1299_v0 }
  0xb6   :  { %v1294_v18 = vpop.permute.xlu0 %1293 }
  0xb7   :  { %v1296_v10 = vunpack.i.h.bf16 %v1294_v18  ;;  %v1295_v13 = vunpack.i.l.bf16 %v1294_v18 }
  0xb9   :  { %v572_v16 = vsel %vm557_vm3, %v1630_v59, %v1296_v10  ;;  %v571_v47 = vsel %vm557_vm3, %v1574_v24, %v1295_v13  ;;  %v1321_v59 = vunpack.i.h.bf16 %v1319_v12  ;;  %v1349_v53 = vpop.permute.xlu2 %1348 }
  0xba   :  { %v587_v1 = vsel %vm573_vm5, %v571_v47, %v1300_v4  ;;  %v588_v44 = vsel %vm573_vm5, %v572_v16, %v1301_v31  ;;  %v677_v4 = vpack.c.bf16 %v1491_v32, %v1858_v33  ;;  %v1351_v18 = vunpack.i.h.bf16 %v1349_v53 }
  0xbb   :  { %v604_v7 = vsel %vm589_vm4, %v587_v1, %v1305_v57  ;;  %v605_v36 = vsel %vm589_vm4, %v588_v44, %v1306_v15  ;;  %v1350_v9 = vunpack.i.l.bf16 %v1349_v53 }
  0xbc   :  { %v675_v37 = vpack.c.bf16 %v605_v36, %v604_v7  ;;  %v1314_v61 = vpop.permute.xlu1 %1313 }
  0xbd   :  { %v1316_v11 = vunpack.i.h.bf16 %v1314_v61  ;;  %v1315_v24 = vunpack.i.l.bf16 %v1314_v61 }
  0xbe   :  { %v1309_v6 = vpop.permute.xlu0 %1308  ;;  %889 = vmatmul.bf16.gmra.mxu3 %v675_v37 }
  0xbf   :  { %v1311_v51 = vunpack.i.h.bf16 %v1309_v6  ;;  %v1310_v43 = vunpack.i.l.bf16 %v1309_v6  ;;  %v612_v35 = vsel %vm557_vm3, %v1643_v2, %v1315_v24 }
  0xc1   :  { %v565_v21 = vsel %vm557_vm3, %v1622_v52, %v1311_v51  ;;  %v564_v62 = vsel %vm557_vm3, %v1590_v30, %v1310_v43  ;;  %v613_v30 = vsel %vm557_vm3, %v1707_v5, %v1316_v11  ;;  %v1364_v16 = vpop.permute.xlu2 %1363 }
  0xc2   :  { %v580_v54 = vsel %vm573_vm5, %v564_v62, %v1320_v46  ;;  %v581_v52 = vsel %vm573_vm5, %v565_v21, %v1321_v59  ;;  %v1366_v6 = vunpack.i.h.bf16 %v1364_v16 }
  0xc3   :  { %1148 = vmatmul.msk.bf16.gmra.mxu2 %vm557_vm3, %v677_v4 }
  0xc4   :  { %v1329_v25 = vpop.permute.xlu1 %1328 }
  0xc5   :  { %v1331_v20 = vunpack.i.h.bf16 %v1329_v25  ;;  %v1330_v22 = vunpack.i.l.bf16 %v1329_v25 }
  0xc6   :  { %v1997_v63 = vpop.permute.xlu0 %1323 }
  0xc7   :  { %v1326_v40 = vunpack.i.h.bf16 %v1997_v63  ;;  %v1325_v42 = vunpack.i.l.bf16 %v1997_v63  ;;  %v596_v34 = vsel %vm589_vm4, %v580_v54, %v1330_v22  ;;  %v597_v3 = vsel %vm589_vm4, %v581_v52, %v1331_v20 }
  0xc8   :  { %v663_v23 = vpack.c.bf16 %v597_v3, %v596_v34 }
  0xc9   :  { %v628_v29 = vsel %vm573_vm5, %v612_v35, %v1325_v42  ;;  %v629_v19 = vsel %vm573_vm5, %v613_v30, %v1326_v40  ;;  %v1379_v51 = vpop.permute.xlu2 %1378  ;;  %v2034_v42 = vpop.f32.mrf.mxu2 }
  0xca   :  { %v644_v60 = vsel %vm589_vm4, %v628_v29, %v1335_v50  ;;  %v645_v5 = vsel %vm589_vm4, %v629_v19, %v1336_v26  ;;  %869 = vmatmul.bf16.gmra.mxu0 %v663_v23  ;;  %v1381_v11 = vunpack.i.h.bf16 %v1379_v51  ;;  %v1380_v24 = vunpack.i.l.bf16 %v1379_v51 }
  0xcb   :  { %v664_v56 = vpack.c.bf16 %v645_v5, %v644_v60 }
  0xcc   :  { %v1344_v2 = vpop.permute.xlu1 %1343 }
  0xcd   :  { %918 = vmatmul.bf16.gmra.mxu1 %v664_v56  ;;  %v1346_v12 = vunpack.i.h.bf16 %v1344_v2  ;;  %v1345_v0 = vunpack.i.l.bf16 %v1344_v2 }
  0xce   :  { %v1339_v31 = vpop.permute.xlu0 %1338 }
  0xcf   :  { %v1341_v15 = vunpack.i.h.bf16 %v1339_v31  ;;  %v1340_v57 = vunpack.i.l.bf16 %v1339_v31 }
  0xd1   :  { %v619_v10 = vsel %vm557_vm3, %v1674_v38, %v1341_v15  ;;  %v618_v13 = vsel %vm557_vm3, %v1587_v28, %v1340_v57  ;;  %v1365_v38 = vunpack.i.l.bf16 %v1364_v16  ;;  %v955_v2 = vpop.f32.mrf.mxu2 }
  0xd2   :  { %v634_v47 = vsel %vm573_vm5, %v618_v13, %v1345_v0  ;;  %v635_v1 = vsel %vm573_vm5, %v619_v10, %v1346_v12 }
  0xd3   :  { %v650_v44 = vsel %vm589_vm4, %v634_v47, %v1350_v9  ;;  %v651_v32 = vsel %vm589_vm4, %v635_v1, %v1351_v18 }
  0xd4   :  { %v673_v33 = vpack.c.bf16 %v651_v32, %v650_v44  ;;  %v1359_v7 = vpop.permute.xlu1 %1358 }
  0xd5   :  { %v1360_v43 = vunpack.i.l.bf16 %v1359_v7  ;;  %v1361_v3 = vunpack.i.h.bf16 %v1359_v7 }
  0xd6   :  { %v1354_v36 = vpop.permute.xlu0 %1353  ;;  %933 = vmatmul.bf16.vlgmr.msrb.gmra.mxu3 %v673_v33 }
  0xd7   :  { %v1356_v37 = vunpack.i.h.bf16 %v1354_v36  ;;  %v1355_v61 = vunpack.i.l.bf16 %v1354_v36  ;;  %v615_v53 = vsel %vm557_vm3, %v1827_v8, %v1360_v43  ;;  %v1394_v8 = vpop.permute.xlu2 %1393 }
  0xd8   :  { %v1395_v57 = vunpack.i.l.bf16 %v1394_v8 }
  0xd9   :  { %v614_v28 = vsel %vm557_vm3, %v1789_v48, %v1356_v37  ;;  %v566_v59 = vsel %vm557_vm3, %v1755_v49, %v1355_v61  ;;  %v958_v16 = vpop.f32.mrf.mxu2 }
  0xda   :  { %v582_v20 = vsel %vm573_vm5, %v566_v59, %v1365_v38  ;;  %v630_v22 = vsel %vm573_vm5, %v614_v28, %v1366_v6  ;;  %v568_v14 = vsel %vm557_vm3, %v1794_v17, %v1395_v57 }
  0xdb   :  { %v646_v30 = vsel %vm589_vm4, %v630_v22, %v1380_v24 }
  0xdc   :  { %v1374_v46 = vpop.permute.xlu1 %1373 }
  0xdd   :  { %v1376_v21 = vunpack.i.h.bf16 %v1374_v46  ;;  %v1375_v62 = vunpack.i.l.bf16 %v1374_v46 }
  0xde   :  { %v1369_v25 = vpop.permute.xlu0 %1368 }
  0xdf   :  { %v1370_v50 = vunpack.i.l.bf16 %v1369_v25  ;;  %v598_v48 = vsel %vm589_vm4, %v1903_v55, %v1375_v62  ;;  %v599_v49 = vsel %vm589_vm4, %v582_v20, %v1376_v21  ;;  %v1371_v29 = vunpack.i.h.bf16 %v1369_v25  ;;  %v1404_v10 = vpop.permute.xlu2 %1403  ;;  %v2075_v25 = vld [vmem:[%s2171_s2] ss:$0 sm:$0xff] }
  0xe0   :  { %v666_v54 = vpack.c.bf16 %v599_v49, %v598_v48  ;;  %v620_v55 = vsel %vm557_vm3, %v1677_v39, %v1361_v3  ;;  %v1396_v39 = vunpack.i.h.bf16 %v1394_v8  ;;  %v1406_v47 = vunpack.i.h.bf16 %v1404_v10  ;;  %v2081_v20 = vld [vmem:[%s2172_s3] ss:$0 sm:$0xff] }
  0xe1   :  { %v631_v52 = vsel %vm573_vm5, %v615_v53, %v1370_v50  ;;  %v636_v12 = vsel %vm573_vm5, %v620_v55, %v1371_v29  ;;  %v1405_v63 = vunpack.i.l.bf16 %v1404_v10  ;;  %v960_v59 = vpop.f32.mrf.mxu2 }
  0xe2   :  { %v647_v35 = vsel %vm589_vm4, %v631_v52, %v1381_v11  ;;  %874 = vmatmul.bf16.gmra.mxu0 %v666_v54 }
  0xe3   :  { %v667_v34 = vpack.c.bf16 %v647_v35, %v646_v30 }
  0xe4   :  { %v1389_v23 = vpop.permute.xlu1 %1388 }
  0xe5   :  { %923 = vmatmul.bf16.gmra.mxu1 %v667_v34  ;;  %v1390_v60 = vunpack.i.l.bf16 %v1389_v23  ;;  %v1391_v36 = vunpack.i.h.bf16 %v1389_v23 }
  0xe6   :  { %v1384_v19 = vpop.permute.xlu0 %1383 }
  0xe7   :  { %v1385_v5 = vunpack.i.l.bf16 %v1384_v19  ;;  %v652_v31 = vsel %vm589_vm4, %v636_v12, %v1390_v60 }
  0xe9   :  { %v621_v56 = vsel %vm557_vm3, %v1854_v45, %v1385_v5  ;;  %v1386_v45 = vunpack.i.h.bf16 %v1384_v19  ;;  %v963_v46 = vpop.f32.mrf.mxu2 }
  0xea   :  { %v637_v0 = vsel %vm573_vm5, %v621_v56, %v1326_v40  ;;  %v616_v40 = vsel %vm557_vm3, %v1812_v58, %v1396_v39 }
  0xeb   :  { %v653_v4 = vsel %vm589_vm4, %v637_v0, %v1336_v26  ;;  %v567_v26 = vsel %vm557_vm3, %v1745_v41, %v1386_v45  ;;  %v632_v38 = vsel %vm573_vm5, %v616_v40, %v1405_v63 }
  0xec   :  { %v676_v18 = vpack.c.bf16 %v653_v4, %v652_v31  ;;  %v1399_v9 = vpop.permute.xlu1 %1398 }
  0xed   :  { %v1400_v13 = vunpack.i.l.bf16 %v1399_v9  ;;  %v1401_v1 = vunpack.i.h.bf16 %v1399_v9 }
  0xee   :  { %v442_v15 = vpop.permute.xlu0 %441  ;;  %938 = vmatmul.bf16.gmra.mxu3 %v676_v18 }
  0xef   :  { %v617_v44 = vsel %vm557_vm3, %v1584_v27, %v442_v15  ;;  %v583_v7 = vsel %vm573_vm5, %v567_v26, %v1400_v13  ;;  %v584_v58 = vsel %vm573_vm5, %v568_v14, %v1401_v1 }
  0xf0   :  { %v633_v6 = vsel %vm573_vm5, %v617_v44, %v1406_v47  ;;  %v600_v41 = vsel %vm589_vm4, %v583_v7, %v1391_v36 }
  0xf1   :  { %v965_v21 = vpop.f32.mrf.mxu2 }
  0xf4   :  { %v535_v32 = vpop.permute.xlu1 %534 }
  0xf5   :  { %v649_v17 = vsel %vm589_vm4, %v633_v6, %v535_v32 }
  0xf6   :  { %v1409_v33 = vpop.permute.xlu0 %1408 }
  0xf7   :  { %v1411_v37 = vunpack.i.h.bf16 %v1409_v33  ;;  %v1410_v61 = vunpack.i.l.bf16 %v1409_v33 }
  0xf9   :  { %v601_v51 = vsel %vm589_vm4, %v584_v58, %v1410_v61  ;;  %v648_v27 = vsel %vm589_vm4, %v632_v38, %v1411_v37 }
  0xfa   :  { %v669_v43 = vpack.c.bf16 %v601_v51, %v600_v41  ;;  %v670_v28 = vpack.c.bf16 %v649_v17, %v648_v27 }
  0xfc   :  { %879 = vmatmul.bf16.gmra.mxu0 %v669_v43  ;;  %928 = vmatmul.bf16.gmra.mxu1 %v670_v28 }
 0x102   :  { %v968_v30 = vpop.f32.mrf.mxu2 }
 0x108   :  { %v855_v11 = vpop.f32.mrf.mxu0 }
 0x10a   :  { %v970_v60 = vpop.f32.mrf.mxu2 }
 0x110   :  { %v857_v22 = vpop.f32.mrf.mxu0 }
 0x111   :  { %v904_v24 = vpop.f32.mrf.mxu1 }
 0x112   :  { %v905_v62 = vadd.f32 %v904_v24, %v855_v11  ;;  %v973_v18 = vpop.f32.mrf.mxu2 }
 0x114   :  { %v954_v50 = vadd.f32 %v2034_v42, %v905_v62 }
 0x116   :  { %v997_v53 = vmul.f32 %v2075_v25, %v954_v50 }
 0x118   :  { %v1017_v48 = vadd.f32 %v2081_v20, %v997_v53  ;;  %v860_v34 = vpop.f32.mrf.mxu0 }
 0x119   :  { %v906_v49 = vpop.f32.mrf.mxu1 }
 0x11a   :  { %v1033_v54 = vmax.f32 %v1017_v48, 0.0  ;;  %v907_v52 = vadd.f32 %v906_v49, %v857_v22  ;;  %v975_v1 = vpop.f32.mrf.mxu2 }
 0x11c   :  { %1049 = vst [vmem:[%s2173_s4] sm:$0xff] %v1033_v54  ;;  %v956_v35 = vadd.f32 %v955_v2, %v907_v52 }
 0x11e   :  { %v998_v42 = vmul.f32 %v2075_v25, %v956_v35 }
 0x120   :  { %v1018_v3 = vadd.f32 %v2081_v20, %v998_v42  ;;  %v862_v56 = vpop.f32.mrf.mxu0 }
 0x121   :  { %v909_v23 = vpop.f32.mrf.mxu1 }
 0x122   :  { %v1034_v29 = vmax.f32 %v1018_v3, 0.0  ;;  %v910_v19 = vadd.f32 %v909_v23, %v860_v34 }
 0x124   :  { %1050 = vst [vmem:[%s2173_s4 + $0x8] sm:$0xff] %v1034_v29  ;;  %v959_v8 = vadd.f32 %v958_v16, %v910_v19 }
 0x126   :  { %v999_v5 = vmul.f32 %v2075_v25, %v959_v8  ;;  %v2110_v37 = vpop.f32.mrf.mxu2 }
 0x128   :  { %v1019_v55 = vadd.f32 %v2081_v20, %v999_v5 }
 0x129   :  { %v911_v2 = vpop.f32.mrf.mxu1  ;;  %v885_v10 = vpop.f32.mrf.mxu3 }
 0x12a   :  { %v1035_v12 = vmax.f32 %v1019_v55, 0.0  ;;  %v912_v0 = vadd.f32 %v911_v2, %v862_v56 }
 0x12c   :  { %1051 = vst [vmem:[%s2173_s4 + $0x10] sm:$0xff] %v1035_v12  ;;  %v961_v31 = vadd.f32 %v960_v59, %v912_v0 }
 0x12e   :  { %v1000_v4 = vmul.f32 %v2075_v25, %v961_v31  ;;  %v2115_v41 = vpop.f32.mrf.mxu2 }
 0x12f   :  { %v865_v15 = vpop.f32.mrf.mxu0 }
 0x130   :  { %v1020_v9 = vadd.f32 %v2081_v20, %v1000_v4 }
 0x131   :  { %v887_v32 = vpop.f32.mrf.mxu3 }
 0x132   :  { %v1036_v39 = vmax.f32 %v1020_v9, 0.0  ;;  %v914_v57 = vpop.f32.mrf.mxu1 }
 0x133   :  { %v915_v45 = vadd.f32 %v914_v57, %v865_v15 }
 0x134   :  { %1052 = vst [vmem:[%s2173_s4 + $0x18] sm:$0xff] %v1036_v39 }
 0x135   :  { %v964_v13 = vadd.f32 %v963_v46, %v915_v45 }
 0x136   :  { %v983_v62 = vpop.f32.mrf.mxu2 }
 0x137   :  { %v1001_v16 = vmul.f32 %v2075_v25, %v964_v13  ;;  %v867_v47 = vpop.f32.mrf.mxu0 }
 0x139   :  { %v1021_v63 = vadd.f32 %v2081_v20, %v1001_v16 }
 0x13a   :  { %v916_v40 = vpop.f32.mrf.mxu1 }
 0x13b   :  { %v1037_v14 = vmax.f32 %v1021_v63, 0.0  ;;  %v917_v26 = vadd.f32 %v916_v40, %v867_v47 }
 0x13d   :  { %1053 = vst [vmem:[%s2173_s4 + $0x20] sm:$0xff] %v1037_v14  ;;  %v966_v44 = vadd.f32 %v965_v21, %v917_v26 }
 0x13e   :  { %v985_v42 = vpop.f32.mrf.mxu2 }
 0x13f   :  { %v1002_v33 = vmul.f32 %v2075_v25, %v966_v44 }
 0x141   :  { %v1022_v7 = vadd.f32 %v2081_v20, %v1002_v33  ;;  %v890_v61 = vpop.f32.mrf.mxu3 }
 0x143   :  { %v1038_v36 = vmax.f32 %v1022_v7, 0.0 }
 0x145   :  { %1054 = vst [vmem:[%s2173_s4 + $0x28] sm:$0xff] %v1038_v36 }
 0x146   :  { %v988_v15 = vpop.f32.mrf.mxu2 }
 0x147   :  { %v870_v6 = vpop.f32.mrf.mxu0 }
 0x149   :  { %v892_v43 = vpop.f32.mrf.mxu3 }
 0x14a   :  { %v919_v58 = vpop.f32.mrf.mxu1 }
 0x14b   :  { %v920_v38 = vadd.f32 %v919_v58, %v870_v6 }
 0x14d   :  { %v969_v17 = vadd.f32 %v968_v30, %v920_v38 }
 0x14e   :  { %v990_v44 = vpop.f32.mrf.mxu2 }
 0x14f   :  { %v1003_v51 = vmul.f32 %v2075_v25, %v969_v17  ;;  %v872_v27 = vpop.f32.mrf.mxu0 }
 0x151   :  { %v1023_v28 = vadd.f32 %v2081_v20, %v1003_v51 }
 0x152   :  { %v921_v59 = vpop.f32.mrf.mxu1 }
 0x153   :  { %v1039_v46 = vmax.f32 %v1023_v28, 0.0  ;;  %v922_v11 = vadd.f32 %v921_v59, %v872_v27 }
 0x155   :  { %1055 = vst [vmem:[%s2173_s4 + $0x30] sm:$0xff] %v1039_v46  ;;  %v971_v24 = vadd.f32 %v970_v60, %v922_v11 }
 0x157   :  { %v1004_v21 = vmul.f32 %v2075_v25, %v971_v24 }
 0x159   :  { %v1024_v50 = vadd.f32 %v2081_v20, %v1004_v21  ;;  %v934_v22 = vpop.f32.mrf.mxu3 }
 0x15a   :  { %v935_v53 = vadd.f32 %v934_v22, %v885_v10 }
 0x15b   :  { %v1040_v48 = vmax.f32 %v1024_v50, 0.0 }
 0x15c   :  { %v984_v49 = vadd.f32 %v983_v62, %v935_v53 }
 0x15d   :  { %1056 = vst [vmem:[%s2173_s4 + $0x38] sm:$0xff] %v1040_v48 }
 0x15e   :  { %v1009_v54 = vmul.f32 %v2075_v25, %v984_v49 }
 0x15f   :  { %v875_v30 = vpop.f32.mrf.mxu0 }
 0x160   :  { %v1029_v52 = vadd.f32 %v2081_v20, %v1009_v54 }
 0x161   :  { %v936_v35 = vpop.f32.mrf.mxu3 }
 0x162   :  { %v1045_v34 = vmax.f32 %v1029_v52, 0.0  ;;  %v937_v3 = vadd.f32 %v936_v35, %v887_v32  ;;  %v924_v23 = vpop.f32.mrf.mxu1 }
 0x163   :  { %v925_v29 = vadd.f32 %v924_v23, %v875_v30 }
 0x164   :  { %1061 = vst [vmem:[%s2173_s4 + $0x60] sm:$0xff] %v1045_v34  ;;  %v986_v19 = vadd.f32 %v985_v42, %v937_v3 }
 0x165   :  { %v974_v8 = vadd.f32 %v973_v18, %v925_v29 }
 0x166   :  { %v1010_v60 = vmul.f32 %v2075_v25, %v986_v19 }
 0x167   :  { %v1005_v5 = vmul.f32 %v2075_v25, %v974_v8  ;;  %v877_v56 = vpop.f32.mrf.mxu0 }
 0x168   :  { %v1030_v55 = vadd.f32 %v2081_v20, %v1010_v60 }
 0x169   :  { %v1025_v2 = vadd.f32 %v2081_v20, %v1005_v5 }
 0x16a   :  { %v1046_v12 = vmax.f32 %v1030_v55, 0.0  ;;  %v926_v0 = vpop.f32.mrf.mxu1 }
 0x16b   :  { %v1041_v31 = vmax.f32 %v1025_v2, 0.0  ;;  %v927_v4 = vadd.f32 %v926_v0, %v877_v56 }
 0x16c   :  { %1062 = vst [vmem:[%s2173_s4 + $0x68] sm:$0xff] %v1046_v12 }
 0x16d   :  { %1057 = vst [vmem:[%s2173_s4 + $0x40] sm:$0xff] %v1041_v31  ;;  %v976_v18 = vadd.f32 %v975_v1, %v927_v4 }
 0x16f   :  { %v1006_v9 = vmul.f32 %v2075_v25, %v976_v18 }
 0x171   :  { %v1026_v39 = vadd.f32 %v2081_v20, %v1006_v9  ;;  %v939_v57 = vpop.f32.mrf.mxu3 }
 0x172   :  { %v940_v45 = vadd.f32 %v939_v57, %v890_v61 }
 0x173   :  { %v1042_v10 = vmax.f32 %v1026_v39, 0.0 }
 0x174   :  { %v989_v13 = vadd.f32 %v988_v15, %v940_v45 }
 0x175   :  { %1058 = vst [vmem:[%s2173_s4 + $0x48] sm:$0xff] %v1042_v10 }
 0x176   :  { %v1011_v16 = vmul.f32 %v2075_v25, %v989_v13 }
 0x178   :  { %v1031_v47 = vadd.f32 %v2081_v20, %v1011_v16 }
 0x179   :  { %v880_v63 = vpop.f32.mrf.mxu0  ;;  %v929_v40 = vpop.f32.mrf.mxu1 }
 0x17a   :  { %v1047_v1 = vmax.f32 %v1031_v47, 0.0  ;;  %v930_v14 = vadd.f32 %v929_v40, %v880_v63  ;;  %v941_v26 = vpop.f32.mrf.mxu3 }
 0x17b   :  { %v942_v32 = vadd.f32 %v941_v26, %v892_v43 }
 0x17c   :  { %1063 = vst [vmem:[%s2173_s4 + $0x70] sm:$0xff] %v1047_v1  ;;  %v979_v33 = vadd.f32 %v2110_v37, %v930_v14 }
 0x17d   :  { %v991_v7 = vadd.f32 %v990_v44, %v942_v32 }
 0x17e   :  { %v1007_v36 = vmul.f32 %v2075_v25, %v979_v33 }
 0x17f   :  { %v1012_v61 = vmul.f32 %v2075_v25, %v991_v7 }
 0x180   :  { %v1027_v6 = vadd.f32 %v2081_v20, %v1007_v36 }
 0x181   :  { %v1032_v58 = vadd.f32 %v2081_v20, %v1012_v61  ;;  %v882_v38 = vpop.f32.mrf.mxu0  ;;  %v931_v17 = vpop.f32.mrf.mxu1 }
 0x182   :  { %v1043_v51 = vmax.f32 %v1027_v6, 0.0  ;;  %v932_v27 = vadd.f32 %v931_v17, %v882_v38 }
 0x183   :  { %v1048_v43 = vmax.f32 %v1032_v58, 0.0 }
 0x184   :  { %1059 = vst [vmem:[%s2173_s4 + $0x50] sm:$0xff] %v1043_v51  ;;  %v981_v37 = vadd.f32 %v2115_v41, %v932_v27 }
 0x185   :  { %1064 = vst [vmem:[%s2173_s4 + $0x78] sm:$0xff] %v1048_v43 }
 0x186   :  { %v1008_v28 = vmul.f32 %v2075_v25, %v981_v37 }
 0x188   :  { %v1028_v59 = vadd.f32 %v2081_v20, %v1008_v28 }
 0x18a   :  { %v1044_v46 = vmax.f32 %v1028_v59, 0.0 }
 0x18c   :  { %1060 = vst [vmem:[%s2173_s4 + $0x58] sm:$0xff] %v1044_v46 }

// kernel: resnet_forward.8
= control target key start
LH: loop header
LB: loop body
LE: loop exit
PB: predicated region body
PF: predicated region fallthrough
CT: control target
= control target key end

     0   :  { %vm91_vm0 = vcmask 1040384   ;;  %vm153_vm1 = vcmask 1046528   ;;  %v4188_v8 = vmov 0.0   ;;  %vm198_vm2 = vcmask 1045504   ;;  %s2761_s11 = smov 96   ;;  %s2762_s16 = smov 32   ;;  %s4179_s0 = inlined_call_operand.vmem [shape: f32[2,8,8,32], index: 0, kind: input, shape index: {}]   ;;  %s4180_s1 = inlined_call_operand.vmem [shape: bf16[288,32], index: 1, kind: input, shape index: {}]   ;;  %s4181_s2 = inlined_call_operand.vmem [shape: f32[1,32], index: 2, kind: input, shape index: {}]   ;;  %s4182_s3 = inlined_call_operand.vmem [shape: f32[1,32], index: 3, kind: input, shape index: {}]   ;;  %s4183_s4 = inlined_call_operand.vmem [shape: bf16[288,32], index: 4, kind: input, shape index: {}]   ;;  %s4184_s5 = inlined_call_operand.vmem [shape: f32[1,32], index: 5, kind: input, shape index: {}]   ;;  %s4185_s6 = inlined_call_operand.vmem [shape: f32[1,32], index: 6, kind: input, shape index: {}]   ;;  %s4186_s7 = inlined_call_operand.vmem [shape: f32[2,8,8,32], index: 7, kind: output, shape index: {}]  }
   0x1   :  { %v35_v0 = vld [vmem:[%s4179_s0 + $0x40] sm:$0xff]  ;;  %v36_v1 = vld [vmem:[%s4179_s0 + $0x48] sm:$0xff]  ;;  %v37_v2 = vld [vmem:[%s4179_s0 + $0x50] sm:$0xff]  ;;  %v2820_v9 = vrot.slane %v4188_v8, 1  ;;  %v2857_v33 = vrot.slane %v4188_v8, 2  ;;  %s2763_s19 = smov 64  }
   0x2   :  { %v67_v3 = vrot.slane %v35_v0, 7  ;;  %v68_v4 = vrot.slane %v36_v1, 7  ;;  %v69_v5 = vrot.slane %v37_v2, 7  ;;  %v38_v6 = vld [vmem:[%s4179_s0 + $0x58] sm:$0xff]  ;;  %v39_v7 = vld [vmem:[%s4179_s0 + $0x60] sm:$0xff]  ;;  %v40_v32 = vld [vmem:[%s4179_s0 + $0x68] sm:$0xff] }
   0x3   :  { %v70_v10 = vrot.slane %v38_v6, 7  ;;  %v71_v11 = vrot.slane %v39_v7, 7  ;;  %v41_v37 = vld [vmem:[%s4179_s0 + $0x70] sm:$0xff]  ;;  %v72_v44 = vrot.slane %v40_v32, 7  ;;  %v28_v61 = vld [vmem:[%s4179_s0 + $0x8] sm:$0xff]  ;;  %vm566_vm3 = vcmask 261120  }
   0x4   :  { %v2823_v12 = vsel %vm91_vm0, 0.0, %v67_v3  ;;  %v2826_v13 = vsel %vm91_vm0, 0.0, %v68_v4  ;;  %v116_v14 = vsel %vm91_vm0, %v67_v3, 0.0  ;;  %v2830_v15 = vsel %vm91_vm0, 0.0, %v69_v5 }
   0x5   :  { %v2303_v16 = vpack.i.bf16 %v2826_v13, %v2823_v12  ;;  %v177_v17 = vrot.slane %v2823_v12, 1  ;;  %v178_v18 = vrot.slane %v116_v14, 1  ;;  %v223_v19 = vrot.slane %v116_v14, 2 }
   0x6   :  { %v117_v20 = vsel %vm91_vm0, %v68_v4, 0.0  ;;  %v118_v21 = vsel %vm91_vm0, %v69_v5, 0.0  ;;  %v180_v22 = vrot.slane %v2826_v13, 1  ;;  %v183_v23 = vrot.slane %v2830_v15, 1 }
   0x7   :  { %2304 = vrot.lane.b32.xlu1 %v2303_v16, %s2761_s11  ;;  %v2841_v24 = vsel %vm153_vm1, %v177_v17, %v178_v18  ;;  %v181_v25 = vrot.slane %v117_v20, 1  ;;  %v184_v26 = vrot.slane %v118_v21, 1  ;;  %v222_v27 = vrot.slane %v2823_v12, 2 }
   0x8   :  { %v2293_v28 = vpack.i.bf16 %v2841_v24, %v2820_v9  ;;  %v2847_v29 = vsel %vm91_vm0, 0.0, %v70_v10  ;;  %v2850_v30 = vsel %vm91_vm0, 0.0, %v71_v11  ;;  %v119_v31 = vsel %vm91_vm0, %v70_v10, 0.0 }
   0x9   :  { %v2860_v34 = vsel %vm153_vm1, %v180_v22, %v181_v25  ;;  %v2863_v35 = vsel %vm153_vm1, %v183_v23, %v184_v26  ;;  %v120_v36 = vsel %vm91_vm0, %v71_v11, 0.0  ;;  %v2871_v38 = vsel %vm198_vm2, %v222_v27, %v223_v19  ;;  %v27_v11 = vld [vmem:[%s4179_s0] sm:$0xff] }
   0xa   :  { %2294 = vrot.lane.b32.xlu0 %v2293_v28, %s2762_s16  ;;  %v231_v39 = vrot.slane %v2847_v29, 2  ;;  %v232_v40 = vrot.slane %v119_v31, 2  ;;  %v2876_v41 = vpack.i.bf16 %v2863_v35, %v2860_v34  ;;  %v234_v42 = vrot.slane %v2850_v30, 2 }
   0xb   :  { %v235_v43 = vrot.slane %v120_v36, 2  ;;  %v73_v45 = vrot.slane %v41_v37, 7  ;;  %v2298_v46 = vpack.i.bf16 %v2871_v38, %v2857_v33  ;;  %v186_v47 = vrot.slane %v2847_v29, 1 }
   0xc   :  { %v187_v48 = vrot.slane %v119_v31, 1  ;;  %v2883_v49 = vsel %vm198_vm2, %v231_v39, %v232_v40  ;;  %v189_v51 = vrot.slane %v2850_v30, 1  ;;  %v190_v52 = vrot.slane %v120_v36, 1 }
   0xd   :  { %v2886_v50 = vsel %vm198_vm2, %v234_v42, %v235_v43  ;;  %v2892_v53 = vsel %vm91_vm0, 0.0, %v72_v44  ;;  %v2895_v54 = vsel %vm91_vm0, 0.0, %v73_v45  ;;  %v121_v55 = vsel %vm91_vm0, %v72_v44, 0.0 }
   0xe   :  { %v122_v56 = vsel %vm91_vm0, %v73_v45, 0.0  ;;  %v2901_v57 = vpack.i.bf16 %v2886_v50, %v2883_v49  ;;  %v2904_v58 = vsel %vm153_vm1, %v186_v47, %v187_v48  ;;  %v225_v59 = vrot.slane %v2826_v13, 2 }
   0xf   :  { %2309 = vrot.lane.b32.xlu1 %v2876_v41, %s2762_s16  ;;  %v226_v60 = vrot.slane %v117_v20, 2  ;;  %v2912_v62 = vsel %vm153_vm1, %v189_v51, %v190_v52  ;;  %v237_v63 = vrot.slane %v2892_v53, 2  ;;  %v228_v0 = vrot.slane %v2830_v15, 2  ;;  %v30_v52 = vld [vmem:[%s4179_s0 + $0x18] sm:$0xff] }
  0x10   :  { %4195 = vst [vmem:[#allocation2_spill] sm:$0xff] %v2912_v62  ;;  %v229_v1 = vrot.slane %v118_v21, 2  ;;  %v238_v2 = vrot.slane %v121_v55, 2  ;;  %v240_v3 = vrot.slane %v2895_v54, 2  ;;  %v241_v4 = vrot.slane %v122_v56, 2 }
  0x11   :  { %v2918_v5 = vsel %vm198_vm2, %v225_v59, %v226_v60  ;;  %v60_v7 = vrot.slane %v28_v61, 7  ;;  %v2932_v14 = vpack.i.bf16 %v2912_v62, %v2904_v58  ;;  %v192_v16 = vrot.slane %v2892_v53, 1 }
  0x12   :  { %2299 = vrot.lane.b32.xlu0 %v2298_v46, %s2763_s19  ;;  %v2921_v6 = vsel %vm198_vm2, %v228_v0, %v229_v1  ;;  %v193_v17 = vrot.slane %v121_v55, 1  ;;  %v2938_v18 = vsel %vm198_vm2, %v237_v63, %v238_v2  ;;  %v2941_v19 = vsel %vm198_vm2, %v240_v3, %v241_v4  ;;  %v2994_v55 = vld [vmem:[%s4179_s0 + $0x78] sm:$0xff]  ;;  %v29_v63 = vld [vmem:[%s4179_s0 + $0x10] sm:$0xff] }
  0x13   :  { %v2925_v10 = vpack.i.bf16 %v2921_v6, %v2918_v5  ;;  %v195_v20 = vrot.slane %v2895_v54, 1  ;;  %v196_v21 = vrot.slane %v122_v56, 1  ;;  %v2947_v22 = vsel %vm91_vm0, 0.0, %v60_v7  ;;  %4198 = vst [vmem:[#allocation5_spill] sm:$0xff] %v2994_v55 }
  0x14   :  { %v109_v23 = vsel %vm91_vm0, %v60_v7, 0.0  ;;  %v59_v25 = vrot.slane %v27_v11, 7  ;;  %v2954_v26 = vpack.i.bf16 %v2941_v19, %v2938_v18  ;;  %v2957_v27 = vsel %vm153_vm1, %v192_v16, %v193_v17  ;;  %v2250_v16 = vld [vmem:[%s4180_s1 + $0x38] sm:$0xff] }
  0x15   :  { %2314 = vrot.lane.b32.xlu2 %v2925_v10, %s2763_s19  ;;  %4196 = vst [vmem:[#allocation3_spill] sm:$0xff] %v2957_v27  ;;  %v2960_v28 = vsel %vm153_vm1, %v195_v20, %v196_v21  ;;  %v159_v31 = vrot.slane %v2947_v22, 1  ;;  %v160_v32 = vrot.slane %v109_v23, 1  ;;  %v2965_v36 = vpack.i.bf16 %v2847_v29, %v2830_v15  ;;  %2279 = vmatpush.bf16.msra.mxu1 %v2250_v16 }
  0x16   :  { %4197 = vst [vmem:[#allocation4_spill] sm:$0xff] %v2960_v28  ;;  %v204_v37 = vrot.slane %v2947_v22, 2  ;;  %v205_v39 = vrot.slane %v109_v23, 2  ;;  %v2969_v40 = vsel %vm91_vm0, 0.0, %v59_v25  ;;  %v108_v42 = vsel %vm91_vm0, %v59_v25, 0.0  ;;  %855 = vmatpush.bf16.msra.mxu0 %v2250_v16 }
  0x17   :  { %2329 = vrot.lane.b32.xlu1 %v2901_v57, %s2763_s19  ;;  %v2974_v43 = vpack.i.bf16 %v2960_v28, %v2957_v27  ;;  %v156_v44 = vrot.slane %v2969_v40, 1  ;;  %v157_v45 = vrot.slane %v108_v42, 1  ;;  %v201_v46 = vrot.slane %v2969_v40, 2 }
  0x18   :  { %v202_v47 = vrot.slane %v108_v42, 2  ;;  %v2983_v48 = vsel %vm153_vm1, %v159_v31, %v160_v32  ;;  %v2986_v51 = vsel %vm198_vm2, %v204_v37, %v205_v39  ;;  %v3006_v61 = vpack.i.bf16 %v2892_v53, %v2850_v30  ;;  %v2249_v39 = vld [vmem:[%s4180_s1 + $0x30] sm:$0xff] }
  0x19   :  { %v2358_v56 = vpack.i.bf16 %v2983_v48, %v2986_v51  ;;  %v3001_v59 = vsel %vm153_vm1, %v156_v44, %v157_v45  ;;  %v62_v0 = vrot.slane %v30_v52, 7  ;;  %v4187_v1 = vrot.slane %v2994_v55, 7  ;;  %2280 = vmatpush.bf16.msra.mxu1 %v2249_v39 }
  0x1a   :  { %2324 = vrot.lane.b32.xlu0 %v2932_v14, %s2762_s16  ;;  %v203_v60 = vsel %vm198_vm2, %v201_v46, %v202_v47  ;;  %v61_v3 = vrot.slane %v29_v63, 7  ;;  %v2373_v17 = vpack.i.bf16 %v2947_v22, %v2969_v40  ;;  %856 = vmatpush.bf16.msra.mxu0 %v2249_v39  ;;  %v32_v63 = vld [vmem:[%s4179_s0 + $0x28] sm:$0xff]  ;;  %vm582_vm4 = vcmask 523264  }
  0x1b   :  { %v2353_v2 = vpack.i.bf16 %v203_v60, %v3001_v59  ;;  %v3017_v4 = vsel %vm91_vm0, 0.0, %v62_v0  ;;  %v3022_v7 = vsel %vm91_vm0, 0.0, %v4187_v1  ;;  %v111_v11 = vsel %vm91_vm0, %v62_v0, 0.0  ;;  %v2248_v0 = vld [vmem:[%s4180_s1 + $0x28] sm:$0xff] }
  0x1c   :  { %4199 = vst [vmem:[#allocation6_spill] sm:$0xff] %v3022_v7  ;;  %v3032_v20 = vsel %vm91_vm0, 0.0, %v61_v3  ;;  %v165_v21 = vrot.slane %v3017_v4, 1  ;;  %v3037_v23 = vpack.i.bf16 %v3022_v7, %v2895_v54  ;;  %v166_v25 = vrot.slane %v111_v11, 1 }
  0x1d   :  { %2319 = vrot.lane.b32.xlu2 %v2965_v36, %s2761_s11  ;;  %v210_v31 = vrot.slane %v3017_v4, 2  ;;  %v211_v32 = vrot.slane %v111_v11, 2  ;;  %v110_v37 = vsel %vm91_vm0, %v61_v3, 0.0  ;;  %v2368_v42 = vpack.i.bf16 %v2986_v51, %v3032_v20  ;;  %2281 = vmatpush.bf16.msra.mxu1 %v2248_v0 }
  0x1e   :  { %v162_v44 = vrot.slane %v3032_v20, 1  ;;  %v163_v45 = vrot.slane %v110_v37, 1  ;;  %v207_v46 = vrot.slane %v3032_v20, 2  ;;  %v208_v47 = vrot.slane %v110_v37, 2  ;;  %857 = vmatpush.bf16.msra.mxu0 %v2248_v0 }
  0x1f   :  { %2344 = vrot.lane.b32.xlu1 %v2954_v26, %s2763_s19  ;;  %v3052_v52 = vsel %vm153_vm1, %v165_v21, %v166_v25  ;;  %v2363_v16 = vpack.i.bf16 %v2947_v22, %v203_v60  ;;  %v2247_v21 = vld [vmem:[%s4180_s1 + $0x20] sm:$0xff]  ;;  %v64_v25 = vrot.slane %v32_v63, 7  ;;  %v2403_v39 = vpack.i.bf16 %v3017_v4, %v3032_v20 }
  0x20   :  { %v3067_v3 = vsel %vm153_vm1, %v162_v44, %v163_v45  ;;  %v3070_v11 = vsel %vm198_vm2, %v207_v46, %v208_v47  ;;  %vm598_vm5 = vcmask 785408  }
  0x21   :  { %2282 = vmatpush.bf16.msra.mxu1 %v2247_v21  ;;  %v3084_v60 = vsel %vm91_vm0, 0.0, %v64_v25  ;;  %v113_v37 = vsel %vm91_vm0, %v64_v25, 0.0 }
  0x22   :  { %2339 = vrot.lane.b32.xlu0 %v2974_v43, %s2762_s16  ;;  %858 = vmatpush.bf16.msra.mxu0 %v2247_v21  ;;  %v171_v46 = vrot.slane %v3084_v60, 1  ;;  %v172_v47 = vrot.slane %v113_v37, 1  ;;  %v216_v63 = vrot.slane %v3084_v60, 2  ;;  %v217_v0 = vrot.slane %v113_v37, 2 }
  0x23   :  { %v2393_v37 = vpack.i.bf16 %v3017_v4, %v3070_v11 }
  0x25   :  { %2334 = vrot.lane.b32.xlu2 %v3006_v61, %s2761_s11 }
  0x27   :  { %2359 = vrot.lane.b32.xlu1 %v2358_v56, %s2762_s16  ;;  %v3055_v56 = vsel %vm198_vm2, %v210_v31, %v211_v32  ;;  %v2383_v31 = vpack.i.bf16 %v3070_v11, %v3067_v3 }
  0x2a   :  { %2354 = vrot.lane.b32.xlu0 %v2353_v2, %s2762_s16  ;;  %v2388_v2 = vpack.i.bf16 %v3052_v52, %v3055_v56 }
  0x2d   :  { %2349 = vrot.lane.b32.xlu2 %v3037_v23, %s2761_s11 }
  0x2f   :  { %2374 = vrot.lane.b32.xlu1 %v2373_v17, %s2761_s11  ;;  %v31_v17 = vld [vmem:[%s4179_s0 + $0x20] sm:$0xff] }
  0x30   :  { %v63_v32 = vrot.slane %v31_v17, 7 }
  0x32   :  { %2369 = vrot.lane.b32.xlu0 %v2368_v42, %s2763_s19  ;;  %v2378_v42 = vpack.i.bf16 %v3067_v3, %v2983_v48  ;;  %v3093_v44 = vsel %vm91_vm0, 0.0, %v63_v32  ;;  %v112_v45 = vsel %vm91_vm0, %v63_v32, 0.0  ;;  %v3108_v32 = vsel %vm198_vm2, %v216_v63, %v217_v0 }
  0x33   :  { %v169_v17 = vrot.slane %v112_v45, 1  ;;  %v213_v21 = vrot.slane %v3093_v44, 2  ;;  %v214_v25 = vrot.slane %v112_v45, 2 }
  0x35   :  { %2364 = vrot.lane.b32.xlu2 %v2363_v16, %s2763_s19  ;;  %v168_v16 = vrot.slane %v3093_v44, 1 }
  0x37   :  { %2389 = vrot.lane.b32.xlu1 %v2388_v2, %s2762_s16  ;;  %v2398_v2 = vpack.i.bf16 %v3055_v56, %v3093_v44 }
  0x3a   :  { %2384 = vrot.lane.b32.xlu0 %v2383_v31, %s2762_s16  ;;  %v3105_v31 = vsel %vm153_vm1, %v171_v46, %v172_v47  ;;  %v33_v46 = vld [vmem:[%s4179_s0 + $0x30] sm:$0xff] }
  0x3b   :  { %v2418_v45 = vpack.i.bf16 %v3105_v31, %v3108_v32  ;;  %v65_v63 = vrot.slane %v33_v46, 7 }
  0x3d   :  { %2379 = vrot.lane.b32.xlu2 %v2378_v42, %s2761_s11  ;;  %v3117_v42 = vsel %vm198_vm2, %v213_v21, %v214_v25  ;;  %v3130_v0 = vsel %vm91_vm0, 0.0, %v65_v63  ;;  %v114_v25 = vsel %vm91_vm0, %v65_v63, 0.0 }
  0x3e   :  { %v219_v46 = vrot.slane %v3130_v0, 2 }
  0x3f   :  { %2404 = vrot.lane.b32.xlu1 %v2403_v39, %s2761_s11  ;;  %v3114_v39 = vsel %vm153_vm1, %v168_v16, %v169_v17  ;;  %v2428_v16 = vpack.i.bf16 %v3108_v32, %v3130_v0  ;;  %v34_v17 = vld [vmem:[%s4179_s0 + $0x38] sm:$0xff] }
  0x40   :  { %v2413_v47 = vpack.i.bf16 %v3117_v42, %v3114_v39  ;;  %v66_v21 = vrot.slane %v34_v17, 7 }
  0x42   :  { %2399 = vrot.lane.b32.xlu0 %v2398_v2, %s2763_s19  ;;  %v2433_v2 = vpack.i.bf16 %v3084_v60, %v3093_v44  ;;  %v99_v1 = vsel %vm91_vm0, 0.0, %v66_v21  ;;  %v115_v8 = vsel %vm91_vm0, %v66_v21, 0.0 }
  0x43   :  { %v269_v28 = vrot.slane %v99_v1, 2  ;;  %v270_v17 = vrot.slane %v115_v8, 2 }
  0x45   :  { %2394 = vrot.lane.b32.xlu2 %v2393_v37, %s2763_s19  ;;  %v174_v37 = vrot.slane %v3130_v0, 1  ;;  %v3155_v7 = vsel %vm198_vm2, %v269_v28, %v270_v17  ;;  %v2245_v28 = vld [vmem:[%s4180_s1 + $0x10] sm:$0xff]  ;;  %v2244_v17 = vld [vmem:[%s4180_s1 + $0x8] sm:$0xff] }
  0x46   :  { %v2448_v21 = vpack.i.bf16 %v2871_v38, %v3155_v7  ;;  %v2463_v38 = vpack.i.bf16 %v99_v1, %v3130_v0 }
  0x47   :  { %2419 = vrot.lane.b32.xlu1 %v2418_v45, %s2762_s16  ;;  %v175_v45 = vrot.slane %v114_v25, 1 }
  0x4a   :  { %2414 = vrot.lane.b32.xlu0 %v2413_v47, %s2762_s16  ;;  %v220_v47 = vrot.slane %v114_v25, 2  ;;  %v2408_v25 = vpack.i.bf16 %v3114_v39, %v3052_v52 }
  0x4d   :  { %2409 = vrot.lane.b32.xlu2 %v2408_v25, %s2761_s11 }
  0x4f   :  { %2434 = vrot.lane.b32.xlu1 %v2433_v2, %s2761_s11  ;;  %v3147_v2 = vsel %vm153_vm1, %v174_v37, %v175_v45  ;;  %v2246_v37 = vld [vmem:[%s4180_s1 + $0x18] sm:$0xff]  ;;  %v4200_v45 = vmov 0.0  }
  0x50   :  { %2283 = vmatpush.bf16.msra.mxu1 %v2246_v37  ;;  %859 = vmatpush.bf16.msra.mxu0 %v2246_v37  ;;  %v2438_v25 = vpack.i.bf16 %v3147_v2, %v3105_v31 }
  0x52   :  { %2429 = vrot.lane.b32.xlu0 %v2428_v16, %s2763_s19  ;;  %v3150_v16 = vsel %vm198_vm2, %v219_v46, %v220_v47  ;;  %v2458_v46 = vpack.i.bf16 %v2826_v13, %v4200_v45  ;;  %v2423_v47 = vpack.i.bf16 %v3084_v60, %v3117_v42  ;;  %v2257_v45 = vld [vmem:[%s4180_s1 + $0x70] sm:$0xff] }
  0x53   :  { %v2443_v63 = vpack.i.bf16 %v3150_v16, %v3147_v2 }
  0x54   :  { %2284 = vmatpush.bf16.msra.mxu1 %v2245_v28  ;;  %860 = vmatpush.bf16.msra.mxu0 %v2245_v28  ;;  %v2453_v28 = vpack.i.bf16 %v99_v1, %v3150_v16 }
  0x55   :  { %2424 = vrot.lane.b32.xlu2 %v2423_v47, %s2763_s19 }
  0x57   :  { %2449 = vrot.lane.b32.xlu1 %v2448_v21, %s2762_s16  ;;  %v2258_v21 = vld [vmem:[%s4180_s1 + $0x78] sm:$0xff] }
  0x58   :  { %2285 = vmatpush.bf16.msra.mxu1 %v2244_v17  ;;  %861 = vmatpush.bf16.msra.mxu0 %v2244_v17 }
  0x5a   :  { %2444 = vrot.lane.b32.xlu0 %v2443_v63, %s2762_s16  ;;  %v2243_v63 = vld [vmem:[%s4180_s1] sm:$0xff] }
  0x5c   :  { %2286 = vmatpush.bf16.msra.mxu1 %v2243_v63  ;;  %862 = vmatpush.bf16.msra.mxu0 %v2243_v63 }
  0x5d   :  { %2439 = vrot.lane.b32.xlu2 %v2438_v25, %s2761_s11  ;;  %v2256_v25 = vld [vmem:[%s4180_s1 + $0x68] sm:$0xff] }
  0x5f   :  { %2464 = vrot.lane.b32.xlu1 %v2463_v38, %s2761_s11  ;;  %v248_v38 = vrot.slane %v115_v8, 1 }
  0x60   :  { %904 = vmatpush.bf16.msrb.mxu1 %v2258_v21 }
  0x62   :  { %2459 = vrot.lane.b32.xlu0 %v2458_v46, %s2763_s19  ;;  %v247_v46 = vrot.slane %v99_v1, 1 }
  0x64   :  { %905 = vmatpush.bf16.msrb.mxu1 %v2257_v45  ;;  %v3202_v47 = vsel %vm153_vm1, %v247_v46, %v248_v38 }
  0x65   :  { %2454 = vrot.lane.b32.xlu2 %v2453_v28, %s2763_s19 }
  0x67   :  { %2479 = vrot.lane.b32.xlu1 %v2965_v36, %s2763_s19 }
  0x68   :  { %906 = vmatpush.bf16.msrb.mxu1 %v2256_v25 }
  0x6a   :  { %2474 = vrot.lane.b32.xlu0 %v2925_v10, %s2762_s16  ;;  %v2468_v10 = vpack.i.bf16 %v2820_v9, %v3202_v47  ;;  %v2255_v9 = vld [vmem:[%s4180_s1 + $0x60] sm:$0xff] }
  0x6c   :  { %907 = vmatpush.bf16.msrb.mxu1 %v2255_v9 }
  0x6d   :  { %2469 = vrot.lane.b32.xlu2 %v2468_v10, %s2761_s11 }
  0x6f   :  { %v3190_v37 = vpop.permute.xlu2 %2314  ;;  %2494 = vrot.lane.b32.xlu1 %v3006_v61, %s2763_s19 }
  0x72   :  { %2489 = vrot.lane.b32.xlu0 %v2901_v57, %s2762_s16 }
  0x75   :  { %2484 = vrot.lane.b32.xlu2 %v2876_v41, %s2761_s11  ;;  %v2316_v41 = vunpack.i.l.bf16 %v3190_v37 }
  0x77   :  { %v2320_v63 = vpop.permute.xlu2 %2319  ;;  %2509 = vrot.lane.b32.xlu1 %v3037_v23, %s2763_s19 }
  0x79   :  { %v2305_v17 = vpop.permute.xlu1 %2304 }
  0x7a   :  { %v2307_v28 = vunpack.i.h.bf16 %v2305_v17  ;;  %v2306_v45 = vunpack.i.l.bf16 %v2305_v17  ;;  %2504 = vrot.lane.b32.xlu0 %v2954_v26, %s2762_s16  ;;  %v2260_v26 = vld [vmem:[%s4180_s1 + $0x88] sm:$0xff] }
  0x7b   :  { %959 = vmatpush.bf16.msra.mxu2 %v2260_v26  ;;  %2287 = vmatpush.bf16.msra.mxu3 %v2260_v26 }
  0x7c   :  { %v2295_v36 = vpop.permute.xlu0 %2294 }
  0x7d   :  { %v2297_v8 = vunpack.i.h.bf16 %v2295_v36  ;;  %v2296_v1 = vunpack.i.l.bf16 %v2295_v36  ;;  %2499 = vrot.lane.b32.xlu2 %v2932_v14, %s2761_s11 }
  0x7f   :  { %v3217_v38 = vpop.permute.xlu2 %2334  ;;  %v575_v57 = vsel %vm566_vm3, %v2823_v12, %v2297_v8  ;;  %v567_v61 = vsel %vm566_vm3, 0.0, %v2296_v1 }
  0x80   :  { %v2336_v26 = vunpack.i.l.bf16 %v3217_v38 }
  0x81   :  { %v2310_v21 = vpop.permute.xlu1 %2309 }
  0x82   :  { %v2312_v12 = vunpack.i.h.bf16 %v2310_v21  ;;  %v2311_v8 = vunpack.i.l.bf16 %v2310_v21 }
  0x84   :  { %v2300_v46 = vpop.permute.xlu0 %2299  ;;  %v576_v21 = vsel %vm566_vm3, %v2826_v13, %v2311_v8  ;;  %v2259_v8 = vld [vmem:[%s4180_s1 + $0x80] sm:$0xff] }
  0x85   :  { %v2302_v10 = vunpack.i.h.bf16 %v2300_v46  ;;  %v2301_v25 = vunpack.i.l.bf16 %v2300_v46  ;;  %v2254_v46 = vld [vmem:[%s4180_s1 + $0x58] sm:$0xff]  ;;  %v592_v23 = vsel %vm582_vm4, %v576_v21, %v2316_v41  ;;  %960 = vmatpush.bf16.msra.mxu2 %v2259_v8  ;;  %2288 = vmatpush.bf16.msra.mxu3 %v2259_v8 }
  0x86   :  { %908 = vmatpush.bf16.msrb.mxu1 %v2254_v46  ;;  %2514 = vrot.lane.b32.xlu2 %v2974_v43, %s2761_s11 }
  0x87   :  { %v3223_v36 = vsel %vm582_vm4, %v567_v61, %v2301_v25  ;;  %v591_v55 = vsel %vm582_vm4, %v575_v57, %v2302_v10  ;;  %v3237_v10 = vpop.permute.xlu2 %2349  ;;  %v2322_v25 = vunpack.i.h.bf16 %v2320_v63  ;;  %v2321_v57 = vunpack.i.l.bf16 %v2320_v63 }
  0x88   :  { %v607_v17 = vsel %vm598_vm5, %v3223_v36, %v2306_v45  ;;  %v608_v27 = vsel %vm598_vm5, %v591_v55, %v2307_v28  ;;  %v2253_v45 = vld [vmem:[%s4180_s1 + $0x50] sm:$0xff]  ;;  %v577_v55 = vsel %vm566_vm3, %v2830_v15, %v2312_v12 }
  0x89   :  { %v2330_v62 = vpop.permute.xlu1 %2329  ;;  %v675_v9 = vpack.c.bf16 %v608_v27, %v607_v17  ;;  %v2317_v27 = vunpack.i.h.bf16 %v3190_v37  ;;  %v609_v15 = vsel %vm598_vm5, %v592_v23, %v2321_v57  ;;  %v2251_v57 = vld [vmem:[%s4180_s1 + $0x40] sm:$0xff] }
  0x8a   :  { %909 = vmatpush.bf16.msrb.mxu1 %v2253_v45  ;;  %v2252_v45 = vld [vmem:[%s4180_s1 + $0x48] sm:$0xff] }
  0x8b   :  { %883 = vmatmul.bf16.vlgmr.msra.gmra.mxu1 %v675_v9  ;;  %v593_v61 = vsel %vm582_vm4, %v577_v55, %v2317_v27  ;;  %v665_v27 = vpack.c.bf16 %v3070_v11, %v2986_v51  ;;  %v2331_v55 = vunpack.i.l.bf16 %v2330_v62 }
  0x8c   :  { %v2325_v1 = vpop.permute.xlu0 %2324  ;;  %v610_v13 = vsel %vm598_vm5, %v593_v61, %v2322_v25 }
  0x8d   :  { %v678_v63 = vpack.c.bf16 %v610_v13, %v609_v15  ;;  %v2327_v46 = vunpack.i.h.bf16 %v2325_v1  ;;  %v2326_v12 = vunpack.i.l.bf16 %v2325_v1  ;;  %v2332_v1 = vunpack.i.h.bf16 %v2330_v62  ;;  %2155 = vmatmul.msk.bf16.vlgmr.msra.gmra.mxu2 %vm566_vm3, %v665_v27 }
  0x8e   :  { %910 = vmatpush.bf16.msrb.mxu1 %v2252_v45  ;;  %v2337_v62 = vunpack.i.h.bf16 %v3217_v38 }
  0x8f   :  { %v3260_v17 = vpop.permute.xlu2 %2364  ;;  %v579_v14 = vsel %vm566_vm3, %v2850_v30, %v2327_v46  ;;  %v578_v51 = vsel %vm566_vm3, %v2847_v29, %v2326_v12 }
  0x90   :  { %v2366_v25 = vunpack.i.l.bf16 %v3260_v17  ;;  %v594_v13 = vsel %vm582_vm4, %v578_v51, %v2331_v55  ;;  %v595_v30 = vsel %vm582_vm4, %v579_v14, %v2332_v1 }
  0x91   :  { %v3249_v28 = vpop.permute.xlu1 %2344  ;;  %v611_v46 = vsel %vm598_vm5, %v594_v13, %v2336_v26  ;;  %v612_v12 = vsel %vm598_vm5, %v595_v30, %v2337_v62  ;;  %v2351_v13 = vunpack.i.l.bf16 %v3237_v10 }
  0x92   :  { %911 = vmatpush.bf16.msrb.mxu1 %v2251_v57  ;;  %v681_v27 = vpack.c.bf16 %v612_v12, %v611_v46  ;;  %v668_v57 = vpack.c.bf16 %v3117_v42, %v3055_v56  ;;  %v2347_v14 = vunpack.i.h.bf16 %v3249_v28 }
  0x94   :  { %v3256_v37 = vpop.permute.xlu0 %2339 }
  0x95   :  { %v2342_v55 = vunpack.i.h.bf16 %v3256_v37  ;;  %v2341_v43 = vunpack.i.l.bf16 %v3256_v37 }
  0x97   :  { %v3290_v23 = vpop.permute.xlu2 %2379 }
  0x99   :  { %v3262_v9 = vpop.permute.xlu1 %2359 }
  0x9b   :  { %888 = vmatmul.bf16.gmra.mxu1 %v678_v63 }
  0x9c   :  { %v3274_v41 = vpop.permute.xlu0 %2354 }
  0x9d   :  { %v2356_v21 = vunpack.i.l.bf16 %v3274_v41  ;;  %2156 = vmatmul.msk.bf16.gmra.mxu2 %vm566_vm3, %v668_v57  ;;  %v2361_v57 = vunpack.i.l.bf16 %v3262_v9 }
  0x9f   :  { %v568_v11 = vsel %vm566_vm3, %v2969_v40, %v2356_v21  ;;  %v2362_v21 = vunpack.i.h.bf16 %v3262_v9 }
  0xa0   :  { %v584_v15 = vsel %vm582_vm4, %v568_v11, %v2366_v25  ;;  %v3309_v25 = vpop.permute.xlu2 %2394  ;;  %v2346_v11 = vunpack.i.l.bf16 %v3249_v28  ;;  %v2352_v28 = vunpack.i.h.bf16 %v3237_v10 }
  0xa1   :  { %v2375_v61 = vpop.permute.xlu1 %2374  ;;  %v2396_v37 = vunpack.i.l.bf16 %v3309_v25  ;;  %v569_v56 = vsel %vm566_vm3, %v2947_v22, %v2362_v21  ;;  %v671_v21 = vpack.c.bf16 %v3150_v16, %v3108_v32  ;;  %v616_v32 = vsel %vm566_vm3, %v2983_v48, %v2361_v57 }
  0xa2   :  { %v2377_v29 = vunpack.i.h.bf16 %v2375_v61  ;;  %v2376_v63 = vunpack.i.l.bf16 %v2375_v61  ;;  %v581_v61 = vsel %vm566_vm3, %v2895_v54, %v2342_v55 }
  0xa3   :  { %v597_v54 = vsel %vm582_vm4, %v581_v61, %v2347_v14  ;;  %v2357_v14 = vunpack.i.h.bf16 %v3274_v41  ;;  %v2367_v61 = vunpack.i.h.bf16 %v3260_v17  ;;  %v2382_v17 = vunpack.i.h.bf16 %v3290_v23 }
  0xa4   :  { %v599_v40 = vsel %vm598_vm5, %v3223_v36, %v2376_v63  ;;  %v600_v38 = vsel %vm598_vm5, %v584_v15, %v2377_v29  ;;  %v3302_v8 = vpop.permute.xlu0 %2369  ;;  %v580_v15 = vsel %vm566_vm3, %v2892_v53, %v2341_v43 }
  0xa5   :  { %v663_v45 = vpack.c.bf16 %v600_v38, %v599_v40  ;;  %v2372_v62 = vunpack.i.h.bf16 %v3302_v8  ;;  %v596_v29 = vsel %vm582_vm4, %v580_v15, %v2346_v11  ;;  %v2371_v15 = vunpack.i.l.bf16 %v3302_v8 }
  0xa6   :  { %v613_v38 = vsel %vm598_vm5, %v596_v29, %v2351_v13  ;;  %v615_v16 = vsel %vm566_vm3, %v3001_v59, %v2357_v14  ;;  %v2381_v8 = vunpack.i.l.bf16 %v3290_v23 }
  0xa7   :  { %863 = vmatmul.bf16.vlgmr.msra.gmra.mxu0 %v663_v45  ;;  %v585_v63 = vsel %vm582_vm4, %v569_v56, %v2372_v62  ;;  %v632_v13 = vsel %vm582_vm4, %v616_v32, %v2371_v15 }
  0xa9   :  { %v3304_v1 = vpop.permute.xlu1 %2389 }
  0xaa   :  { %v2392_v11 = vunpack.i.h.bf16 %v3304_v1 }
  0xab   :  { %893 = vmatmul.bf16.gmra.mxu1 %v681_v27  ;;  %v3339_v27 = vpop.permute.xlu2 %2409 }
  0xac   :  { %v3314_v51 = vpop.permute.xlu0 %2384  ;;  %v571_v9 = vsel %vm566_vm3, %v3017_v4, %v2392_v11 }
  0xad   :  { %v2386_v26 = vunpack.i.l.bf16 %v3314_v51  ;;  %2157 = vmatmul.msk.bf16.gmra.mxu2 %vm566_vm3, %v671_v21 }
  0xaf   :  { %v570_v42 = vsel %vm566_vm3, %v3032_v20, %v2386_v26  ;;  %v614_v20 = vsel %vm598_vm5, %v597_v54, %v2352_v28  ;;  %v631_v28 = vsel %vm582_vm4, %v615_v16, %v2367_v61 }
  0xb0   :  { %v586_v53 = vsel %vm582_vm4, %v570_v42, %v2396_v37  ;;  %v684_v55 = vpack.c.bf16 %v614_v20, %v613_v38  ;;  %v647_v4 = vsel %vm598_vm5, %v631_v28, %v2381_v8  ;;  %v2391_v20 = vunpack.i.l.bf16 %v3304_v1 }
  0xb1   :  { %v2405_v30 = vpop.permute.xlu1 %2404 }
  0xb2   :  { %v2407_v40 = vunpack.i.h.bf16 %v2405_v30  ;;  %v2406_v22 = vunpack.i.l.bf16 %v2405_v30  ;;  %v618_v21 = vsel %vm566_vm3, %v3052_v52, %v2391_v20 }
  0xb3   :  { %v3351_v37 = vpop.permute.xlu2 %2424 }
  0xb4   :  { %v601_v46 = vsel %vm598_vm5, %v585_v63, %v2406_v22  ;;  %v602_v12 = vsel %vm598_vm5, %v586_v53, %v2407_v40  ;;  %v2400_v10 = vpop.permute.xlu0 %2399  ;;  %v2426_v42 = vunpack.i.l.bf16 %v3351_v37 }
  0xb5   :  { %v666_v45 = vpack.c.bf16 %v602_v12, %v601_v46  ;;  %v2402_v56 = vunpack.i.h.bf16 %v2400_v10  ;;  %v2387_v46 = vunpack.i.h.bf16 %v3314_v51  ;;  %v674_v12 = vpack.c.bf16 %v2857_v33, %v3155_v7 }
  0xb6   :  { %v2412_v51 = vunpack.i.h.bf16 %v3339_v27  ;;  %v2411_v7 = vunpack.i.l.bf16 %v3339_v27 }
  0xb7   :  { %868 = vmatmul.bf16.gmra.mxu0 %v666_v45  ;;  %v587_v48 = vsel %vm582_vm4, %v571_v9, %v2402_v56  ;;  %v2397_v45 = vunpack.i.h.bf16 %v3309_v25  ;;  %v617_v57 = vsel %vm566_vm3, %v3067_v3, %v2387_v46 }
  0xb9   :  { %v3341_v43 = vpop.permute.xlu1 %2419  ;;  %v633_v25 = vsel %vm582_vm4, %v617_v57, %v2397_v45  ;;  %v680_v45 = vpack.c.bf16 %v2886_v50, %v2883_v49 }
  0xba   :  { %v2422_v1 = vunpack.i.h.bf16 %v3341_v43 }
  0xbb   :  { %898 = vmatmul.bf16.gmra.mxu1 %v684_v55  ;;  %v2440_v40 = vpop.permute.xlu2 %2439  ;;  %v2401_v55 = vunpack.i.l.bf16 %v2400_v10  ;;  %2160 = vmatmul.msk.bf16.vlgmr.msra.gmra.mxu3 %vm566_vm3, %v680_v45 }
  0xbc   :  { %v3348_v62 = vpop.permute.xlu0 %2414  ;;  %v573_v3 = vsel %vm566_vm3, %v3084_v60, %v2422_v1 }
  0xbd   :  { %v2416_v26 = vunpack.i.l.bf16 %v3348_v62  ;;  %2158 = vmatmul.msk.bf16.gmra.mxu2 %vm566_vm3, %v674_v12  ;;  %v634_v10 = vsel %vm582_vm4, %v618_v21, %v2401_v55  ;;  %v2417_v60 = vunpack.i.h.bf16 %v3348_v62  ;;  %v2442_v62 = vunpack.i.h.bf16 %v2440_v40 }
  0xbe   :  { %v650_v32 = vsel %vm598_vm5, %v634_v10, %v2412_v51 }
  0xbf   :  { %v572_v41 = vsel %vm566_vm3, %v3093_v44, %v2416_v26  ;;  %v648_v44 = vsel %vm598_vm5, %v632_v13, %v2382_v17 }
  0xc0   :  { %v588_v29 = vsel %vm582_vm4, %v572_v41, %v2426_v42  ;;  %v664_v38 = vpack.c.bf16 %v648_v44, %v647_v4  ;;  %v649_v42 = vsel %vm598_vm5, %v633_v25, %v2411_v7  ;;  %v2441_v44 = vunpack.i.l.bf16 %v2440_v40 }
  0xc1   :  { %v2435_v30 = vpop.permute.xlu1 %2434  ;;  %v667_v41 = vpack.c.bf16 %v650_v32, %v649_v42  ;;  %v683_v42 = vpack.c.bf16 %v2941_v19, %v2938_v18 }
  0xc2   :  { %v2437_v54 = vunpack.i.h.bf16 %v2435_v30  ;;  %v2436_v63 = vunpack.i.l.bf16 %v2435_v30 }
  0xc3   :  { %v2455_v52 = vpop.permute.xlu2 %2454 }
  0xc4   :  { %v2430_v59 = vpop.permute.xlu0 %2429  ;;  %v603_v53 = vsel %vm598_vm5, %v587_v48, %v2436_v63  ;;  %v604_v23 = vsel %vm598_vm5, %v588_v29, %v2437_v54  ;;  %v2456_v15 = vunpack.i.l.bf16 %v2455_v52  ;;  %v677_v48 = vpack.c.bf16 %v2921_v6, %v2918_v5 }
  0xc5   :  { %v669_v22 = vpack.c.bf16 %v604_v23, %v603_v53  ;;  %v2432_v61 = vunpack.i.h.bf16 %v2430_v59  ;;  %v2427_v29 = vunpack.i.h.bf16 %v3351_v37  ;;  %v2431_v54 = vunpack.i.l.bf16 %v2430_v59 }
  0xc6   :  { %v619_v63 = vsel %vm566_vm3, %v3114_v39, %v2417_v60 }
  0xc7   :  { %873 = vmatmul.bf16.gmra.mxu0 %v669_v22  ;;  %v589_v27 = vsel %vm582_vm4, %v573_v3, %v2432_v61  ;;  %v2457_v22 = vunpack.i.h.bf16 %v2455_v52 }
  0xc9   :  { %v3384_v11 = vpop.permute.xlu1 %2449 }
  0xca   :  { %v2451_v23 = vunpack.i.l.bf16 %v3384_v11  ;;  %v2452_v1 = vunpack.i.h.bf16 %v3384_v11 }
  0xcb   :  { %912 = vmatmul.bf16.vlgmr.msrb.gmra.mxu1 %v664_v38  ;;  %v2470_v38 = vpop.permute.xlu2 %2469  ;;  %2161 = vmatmul.msk.bf16.gmra.mxu3 %vm566_vm3, %v683_v42 }
  0xcc   :  { %v2445_v14 = vpop.permute.xlu0 %2444  ;;  %v622_v20 = vsel %vm566_vm3, %v3202_v47, %v2451_v23  ;;  %v3423_v46 = vunpack.i.h.bf16 %v2470_v38  ;;  %v2471_v12 = vunpack.i.l.bf16 %v2470_v38  ;;  %v623_v25 = vsel %vm566_vm3, %v2841_v24, %v2452_v1 }
  0xcd   :  { %v2446_v26 = vunpack.i.l.bf16 %v2445_v14  ;;  %2159 = vmatmul.msk.bf16.gmra.mxu2 %vm566_vm3, %v677_v48  ;;  %v2447_v59 = vunpack.i.h.bf16 %v2445_v14 }
  0xcf   :  { %v574_v56 = vsel %vm566_vm3, %v3130_v0, %v2446_v26  ;;  %v2421_v0 = vunpack.i.l.bf16 %v3341_v43  ;;  %v635_v43 = vsel %vm582_vm4, %v619_v63, %v2427_v29  ;;  %v621_v40 = vsel %vm566_vm3, %v3147_v2, %v2447_v59 }
  0xd0   :  { %v590_v9 = vsel %vm582_vm4, %v574_v56, %v2456_v15  ;;  %v651_v5 = vsel %vm598_vm5, %v635_v43, %v2441_v44  ;;  %v637_v55 = vsel %vm582_vm4, %v621_v40, %v2457_v22 }
  0xd1   :  { %v2465_v16 = vpop.permute.xlu1 %2464  ;;  %v620_v4 = vsel %vm566_vm3, %v3105_v31, %v2421_v0  ;;  %v653_v57 = vsel %vm598_vm5, %v637_v55, %v2471_v12 }
  0xd2   :  { %v2467_v17 = vunpack.i.h.bf16 %v2465_v16  ;;  %v2466_v8 = vunpack.i.l.bf16 %v2465_v16  ;;  %v636_v53 = vsel %vm582_vm4, %v620_v4, %v2431_v54 }
  0xd3   :  { %v652_v6 = vsel %vm598_vm5, %v636_v53, %v2442_v62  ;;  %v2485_v7 = vpop.permute.xlu2 %2484 }
  0xd4   :  { %v605_v28 = vsel %vm598_vm5, %v589_v27, %v2466_v8  ;;  %v606_v13 = vsel %vm598_vm5, %v590_v9, %v2467_v17  ;;  %v670_v37 = vpack.c.bf16 %v652_v6, %v651_v5  ;;  %v2460_v39 = vpop.permute.xlu0 %2459  ;;  %v2487_v52 = vunpack.i.h.bf16 %v2485_v7  ;;  %v4201_v5 = vld [vmem:[#allocation2_spill] sm:$0xff] }
  0xd5   :  { %v672_v30 = vpack.c.bf16 %v606_v13, %v605_v28  ;;  %v3417_v31 = vunpack.i.l.bf16 %v2460_v39  ;;  %v2462_v49 = vunpack.i.h.bf16 %v2460_v39  ;;  %v2486_v61 = vunpack.i.l.bf16 %v2485_v7 }
  0xd7   :  { %878 = vmatmul.bf16.gmra.mxu0 %v672_v30  ;;  %v638_v21 = vsel %vm582_vm4, %v622_v20, %v3417_v31  ;;  %v639_v15 = vsel %vm582_vm4, %v623_v25, %v2462_v49  ;;  %v2277_v49 = vld [vmem:[%s4183_s4 + $0x80] sm:$0xff] }
  0xd8   :  { %v654_v2 = vsel %vm598_vm5, %v638_v21, %v3423_v46  ;;  %v655_v11 = vsel %vm598_vm5, %v639_v15, %v2486_v61  ;;  %v3493_v25 = vld [vmem:[%s4181_s2] ss:$0 sm:$0xff]  ;;  %v4203_v15 = vld [vmem:[#allocation5_spill] sm:$0xff] }
  0xd9   :  { %v673_v14 = vpack.c.bf16 %v654_v2, %v653_v57  ;;  %v2480_v51 = vpop.permute.xlu1 %2479  ;;  %v3498_v61 = vld [vmem:[%s4182_s3] ss:$0 sm:$0xff] }
  0xda   :  { %v2481_v50 = vunpack.i.l.bf16 %v2480_v51 }
  0xdb   :  { %917 = vmatmul.bf16.gmra.mxu1 %v667_v41  ;;  %v2482_v41 = vunpack.i.h.bf16 %v2480_v51  ;;  %v2500_v8 = vpop.permute.xlu2 %2499 }
  0xdc   :  { %v2475_v47 = vpop.permute.xlu0 %2474  ;;  %v2502_v19 = vunpack.i.h.bf16 %v2500_v8  ;;  %v2501_v60 = vunpack.i.l.bf16 %v2500_v8 }
  0xdd   :  { %v2476_v26 = vunpack.i.l.bf16 %v2475_v47 }
  0xdf   :  { %v624_v10 = vsel %vm566_vm3, %v2860_v34, %v2476_v26  ;;  %v2477_v34 = vunpack.i.h.bf16 %v2475_v47  ;;  %v2278_v26 = vld [vmem:[%s4183_s4 + $0x88] sm:$0xff] }
  0xe0   :  { %v640_v3 = vsel %vm582_vm4, %v624_v10, %v2481_v50  ;;  %1948 = vmatpush.bf16.msrb.mxu0 %v2278_v26 }
  0xe1   :  { %v656_v56 = vsel %vm598_vm5, %v640_v3, %v2487_v52  ;;  %v2495_v9 = vpop.permute.xlu1 %2494  ;;  %v625_v28 = vsel %vm566_vm3, %v2863_v35, %v2477_v34  ;;  %v4204_v3 = vrot.slane %v4203_v15, 7 }
  0xe2   :  { %v676_v32 = vpack.c.bf16 %v656_v56, %v655_v11  ;;  %v2496_v17 = vunpack.i.l.bf16 %v2495_v9  ;;  %v641_v0 = vsel %vm582_vm4, %v625_v28, %v2482_v41  ;;  %v2497_v44 = vunpack.i.h.bf16 %v2495_v9 }
  0xe3   :  { %v657_v48 = vsel %vm598_vm5, %v641_v0, %v2501_v60  ;;  %v2515_v53 = vpop.permute.xlu2 %2514  ;;  %v123_v11 = vsel %vm91_vm0, %v4204_v3, 0.0 }
  0xe4   :  { %v2490_v24 = vpop.permute.xlu0 %2489  ;;  %v2517_v39 = vunpack.i.h.bf16 %v2515_v53  ;;  %v2516_v22 = vunpack.i.l.bf16 %v2515_v53  ;;  %1949 = vmatpush.bf16.msrb.mxu0 %v2277_v49  ;;  %v273_v28 = vrot.slane %v123_v11, 2 }
  0xe5   :  { %v2491_v27 = vunpack.i.l.bf16 %v2490_v24  ;;  %v2492_v35 = vunpack.i.h.bf16 %v2490_v24  ;;  %v4205_v24 = vld [vmem:[#allocation6_spill] sm:$0xff] }
  0xe6   :  { %v250_v34 = vrot.slane %v4205_v24, 1  ;;  %v272_v8 = vrot.slane %v4205_v24, 2 }
  0xe7   :  { %v626_v13 = vsel %vm566_vm3, %v2904_v58, %v2491_v27  ;;  %v627_v6 = vsel %vm566_vm3, %v4201_v5, %v2492_v35  ;;  %v251_v27 = vrot.slane %v123_v11, 1 }
  0xe8   :  { %v642_v30 = vsel %vm582_vm4, %v626_v13, %v2496_v17  ;;  %v643_v38 = vsel %vm582_vm4, %v627_v6, %v2497_v44  ;;  %v3518_v35 = vsel %vm198_vm2, %v272_v8, %v273_v28 }
  0xe9   :  { %v658_v29 = vsel %vm598_vm5, %v642_v30, %v2502_v19  ;;  %v3463_v62 = vpop.permute.xlu1 %2509  ;;  %v659_v20 = vsel %vm598_vm5, %v643_v38, %v2516_v22  ;;  %v3508_v60 = vsel %vm153_vm1, %v250_v34, %v251_v27 }
  0xea   :  { %v679_v54 = vpack.c.bf16 %v658_v29, %v657_v48  ;;  %v2511_v43 = vunpack.i.l.bf16 %v3463_v62 }
  0xeb   :  { %922 = vmatmul.bf16.gmra.mxu1 %v670_v37  ;;  %v4202_v37 = vld [vmem:[#allocation3_spill] sm:$0xff] }
  0xec   :  { %v3458_v63 = vpop.permute.xlu0 %2504 }
  0xed   :  { %v2506_v58 = vunpack.i.l.bf16 %v3458_v63 }
  0xef   :  { %v628_v59 = vsel %vm566_vm3, %v4202_v37, %v2506_v58 }
  0xf0   :  { %v644_v40 = vsel %vm582_vm4, %v628_v59, %v2511_v43 }
  0xf1   :  { %v660_v12 = vsel %vm598_vm5, %v644_v40, %v2517_v39 }
  0xf2   :  { %v682_v45 = vpack.c.bf16 %v660_v12, %v659_v20 }
  0xfb   :  { %927 = vmatmul.bf16.gmra.mxu1 %v673_v14 }
 0x108   :  { %v3446_v16 = vpop.f32.mrf.mxu1 }
 0x10b   :  { %932 = vmatmul.bf16.gmra.mxu1 %v676_v32 }
 0x110   :  { %v3452_v18 = vpop.f32.mrf.mxu1  ;;  %v962_v2 = vpop.f32.mrf.mxu2 }
 0x118   :  { %v3460_v4 = vpop.f32.mrf.mxu1  ;;  %v964_v1 = vpop.f32.mrf.mxu2 }
 0x11b   :  { %937 = vmatmul.bf16.gmra.mxu1 %v679_v54 }
 0x120   :  { %v3470_v23 = vpop.f32.mrf.mxu1  ;;  %v967_v10 = vpop.f32.mrf.mxu2 }
 0x124   :  { %v864_v14 = vpop.f32.mrf.mxu0 }
 0x128   :  { %v3476_v55 = vpop.f32.mrf.mxu1  ;;  %v969_v0 = vpop.f32.mrf.mxu2 }
 0x12b   :  { %942 = vmatmul.bf16.gmra.mxu1 %v682_v45 }
 0x12c   :  { %v866_v51 = vpop.f32.mrf.mxu0 }
 0x130   :  { %v3478_v21 = vpop.f32.mrf.mxu1  ;;  %v972_v26 = vpop.f32.mrf.mxu2 }
 0x134   :  { %v869_v42 = vpop.f32.mrf.mxu0 }
 0x138   :  { %v3480_v57 = vpop.f32.mrf.mxu1 }
 0x13c   :  { %v871_v53 = vpop.f32.mrf.mxu0 }
 0x140   :  { %v3482_v47 = vpop.f32.mrf.mxu1 }
 0x144   :  { %v874_v15 = vpop.f32.mrf.mxu0 }
 0x148   :  { %v913_v50 = vpop.f32.mrf.mxu1 }
 0x149   :  { %v914_v7 = vadd.f32 %v913_v50, %v864_v14 }
 0x14b   :  { %v963_v52 = vadd.f32 %v962_v2, %v914_v7 }
 0x14d   :  { %v1006_v56 = vmul.f32 %v3493_v25, %v963_v52 }
 0x14f   :  { %v1026_v32 = vadd.f32 %v3498_v61, %v1006_v56 }
 0x150   :  { %v915_v9 = vpop.f32.mrf.mxu1 }
 0x151   :  { %v1042_v41 = vmax.f32 %v1026_v32, 0.0  ;;  %v916_v17 = vadd.f32 %v915_v9, %v866_v51 }
 0x153   :  { %v1074_v13 = vrot.slane %v1042_v41, 7  ;;  %v965_v19 = vadd.f32 %v964_v1, %v916_v17 }
 0x155   :  { %v1122_v30 = vsel %vm91_vm0, %v1074_v13, 0.0  ;;  %v1007_v48 = vmul.f32 %v3493_v25, %v965_v19  ;;  %v3513_v29 = vsel %vm91_vm0, 0.0, %v1074_v13 }
 0x156   :  { %v2523_v54 = vpack.i.bf16 %v3513_v29, %v3508_v60  ;;  %v1166_v58 = vrot.slane %v3513_v29, 1  ;;  %v1167_v44 = vrot.slane %v1122_v30, 1  ;;  %v1208_v40 = vrot.slane %v3513_v29, 2 }
 0x157   :  { %v1027_v43 = vadd.f32 %v3498_v61, %v1007_v48  ;;  %v1209_v20 = vrot.slane %v1122_v30, 2 }
 0x158   :  { %v918_v5 = vpop.f32.mrf.mxu1  ;;  %2524 = vrot.lane.b32.xlu1 %v2523_v54, %s2761_s11  ;;  %v3524_v6 = vsel %vm153_vm1, %v1166_v58, %v1167_v44  ;;  %v974_v58 = vpop.f32.mrf.mxu2 }
 0x159   :  { %v1043_v37 = vmax.f32 %v1027_v43, 0.0  ;;  %v919_v59 = vadd.f32 %v918_v5, %v869_v42  ;;  %v2518_v39 = vpack.i.bf16 %v3524_v6, %v3518_v35  ;;  %v1210_v49 = vsel %vm198_vm2, %v1208_v40, %v1209_v20 }
 0x15b   :  { %v1075_v22 = vrot.slane %v1043_v37, 7  ;;  %v968_v38 = vadd.f32 %v967_v10, %v919_v59  ;;  %2519 = vrot.lane.b32.xlu0 %v2518_v39, %s2762_s16  ;;  %v876_v59 = vpop.f32.mrf.mxu0 }
 0x15d   :  { %v3531_v12 = vsel %vm91_vm0, 0.0, %v1075_v22  ;;  %v1123_v45 = vsel %vm91_vm0, %v1075_v22, 0.0  ;;  %v1008_v2 = vmul.f32 %v3493_v25, %v968_v38 }
 0x15e   :  { %v1212_v14 = vrot.slane %v1123_v45, 2  ;;  %v1211_v1 = vrot.slane %v3531_v12, 2  ;;  %v1170_v50 = vrot.slane %v1123_v45, 1  ;;  %v2528_v10 = vpack.i.bf16 %v3531_v12, %v1210_v49 }
 0x15f   :  { %v1028_v51 = vadd.f32 %v3498_v61, %v1008_v2  ;;  %v1169_v42 = vrot.slane %v3531_v12, 1 }
 0x160   :  { %v920_v7 = vpop.f32.mrf.mxu1  ;;  %v1213_v52 = vsel %vm198_vm2, %v1211_v1, %v1212_v14 }
 0x161   :  { %v1044_v3 = vmax.f32 %v1028_v51, 0.0  ;;  %v921_v11 = vadd.f32 %v920_v7, %v871_v53  ;;  %v2533_v56 = vpack.i.bf16 %v1213_v52, %v1210_v49  ;;  %v3549_v41 = vsel %vm153_vm1, %v1169_v42, %v1170_v50 }
 0x162   :  { %v2538_v48 = vpack.i.bf16 %v3549_v41, %v3531_v12 }
 0x163   :  { %v1076_v32 = vrot.slane %v1044_v3, 7  ;;  %v970_v24 = vadd.f32 %v969_v0, %v921_v11  ;;  %2529 = vrot.lane.b32.xlu0 %v2528_v10, %s2763_s19  ;;  %2534 = vrot.lane.b32.xlu2 %v2533_v56, %s2762_s16  ;;  %v977_v3 = vpop.f32.mrf.mxu2  ;;  %v879_v42 = vpop.f32.mrf.mxu0 }
 0x165   :  { %v3544_v34 = vsel %vm91_vm0, 0.0, %v1076_v32  ;;  %v1124_v27 = vsel %vm91_vm0, %v1076_v32, 0.0  ;;  %v1009_v9 = vmul.f32 %v3493_v25, %v970_v24 }
 0x166   :  { %v1173_v17 = vrot.slane %v1124_v27, 1  ;;  %v1214_v8 = vrot.slane %v3544_v34, 2  ;;  %v1215_v28 = vrot.slane %v1124_v27, 2  ;;  %v2543_v13 = vpack.i.bf16 %v1213_v52, %v3544_v34 }
 0x167   :  { %v1029_v19 = vadd.f32 %v3498_v61, %v1009_v9  ;;  %v1172_v0 = vrot.slane %v3544_v34, 1 }
 0x168   :  { %v923_v30 = vpop.f32.mrf.mxu1  ;;  %2544 = vrot.lane.b32.xlu1 %v2543_v13, %s2763_s19  ;;  %v1216_v54 = vsel %vm198_vm2, %v1214_v8, %v1215_v28 }
 0x169   :  { %v1045_v44 = vmax.f32 %v1029_v19, 0.0  ;;  %v924_v43 = vadd.f32 %v923_v30, %v874_v15  ;;  %v1654_v53 = vpack.c.bf16 %v1216_v54, %v1213_v52  ;;  %v3560_v5 = vsel %vm153_vm1, %v1172_v0, %v1173_v17 }
 0x16a   :  { %v2548_v37 = vpack.i.bf16 %v3544_v34, %v3560_v5  ;;  %v2553_v2 = vpack.i.bf16 %v3560_v5, %v3549_v41 }
 0x16b   :  { %v1077_v39 = vrot.slane %v1045_v44, 7  ;;  %v973_v22 = vadd.f32 %v972_v26, %v924_v43  ;;  %2539 = vrot.lane.b32.xlu2 %v2538_v48, %s2761_s11  ;;  %2235 = vmatmul.msk.bf16.vlgmr.msrb.gmra.mxu0 %vm566_vm3, %v1654_v53 }
 0x16c   :  { %2549 = vrot.lane.b32.xlu0 %v2548_v37, %s2761_s11 }
 0x16d   :  { %v3568_v38 = vsel %vm91_vm0, 0.0, %v1077_v39  ;;  %v1125_v40 = vsel %vm91_vm0, %v1077_v39, 0.0  ;;  %v1010_v20 = vmul.f32 %v3493_v25, %v973_v22  ;;  %v979_v22 = vpop.f32.mrf.mxu2 }
 0x16e   :  { %v1218_v45 = vrot.slane %v1125_v40, 2  ;;  %v1217_v14 = vrot.slane %v3568_v38, 2  ;;  %v1176_v26 = vrot.slane %v1125_v40, 1  ;;  %v1175_v52 = vrot.slane %v3568_v38, 1 }
 0x16f   :  { %v1030_v1 = vadd.f32 %v3498_v61, %v1010_v20  ;;  %v2558_v15 = vpack.i.bf16 %v3568_v38, %v1216_v54 }
 0x170   :  { %v925_v51 = vpop.f32.mrf.mxu1  ;;  %2554 = vrot.lane.b32.xlu1 %v2553_v2, %s2762_s16  ;;  %v1219_v49 = vsel %vm198_vm2, %v1217_v14, %v1218_v45  ;;  %v3588_v9 = vsel %vm153_vm1, %v1175_v52, %v1176_v26 }
 0x171   :  { %v1046_v50 = vmax.f32 %v1030_v1, 0.0  ;;  %v926_v7 = vadd.f32 %v925_v51, %v876_v59  ;;  %v2563_v10 = vpack.i.bf16 %v1219_v49, %v1216_v54  ;;  %v2568_v48 = vpack.i.bf16 %v3588_v9, %v3568_v38  ;;  %v881_v1 = vpop.f32.mrf.mxu0 }
 0x173   :  { %v1078_v11 = vrot.slane %v1046_v50, 7  ;;  %v975_v56 = vadd.f32 %v974_v58, %v926_v7  ;;  %2564 = vrot.lane.b32.xlu2 %v2563_v10, %s2762_s16 }
 0x174   :  { %2559 = vrot.lane.b32.xlu0 %v2558_v15, %s2763_s19 }
 0x175   :  { %v3583_v32 = vsel %vm91_vm0, 0.0, %v1078_v11  ;;  %v1126_v24 = vsel %vm91_vm0, %v1078_v11, 0.0  ;;  %v1011_v27 = vmul.f32 %v3493_v25, %v975_v56 }
 0x176   :  { %v1179_v17 = vrot.slane %v1126_v24, 1  ;;  %v1221_v8 = vrot.slane %v1126_v24, 2  ;;  %v2573_v28 = vpack.i.bf16 %v1219_v49, %v3583_v32  ;;  %v1220_v13 = vrot.slane %v3583_v32, 2 }
 0x177   :  { %v1031_v19 = vadd.f32 %v3498_v61, %v1011_v27  ;;  %v1178_v0 = vrot.slane %v3583_v32, 1 }
 0x178   :  { %v928_v30 = vpop.f32.mrf.mxu1  ;;  %2574 = vrot.lane.b32.xlu1 %v2573_v28, %s2763_s19  ;;  %v1222_v54 = vsel %vm198_vm2, %v1220_v13, %v1221_v8 }
 0x179   :  { %v1047_v58 = vmax.f32 %v1031_v19, 0.0  ;;  %v929_v44 = vadd.f32 %v928_v30, %v879_v42  ;;  %v1657_v43 = vpack.c.bf16 %v1222_v54, %v1219_v49  ;;  %v3599_v53 = vsel %vm153_vm1, %v1178_v0, %v1179_v17  ;;  %v982_v0 = vpop.f32.mrf.mxu2 }
 0x17a   :  { %v2578_v37 = vpack.i.bf16 %v3583_v32, %v3599_v53  ;;  %v2583_v14 = vpack.i.bf16 %v3599_v53, %v3588_v9 }
 0x17b   :  { %v1079_v59 = vrot.slane %v1047_v58, 7  ;;  %v978_v39 = vadd.f32 %v977_v3, %v929_v44  ;;  %2569 = vrot.lane.b32.xlu2 %v2568_v48, %s2761_s11  ;;  %2236 = vmatmul.msk.bf16.gmra.mxu0 %vm566_vm3, %v1657_v43 }
 0x17c   :  { %2579 = vrot.lane.b32.xlu0 %v2578_v37, %s2761_s11 }
 0x17d   :  { %v3607_v40 = vsel %vm91_vm0, 0.0, %v1079_v59  ;;  %v1127_v20 = vsel %vm91_vm0, %v1079_v59, 0.0  ;;  %v1012_v45 = vmul.f32 %v3493_v25, %v978_v39 }
 0x17e   :  { %v1224_v2 = vrot.slane %v1127_v20, 2  ;;  %v1223_v26 = vrot.slane %v3607_v40, 2  ;;  %v1182_v49 = vrot.slane %v1127_v20, 1  ;;  %v2588_v7 = vpack.i.bf16 %v3607_v40, %v1222_v54 }
 0x17f   :  { %v1032_v51 = vadd.f32 %v3498_v61, %v1012_v45  ;;  %v1181_v52 = vrot.slane %v3607_v40, 1 }
 0x180   :  { %v930_v50 = vpop.f32.mrf.mxu1  ;;  %2584 = vrot.lane.b32.xlu1 %v2583_v14, %s2762_s16  ;;  %v1225_v10 = vsel %vm198_vm2, %v1223_v26, %v1224_v2 }
 0x181   :  { %v1048_v15 = vmax.f32 %v1032_v51, 0.0  ;;  %v931_v3 = vadd.f32 %v930_v50, %v881_v1  ;;  %v2593_v11 = vpack.i.bf16 %v1225_v10, %v1222_v54  ;;  %v3622_v24 = vsel %vm153_vm1, %v1181_v52, %v1182_v49 }
 0x182   :  { %v2603_v54 = vpack.i.bf16 %v3622_v24, %v3607_v40 }
 0x183   :  { %v1080_v56 = vrot.slane %v1048_v15, 7  ;;  %v980_v42 = vadd.f32 %v979_v22, %v931_v3  ;;  %2594 = vrot.lane.b32.xlu2 %v2593_v11, %s2762_s16  ;;  %v984_v15 = vpop.f32.mrf.mxu2 }
 0x184   :  { %2589 = vrot.lane.b32.xlu0 %v2588_v7, %s2763_s19 }
 0x185   :  { %v3625_v27 = vsel %vm91_vm0, 0.0, %v1080_v56  ;;  %v1128_v17 = vsel %vm91_vm0, %v1080_v56, 0.0  ;;  %v1013_v8 = vmul.f32 %v3493_v25, %v980_v42 }
 0x186   :  { %v1185_v28 = vrot.slane %v1128_v17, 1  ;;  %v1227_v13 = vrot.slane %v1128_v17, 2  ;;  %v2598_v19 = vpack.i.bf16 %v1225_v10, %v3625_v27  ;;  %v1226_v30 = vrot.slane %v3625_v27, 2 }
 0x187   :  { %v1033_v48 = vadd.f32 %v3498_v61, %v1013_v8  ;;  %v1184_v58 = vrot.slane %v3625_v27, 1 }
 0x188   :  { %v933_v44 = vpop.f32.mrf.mxu1  ;;  %2599 = vrot.lane.b32.xlu1 %v2598_v19, %s2763_s19  ;;  %v1228_v43 = vsel %vm198_vm2, %v1226_v30, %v1227_v13 }
 0x189   :  { %v1049_v37 = vmax.f32 %v1033_v48, 0.0  ;;  %v934_v59 = vadd.f32 %v933_v44, %v3446_v16  ;;  %v1660_v39 = vpack.c.bf16 %v1228_v43, %v1225_v10  ;;  %v3639_v22 = vsel %vm153_vm1, %v1184_v58, %v1185_v28  ;;  %v987_v28 = vpop.f32.mrf.mxu3 }
 0x18a   :  { %v2608_v20 = vpack.i.bf16 %v3625_v27, %v3639_v22  ;;  %v2613_v14 = vpack.i.bf16 %v3639_v22, %v3622_v24 }
 0x18b   :  { %v1081_v45 = vrot.slane %v1049_v37, 7  ;;  %v983_v2 = vadd.f32 %v982_v0, %v934_v59  ;;  %2604 = vrot.lane.b32.xlu2 %v2603_v54, %s2761_s11  ;;  %2237 = vmatmul.msk.bf16.gmra.mxu0 %vm566_vm3, %v1660_v39 }
 0x18c   :  { %2609 = vrot.lane.b32.xlu0 %v2608_v20, %s2761_s11 }
 0x18d   :  { %v1113_v16 = vsel %vm91_vm0, 0.0, %v1081_v45  ;;  %v1129_v1 = vsel %vm91_vm0, %v1081_v45, 0.0  ;;  %v1014_v26 = vmul.f32 %v3493_v25, %v983_v2 }
 0x18e   :  { %v1255_v51 = vrot.slane %v1129_v1, 1  ;;  %v1277_v49 = vrot.slane %v1129_v1, 2  ;;  %v1276_v50 = vrot.slane %v1113_v16, 2  ;;  %v1254_v10 = vrot.slane %v1113_v16, 1 }
 0x18f   :  { %v1034_v7 = vadd.f32 %v3498_v61, %v1014_v26  ;;  %v2623_v11 = vpack.i.bf16 %v1113_v16, %v1228_v43 }
 0x190   :  { %v935_v52 = vpop.f32.mrf.mxu1  ;;  %2614 = vrot.lane.b32.xlu1 %v2613_v14, %s2762_s16  ;;  %v1278_v3 = vsel %vm198_vm2, %v1276_v50, %v1277_v49  ;;  %v3656_v8 = vsel %vm153_vm1, %v1254_v10, %v1255_v51  ;;  %v2268_v49 = vld [vmem:[%s4183_s4 + $0x38] sm:$0xff] }
 0x191   :  { %v1050_v56 = vmax.f32 %v1034_v7, 0.0  ;;  %v936_v42 = vadd.f32 %v935_v52, %v3452_v18  ;;  %v2618_v17 = vpack.i.bf16 %v1278_v3, %v1228_v43  ;;  %v2628_v0 = vpack.i.bf16 %v3656_v8, %v1113_v16  ;;  %v989_v51 = vpop.f32.mrf.mxu3  ;;  %1844 = vmatpush.bf16.msrb.mxu3 %v2268_v49 }
 0x192   :  { %v1663_v59 = vpack.c.bf16 %v2857_v33, %v1278_v3  ;;  %v686_v49 = vpack.c.bf16 %v2857_v33, %v3518_v35 }
 0x193   :  { %v1082_v13 = vrot.slane %v1050_v56, 7  ;;  %v985_v19 = vadd.f32 %v984_v15, %v936_v42  ;;  %2619 = vrot.lane.b32.xlu2 %v2618_v17, %s2762_s16 }
 0x194   :  { %2624 = vrot.lane.b32.xlu0 %v2623_v11, %s2763_s19  ;;  %2162 = vmatmul.msk.bf16.gmra.mxu3 %vm566_vm3, %v686_v49 }
 0x195   :  { %v3662_v30 = vsel %vm91_vm0, 0.0, %v1082_v13  ;;  %v1130_v48 = vsel %vm91_vm0, %v1082_v13, 0.0  ;;  %v1015_v18 = vmul.f32 %v3493_v25, %v985_v19 }
 0x196   :  { %v1188_v54 = vrot.slane %v1130_v48, 1  ;;  %v1230_v58 = vrot.slane %v1130_v48, 2  ;;  %v1187_v44 = vrot.slane %v3662_v30, 1  ;;  %v1229_v43 = vrot.slane %v3662_v30, 2 }
 0x197   :  { %v1035_v37 = vadd.f32 %v3498_v61, %v1015_v18 }
 0x198   :  { %v938_v39 = vpop.f32.mrf.mxu1  ;;  %2629 = vrot.lane.b32.xlu1 %v2628_v0, %s2761_s11  ;;  %v3672_v20 = vsel %vm153_vm1, %v1187_v44, %v1188_v54  ;;  %v1231_v45 = vsel %vm198_vm2, %v1229_v43, %v1230_v58  ;;  %v2276_v58 = vld [vmem:[%s4183_s4 + $0x78] sm:$0xff]  ;;  %v2266_v44 = vld [vmem:[%s4183_s4 + $0x28] sm:$0xff] }
 0x199   :  { %v1051_v2 = vmax.f32 %v1035_v37, 0.0  ;;  %v939_v14 = vadd.f32 %v938_v39, %v3460_v4  ;;  %v2633_v16 = vpack.i.bf16 %v1231_v45, %v3672_v20  ;;  %1893 = vmatpush.bf16.msrb.mxu2 %v2276_v58 }
 0x19b   :  { %v1083_v1 = vrot.slane %v1051_v2, 7  ;;  %v988_v26 = vadd.f32 %v987_v28, %v939_v14  ;;  %2634 = vrot.lane.b32.xlu2 %v2633_v16, %s2762_s16  ;;  %2238 = vmatmul.msk.bf16.gmra.mxu0 %vm566_vm3, %v1663_v59  ;;  %v2267_v28 = vld [vmem:[%s4183_s4 + $0x30] sm:$0xff]  ;;  %v992_v2 = vpop.f32.mrf.mxu3 }
 0x19c   :  { %1845 = vmatpush.bf16.msrb.mxu3 %v2267_v28  ;;  %v2275_v16 = vld [vmem:[%s4183_s4 + $0x70] sm:$0xff]  ;;  %v2264_v28 = vld [vmem:[%s4183_s4 + $0x18] sm:$0xff] }
 0x19d   :  { %v3683_v50 = vsel %vm91_vm0, 0.0, %v1083_v1  ;;  %v1131_v7 = vsel %vm91_vm0, %v1083_v1, 0.0  ;;  %v1016_v4 = vmul.f32 %v3493_v25, %v988_v26  ;;  %v2265_v1 = vld [vmem:[%s4183_s4 + $0x20] sm:$0xff]  ;;  %1894 = vmatpush.bf16.msrb.mxu2 %v2275_v16 }
 0x19e   :  { %v1191_v10 = vrot.slane %v1131_v7, 1  ;;  %v1233_v52 = vrot.slane %v1131_v7, 2  ;;  %v2638_v15 = vpack.i.bf16 %v3683_v50, %v1231_v45  ;;  %v1190_v3 = vrot.slane %v3683_v50, 1 }
 0x19f   :  { %v1036_v11 = vadd.f32 %v3498_v61, %v1016_v4  ;;  %v1232_v56 = vrot.slane %v3683_v50, 2 }
 0x1a0   :  { %v940_v42 = vpop.f32.mrf.mxu1  ;;  %2639 = vrot.lane.b32.xlu1 %v2638_v15, %s2763_s19  ;;  %v3693_v17 = vsel %vm153_vm1, %v1190_v3, %v1191_v10  ;;  %1846 = vmatpush.bf16.msrb.mxu3 %v2266_v44 }
 0x1a1   :  { %v1052_v13 = vmax.f32 %v1036_v11, 0.0  ;;  %v941_v19 = vadd.f32 %v940_v42, %v3470_v23  ;;  %v1234_v0 = vsel %vm198_vm2, %v1232_v56, %v1233_v52  ;;  %v2648_v11 = vpack.i.bf16 %v3683_v50, %v3662_v30 }
 0x1a2   :  { %v2643_v48 = vpack.i.bf16 %v3693_v17, %v1234_v0 }
 0x1a3   :  { %v1084_v18 = vrot.slane %v1052_v13, 7  ;;  %v990_v54 = vadd.f32 %v989_v51, %v941_v19 }
 0x1a4   :  { %2644 = vrot.lane.b32.xlu0 %v2643_v48, %s2762_s16  ;;  %1847 = vmatpush.bf16.msrb.mxu3 %v2265_v1 }
 0x1a5   :  { %v3709_v43 = vsel %vm91_vm0, 0.0, %v1084_v18  ;;  %v1132_v23 = vsel %vm91_vm0, %v1084_v18, 0.0  ;;  %v1017_v37 = vmul.f32 %v3493_v25, %v990_v54 }
 0x1a6   :  { %v1194_v59 = vrot.slane %v1132_v23, 1  ;;  %v1236_v39 = vrot.slane %v1132_v23, 2  ;;  %v2653_v45 = vpack.i.bf16 %v1234_v0, %v3709_v43  ;;  %v1235_v14 = vrot.slane %v3709_v43, 2 }
 0x1a7   :  { %v1037_v26 = vadd.f32 %v3498_v61, %v1017_v37  ;;  %v1193_v51 = vrot.slane %v3709_v43, 1  ;;  %v2273_v37 = vld [vmem:[%s4183_s4 + $0x60] sm:$0xff] }
 0x1a8   :  { %v943_v7 = vpop.f32.mrf.mxu1  ;;  %2654 = vrot.lane.b32.xlu2 %v2653_v45, %s2763_s19  ;;  %v1237_v4 = vsel %vm198_vm2, %v1235_v14, %v1236_v39  ;;  %1848 = vmatpush.bf16.msrb.mxu3 %v2264_v28  ;;  %v994_v39 = vpop.f32.mrf.mxu3  ;;  %v2263_v14 = vld [vmem:[%s4183_s4 + $0x10] sm:$0xff] }
 0x1a9   :  { %v1053_v10 = vmax.f32 %v1037_v26, 0.0  ;;  %v944_v52 = vadd.f32 %v943_v7, %v3476_v55  ;;  %v1666_v15 = vpack.c.bf16 %v1237_v4, %v1234_v0  ;;  %v3729_v3 = vsel %vm153_vm1, %v1193_v51, %v1194_v59  ;;  %v2274_v55 = vld [vmem:[%s4183_s4 + $0x68] sm:$0xff]  ;;  %v2272_v51 = vld [vmem:[%s4183_s4 + $0x58] sm:$0xff] }
 0x1aa   :  { %v2658_v35 = vpack.i.bf16 %v3729_v3, %v3693_v17  ;;  %v2663_v48 = vpack.i.bf16 %v1237_v4, %v3729_v3  ;;  %1895 = vmatpush.bf16.msrb.mxu2 %v2274_v55 }
 0x1ab   :  { %v1085_v56 = vrot.slane %v1053_v10, 7  ;;  %v993_v42 = vadd.f32 %v992_v2, %v944_v52  ;;  %2239 = vmatmul.msk.bf16.gmra.mxu0 %vm566_vm3, %v1666_v15 }
 0x1ac   :  { %2649 = vrot.lane.b32.xlu0 %v2648_v11, %s2761_s11  ;;  %2659 = vrot.lane.b32.xlu1 %v2658_v35, %s2761_s11 }
 0x1ad   :  { %v3746_v13 = vsel %vm91_vm0, 0.0, %v1085_v56  ;;  %v1133_v19 = vsel %vm91_vm0, %v1085_v56, 0.0  ;;  %v1018_v0 = vmul.f32 %v3493_v25, %v993_v42  ;;  %1849 = vmatpush.bf16.msrb.mxu3 %v2263_v14 }
 0x1ae   :  { %v1197_v18 = vrot.slane %v1133_v19, 1  ;;  %v1239_v54 = vrot.slane %v1133_v19, 2  ;;  %v1196_v58 = vrot.slane %v3746_v13, 1  ;;  %v1238_v44 = vrot.slane %v3746_v13, 2  ;;  %1896 = vmatpush.bf16.msrb.mxu2 %v2273_v37  ;;  %v2271_v19 = vld [vmem:[%s4183_s4 + $0x50] sm:$0xff] }
 0x1af   :  { %v1038_v23 = vadd.f32 %v3498_v61, %v1018_v0  ;;  %v2668_v49 = vpack.i.bf16 %v3746_v13, %v1237_v4  ;;  %v2261_v0 = vld [vmem:[%s4183_s4] sm:$0xff] }
 0x1b0   :  { %v945_v59 = vpop.f32.mrf.mxu1  ;;  %2664 = vrot.lane.b32.xlu2 %v2663_v48, %s2762_s16  ;;  %v3759_v45 = vsel %vm153_vm1, %v1196_v58, %v1197_v18  ;;  %v1240_v2 = vsel %vm198_vm2, %v1238_v44, %v1239_v54 }
 0x1b1   :  { %v1054_v16 = vmax.f32 %v1038_v23, 0.0  ;;  %v946_v1 = vadd.f32 %v945_v59, %v3478_v21  ;;  %v2673_v26 = vpack.i.bf16 %v3759_v45, %v1240_v2  ;;  %v2262_v21 = vld [vmem:[%s4183_s4 + $0x8] sm:$0xff] }
 0x1b2   :  { %1897 = vmatpush.bf16.msrb.mxu2 %v2272_v51  ;;  %1850 = vmatpush.bf16.msrb.mxu3 %v2262_v21  ;;  %v2270_v23 = vld [vmem:[%s4183_s4 + $0x48] sm:$0xff] }
 0x1b3   :  { %v1086_v7 = vrot.slane %v1054_v16, 7  ;;  %v995_v10 = vadd.f32 %v994_v39, %v946_v1 }
 0x1b4   :  { %2674 = vrot.lane.b32.xlu0 %v2673_v26, %s2762_s16  ;;  %2669 = vrot.lane.b32.xlu1 %v2668_v49, %s2763_s19  ;;  %v2269_v26 = vld [vmem:[%s4183_s4 + $0x40] sm:$0xff] }
 0x1b5   :  { %v3777_v52 = vsel %vm91_vm0, 0.0, %v1086_v7  ;;  %v1134_v15 = vsel %vm91_vm0, %v1086_v7, 0.0  ;;  %v1019_v11 = vmul.f32 %v3493_v25, %v995_v10 }
 0x1b6   :  { %v1200_v4 = vrot.slane %v1134_v15, 1  ;;  %v1242_v35 = vrot.slane %v1134_v15, 2  ;;  %v2683_v56 = vpack.i.bf16 %v1240_v2, %v3777_v52  ;;  %v1241_v42 = vrot.slane %v3777_v52, 2  ;;  %1898 = vmatpush.bf16.msrb.mxu2 %v2271_v19  ;;  %1851 = vmatpush.bf16.msrb.mxu3 %v2261_v0 }
 0x1b7   :  { %v1039_v55 = vadd.f32 %v3498_v61, %v1019_v11  ;;  %v1199_v28 = vrot.slane %v3777_v52, 1  ;;  %v2678_v61 = vpack.i.bf16 %v3746_v13, %v3709_v43  ;;  %v2507_v15 = vunpack.i.h.bf16 %v3458_v63 }
 0x1b8   :  { %2684 = vrot.lane.b32.xlu2 %v2683_v56, %s2763_s19  ;;  %v1243_v25 = vsel %vm198_vm2, %v1241_v42, %v1242_v35  ;;  %v2512_v35 = vunpack.i.h.bf16 %v3463_v62 }
 0x1b9   :  { %v1055_v48 = vmax.f32 %v1039_v55, 0.0  ;;  %v1669_v18 = vpack.c.bf16 %v1243_v25, %v1240_v2  ;;  %v3794_v54 = vsel %vm153_vm1, %v1199_v28, %v1200_v4  ;;  %v4206_v55 = vld [vmem:[#allocation4_spill] sm:$0xff] }
 0x1ba   :  { %v2688_v58 = vpack.i.bf16 %v3794_v54, %v3759_v45  ;;  %1899 = vmatpush.bf16.msrb.mxu2 %v2270_v23  ;;  %v2693_v14 = vpack.i.bf16 %v1243_v25, %v3794_v54  ;;  %v629_v28 = vsel %vm566_vm3, %v4206_v55, %v2507_v15 }
 0x1bb   :  { %v1087_v44 = vrot.slane %v1055_v48, 7  ;;  %2240 = vmatmul.msk.bf16.gmra.mxu0 %vm566_vm3, %v1669_v18  ;;  %v645_v63 = vsel %vm582_vm4, %v629_v28, %v2512_v35 }
 0x1bc   :  { %2679 = vrot.lane.b32.xlu0 %v2678_v61, %s2761_s11  ;;  %2689 = vrot.lane.b32.xlu1 %v2688_v58, %s2761_s11 }
 0x1bd   :  { %v3807_v37 = vsel %vm91_vm0, 0.0, %v1087_v44  ;;  %v1135_v59 = vsel %vm91_vm0, %v1087_v44, 0.0  ;;  %v2535_v21 = vpop.permute.xlu2 %2534 }
 0x1be   :  { %v1203_v39 = vrot.slane %v1135_v59, 1  ;;  %v1245_v2 = vrot.slane %v1135_v59, 2  ;;  %v1202_v16 = vrot.slane %v3807_v37, 1  ;;  %v1244_v1 = vrot.slane %v3807_v37, 2  ;;  %1900 = vmatpush.bf16.msrb.mxu2 %v2269_v26 }
 0x1bf   :  { %v2698_v10 = vpack.i.bf16 %v3807_v37, %v1243_v25  ;;  %v2713_v11 = vpack.i.bf16 %v3807_v37, %v3777_v52 }
 0x1c0   :  { %2694 = vrot.lane.b32.xlu2 %v2693_v14, %s2762_s16  ;;  %v3818_v51 = vsel %vm153_vm1, %v1202_v16, %v1203_v39  ;;  %v3821_v49 = vsel %vm198_vm2, %v1244_v1, %v1245_v2  ;;  %v2536_v16 = vunpack.i.l.bf16 %v2535_v21 }
 0x1c1   :  { %v2703_v7 = vpack.i.bf16 %v3818_v51, %v3821_v49 }
 0x1c2   :  { %v1604_v35 = vsel %vm566_vm3, %v3524_v6, %v2536_v16 }
 0x1c4   :  { %2704 = vrot.lane.b32.xlu0 %v2703_v7, %s2762_s16  ;;  %2699 = vrot.lane.b32.xlu1 %v2698_v10, %s2763_s19 }
 0x1c5   :  { %v2540_v56 = vpop.permute.xlu2 %2539 }
 0x1c6   :  { %v2541_v39 = vunpack.i.l.bf16 %v2540_v56  ;;  %v2542_v28 = vunpack.i.h.bf16 %v2540_v56 }
 0x1ca   :  { %v2525_v4 = vpop.permute.xlu1 %2524 }
 0x1cb   :  { %v2526_v19 = vunpack.i.l.bf16 %v2525_v4  ;;  %v2527_v44 = vunpack.i.h.bf16 %v2525_v4 }
 0x1cc   :  { %2714 = vrot.lane.b32.xlu0 %v2713_v11, %s2761_s11  ;;  %v2537_v11 = vunpack.i.h.bf16 %v2535_v21 }
 0x1cd   :  { %v2520_v42 = vpop.permute.xlu0 %2519  ;;  %v661_v18 = vsel %vm598_vm5, %v645_v63, %v2526_v19  ;;  %v2565_v2 = vpop.permute.xlu2 %2564  ;;  %v1588_v1 = vsel %vm598_vm5, %v3223_v36, %v2527_v44 }
 0x1ce   :  { %v2521_v25 = vunpack.i.l.bf16 %v2520_v42  ;;  %v2522_v61 = vunpack.i.h.bf16 %v2520_v42  ;;  %v1605_v55 = vsel %vm566_vm3, %v3549_v41, %v2537_v11 }
 0x1d0   :  { %v630_v0 = vsel %vm566_vm3, %v3508_v60, %v2521_v25  ;;  %v1560_v60 = vsel %vm566_vm3, %v3513_v29, %v2522_v61 }
 0x1d1   :  { %v646_v48 = vsel %vm582_vm4, %v630_v0, %v3417_v31 }
 0x1d2   :  { %v662_v62 = vsel %vm598_vm5, %v646_v48, %v3423_v46 }
 0x1d3   :  { %v685_v58 = vpack.c.bf16 %v662_v62, %v661_v18 }
 0x1d5   :  { %947 = vmatmul.bf16.gmra.mxu1 %v685_v58  ;;  %v2530_v23 = vpop.permute.xlu0 %2529  ;;  %v2570_v0 = vpop.permute.xlu2 %2569 }
 0x1d6   :  { %v2531_v59 = vunpack.i.l.bf16 %v2530_v23  ;;  %v2532_v7 = vunpack.i.h.bf16 %v2530_v23  ;;  %v2571_v23 = vunpack.i.l.bf16 %v2570_v0 }
 0x1d8   :  { %v1574_v14 = vsel %vm582_vm4, %v1560_v60, %v2531_v59  ;;  %v1620_v29 = vsel %vm582_vm4, %v1604_v35, %v2532_v7  ;;  %v2566_v60 = vunpack.i.l.bf16 %v2565_v2 }
 0x1d9   :  { %v1589_v26 = vsel %vm598_vm5, %v1574_v14, %v2541_v39  ;;  %v1636_v63 = vsel %vm598_vm5, %v1620_v29, %v2542_v28 }
 0x1da   :  { %v2545_v10 = vpop.permute.xlu1 %2544  ;;  %v1652_v15 = vpack.c.bf16 %v1589_v26, %v1588_v1 }
 0x1db   :  { %v2546_v4 = vunpack.i.l.bf16 %v2545_v10  ;;  %v2547_v6 = vunpack.i.h.bf16 %v2545_v10  ;;  %v2567_v10 = vunpack.i.h.bf16 %v2565_v2 }
 0x1dc   :  { %1852 = vmatmul.bf16.vlgmr.msrb.gmra.mxu3 %v1652_v15 }
 0x1dd   :  { %v1621_v25 = vsel %vm582_vm4, %v1605_v55, %v2546_v4  ;;  %v1606_v4 = vsel %vm566_vm3, %v3560_v5, %v2566_v60  ;;  %v1607_v29 = vsel %vm566_vm3, %v3588_v9, %v2567_v10 }
 0x1de   :  { %v2550_v42 = vpop.permute.xlu0 %2549 }
 0x1df   :  { %v2551_v19 = vunpack.i.l.bf16 %v2550_v42  ;;  %v2552_v59 = vunpack.i.h.bf16 %v2550_v42  ;;  %v2572_v42 = vunpack.i.h.bf16 %v2570_v0 }
 0x1e1   :  { %v1637_v21 = vsel %vm598_vm5, %v1621_v25, %v2551_v19 }
 0x1e2   :  { %v2555_v48 = vpop.permute.xlu1 %2554  ;;  %v1653_v18 = vpack.c.bf16 %v1637_v21, %v1636_v63 }
 0x1e3   :  { %v2556_v62 = vunpack.i.l.bf16 %v2555_v48  ;;  %v2557_v61 = vunpack.i.h.bf16 %v2555_v48 }
 0x1e4   :  { %1901 = vmatmul.bf16.vlgmr.msrb.gmra.mxu2 %v1653_v18 }
 0x1e5   :  { %v1561_v58 = vsel %vm566_vm3, %v3531_v12, %v2556_v62  ;;  %v1562_v39 = vsel %vm566_vm3, %v3544_v34, %v2557_v61  ;;  %v2595_v12 = vpop.permute.xlu2 %2594 }
 0x1e6   :  { %v2560_v44 = vpop.permute.xlu0 %2559  ;;  %v1575_v56 = vsel %vm582_vm4, %v1561_v58, %v2547_v6  ;;  %v2596_v5 = vunpack.i.l.bf16 %v2595_v12  ;;  %v2597_v58 = vunpack.i.h.bf16 %v2595_v12 }
 0x1e7   :  { %v2561_v41 = vunpack.i.l.bf16 %v2560_v44  ;;  %v2562_v16 = vunpack.i.h.bf16 %v2560_v44  ;;  %v1590_v26 = vsel %vm598_vm5, %v1575_v56, %v2552_v59 }
 0x1e8   :  { %v1608_v59 = vsel %vm566_vm3, %v3599_v53, %v2596_v5 }
 0x1e9   :  { %v1576_v14 = vsel %vm582_vm4, %v1562_v39, %v2561_v41  ;;  %v1622_v34 = vsel %vm582_vm4, %v1606_v4, %v2562_v16  ;;  %v1609_v16 = vsel %vm566_vm3, %v3622_v24, %v2597_v58 }
 0x1ea   :  { %v2575_v1 = vpop.permute.xlu1 %2574  ;;  %v1591_v7 = vsel %vm598_vm5, %v1576_v14, %v2571_v23  ;;  %v1638_v19 = vsel %vm598_vm5, %v1622_v34, %v2572_v42 }
 0x1eb   :  { %v1655_v15 = vpack.c.bf16 %v1591_v7, %v1590_v26  ;;  %v2576_v11 = vunpack.i.l.bf16 %v2575_v1  ;;  %v2577_v62 = vunpack.i.h.bf16 %v2575_v1 }
 0x1ed   :  { %1857 = vmatmul.bf16.gmra.mxu3 %v1655_v15  ;;  %v1623_v28 = vsel %vm582_vm4, %v1607_v29, %v2576_v11  ;;  %v2605_v18 = vpop.permute.xlu2 %2604 }
 0x1ee   :  { %v2580_v35 = vpop.permute.xlu0 %2579  ;;  %v2606_v9 = vunpack.i.l.bf16 %v2605_v18  ;;  %v2607_v1 = vunpack.i.h.bf16 %v2605_v18 }
 0x1ef   :  { %v2581_v55 = vunpack.i.l.bf16 %v2580_v35  ;;  %v2582_v0 = vunpack.i.h.bf16 %v2580_v35 }
 0x1f1   :  { %v1639_v2 = vsel %vm598_vm5, %v1623_v28, %v2581_v55 }
 0x1f2   :  { %v2585_v25 = vpop.permute.xlu1 %2584  ;;  %v1656_v63 = vpack.c.bf16 %v1639_v2, %v1638_v19 }
 0x1f3   :  { %v2586_v21 = vunpack.i.l.bf16 %v2585_v25  ;;  %v2587_v48 = vunpack.i.h.bf16 %v2585_v25 }
 0x1f4   :  { %1906 = vmatmul.bf16.gmra.mxu2 %v1656_v63 }
 0x1f5   :  { %v1563_v61 = vsel %vm566_vm3, %v3568_v38, %v2586_v21  ;;  %v1564_v56 = vsel %vm566_vm3, %v3583_v32, %v2587_v48  ;;  %v2620_v42 = vpop.permute.xlu2 %2619 }
 0x1f6   :  { %v2590_v6 = vpop.permute.xlu0 %2589  ;;  %v1577_v41 = vsel %vm582_vm4, %v1563_v61, %v2577_v62  ;;  %v2621_v24 = vunpack.i.l.bf16 %v2620_v42  ;;  %v2622_v19 = vunpack.i.h.bf16 %v2620_v42 }
 0x1f7   :  { %v2591_v44 = vunpack.i.l.bf16 %v2590_v6  ;;  %v2592_v23 = vunpack.i.h.bf16 %v2590_v6  ;;  %v1592_v14 = vsel %vm598_vm5, %v1577_v41, %v2582_v0 }
 0x1f8   :  { %v1610_v48 = vsel %vm566_vm3, %v3639_v22, %v2621_v24 }
 0x1f9   :  { %v1578_v39 = vsel %vm582_vm4, %v1564_v56, %v2591_v44  ;;  %v1624_v10 = vsel %vm582_vm4, %v1608_v59, %v2592_v23 }
 0x1fa   :  { %v2600_v60 = vpop.permute.xlu1 %2599  ;;  %v1593_v38 = vsel %vm598_vm5, %v1578_v39, %v2606_v9  ;;  %v1640_v15 = vsel %vm598_vm5, %v1624_v10, %v2607_v1  ;;  %v1611_v9 = vsel %vm566_vm3, %v3656_v8, %v2622_v19 }
 0x1fb   :  { %v2601_v26 = vunpack.i.l.bf16 %v2600_v60  ;;  %v1658_v7 = vpack.c.bf16 %v1593_v38, %v1592_v14  ;;  %v2602_v55 = vunpack.i.h.bf16 %v2600_v60  ;;  %v1627_v22 = vsel %vm582_vm4, %v1611_v9, %v3417_v31 }
 0x1fc   :  { %v1643_v23 = vsel %vm598_vm5, %v1627_v22, %v3423_v46 }
 0x1fd   :  { %1862 = vmatmul.bf16.gmra.mxu3 %v1658_v7  ;;  %v1625_v12 = vsel %vm582_vm4, %v1609_v16, %v2601_v26  ;;  %v2635_v41 = vpop.permute.xlu2 %2634 }
 0x1fe   :  { %v2610_v32 = vpop.permute.xlu0 %2609  ;;  %v2637_v38 = vunpack.i.h.bf16 %v2635_v41  ;;  %v2636_v16 = vunpack.i.l.bf16 %v2635_v41 }
 0x1ff   :  { %v2611_v53 = vunpack.i.l.bf16 %v2610_v32  ;;  %v2612_v5 = vunpack.i.h.bf16 %v2610_v32 }
 0x200   :  { %v1612_v10 = vsel %vm566_vm3, %v3672_v20, %v2637_v38  ;;  %v1567_v32 = vsel %vm566_vm3, %v3662_v30, %v2636_v16 }
 0x201   :  { %v1641_v11 = vsel %vm598_vm5, %v1625_v12, %v2611_v53 }
 0x202   :  { %v2615_v4 = vpop.permute.xlu1 %2614  ;;  %v1659_v35 = vpack.c.bf16 %v1641_v11, %v1640_v15 }
 0x203   :  { %v2617_v34 = vunpack.i.h.bf16 %v2615_v4  ;;  %v2616_v29 = vunpack.i.l.bf16 %v2615_v4 }
 0x204   :  { %1911 = vmatmul.bf16.gmra.mxu2 %v1659_v35 }
 0x205   :  { %v1566_v2 = vsel %vm566_vm3, %v3625_v27, %v2617_v34  ;;  %v1565_v25 = vsel %vm566_vm3, %v3607_v40, %v2616_v29  ;;  %v2655_v60 = vpop.permute.xlu2 %2654 }
 0x206   :  { %v2625_v28 = vpop.permute.xlu0 %2624  ;;  %v1579_v62 = vsel %vm582_vm4, %v1565_v25, %v2602_v55  ;;  %v2656_v12 = vunpack.i.l.bf16 %v2655_v60 }
 0x207   :  { %v2626_v63 = vunpack.i.l.bf16 %v2625_v28  ;;  %v2627_v21 = vunpack.i.h.bf16 %v2625_v28  ;;  %v1594_v40 = vsel %vm598_vm5, %v1579_v62, %v2612_v5 }
 0x209   :  { %v1580_v61 = vsel %vm582_vm4, %v1566_v2, %v2626_v63  ;;  %v1626_v27 = vsel %vm582_vm4, %v1610_v48, %v2627_v21 }
 0x20a   :  { %v2630_v18 = vpop.permute.xlu1 %2629 }
 0x20b   :  { %v2632_v0 = vunpack.i.h.bf16 %v2630_v18  ;;  %v2631_v6 = vunpack.i.l.bf16 %v2630_v18 }
 0x20d   :  { %v1595_v58 = vsel %vm598_vm5, %v1580_v61, %v2631_v6  ;;  %v1642_v56 = vsel %vm598_vm5, %v1626_v27, %v2632_v0  ;;  %v2657_v6 = vunpack.i.h.bf16 %v2655_v60 }
 0x20e   :  { %v1661_v44 = vpack.c.bf16 %v1595_v58, %v1594_v40  ;;  %v1662_v8 = vpack.c.bf16 %v1643_v23, %v1642_v56 }
 0x210   :  { %1867 = vmatmul.bf16.gmra.mxu3 %v1661_v44 }
 0x212   :  { %v2640_v59 = vpop.permute.xlu1 %2639 }
 0x213   :  { %v2642_v1 = vunpack.i.h.bf16 %v2640_v59  ;;  %v2641_v26 = vunpack.i.l.bf16 %v2640_v59 }
 0x214   :  { %1916 = vmatmul.bf16.gmra.mxu2 %v1662_v8 }
 0x215   :  { %v1581_v29 = vsel %vm582_vm4, %v1567_v32, %v2641_v26  ;;  %v1628_v42 = vsel %vm582_vm4, %v1612_v10, %v2642_v1 }
 0x216   :  { %v2645_v39 = vpop.permute.xlu0 %2644 }
 0x217   :  { %v2646_v14 = vunpack.i.l.bf16 %v2645_v39  ;;  %v2647_v21 = vunpack.i.h.bf16 %v2645_v39 }
 0x219   :  { %v1613_v7 = vsel %vm566_vm3, %v3693_v17, %v2646_v14  ;;  %v2665_v17 = vpop.permute.xlu2 %2664 }
 0x21a   :  { %v1629_v24 = vsel %vm582_vm4, %v1613_v7, %v2656_v12  ;;  %v2667_v5 = vunpack.i.h.bf16 %v2665_v17  ;;  %v2666_v18 = vunpack.i.l.bf16 %v2665_v17 }
 0x21c   :  { %v1614_v27 = vsel %vm566_vm3, %v3729_v3, %v2667_v5  ;;  %v1569_v40 = vsel %vm566_vm3, %v3709_v43, %v2666_v18 }
 0x21e   :  { %v2650_v53 = vpop.permute.xlu0 %2649  ;;  %v2660_v15 = vpop.permute.xlu1 %2659 }
 0x21f   :  { %v2652_v11 = vunpack.i.h.bf16 %v2650_v53  ;;  %v2651_v4 = vunpack.i.l.bf16 %v2650_v53  ;;  %v2662_v35 = vunpack.i.h.bf16 %v2660_v15  ;;  %v2661_v34 = vunpack.i.l.bf16 %v2660_v15 }
 0x221   :  { %v1596_v20 = vsel %vm598_vm5, %v3223_v36, %v2651_v4  ;;  %v1597_v55 = vsel %vm598_vm5, %v1581_v29, %v2652_v11  ;;  %v1644_v30 = vsel %vm598_vm5, %v1628_v42, %v2661_v34  ;;  %v1645_v28 = vsel %vm598_vm5, %v1629_v24, %v2662_v35  ;;  %v2685_v62 = vpop.permute.xlu2 %2684 }
 0x222   :  { %v1664_v19 = vpack.c.bf16 %v1597_v55, %v1596_v20  ;;  %v1665_v2 = vpack.c.bf16 %v1645_v28, %v1644_v30  ;;  %v1568_v36 = vsel %vm566_vm3, %v3683_v50, %v2647_v21  ;;  %v2686_v58 = vunpack.i.l.bf16 %v2685_v62  ;;  %v997_v55 = vpop.f32.mrf.mxu3  ;;  %v1951_v30 = vpop.f32.mrf.mxu0 }
 0x223   :  { %v1582_v59 = vsel %vm582_vm4, %v1568_v36, %v2657_v6  ;;  %v2687_v15 = vunpack.i.h.bf16 %v2685_v62 }
 0x224   :  { %1872 = vmatmul.bf16.gmra.mxu3 %v1664_v19  ;;  %1921 = vmatmul.bf16.gmra.mxu2 %v1665_v2 }
 0x226   :  { %v2675_v25 = vpop.permute.xlu0 %2674  ;;  %v2670_v63 = vpop.permute.xlu1 %2669 }
 0x227   :  { %v2676_v48 = vunpack.i.l.bf16 %v2675_v25  ;;  %v2672_v61 = vunpack.i.h.bf16 %v2670_v63  ;;  %v2671_v9 = vunpack.i.l.bf16 %v2670_v63  ;;  %v2677_v7 = vunpack.i.h.bf16 %v2675_v25  ;;  %v2743_v63 = vld [vmem:[%s4182_s3] ss:$0 sm:$0xff] }
 0x229   :  { %v1615_v0 = vsel %vm566_vm3, %v3759_v45, %v2676_v48  ;;  %v1583_v50 = vsel %vm582_vm4, %v1569_v40, %v2671_v9  ;;  %v1630_v45 = vsel %vm582_vm4, %v1614_v27, %v2672_v61  ;;  %v3939_v26 = vpop.permute.xlu2 %2694  ;;  %v1570_v53 = vsel %vm566_vm3, %v3746_v13, %v2677_v7 }
 0x22a   :  { %v1631_v39 = vsel %vm582_vm4, %v1615_v0, %v2686_v58  ;;  %v2696_v32 = vunpack.i.l.bf16 %v3939_v26  ;;  %v1584_v29 = vsel %vm582_vm4, %v1570_v53, %v2687_v15  ;;  %v999_v25 = vpop.f32.mrf.mxu3  ;;  %v1953_v62 = vpop.f32.mrf.mxu0 }
 0x22c   :  { %v1571_v4 = vsel %vm566_vm3, %v3777_v52, %v2696_v32  ;;  %v2742_v52 = vld [vmem:[%s4181_s2] ss:$0 sm:$0xff] }
 0x22e   :  { %v2680_v44 = vpop.permute.xlu0 %2679  ;;  %v2690_v22 = vpop.permute.xlu1 %2689 }
 0x22f   :  { %v2682_v41 = vunpack.i.h.bf16 %v2680_v44  ;;  %v2681_v56 = vunpack.i.l.bf16 %v2680_v44  ;;  %v2692_v23 = vunpack.i.h.bf16 %v2690_v22  ;;  %v2691_v8 = vunpack.i.l.bf16 %v2690_v22 }
 0x231   :  { %v1598_v3 = vsel %vm598_vm5, %v1582_v59, %v2681_v56  ;;  %v1599_v60 = vsel %vm598_vm5, %v1583_v50, %v2682_v41  ;;  %v1646_v43 = vsel %vm598_vm5, %v1630_v45, %v2691_v8  ;;  %v1647_v14 = vsel %vm598_vm5, %v1631_v39, %v2692_v23 }
 0x232   :  { %v1667_v38 = vpack.c.bf16 %v1599_v60, %v1598_v3  ;;  %v1668_v16 = vpack.c.bf16 %v1647_v14, %v1646_v43  ;;  %v1956_v45 = vpop.f32.mrf.mxu0 }
 0x234   :  { %1877 = vmatmul.bf16.gmra.mxu3 %v1667_v38  ;;  %1926 = vmatmul.bf16.gmra.mxu2 %v1668_v16 }
 0x236   :  { %v3937_v1 = vpop.permute.xlu0 %2704  ;;  %v3941_v10 = vpop.permute.xlu1 %2699 }
 0x237   :  { %v2701_v12 = vunpack.i.l.bf16 %v3941_v10 }
 0x239   :  { %v1585_v42 = vsel %vm582_vm4, %v1571_v4, %v2701_v12  ;;  %v3990_v12 = vld [vmem:[%s4185_s6] ss:$0 sm:$0xff] }
 0x23e   :  { %v2715_v11 = vpop.permute.xlu0 %2714 }
 0x23f   :  { %v2717_v35 = vunpack.i.h.bf16 %v2715_v11  ;;  %v2716_v34 = vunpack.i.l.bf16 %v2715_v11 }
 0x241   :  { %v1600_v24 = vsel %vm598_vm5, %v1584_v29, %v2716_v34  ;;  %v1601_v17 = vsel %vm598_vm5, %v1585_v42, %v2717_v35  ;;  %v1958_v42 = vpop.f32.mrf.mxu0 }
 0x242   :  { %v1670_v20 = vpack.c.bf16 %v1601_v17, %v1600_v24  ;;  %v2744_v24 = vld [vmem:[%s4179_s0] sm:$0xff] }
 0x244   :  { %1882 = vmatmul.bf16.gmra.mxu3 %v1670_v20 }
 0x252   :  { %v948_v13 = vpop.f32.mrf.mxu1 }
 0x253   :  { %v949_v28 = vadd.f32 %v948_v13, %v3480_v57 }
 0x255   :  { %v998_v19 = vadd.f32 %v997_v55, %v949_v28 }
 0x257   :  { %v1020_v2 = vmul.f32 %v2742_v52, %v998_v19 }
 0x259   :  { %v1040_v21 = vadd.f32 %v2743_v63, %v1020_v2 }
 0x25a   :  { %v950_v48 = vpop.f32.mrf.mxu1 }
 0x25b   :  { %v1056_v5 = vmax.f32 %v1040_v21, 0.0  ;;  %v951_v18 = vadd.f32 %v950_v48, %v3482_v47  ;;  %v2745_v21 = vld [vmem:[%s4179_s0 + $0x8] sm:$0xff] }
 0x25d   :  { %v1088_v61 = vrot.slane %v1056_v5, 7  ;;  %v1000_v9 = vadd.f32 %v999_v25, %v951_v18  ;;  %v1961_v18 = vpop.f32.mrf.mxu0 }
 0x25f   :  { %v3962_v57 = vsel %vm91_vm0, 0.0, %v1088_v61  ;;  %v1136_v36 = vsel %vm91_vm0, %v1088_v61, 0.0  ;;  %v1021_v0 = vmul.f32 %v2742_v52, %v1000_v9  ;;  %v1853_v6 = vpop.f32.mrf.mxu3 }
 0x260   :  { %v1206_v27 = vrot.slane %v1136_v36, 1  ;;  %v1248_v40 = vrot.slane %v1136_v36, 2  ;;  %v2708_v58 = vpack.i.bf16 %v3821_v49, %v3962_v57  ;;  %v1247_v44 = vrot.slane %v3962_v57, 2 }
 0x261   :  { %v1041_v22 = vadd.f32 %v2743_v63, %v1021_v0  ;;  %v1205_v47 = vrot.slane %v3962_v57, 1 }
 0x262   :  { %2709 = vrot.lane.b32.xlu2 %v2708_v58, %s2763_s19  ;;  %v1249_v41 = vsel %vm198_vm2, %v1247_v44, %v1248_v40 }
 0x263   :  { %v1057_v56 = vmax.f32 %v1041_v22, 0.0  ;;  %v1672_v23 = vpack.c.bf16 %v1249_v41, %v3821_v49  ;;  %v3973_v8 = vsel %vm153_vm1, %v1205_v47, %v1206_v27  ;;  %v3984_v49 = vld [vmem:[%s4184_s5] ss:$0 sm:$0xff] }
 0x264   :  { %v2718_v59 = vpack.i.bf16 %v3973_v8, %v3818_v51  ;;  %v2723_v38 = vpack.i.bf16 %v1249_v41, %v3973_v8 }
 0x265   :  { %v1089_v50 = vrot.slane %v1057_v56, 7  ;;  %2241 = vmatmul.msk.bf16.gmra.mxu0 %vm566_vm3, %v1672_v23  ;;  %v1963_v47 = vpop.f32.mrf.mxu0 }
 0x266   :  { %2719 = vrot.lane.b32.xlu1 %v2718_v59, %s2761_s11  ;;  %v2747_v59 = vld [vmem:[%s4179_s0 + $0x18] sm:$0xff] }
 0x267   :  { %v1121_v39 = vsel %vm91_vm0, 0.0, %v1089_v50  ;;  %v1902_v3 = vpop.f32.mrf.mxu2  ;;  %v1855_v60 = vpop.f32.mrf.mxu3  ;;  %v1137_v43 = vsel %vm91_vm0, %v1089_v50, 0.0 }
 0x268   :  { %v1903_v14 = vadd.f32 %v1902_v3, %v1853_v6  ;;  %v1279_v16 = vrot.slane %v1121_v39, 2  ;;  %v1280_v7 = vrot.slane %v1137_v43, 2  ;;  %v2728_v11 = vpack.i.bf16 %v1121_v39, %v1249_v41  ;;  %v2746_v6 = vld [vmem:[%s4179_s0 + $0x10] sm:$0xff] }
 0x269   :  { %v1257_v35 = vrot.slane %v1121_v39, 1  ;;  %v1258_v34 = vrot.slane %v1137_v43, 1 }
 0x26a   :  { %v1952_v32 = vadd.f32 %v1951_v30, %v1903_v14  ;;  %2724 = vrot.lane.b32.xlu2 %v2723_v38, %s2762_s16  ;;  %v1281_v53 = vsel %vm198_vm2, %v1279_v16, %v1280_v7  ;;  %v2733_v30 = vpack.i.bf16 %v1121_v39, %v3962_v57  ;;  %v2748_v7 = vld [vmem:[%s4179_s0 + $0x20] sm:$0xff] }
 0x26b   :  { %1458 = vrot.lane.b32.xlu0 %v1281_v53, %s2762_s16  ;;  %v4004_v19 = vsel %vm153_vm1, %v1257_v35, %v1258_v34  ;;  %v1675_v52 = vpack.c.bf16 %v2857_v33, %v1281_v53 }
 0x26c   :  { %v1995_v15 = vmul.f32 %v3984_v49, %v1952_v32 }
 0x26d   :  { %v1966_v14 = vpop.f32.mrf.mxu0 }
 0x26e   :  { %v2015_v4 = vadd.f32 %v3990_v12, %v1995_v15  ;;  %2729 = vrot.lane.b32.xlu1 %v2728_v11, %s2763_s19 }
 0x26f   :  { %v1904_v29 = vpop.f32.mrf.mxu2 }
 0x270   :  { %v2031_v17 = vadd.f32 %v2744_v24, %v2015_v4  ;;  %v1905_v20 = vadd.f32 %v1904_v29, %v1855_v60  ;;  %v1858_v55 = vpop.f32.mrf.mxu3  ;;  %v2749_v24 = vld [vmem:[%s4179_s0 + $0x28] sm:$0xff] }
 0x272   :  { %v2047_v13 = vmax.f32 %v2031_v17, 0.0  ;;  %v1954_v28 = vadd.f32 %v1953_v62, %v1905_v20  ;;  %2734 = vrot.lane.b32.xlu2 %v2733_v30, %s2761_s11 }
 0x273   :  { %1544 = vrot.lane.b32.xlu0 %v4004_v19, %s2761_s11 }
 0x274   :  { %2063 = vst.msk [vmem:[%s4186_s7] sm:$0xff] %vm566_vm3, %v2047_v13  ;;  %v1996_v2 = vmul.f32 %v3984_v49, %v1954_v28 }
 0x275   :  { %2242 = vmatmul.msk.bf16.gmra.mxu0 %vm566_vm3, %v1675_v52 }
 0x276   :  { %v2016_v25 = vadd.f32 %v3990_v12, %v1996_v2 }
 0x277   :  { %v1907_v63 = vpop.f32.mrf.mxu2 }
 0x278   :  { %v2032_v33 = vadd.f32 %v2745_v21, %v2016_v25  ;;  %v1908_v48 = vadd.f32 %v1907_v63, %v1858_v55  ;;  %v1860_v5 = vpop.f32.mrf.mxu3  ;;  %v2750_v25 = vld [vmem:[%s4179_s0 + $0x30] sm:$0xff] }
 0x27a   :  { %v2048_v62 = vmax.f32 %v2032_v33, 0.0  ;;  %v1957_v61 = vadd.f32 %v1956_v45, %v1908_v48 }
 0x27c   :  { %2064 = vst.msk [vmem:[%s4186_s7 + $0x8] sm:$0xff] %vm566_vm3, %v2048_v62  ;;  %v1997_v9 = vmul.f32 %v3984_v49, %v1957_v61 }
 0x27e   :  { %v2017_v36 = vadd.f32 %v3990_v12, %v1997_v9 }
 0x27f   :  { %v1909_v0 = vpop.f32.mrf.mxu2 }
 0x280   :  { %v2033_v27 = vadd.f32 %v2746_v6, %v2017_v36  ;;  %v1910_v40 = vadd.f32 %v1909_v0, %v1860_v5  ;;  %v1863_v22 = vpop.f32.mrf.mxu3  ;;  %v2751_v36 = vld [vmem:[%s4179_s0 + $0x38] sm:$0xff] }
 0x282   :  { %v2049_v58 = vmax.f32 %v2033_v27, 0.0  ;;  %v1959_v44 = vadd.f32 %v1958_v42, %v1910_v40  ;;  %v1968_v42 = vpop.f32.mrf.mxu0 }
 0x284   :  { %2065 = vst.msk [vmem:[%s4186_s7 + $0x10] sm:$0xff] %vm566_vm3, %v2049_v58  ;;  %v1998_v41 = vmul.f32 %v3984_v49, %v1959_v44 }
 0x286   :  { %v2018_v56 = vadd.f32 %v3990_v12, %v1998_v41 }
 0x287   :  { %v1912_v23 = vpop.f32.mrf.mxu2 }
 0x288   :  { %v2034_v50 = vadd.f32 %v2747_v59, %v2018_v56  ;;  %v1913_v45 = vadd.f32 %v1912_v23, %v1863_v22  ;;  %v1865_v43 = vpop.f32.mrf.mxu3  ;;  %v2752_v56 = vld [vmem:[%s4179_s0 + $0x40] sm:$0xff] }
 0x28a   :  { %v2050_v39 = vmax.f32 %v2034_v50, 0.0  ;;  %v1962_v3 = vadd.f32 %v1961_v18, %v1913_v45  ;;  %v1971_v33 = vpop.f32.mrf.mxu0 }
 0x28c   :  { %2066 = vst.msk [vmem:[%s4186_s7 + $0x18] sm:$0xff] %vm566_vm3, %v2050_v39  ;;  %v1999_v60 = vmul.f32 %v3984_v49, %v1962_v3 }
 0x28e   :  { %v2019_v38 = vadd.f32 %v3990_v12, %v1999_v60 }
 0x28f   :  { %v1914_v16 = vpop.f32.mrf.mxu2 }
 0x290   :  { %v2035_v32 = vadd.f32 %v2748_v7, %v2019_v38  ;;  %v1915_v53 = vadd.f32 %v1914_v16, %v1865_v43  ;;  %v2753_v38 = vld [vmem:[%s4179_s0 + $0x48] sm:$0xff] }
 0x292   :  { %v2051_v15 = vmax.f32 %v2035_v32, 0.0  ;;  %v1964_v11 = vadd.f32 %v1963_v47, %v1915_v53  ;;  %v1973_v58 = vpop.f32.mrf.mxu0 }
 0x293   :  { %v1868_v35 = vpop.f32.mrf.mxu3 }
 0x294   :  { %2067 = vst.msk [vmem:[%s4186_s7 + $0x20] sm:$0xff] %vm566_vm3, %v2051_v15  ;;  %v2000_v4 = vmul.f32 %v3984_v49, %v1964_v11 }
 0x296   :  { %v2020_v34 = vadd.f32 %v3990_v12, %v2000_v4 }
 0x297   :  { %v1917_v29 = vpop.f32.mrf.mxu2 }
 0x298   :  { %v2036_v17 = vadd.f32 %v2749_v24, %v2020_v34  ;;  %v1918_v20 = vadd.f32 %v1917_v29, %v1868_v35  ;;  %v2754_v34 = vld [vmem:[%s4179_s0 + $0x50] sm:$0xff] }
 0x29a   :  { %v2052_v55 = vmax.f32 %v2036_v17, 0.0  ;;  %v1967_v30 = vadd.f32 %v1966_v14, %v1918_v20  ;;  %v1976_v3 = vpop.f32.mrf.mxu0 }
 0x29b   :  { %v1870_v52 = vpop.f32.mrf.mxu3 }
 0x29c   :  { %2068 = vst.msk [vmem:[%s4186_s7 + $0x28] sm:$0xff] %vm566_vm3, %v2052_v55  ;;  %v2001_v13 = vmul.f32 %v3984_v49, %v1967_v30 }
 0x29e   :  { %v2021_v28 = vadd.f32 %v3990_v12, %v2001_v13  ;;  %v2755_v13 = vld [vmem:[%s4179_s0 + $0x58] sm:$0xff] }
 0x29f   :  { %v1919_v2 = vpop.f32.mrf.mxu2 }
 0x2a0   :  { %v2037_v63 = vadd.f32 %v2750_v25, %v2021_v28  ;;  %v1920_v21 = vadd.f32 %v1919_v2, %v1870_v52 }
 0x2a2   :  { %v2053_v48 = vmax.f32 %v2037_v63, 0.0  ;;  %v1969_v5 = vadd.f32 %v1968_v42, %v1920_v21  ;;  %v1978_v24 = vpop.f32.mrf.mxu0  ;;  %v2697_v63 = vunpack.i.h.bf16 %v3939_v26  ;;  %v2706_v21 = vunpack.i.l.bf16 %v3937_v1 }
 0x2a4   :  { %2069 = vst.msk [vmem:[%s4186_s7 + $0x30] sm:$0xff] %vm566_vm3, %v2053_v48  ;;  %v2002_v18 = vmul.f32 %v3984_v49, %v1969_v5 }
 0x2a6   :  { %v2022_v62 = vadd.f32 %v3990_v12, %v2002_v18  ;;  %v1616_v18 = vsel %vm566_vm3, %v3794_v54, %v2697_v63 }
 0x2a7   :  { %v1873_v61 = vpop.f32.mrf.mxu3  ;;  %v1922_v9 = vpop.f32.mrf.mxu2 }
 0x2a8   :  { %v2038_v0 = vadd.f32 %v2751_v36, %v2022_v62  ;;  %v1923_v6 = vadd.f32 %v1922_v9, %v1873_v61  ;;  %v1617_v62 = vsel %vm566_vm3, %v3818_v51, %v2706_v21 }
 0x2aa   :  { %v2054_v27 = vmax.f32 %v2038_v0, 0.0  ;;  %v1972_v40 = vadd.f32 %v1971_v33, %v1923_v6  ;;  %v2702_v33 = vunpack.i.h.bf16 %v3941_v10 }
 0x2ac   :  { %2070 = vst.msk [vmem:[%s4186_s7 + $0x38] sm:$0xff] %vm566_vm3, %v2054_v27  ;;  %v2003_v44 = vmul.f32 %v3984_v49, %v1972_v40  ;;  %v1632_v36 = vsel %vm582_vm4, %v1616_v18, %v2702_v33 }
 0x2ae   :  { %v2023_v22 = vadd.f32 %v3990_v12, %v2003_v44 }
 0x2af   :  { %v1875_v47 = vpop.f32.mrf.mxu3  ;;  %v1924_v41 = vpop.f32.mrf.mxu2 }
 0x2b0   :  { %v2039_v23 = vadd.f32 %v2752_v56, %v2023_v22  ;;  %v1925_v59 = vadd.f32 %v1924_v41, %v1875_v47 }
 0x2b2   :  { %v2055_v50 = vmax.f32 %v2039_v23, 0.0  ;;  %v1974_v45 = vadd.f32 %v1973_v58, %v1925_v59  ;;  %v2707_v58 = vunpack.i.h.bf16 %v3937_v1 }
 0x2b4   :  { %2071 = vst.msk [vmem:[%s4186_s7 + $0x40] sm:$0xff] %vm566_vm3, %v2055_v50  ;;  %v2004_v39 = vmul.f32 %v3984_v49, %v1974_v45  ;;  %v1572_v41 = vsel %vm566_vm3, %v3807_v37, %v2707_v58 }
 0x2b6   :  { %v2024_v60 = vadd.f32 %v3990_v12, %v2004_v39 }
 0x2b7   :  { %v1878_v43 = vpop.f32.mrf.mxu3  ;;  %v1927_v14 = vpop.f32.mrf.mxu2 }
 0x2b8   :  { %v2040_v16 = vadd.f32 %v2753_v38, %v2024_v60  ;;  %v1928_v7 = vadd.f32 %v1927_v14, %v1878_v43 }
 0x2ba   :  { %v2056_v32 = vmax.f32 %v2040_v16, 0.0  ;;  %v1977_v53 = vadd.f32 %v1976_v3, %v1928_v7 }
 0x2bc   :  { %2072 = vst.msk [vmem:[%s4186_s7 + $0x48] sm:$0xff] %vm566_vm3, %v2056_v32  ;;  %v2005_v15 = vmul.f32 %v3984_v49, %v1977_v53  ;;  %v2710_v52 = vpop.permute.xlu2 %2709 }
 0x2bd   :  { %v2711_v48 = vunpack.i.l.bf16 %v2710_v52  ;;  %v2712_v54 = vunpack.i.h.bf16 %v2710_v52 }
 0x2be   :  { %v2025_v11 = vadd.f32 %v3990_v12, %v2005_v15 }
 0x2bf   :  { %v1880_v4 = vpop.f32.mrf.mxu3  ;;  %v1929_v35 = vpop.f32.mrf.mxu2  ;;  %v1633_v0 = vsel %vm582_vm4, %v1617_v62, %v2711_v48  ;;  %v1586_v50 = vsel %vm582_vm4, %v1572_v41, %v2712_v54 }
 0x2c0   :  { %v2041_v29 = vadd.f32 %v2754_v34, %v2025_v11  ;;  %v1930_v42 = vadd.f32 %v1929_v35, %v1880_v4 }
 0x2c2   :  { %v2057_v17 = vmax.f32 %v2041_v29, 0.0  ;;  %v1979_v20 = vadd.f32 %v1978_v24, %v1930_v42  ;;  %v2756_v42 = vld [vmem:[%s4179_s0 + $0x60] sm:$0xff] }
 0x2c4   :  { %2073 = vst.msk [vmem:[%s4186_s7 + $0x50] sm:$0xff] %vm566_vm3, %v2057_v17  ;;  %v2006_v55 = vmul.f32 %v3984_v49, %v1979_v20  ;;  %v2725_v25 = vpop.permute.xlu2 %2724 }
 0x2c5   :  { %v2726_v44 = vunpack.i.l.bf16 %v2725_v25  ;;  %v2727_v59 = vunpack.i.h.bf16 %v2725_v25 }
 0x2c6   :  { %v2026_v30 = vadd.f32 %v3990_v12, %v2006_v55 }
 0x2c7   :  { %v1573_v56 = vsel %vm566_vm3, %v3962_v57, %v2726_v44  ;;  %v1618_v37 = vsel %vm566_vm3, %v3973_v8, %v2727_v59  ;;  %v1883_v53 = vpop.f32.mrf.mxu3 }
 0x2c8   :  { %v2042_v28 = vadd.f32 %v2755_v13, %v2026_v30 }
 0x2ca   :  { %v2058_v2 = vmax.f32 %v2042_v28, 0.0 }
 0x2cc   :  { %2074 = vst.msk [vmem:[%s4186_s7 + $0x58] sm:$0xff] %vm566_vm3, %v2058_v2  ;;  %v2735_v10 = vpop.permute.xlu2 %2734  ;;  %v2757_v2 = vld [vmem:[%s4179_s0 + $0x68] sm:$0xff] }
 0x2cd   :  { %v2736_v22 = vunpack.i.l.bf16 %v2735_v10  ;;  %v2737_v23 = vunpack.i.h.bf16 %v2735_v10 }
 0x2cf   :  { %v1602_v1 = vsel %vm598_vm5, %v1586_v50, %v2736_v22  ;;  %v1885_v35 = vpop.f32.mrf.mxu3 }
 0x2d8   :  { %v2720_v5 = vpop.permute.xlu1 %2719 }
 0x2d9   :  { %v2722_v61 = vunpack.i.h.bf16 %v2720_v5  ;;  %v2721_v9 = vunpack.i.l.bf16 %v2720_v5 }
 0x2db   :  { %v1648_v26 = vsel %vm598_vm5, %v1632_v36, %v2721_v9  ;;  %v1649_v6 = vsel %vm598_vm5, %v1633_v0, %v2722_v61  ;;  %v2758_v61 = vld [vmem:[%s4179_s0 + $0x70] sm:$0xff] }
 0x2dc   :  { %v1671_v27 = vpack.c.bf16 %v1649_v6, %v1648_v26 }
 0x2dd   :  { %v1459_v40 = vpop.permute.xlu0 %1458 }
 0x2de   :  { %1931 = vmatmul.bf16.gmra.mxu2 %v1671_v27  ;;  %v1619_v60 = vsel %vm566_vm3, %v4004_v19, %v1459_v40  ;;  %v2759_v40 = vld [vmem:[%s4179_s0 + $0x78] sm:$0xff] }
 0x2df   :  { %v1635_v57 = vsel %vm582_vm4, %v1619_v60, %v3417_v31 }
 0x2e0   :  { %v2730_v51 = vpop.permute.xlu1 %2729  ;;  %v1651_v7 = vsel %vm598_vm5, %v1635_v57, %v3423_v46 }
 0x2e1   :  { %v2731_v47 = vunpack.i.l.bf16 %v2730_v51  ;;  %v2732_v39 = vunpack.i.h.bf16 %v2730_v51 }
 0x2e2   :  { %v1981_v19 = vpop.f32.mrf.mxu0 }
 0x2e3   :  { %v1587_v45 = vsel %vm582_vm4, %v1573_v56, %v2731_v47  ;;  %v1634_v38 = vsel %vm582_vm4, %v1618_v37, %v2732_v39 }
 0x2e4   :  { %v1603_v3 = vsel %vm598_vm5, %v1587_v45, %v2737_v23 }
 0x2e5   :  { %v1673_v43 = vpack.c.bf16 %v1603_v3, %v1602_v1  ;;  %v1545_v14 = vpop.permute.xlu0 %1544 }
 0x2e6   :  { %v1650_v16 = vsel %vm598_vm5, %v1634_v38, %v1545_v14 }
 0x2e7   :  { %1887 = vmatmul.bf16.gmra.mxu3 %v1673_v43  ;;  %v1674_v32 = vpack.c.bf16 %v1651_v7, %v1650_v16 }
 0x2ea   :  { %v1983_v34 = vpop.f32.mrf.mxu0 }
 0x2ee   :  { %1936 = vmatmul.bf16.gmra.mxu2 %v1674_v32 }
 0x2f2   :  { %v1986_v28 = vpop.f32.mrf.mxu0 }
 0x2fa   :  { %v1988_v0 = vpop.f32.mrf.mxu0 }
 0x361   :  { %v1932_v15 = vpop.f32.mrf.mxu2 }
 0x362   :  { %v1933_v11 = vadd.f32 %v1932_v15, %v1883_v53 }
 0x364   :  { %v1982_v4 = vadd.f32 %v1981_v19, %v1933_v11 }
 0x366   :  { %v2007_v8 = vmul.f32 %v3984_v49, %v1982_v4 }
 0x368   :  { %v2027_v31 = vadd.f32 %v3990_v12, %v2007_v8 }
 0x369   :  { %v1934_v29 = vpop.f32.mrf.mxu2 }
 0x36a   :  { %v2043_v24 = vadd.f32 %v2756_v42, %v2027_v31  ;;  %v1935_v46 = vadd.f32 %v1934_v29, %v1885_v35  ;;  %v1888_v30 = vpop.f32.mrf.mxu3 }
 0x36c   :  { %v2059_v17 = vmax.f32 %v2043_v24, 0.0  ;;  %v1984_v20 = vadd.f32 %v1983_v34, %v1935_v46 }
 0x36e   :  { %2075 = vst.msk [vmem:[%s4186_s7 + $0x60] sm:$0xff] %vm566_vm3, %v2059_v17  ;;  %v2008_v55 = vmul.f32 %v3984_v49, %v1984_v20 }
 0x370   :  { %v2028_v13 = vadd.f32 %v3990_v12, %v2008_v55 }
 0x371   :  { %v1937_v52 = vpop.f32.mrf.mxu2 }
 0x372   :  { %v2044_v25 = vadd.f32 %v2757_v2, %v2028_v13  ;;  %v1938_v63 = vadd.f32 %v1937_v52, %v1888_v30  ;;  %v1890_v18 = vpop.f32.mrf.mxu3 }
 0x374   :  { %v2060_v21 = vmax.f32 %v2044_v25, 0.0  ;;  %v1987_v33 = vadd.f32 %v1986_v28, %v1938_v63 }
 0x376   :  { %2076 = vst.msk [vmem:[%s4186_s7 + $0x68] sm:$0xff] %vm566_vm3, %v2060_v21  ;;  %v2009_v48 = vmul.f32 %v3984_v49, %v1987_v33 }
 0x378   :  { %v2029_v5 = vadd.f32 %v3990_v12, %v2009_v48 }
 0x379   :  { %v1939_v62 = vpop.f32.mrf.mxu2 }
 0x37a   :  { %v2045_v9 = vadd.f32 %v2758_v61, %v2029_v5  ;;  %v1940_v36 = vadd.f32 %v1939_v62, %v1890_v18 }
 0x37c   :  { %v2061_v26 = vmax.f32 %v2045_v9, 0.0  ;;  %v1989_v6 = vadd.f32 %v1988_v0, %v1940_v36 }
 0x37e   :  { %2077 = vst.msk [vmem:[%s4186_s7 + $0x70] sm:$0xff] %vm566_vm3, %v2061_v26  ;;  %v2010_v27 = vmul.f32 %v3984_v49, %v1989_v6 }
 0x380   :  { %v2030_v10 = vadd.f32 %v3990_v12, %v2010_v27 }
 0x382   :  { %v2046_v58 = vadd.f32 %v2759_v40, %v2030_v10 }
 0x384   :  { %v2062_v44 = vmax.f32 %v2046_v58, 0.0 }
 0x386   :  { %2078 = vst.msk [vmem:[%s4186_s7 + $0x78] sm:$0xff] %vm566_vm3, %v2062_v44 }

// kernel: resnet_forward.11
= control target key start
LH: loop header
LB: loop body
LE: loop exit
PB: predicated region body
PF: predicated region fallthrough
CT: control target
= control target key end

     0   :  { %vm124_vm0 = vcmask 523264   ;;  %s289_s1 = inlined_call_operand.vmem [shape: bf16[192,128], index: 1, kind: input, shape index: {}]   ;;  %s290_s0 = inlined_call_operand.vmem [shape: f32[2,192], index: 0, kind: input, shape index: {}]   ;;  %s291_s2 = inlined_call_operand.vmem [shape: f32[1,128], index: 2, kind: input, shape index: {}]   ;;  %s292_s3 = inlined_call_operand.vmem [shape: f32[2,128], index: 3, kind: output, shape index: {}]  }
   0x1   :  { %v216_v0 = vld [vmem:[%s289_s1 + $0x38] sm:$0xff]  ;;  %v215_v2 = vld [vmem:[%s289_s1 + $0x30] sm:$0xff]  ;;  %v15_v4 = vld [vmem:[%s290_s0] sm:$0xf] }
   0x2   :  { %v220_v1 = vld [vmem:[%s289_s1 + $0x58] sm:$0xff]  ;;  %128 = vmatpush.bf16.msra.mxu0 %v216_v0  ;;  %v219_v3 = vld [vmem:[%s289_s1 + $0x50] sm:$0xff]  ;;  %17 = vst [vmem:[#allocation1] ss:$4 sm:$0xff] %v15_v4  ;;  %v214_v5 = vld [vmem:[%s289_s1 + $0x28] sm:$0xff] }
   0x3   :  { %145 = vmatpush.bf16.msra.mxu1 %v220_v1  ;;  %v218_v6 = vld [vmem:[%s289_s1 + $0x48] sm:$0xff]  ;;  %v213_v7 = vld [vmem:[%s289_s1 + $0x20] sm:$0xff]  ;;  %v212_v10 = vld [vmem:[%s289_s1 + $0x18] sm:$0xff] }
   0x4   :  { %v217_v8 = vld [vmem:[%s289_s1 + $0x40] sm:$0xff]  ;;  %v211_v12 = vld [vmem:[%s289_s1 + $0x10] sm:$0xff]  ;;  %v210_v13 = vld [vmem:[%s289_s1 + $0x8] sm:$0xff] }
   0x5   :  { %v209_v14 = vld [vmem:[%s289_s1] sm:$0xff] }
   0x6   :  { %129 = vmatpush.bf16.msra.mxu0 %v215_v2  ;;  %v221_v19 = vld [vmem:[%s291_s2] ss:$0 sm:$0xff] }
   0x7   :  { %146 = vmatpush.bf16.msra.mxu1 %v219_v3 }
   0x9   :  { %v19_v9 = vld.sshfl [vmem:[#allocation1 + $0x8] sm:$0xff pattern:$0x73625140]  ;;  %v18_v15 = vld.sshfl [vmem:[#allocation1] sm:$0xff pattern:$0x73625140] }
   0xa   :  { %130 = vmatpush.bf16.msra.mxu0 %v214_v5  ;;  %v23_v11 = vpack.c.bf16 %v19_v9, %v19_v9  ;;  %v22_v16 = vpack.c.bf16 %v18_v15, %v18_v15 }
   0xb   :  { %147 = vmatpush.bf16.msra.mxu1 %v218_v6 }
   0xe   :  { %131 = vmatpush.bf16.msra.mxu0 %v213_v7 }
   0xf   :  { %148 = vmatpush.bf16.msra.mxu1 %v217_v8 }
  0x12   :  { %132 = vmatpush.bf16.msra.mxu0 %v212_v10  ;;  %208 = vmatmul.msk.bf16.vlgmr.msra.gmra.mxu1 %vm124_vm0, %v23_v11 }
  0x16   :  { %133 = vmatpush.bf16.msra.mxu0 %v211_v12 }
  0x1a   :  { %134 = vmatpush.bf16.msra.mxu0 %v210_v13 }
  0x1e   :  { %135 = vmatpush.bf16.msra.mxu0 %v209_v14 }
  0x21   :  { %136 = vmatmul.bf16.vlgmr.msra.gmra.mxu0 %v22_v16 }
  0x8f   :  { %v150_v17 = vpop.f32.mrf.mxu1 }
  0x97   :  { %v152_v18 = vpop.f32.mrf.mxu1 }
  0x9e   :  { %v137_v20 = vpop.f32.mrf.mxu0 }
  0x9f   :  { %v138_v21 = vadd.f32 %v221_v19, %v137_v20 }
  0xa1   :  { %v151_v22 = vadd.f32 %v150_v17, %v138_v21 }
  0xa3   :  { %222 = vtanh.f32 %v151_v22 }
  0xa6   :  { %v139_v23 = vpop.f32.mrf.mxu0 }
  0xa9   :  { %v223_v24 = vpop.eup %222 }
  0xaa   :  { %155 = vst [vmem:[%s292_s3] sm:$0x3] %v223_v24 }

// kernel: resnet_forward.10
= control target key start
LH: loop header
LB: loop body
LE: loop exit
PB: predicated region body
PF: predicated region fallthrough
CT: control target
= control target key end

     0   :  { %s2436_s0 = inlined_call_operand.vmem [shape: f32[2,2048], index: 0, kind: input, shape index: {}]   ;;  %s2437_s1 = inlined_call_operand.vmem [shape: bf16[2048,128], index: 1, kind: input, shape index: {}]   ;;  %s2438_s2 = inlined_call_operand.vmem [shape: f32[1,128], index: 2, kind: input, shape index: {}]   ;;  %s2439_s3 = inlined_call_operand.hbm [shape: f32[2,128], index: 3, kind: output, shape index: {}]  }
   0x1   :  { %v1848_v0 = vld [vmem:[%s2437_s1 + $0x38] sm:$0xff]  ;;  %v1847_v4 = vld [vmem:[%s2437_s1 + $0x30] sm:$0xff]  ;;  %v1846_v8 = vld [vmem:[%s2437_s1 + $0x28] sm:$0xff] }
   0x2   :  { %v1856_v1 = vld [vmem:[%s2437_s1 + $0x78] sm:$0xff]  ;;  %1104 = vmatpush.bf16.msra.mxu0 %v1848_v0  ;;  %v1855_v5 = vld [vmem:[%s2437_s1 + $0x70] sm:$0xff]  ;;  %v1854_v9 = vld [vmem:[%s2437_s1 + $0x68] sm:$0xff] }
   0x3   :  { %v1864_v2 = vld [vmem:[%s2437_s1 + $0xb8] sm:$0xff]  ;;  %1117 = vmatpush.bf16.msra.mxu1 %v1856_v1  ;;  %v1863_v6 = vld [vmem:[%s2437_s1 + $0xb0] sm:$0xff]  ;;  %v1862_v10 = vld [vmem:[%s2437_s1 + $0xa8] sm:$0xff] }
   0x4   :  { %v1872_v3 = vld [vmem:[%s2437_s1 + $0xf8] sm:$0xff]  ;;  %1130 = vmatpush.bf16.msra.mxu2 %v1864_v2  ;;  %v1871_v7 = vld [vmem:[%s2437_s1 + $0xf0] sm:$0xff]  ;;  %v1870_v11 = vld [vmem:[%s2437_s1 + $0xe8] sm:$0xff] }
   0x5   :  { %1143 = vmatpush.bf16.msra.mxu3 %v1872_v3  ;;  %v1845_v12 = vld [vmem:[%s2437_s1 + $0x20] sm:$0xff]  ;;  %v1844_v16 = vld [vmem:[%s2437_s1 + $0x18] sm:$0xff]  ;;  %v1843_v20 = vld [vmem:[%s2437_s1 + $0x10] sm:$0xff] }
   0x6   :  { %1105 = vmatpush.bf16.msra.mxu0 %v1847_v4  ;;  %v1853_v13 = vld [vmem:[%s2437_s1 + $0x60] sm:$0xff]  ;;  %v1852_v17 = vld [vmem:[%s2437_s1 + $0x58] sm:$0xff]  ;;  %v1851_v21 = vld [vmem:[%s2437_s1 + $0x50] sm:$0xff] }
   0x7   :  { %1118 = vmatpush.bf16.msra.mxu1 %v1855_v5  ;;  %v1861_v14 = vld [vmem:[%s2437_s1 + $0xa0] sm:$0xff]  ;;  %v1860_v18 = vld [vmem:[%s2437_s1 + $0x98] sm:$0xff] }
   0x8   :  { %1131 = vmatpush.bf16.msra.mxu2 %v1863_v6  ;;  %v1869_v15 = vld [vmem:[%s2437_s1 + $0xe0] sm:$0xff]  ;;  %v1868_v19 = vld [vmem:[%s2437_s1 + $0xd8] sm:$0xff] }
   0x9   :  { %1144 = vmatpush.bf16.msra.mxu3 %v1871_v7  ;;  %v15_v22 = vld [vmem:[%s2436_s0] sm:$0xff] }
   0xa   :  { %1106 = vmatpush.bf16.msra.mxu0 %v1846_v8  ;;  %23 = vst [vmem:[#allocation1] ss:$4 sm:$0xff] %v15_v22 }
   0xb   :  { %1119 = vmatpush.bf16.msra.mxu1 %v1854_v9 }
   0xc   :  { %1132 = vmatpush.bf16.msra.mxu2 %v1862_v10 }
   0xd   :  { %1145 = vmatpush.bf16.msra.mxu3 %v1870_v11 }
   0xe   :  { %1107 = vmatpush.bf16.msra.mxu0 %v1845_v12 }
   0xf   :  { %1120 = vmatpush.bf16.msra.mxu1 %v1853_v13 }
  0x10   :  { %1133 = vmatpush.bf16.msra.mxu2 %v1861_v14 }
  0x11   :  { %1146 = vmatpush.bf16.msra.mxu3 %v1869_v15 }
  0x12   :  { %1108 = vmatpush.bf16.msra.mxu0 %v1844_v16 }
  0x13   :  { %1121 = vmatpush.bf16.msra.mxu1 %v1852_v17 }
  0x14   :  { %8 = vsyncpa [#allocation3], 0  ;;  %1134 = vmatpush.bf16.msra.mxu2 %v1860_v18  ;;  %v1859_v23 = vld [vmem:[%s2437_s1 + $0x90] sm:$0xff]  ;;  %v1842_v25 = vld [vmem:[%s2437_s1 + $0x8] sm:$0xff]  ;;  %s1320_s4 = sshll.u32 %s2439_s3, 4  ;;  %s1321_s4 = int_to_ptr.hbm [resolvable:$true] %s1320_s4 }
  0x15   :  { %1147 = vmatpush.bf16.msra.mxu3 %v1868_v19  ;;  %v1867_v24 = vld [vmem:[%s2437_s1 + $0xd0] sm:$0xff]  ;;  %v1850_v26 = vld [vmem:[%s2437_s1 + $0x48] sm:$0xff]  ;;  %v1841_v29 = vld [vmem:[%s2437_s1] sm:$0xff] }
  0x16   :  { %1109 = vmatpush.bf16.msra.mxu0 %v1843_v20  ;;  %v1858_v27 = vld [vmem:[%s2437_s1 + $0x88] sm:$0xff]  ;;  %v1849_v30 = vld [vmem:[%s2437_s1 + $0x40] sm:$0xff]  ;;  %v17_v31 = vld [vmem:[%s2436_s0 + $0x10] sm:$0xff] }
  0x17   :  { %1122 = vmatpush.bf16.msra.mxu1 %v1851_v21  ;;  %v1866_v28 = vld [vmem:[%s2437_s1 + $0xc8] sm:$0xff]  ;;  %v28_v32 = vld.sshfl [vmem:[#allocation1 + $0x10] sm:$0xff pattern:$0x73625140]  ;;  %v1857_v36 = vld [vmem:[%s2437_s1 + $0x80] sm:$0xff] }
  0x18   :  { %1135 = vmatpush.bf16.msra.mxu2 %v1859_v23  ;;  %v26_v33 = vld.sshfl [vmem:[#allocation1] sm:$0xff pattern:$0x73625140]  ;;  %v29_v34 = vld.sshfl [vmem:[#allocation1 + $0x18] sm:$0xff pattern:$0x73625140]  ;;  %v62_v43 = vpack.c.bf16 %v28_v32, %v28_v32 }
  0x19   :  { %1148 = vmatpush.bf16.msra.mxu3 %v1867_v24  ;;  %v27_v35 = vld.sshfl [vmem:[#allocation1 + $0x8] sm:$0xff pattern:$0x73625140]  ;;  %v1865_v37 = vld [vmem:[%s2437_s1 + $0xc0] sm:$0xff]  ;;  %v1880_v38 = vld [vmem:[%s2437_s1 + $0x138] sm:$0xff]  ;;  %v60_v44 = vpack.c.bf16 %v26_v33, %v26_v33  ;;  %v63_v45 = vpack.c.bf16 %v29_v34, %v29_v34 }
  0x1a   :  { %1110 = vmatpush.bf16.msra.mxu0 %v1842_v25  ;;  %34 = vst [vmem:[#allocation1] ss:$4 sm:$0xff] %v17_v31  ;;  %v1888_v39 = vld [vmem:[%s2437_s1 + $0x178] sm:$0xff]  ;;  %v16_v42 = vld [vmem:[%s2436_s0 + $0x8] sm:$0xff]  ;;  %v61_v46 = vpack.c.bf16 %v27_v35, %v27_v35  ;;  %v1879_v47 = vld [vmem:[%s2437_s1 + $0x130] sm:$0xff] }
  0x1b   :  { %1123 = vmatpush.bf16.msra.mxu1 %v1850_v26  ;;  %v1896_v40 = vld [vmem:[%s2437_s1 + $0x1b8] sm:$0xff]  ;;  %25 = vst [vmem:[#allocation1 + $0x20] ss:$4 sm:$0xff] %v16_v42  ;;  %v1887_v48 = vld [vmem:[%s2437_s1 + $0x170] sm:$0xff]  ;;  %v1878_v51 = vld [vmem:[%s2437_s1 + $0x128] sm:$0xff] }
  0x1c   :  { %1136 = vmatpush.bf16.msra.mxu2 %v1858_v27  ;;  %v1904_v41 = vld [vmem:[%s2437_s1 + $0x1f8] sm:$0xff]  ;;  %v1895_v49 = vld [vmem:[%s2437_s1 + $0x1b0] sm:$0xff]  ;;  %v1886_v52 = vld [vmem:[%s2437_s1 + $0x168] sm:$0xff] }
  0x1d   :  { %1149 = vmatpush.bf16.msra.mxu3 %v1866_v28  ;;  %v1903_v50 = vld [vmem:[%s2437_s1 + $0x1f0] sm:$0xff]  ;;  %v1894_v53 = vld [vmem:[%s2437_s1 + $0x1a8] sm:$0xff]  ;;  %v18_v58 = vld [vmem:[%s2436_s0 + $0x18] sm:$0xff] }
  0x1e   :  { %1111 = vmatpush.bf16.msra.mxu0 %v1841_v29  ;;  %v1902_v54 = vld [vmem:[%s2437_s1 + $0x1e8] sm:$0xff]  ;;  %v1877_v60 = vld [vmem:[%s2437_s1 + $0x120] sm:$0xff]  ;;  %v1876_v0 = vld [vmem:[%s2437_s1 + $0x118] sm:$0xff] }
  0x1f   :  { %1124 = vmatpush.bf16.msra.mxu1 %v1849_v30  ;;  %v1885_v61 = vld [vmem:[%s2437_s1 + $0x160] sm:$0xff]  ;;  %v1884_v1 = vld [vmem:[%s2437_s1 + $0x158] sm:$0xff]  ;;  %v1875_v4 = vld [vmem:[%s2437_s1 + $0x110] sm:$0xff] }
  0x20   :  { %1137 = vmatpush.bf16.msra.mxu2 %v1857_v36  ;;  %v1893_v62 = vld [vmem:[%s2437_s1 + $0x1a0] sm:$0xff]  ;;  %v1892_v2 = vld [vmem:[%s2437_s1 + $0x198] sm:$0xff]  ;;  %v1883_v5 = vld [vmem:[%s2437_s1 + $0x150] sm:$0xff] }
  0x21   :  { %1150 = vmatpush.bf16.msra.mxu3 %v1865_v37  ;;  %1112 = vmatmul.bf16.vlgmr.msra.gmra.mxu0 %v60_v44  ;;  %v1901_v63 = vld [vmem:[%s2437_s1 + $0x1e0] sm:$0xff]  ;;  %v1900_v3 = vld [vmem:[%s2437_s1 + $0x1d8] sm:$0xff]  ;;  %v1891_v6 = vld [vmem:[%s2437_s1 + $0x190] sm:$0xff] }
  0x22   :  { %1156 = vmatpush.bf16.msrb.mxu0 %v1880_v38  ;;  %1125 = vmatmul.bf16.vlgmr.msra.gmra.mxu1 %v61_v46  ;;  %v2159_v55 = vld.sshfl [vmem:[#allocation1 + $0x30] sm:$0xff pattern:$0x73625140]  ;;  %v2161_v56 = vld.sshfl [vmem:[#allocation1 + $0x20] sm:$0xff pattern:$0x73625140] }
  0x23   :  { %1169 = vmatpush.bf16.msrb.mxu1 %v1888_v39  ;;  %1138 = vmatmul.bf16.vlgmr.msra.gmra.mxu2 %v62_v43  ;;  %v2163_v57 = vld.sshfl [vmem:[#allocation1 + $0x38] sm:$0xff pattern:$0x73625140]  ;;  %v2168_v59 = vld.sshfl [vmem:[#allocation1 + $0x28] sm:$0xff pattern:$0x73625140]  ;;  %v66_v20 = vpack.c.bf16 %v2159_v55, %v2159_v55  ;;  %v64_v21 = vpack.c.bf16 %v2161_v56, %v2161_v56 }
  0x24   :  { %1182 = vmatpush.bf16.msrb.mxu2 %v1896_v40  ;;  %1151 = vmatmul.bf16.vlgmr.msra.gmra.mxu3 %v63_v45  ;;  %35 = vst [vmem:[#allocation1 + $0x20] ss:$4 sm:$0xff] %v18_v58  ;;  %v1899_v7 = vld [vmem:[%s2437_s1 + $0x1d0] sm:$0xff]  ;;  %v1874_v8 = vld [vmem:[%s2437_s1 + $0x108] sm:$0xff]  ;;  %v1873_v12 = vld [vmem:[%s2437_s1 + $0x100] sm:$0xff]  ;;  %v67_v22 = vpack.c.bf16 %v2163_v57, %v2163_v57  ;;  %v65_v23 = vpack.c.bf16 %v2168_v59, %v2168_v59 }
  0x25   :  { %1195 = vmatpush.bf16.msrb.mxu3 %v1904_v41  ;;  %v1882_v9 = vld [vmem:[%s2437_s1 + $0x148] sm:$0xff]  ;;  %v1881_v13 = vld [vmem:[%s2437_s1 + $0x140] sm:$0xff]  ;;  %v1912_v16 = vld [vmem:[%s2437_s1 + $0x238] sm:$0xff] }
  0x26   :  { %1157 = vmatpush.bf16.msrb.mxu0 %v1879_v47  ;;  %v1890_v10 = vld [vmem:[%s2437_s1 + $0x188] sm:$0xff]  ;;  %v1889_v14 = vld [vmem:[%s2437_s1 + $0x180] sm:$0xff]  ;;  %v1920_v17 = vld [vmem:[%s2437_s1 + $0x278] sm:$0xff] }
  0x27   :  { %1170 = vmatpush.bf16.msrb.mxu1 %v1887_v48  ;;  %v1898_v11 = vld [vmem:[%s2437_s1 + $0x1c8] sm:$0xff]  ;;  %v1897_v15 = vld [vmem:[%s2437_s1 + $0x1c0] sm:$0xff]  ;;  %v1928_v18 = vld [vmem:[%s2437_s1 + $0x2b8] sm:$0xff] }
  0x28   :  { %1183 = vmatpush.bf16.msrb.mxu2 %v1895_v49  ;;  %v1936_v19 = vld [vmem:[%s2437_s1 + $0x2f8] sm:$0xff]  ;;  %v1911_v24 = vld [vmem:[%s2437_s1 + $0x230] sm:$0xff]  ;;  %v1910_v28 = vld [vmem:[%s2437_s1 + $0x228] sm:$0xff] }
  0x29   :  { %1196 = vmatpush.bf16.msrb.mxu3 %v1903_v50  ;;  %v1919_v25 = vld [vmem:[%s2437_s1 + $0x270] sm:$0xff]  ;;  %v1918_v29 = vld [vmem:[%s2437_s1 + $0x268] sm:$0xff]  ;;  %v1909_v32 = vld [vmem:[%s2437_s1 + $0x220] sm:$0xff] }
  0x2a   :  { %1158 = vmatpush.bf16.msrb.mxu0 %v1878_v51  ;;  %v1927_v26 = vld [vmem:[%s2437_s1 + $0x2b0] sm:$0xff]  ;;  %v1926_v30 = vld [vmem:[%s2437_s1 + $0x2a8] sm:$0xff]  ;;  %v1917_v33 = vld [vmem:[%s2437_s1 + $0x260] sm:$0xff] }
  0x2b   :  { %1171 = vmatpush.bf16.msrb.mxu1 %v1886_v52  ;;  %v1935_v27 = vld [vmem:[%s2437_s1 + $0x2f0] sm:$0xff]  ;;  %v1934_v31 = vld [vmem:[%s2437_s1 + $0x2e8] sm:$0xff]  ;;  %v1925_v34 = vld [vmem:[%s2437_s1 + $0x2a0] sm:$0xff] }
  0x2c   :  { %1184 = vmatpush.bf16.msrb.mxu2 %v1894_v53  ;;  %v1933_v35 = vld [vmem:[%s2437_s1 + $0x2e0] sm:$0xff]  ;;  %v1908_v36 = vld [vmem:[%s2437_s1 + $0x218] sm:$0xff]  ;;  %v1907_v40 = vld [vmem:[%s2437_s1 + $0x210] sm:$0xff] }
  0x2d   :  { %1197 = vmatpush.bf16.msrb.mxu3 %v1902_v54  ;;  %v1916_v37 = vld [vmem:[%s2437_s1 + $0x258] sm:$0xff]  ;;  %v1915_v41 = vld [vmem:[%s2437_s1 + $0x250] sm:$0xff]  ;;  %v1906_v44 = vld [vmem:[%s2437_s1 + $0x208] sm:$0xff] }
  0x2e   :  { %1159 = vmatpush.bf16.msrb.mxu0 %v1877_v60  ;;  %v1924_v38 = vld [vmem:[%s2437_s1 + $0x298] sm:$0xff]  ;;  %v1923_v42 = vld [vmem:[%s2437_s1 + $0x290] sm:$0xff]  ;;  %v1914_v45 = vld [vmem:[%s2437_s1 + $0x248] sm:$0xff] }
  0x2f   :  { %1172 = vmatpush.bf16.msrb.mxu1 %v1885_v61  ;;  %v1932_v39 = vld [vmem:[%s2437_s1 + $0x2d8] sm:$0xff]  ;;  %v1931_v43 = vld [vmem:[%s2437_s1 + $0x2d0] sm:$0xff]  ;;  %v1922_v46 = vld [vmem:[%s2437_s1 + $0x288] sm:$0xff] }
  0x30   :  { %1185 = vmatpush.bf16.msrb.mxu2 %v1893_v62  ;;  %v1930_v47 = vld [vmem:[%s2437_s1 + $0x2c8] sm:$0xff]  ;;  %v1905_v48 = vld [vmem:[%s2437_s1 + $0x200] sm:$0xff]  ;;  %v1944_v52 = vld [vmem:[%s2437_s1 + $0x338] sm:$0xff] }
  0x31   :  { %1198 = vmatpush.bf16.msrb.mxu3 %v1901_v63  ;;  %v1913_v49 = vld [vmem:[%s2437_s1 + $0x240] sm:$0xff]  ;;  %v1952_v53 = vld [vmem:[%s2437_s1 + $0x378] sm:$0xff]  ;;  %v38_v55 = vld.sshfl [vmem:[#allocation1 + $0x10] sm:$0xff pattern:$0x73625140] }
  0x32   :  { %1160 = vmatpush.bf16.msrb.mxu0 %v1876_v0  ;;  %v1921_v50 = vld [vmem:[%s2437_s1 + $0x280] sm:$0xff]  ;;  %v37_v56 = vld.sshfl [vmem:[#allocation1 + $0x8] sm:$0xff pattern:$0x73625140]  ;;  %v1960_v58 = vld [vmem:[%s2437_s1 + $0x3b8] sm:$0xff]  ;;  %v70_v61 = vpack.c.bf16 %v38_v55, %v38_v55 }
  0x33   :  { %1173 = vmatpush.bf16.msrb.mxu1 %v1884_v1  ;;  %v1929_v51 = vld [vmem:[%s2437_s1 + $0x2c0] sm:$0xff]  ;;  %v39_v57 = vld.sshfl [vmem:[#allocation1 + $0x18] sm:$0xff pattern:$0x73625140]  ;;  %v69_v62 = vpack.c.bf16 %v37_v56, %v37_v56  ;;  %v1943_v0 = vld [vmem:[%s2437_s1 + $0x330] sm:$0xff] }
  0x34   :  { %1186 = vmatpush.bf16.msrb.mxu2 %v1892_v2  ;;  %v36_v54 = vld.sshfl [vmem:[#allocation1] sm:$0xff pattern:$0x73625140]  ;;  %v1968_v59 = vld [vmem:[%s2437_s1 + $0x3f8] sm:$0xff]  ;;  %v71_v63 = vpack.c.bf16 %v39_v57, %v39_v57  ;;  %v1951_v1 = vld [vmem:[%s2437_s1 + $0x370] sm:$0xff] }
  0x35   :  { %1199 = vmatpush.bf16.msrb.mxu3 %v1900_v3  ;;  %v68_v60 = vpack.c.bf16 %v36_v54, %v36_v54  ;;  %v1959_v2 = vld [vmem:[%s2437_s1 + $0x3b0] sm:$0xff] }
  0x36   :  { %1161 = vmatpush.bf16.msrb.mxu0 %v1875_v4  ;;  %v1967_v3 = vld [vmem:[%s2437_s1 + $0x3f0] sm:$0xff]  ;;  %v1942_v4 = vld [vmem:[%s2437_s1 + $0x328] sm:$0xff] }
  0x37   :  { %1174 = vmatpush.bf16.msrb.mxu1 %v1883_v5  ;;  %v1950_v5 = vld [vmem:[%s2437_s1 + $0x368] sm:$0xff] }
  0x38   :  { %1187 = vmatpush.bf16.msrb.mxu2 %v1891_v6  ;;  %v1958_v6 = vld [vmem:[%s2437_s1 + $0x3a8] sm:$0xff] }
  0x39   :  { %1200 = vmatpush.bf16.msrb.mxu3 %v1899_v7  ;;  %v1966_v7 = vld [vmem:[%s2437_s1 + $0x3e8] sm:$0xff] }
  0x3a   :  { %1162 = vmatpush.bf16.msrb.mxu0 %v1874_v8  ;;  %v1941_v8 = vld [vmem:[%s2437_s1 + $0x320] sm:$0xff] }
  0x3b   :  { %1175 = vmatpush.bf16.msrb.mxu1 %v1882_v9  ;;  %v1949_v9 = vld [vmem:[%s2437_s1 + $0x360] sm:$0xff] }
  0x3c   :  { %1188 = vmatpush.bf16.msrb.mxu2 %v1890_v10  ;;  %v1957_v10 = vld [vmem:[%s2437_s1 + $0x3a0] sm:$0xff] }
  0x3d   :  { %1201 = vmatpush.bf16.msrb.mxu3 %v1898_v11  ;;  %v1965_v11 = vld [vmem:[%s2437_s1 + $0x3e0] sm:$0xff] }
  0x3e   :  { %1163 = vmatpush.bf16.msrb.mxu0 %v1873_v12  ;;  %v1940_v12 = vld [vmem:[%s2437_s1 + $0x318] sm:$0xff] }
  0x3f   :  { %1176 = vmatpush.bf16.msrb.mxu1 %v1881_v13  ;;  %v1948_v13 = vld [vmem:[%s2437_s1 + $0x358] sm:$0xff] }
  0x40   :  { %1189 = vmatpush.bf16.msrb.mxu2 %v1889_v14  ;;  %v1956_v14 = vld [vmem:[%s2437_s1 + $0x398] sm:$0xff] }
  0x41   :  { %1202 = vmatpush.bf16.msrb.mxu3 %v1897_v15  ;;  %1164 = vmatmul.bf16.vlgmr.msrb.gmra.mxu0 %v64_v21  ;;  %v1964_v15 = vld [vmem:[%s2437_s1 + $0x3d8] sm:$0xff]  ;;  %v1946_v21 = vld [vmem:[%s2437_s1 + $0x348] sm:$0xff] }
  0x42   :  { %1208 = vmatpush.bf16.msra.mxu0 %v1912_v16  ;;  %1177 = vmatmul.bf16.vlgmr.msrb.gmra.mxu1 %v65_v23  ;;  %v1939_v16 = vld [vmem:[%s2437_s1 + $0x310] sm:$0xff]  ;;  %v1962_v23 = vld [vmem:[%s2437_s1 + $0x3c8] sm:$0xff] }
  0x43   :  { %1221 = vmatpush.bf16.msra.mxu1 %v1920_v17  ;;  %1190 = vmatmul.bf16.vlgmr.msrb.gmra.mxu2 %v66_v20  ;;  %v1947_v17 = vld [vmem:[%s2437_s1 + $0x350] sm:$0xff]  ;;  %v1938_v20 = vld [vmem:[%s2437_s1 + $0x308] sm:$0xff] }
  0x44   :  { %1234 = vmatpush.bf16.msra.mxu2 %v1928_v18  ;;  %1203 = vmatmul.bf16.vlgmr.msrb.gmra.mxu3 %v67_v22  ;;  %v1955_v18 = vld [vmem:[%s2437_s1 + $0x390] sm:$0xff]  ;;  %v1954_v22 = vld [vmem:[%s2437_s1 + $0x388] sm:$0xff] }
  0x45   :  { %1247 = vmatpush.bf16.msra.mxu3 %v1936_v19  ;;  %v1963_v19 = vld [vmem:[%s2437_s1 + $0x3d0] sm:$0xff] }
  0x46   :  { %1209 = vmatpush.bf16.msra.mxu0 %v1911_v24  ;;  %v1937_v24 = vld [vmem:[%s2437_s1 + $0x300] sm:$0xff] }
  0x47   :  { %1222 = vmatpush.bf16.msra.mxu1 %v1919_v25  ;;  %v1945_v25 = vld [vmem:[%s2437_s1 + $0x340] sm:$0xff] }
  0x48   :  { %1235 = vmatpush.bf16.msra.mxu2 %v1927_v26  ;;  %v1953_v26 = vld [vmem:[%s2437_s1 + $0x380] sm:$0xff] }
  0x49   :  { %1248 = vmatpush.bf16.msra.mxu3 %v1935_v27  ;;  %v1961_v27 = vld [vmem:[%s2437_s1 + $0x3c0] sm:$0xff] }
  0x4a   :  { %1210 = vmatpush.bf16.msra.mxu0 %v1910_v28  ;;  %v40_v28 = vld.sshfl [vmem:[#allocation1 + $0x20] sm:$0xff pattern:$0x73625140] }
  0x4b   :  { %1223 = vmatpush.bf16.msra.mxu1 %v1918_v29  ;;  %v41_v29 = vld.sshfl [vmem:[#allocation1 + $0x28] sm:$0xff pattern:$0x73625140] }
  0x4c   :  { %1236 = vmatpush.bf16.msra.mxu2 %v1926_v30  ;;  %v42_v30 = vld.sshfl [vmem:[#allocation1 + $0x30] sm:$0xff pattern:$0x73625140] }
  0x4d   :  { %1249 = vmatpush.bf16.msra.mxu3 %v1934_v31  ;;  %v43_v31 = vld.sshfl [vmem:[#allocation1 + $0x38] sm:$0xff pattern:$0x73625140] }
  0x4e   :  { %1211 = vmatpush.bf16.msra.mxu0 %v1909_v32  ;;  %v72_v32 = vpack.c.bf16 %v40_v28, %v40_v28 }
  0x4f   :  { %1224 = vmatpush.bf16.msra.mxu1 %v1917_v33  ;;  %v73_v33 = vpack.c.bf16 %v41_v29, %v41_v29 }
  0x50   :  { %1237 = vmatpush.bf16.msra.mxu2 %v1925_v34  ;;  %v74_v34 = vpack.c.bf16 %v42_v30, %v42_v30 }
  0x51   :  { %1250 = vmatpush.bf16.msra.mxu3 %v1933_v35  ;;  %v75_v35 = vpack.c.bf16 %v43_v31, %v43_v31 }
  0x52   :  { %1212 = vmatpush.bf16.msra.mxu0 %v1908_v36  ;;  %v1970_v36 = vld [vmem:[%s2438_s2] ss:$0 sm:$0xff]  ;;  %s1997_s2 = smov [#allocation2]  }
  0x53   :  { %1225 = vmatpush.bf16.msra.mxu1 %v1916_v37  ;;  %s1318_s28 = sshll.u32 %s1997_s2, 4  ;;  %s1319_s28 = int_to_ptr.vmem [resolvable:$true] %s1318_s28 }
  0x54   :  { %1238 = vmatpush.bf16.msra.mxu2 %v1924_v38 }
  0x55   :  { %1251 = vmatpush.bf16.msra.mxu3 %v1932_v39 }
  0x56   :  { %1213 = vmatpush.bf16.msra.mxu0 %v1907_v40 }
  0x57   :  { %1226 = vmatpush.bf16.msra.mxu1 %v1915_v41 }
  0x58   :  { %1239 = vmatpush.bf16.msra.mxu2 %v1923_v42 }
  0x59   :  { %1252 = vmatpush.bf16.msra.mxu3 %v1931_v43 }
  0x5a   :  { %1214 = vmatpush.bf16.msra.mxu0 %v1906_v44 }
  0x5b   :  { %1227 = vmatpush.bf16.msra.mxu1 %v1914_v45 }
  0x5c   :  { %1240 = vmatpush.bf16.msra.mxu2 %v1922_v46 }
  0x5d   :  { %1253 = vmatpush.bf16.msra.mxu3 %v1930_v47 }
  0x5e   :  { %1215 = vmatpush.bf16.msra.mxu0 %v1905_v48 }
  0x5f   :  { %1228 = vmatpush.bf16.msra.mxu1 %v1913_v49 }
  0x60   :  { %1241 = vmatpush.bf16.msra.mxu2 %v1921_v50 }
  0x61   :  { %1254 = vmatpush.bf16.msra.mxu3 %v1929_v51  ;;  %1216 = vmatmul.bf16.vlgmr.msra.gmra.mxu0 %v68_v60 }
  0x62   :  { %1260 = vmatpush.bf16.msrb.mxu0 %v1944_v52  ;;  %1229 = vmatmul.bf16.vlgmr.msra.gmra.mxu1 %v69_v62 }
  0x63   :  { %1273 = vmatpush.bf16.msrb.mxu1 %v1952_v53  ;;  %1242 = vmatmul.bf16.vlgmr.msra.gmra.mxu2 %v70_v61 }
  0x64   :  { %1286 = vmatpush.bf16.msrb.mxu2 %v1960_v58  ;;  %1255 = vmatmul.bf16.vlgmr.msra.gmra.mxu3 %v71_v63 }
  0x65   :  { %1299 = vmatpush.bf16.msrb.mxu3 %v1968_v59 }
  0x66   :  { %1261 = vmatpush.bf16.msrb.mxu0 %v1943_v0 }
  0x67   :  { %1274 = vmatpush.bf16.msrb.mxu1 %v1951_v1 }
  0x68   :  { %1287 = vmatpush.bf16.msrb.mxu2 %v1959_v2 }
  0x69   :  { %1300 = vmatpush.bf16.msrb.mxu3 %v1967_v3 }
  0x6a   :  { %1262 = vmatpush.bf16.msrb.mxu0 %v1942_v4 }
  0x6b   :  { %1275 = vmatpush.bf16.msrb.mxu1 %v1950_v5 }
  0x6c   :  { %1288 = vmatpush.bf16.msrb.mxu2 %v1958_v6 }
  0x6d   :  { %1301 = vmatpush.bf16.msrb.mxu3 %v1966_v7 }
  0x6e   :  { %1263 = vmatpush.bf16.msrb.mxu0 %v1941_v8 }
  0x6f   :  { %1276 = vmatpush.bf16.msrb.mxu1 %v1949_v9 }
  0x70   :  { %1289 = vmatpush.bf16.msrb.mxu2 %v1957_v10 }
  0x71   :  { %1302 = vmatpush.bf16.msrb.mxu3 %v1965_v11 }
  0x72   :  { %1264 = vmatpush.bf16.msrb.mxu0 %v1940_v12 }
  0x73   :  { %1277 = vmatpush.bf16.msrb.mxu1 %v1948_v13 }
  0x74   :  { %1290 = vmatpush.bf16.msrb.mxu2 %v1956_v14 }
  0x75   :  { %1303 = vmatpush.bf16.msrb.mxu3 %v1964_v15 }
  0x76   :  { %1265 = vmatpush.bf16.msrb.mxu0 %v1939_v16 }
  0x77   :  { %1278 = vmatpush.bf16.msrb.mxu1 %v1947_v17 }
  0x78   :  { %1291 = vmatpush.bf16.msrb.mxu2 %v1955_v18 }
  0x79   :  { %1304 = vmatpush.bf16.msrb.mxu3 %v1963_v19 }
  0x7a   :  { %1266 = vmatpush.bf16.msrb.mxu0 %v1938_v20 }
  0x7b   :  { %1279 = vmatpush.bf16.msrb.mxu1 %v1946_v21 }
  0x7c   :  { %1292 = vmatpush.bf16.msrb.mxu2 %v1954_v22 }
  0x7d   :  { %1305 = vmatpush.bf16.msrb.mxu3 %v1962_v23 }
  0x7e   :  { %1267 = vmatpush.bf16.msrb.mxu0 %v1937_v24 }
  0x7f   :  { %1280 = vmatpush.bf16.msrb.mxu1 %v1945_v25 }
  0x80   :  { %1293 = vmatpush.bf16.msrb.mxu2 %v1953_v26 }
  0x81   :  { %1306 = vmatpush.bf16.msrb.mxu3 %v1961_v27  ;;  %1268 = vmatmul.bf16.vlgmr.msrb.gmra.mxu0 %v72_v32 }
  0x82   :  { %1281 = vmatmul.bf16.vlgmr.msrb.gmra.mxu1 %v73_v33 }
  0x83   :  { %1294 = vmatmul.bf16.vlgmr.msrb.gmra.mxu2 %v74_v34 }
  0x84   :  { %1307 = vmatmul.bf16.vlgmr.msrb.gmra.mxu3 %v75_v35 }
  0x9e   :  { %v1113_v37 = vpop.f32.mrf.mxu0 }
  0x9f   :  { %v1114_v38 = vadd.f32 %v1970_v36, %v1113_v37  ;;  %v1126_v39 = vpop.f32.mrf.mxu1 }
  0xa1   :  { %v1127_v40 = vadd.f32 %v1126_v39, %v1114_v38 }
  0xa6   :  { %v1139_v41 = vpop.f32.mrf.mxu2  ;;  %v1115_v44 = vpop.f32.mrf.mxu0 }
  0xa7   :  { %v1140_v42 = vadd.f32 %v1139_v41, %v1127_v40  ;;  %v1152_v43 = vpop.f32.mrf.mxu3  ;;  %v1128_v46 = vpop.f32.mrf.mxu1 }
  0xa9   :  { %v1153_v45 = vadd.f32 %v1152_v43, %v1140_v42 }
  0xae   :  { %v1141_v47 = vpop.f32.mrf.mxu2 }
  0xaf   :  { %v1154_v48 = vpop.f32.mrf.mxu3 }
  0xbe   :  { %v1165_v49 = vpop.f32.mrf.mxu0 }
  0xbf   :  { %v1178_v50 = vpop.f32.mrf.mxu1  ;;  %v1166_v59 = vadd.f32 %v1165_v49, %v1153_v45 }
  0xc1   :  { %v1179_v63 = vadd.f32 %v1178_v50, %v1166_v59 }
  0xc6   :  { %v1191_v51 = vpop.f32.mrf.mxu2  ;;  %v1167_v53 = vpop.f32.mrf.mxu0 }
  0xc7   :  { %v1204_v52 = vpop.f32.mrf.mxu3  ;;  %v1180_v54 = vpop.f32.mrf.mxu1  ;;  %v1192_v1 = vadd.f32 %v1191_v51, %v1179_v63 }
  0xc9   :  { %v1205_v4 = vadd.f32 %v1204_v52, %v1192_v1 }
  0xce   :  { %v1193_v55 = vpop.f32.mrf.mxu2 }
  0xcf   :  { %v1206_v56 = vpop.f32.mrf.mxu3 }
  0xde   :  { %v1217_v57 = vpop.f32.mrf.mxu0 }
  0xdf   :  { %v1230_v58 = vpop.f32.mrf.mxu1  ;;  %v1218_v5 = vadd.f32 %v1217_v57, %v1205_v4 }
  0xe1   :  { %v1231_v6 = vadd.f32 %v1230_v58, %v1218_v5 }
  0xe6   :  { %v1243_v60 = vpop.f32.mrf.mxu2  ;;  %v1219_v62 = vpop.f32.mrf.mxu0 }
  0xe7   :  { %v1256_v61 = vpop.f32.mrf.mxu3  ;;  %v1232_v0 = vpop.f32.mrf.mxu1  ;;  %v1244_v7 = vadd.f32 %v1243_v60, %v1231_v6 }
  0xe9   :  { %v1257_v8 = vadd.f32 %v1256_v61, %v1244_v7 }
  0xee   :  { %v1245_v2 = vpop.f32.mrf.mxu2 }
  0xef   :  { %v1258_v3 = vpop.f32.mrf.mxu3 }
  0xfe   :  { %v1269_v9 = vpop.f32.mrf.mxu0 }
  0xff   :  { %v1282_v10 = vpop.f32.mrf.mxu1  ;;  %v1270_v11 = vadd.f32 %v1269_v9, %v1257_v8 }
 0x101   :  { %v1283_v12 = vadd.f32 %v1282_v10, %v1270_v11 }
 0x106   :  { %v1295_v13 = vpop.f32.mrf.mxu2  ;;  %v1271_v16 = vpop.f32.mrf.mxu0 }
 0x107   :  { %v1308_v14 = vpop.f32.mrf.mxu3  ;;  %v1296_v15 = vadd.f32 %v1295_v13, %v1283_v12  ;;  %v1284_v17 = vpop.f32.mrf.mxu1 }
 0x109   :  { %v1309_v18 = vadd.f32 %v1308_v14, %v1296_v15 }
 0x10b   :  { %1312 = vst [vmem:[#allocation2] sm:$0x3] %v1309_v18 }
 0x10c   :  { %1323 = dma.vmem_to_hbm [thread:$0]  %s1319_s28, 32, %s1321_s4, [#allocation3]  }
 0x10e   :  { %v1297_v19 = vpop.f32.mrf.mxu2 }
 0x10f   :  { %v1310_v20 = vpop.f32.mrf.mxu3 }
 0x110   :  { %1995 = dma.done.wait [#allocation3], 32  }
 0x111   :  { %1996 = vsyncadd [#allocation3], 4294967264 }
 0x112   :  { %1328 = vsyncpa [#allocation3], 1 }

</bundles_post_ra>
